<compile_context>
chip_gen: v7x
topology: tpu7x:2x2x1
jax: 0.10.0
libtpu: 0.0.40
codegen_flags: <defaults>
</compile_context>

<pallas_src>
import jax
import jax.numpy as jnp
import numpy as np
from jax.experimental import pallas as pl
from jax.experimental.pallas import tpu as pltpu

NEG_SLOPE = 0.3   # LeakyReLU slope
BN_EPS = 1e-5     # nn.BatchNorm2d default eps
KSIZE = 3         # 3x3 conv, stride 1, padding 1
LANE = 128        # TPU lane width
SUB = 8           # TPU sublane width


def _leaky_relu(x):
    return jnp.where(x >= 0, x, NEG_SLOPE * x)


def _round_up(x, m):
    return ((x + m - 1) // m) * m


def _pick_row_tile(H, Wp, Wo, Cp, budget_bytes=18 << 20):
    """Largest row tile whose estimated per-step VMEM footprint fits the budget.

    Budget is kept conservative so it is safe on v7x (64 MiB physical VMEM) as well as
    v5e/v6e; vmem_limit_bytes is raised above the per-chip scoped defaults in the call.
    """
    def footprint(th):
        inp = 2 * (th + 5) * Wp * Cp * 2           # bf16 input block, double-buffered
        outp = 2 * th * Wo * Cp * 4                # f32 output block, double-buffered
        ib = (th + 3) * Wp * Cp * 2                # bf16 intermediate scratch
        tmp = (th + 2) * Wp * Cp * 4               # f32 conv1 accumulator
        tmp += th * Wp * Cp * 4                    # f32 conv2 accumulator
        tmp += (th + 2) * Wp * Cp * 2 * 2          # shifted-view relayout temporaries
        wts = 2 * 2 * KSIZE * KSIZE * Cp * Cp * 2  # both weight slabs, double-buffered
        return inp + outp + ib + tmp + wts + (2 << 20)

    th = 1
    for cand in range(1, H + 1):
        if footprint(cand) <= budget_bytes:
            th = cand
    n_tiles = -(-H // th)
    th = -(-H // n_tiles)                          # balance tiles -> less tail waste
    n_tiles = -(-H // th)
    return th, n_tiles


def _make_kernel(H, W, TH, Wp, Wo, Cp, n_tiles):
    R1 = TH + 5                    # fetched input rows per tile (TH + conv halos + spare)
    M1 = (TH + 2) * Wp             # conv1 "wide" output rows (1-row halo for conv2)
    M2 = TH * Wp                   # conv2 "wide" output rows
    bot = H - (n_tiles - 1) * TH + 1   # ibuf row holding the bottom conv2 pad (static)

    def kernel(x_ref,                         # (1, R1, Wp, Cp) bf16 input slab tile
               w1_ref,                        # (9, Cp, Cp) bf16  conv1 taps (Cin, Cout)
               b1_ref,                        # (1, Cp) f32       conv1 bias
               p1_ref,                        # (1, Cp) f32       BN1 pad value (-t1/s1)
               w2_ref,                        # (9, Cp, Cp) bf16  conv2 taps, BN1 folded
               b2_ref,                        # (1, Cp) f32       conv2 bias, BN1 folded
               s2_ref, t2_ref,                # (1, Cp) f32       BN2 folded affine
               o_ref,                         # (1, TH, Wo, Cp) f32 output tile
               ibuf):                         # (TH+3, Wp, Cp) bf16 scratch
        t = pl.program_id(1)

        # Flattened bf16 view of this tile's input slab (layout-free: Wp % 8 == 0).
        xf = x_ref[...].reshape(R1 * Wp, Cp)

        # ---- conv1: 9 accumulating MXU matmuls over shifted flat views ----
        # h[e*Wp + c] (c in [1, W]) == conv1 output at real row (t*TH + e - 1), col c-1.
        h = jnp.zeros((M1, Cp), jnp.float32)
        for ky in range(KSIZE):
            for kx in range(KSIZE):
                off = ky * Wp + kx
                h = h + jnp.dot(xf[off:off + M1], w1_ref[ky * KSIZE + kx],
                                preferred_element_type=jnp.float32)
        h = _leaky_relu(h + b1_ref[...])
        # Dropout(0.2): identity in eval mode.
        # TODO(synk): training-mode dropout RNG (pltpu.prng_*) not implemented.
        # BN1 is folded into conv2's weights/bias; conv2's zero-pad positions therefore
        # hold p1 = -t1/s1 (so that s1*p1 + t1 == 0, matching the original zero pad).

        pad_v = p1_ref[...].astype(ibuf.dtype).reshape(1, 1, Cp)

        # ---- stage the intermediate into the padded bf16 buffer ----
        ibuf[0:TH + 2] = h.reshape(TH + 2, Wp, Cp).astype(ibuf.dtype)
        ibuf[TH + 2:TH + 3] = jnp.zeros((1, Wp, Cp), ibuf.dtype)          # overhang row
        ibuf[:, 0:1, :] = jnp.broadcast_to(pad_v, (TH + 3, 1, Cp))        # left pad col
        ibuf[:, W + 1:W + 2, :] = jnp.broadcast_to(pad_v, (TH + 3, 1, Cp))  # right pad

        @pl.when(t == 0)
        def _():                                   # image top -> conv2 pad row
            ibuf[0:1] = jnp.broadcast_to(pad_v, (1, Wp, Cp))

        @pl.when(t == n_tiles - 1)
        def _():                                   # image bottom -> conv2 pad row
            ibuf[bot:bot + 1] = jnp.broadcast_to(pad_v, (1, Wp, Cp))

        # ---- conv2 (+ residual): 9 accumulating MXU matmuls over shifted views ----
        ibf = ibuf[...].reshape((TH + 3) * Wp, Cp)
        y = jnp.zeros((M2, Cp), jnp.float32)
        for ky in range(KSIZE):
            for kx in range(KSIZE):
                off = ky * Wp + kx
                y = y + jnp.dot(ibf[off:off + M2], w2_ref[ky * KSIZE + kx],
                                preferred_element_type=jnp.float32)
        y = y + b2_ref[...]
        y = y + xf[2 * Wp + 2:2 * Wp + 2 + M2].astype(jnp.float32)   # residual (x)
        y = _leaky_relu(y)
        # Dropout(0.2): identity in eval mode.
        y = y * s2_ref[...] + t2_ref[...]           # BatchNorm2 (eval, folded affine)

        o_ref[0] = y.reshape(TH, Wp, Cp)[:, :Wo, :].astype(o_ref.dtype)

    return kernel


def resblock_forward(x_nchw, params):
    """Eval-mode ResBlock forward. x_nchw: (N, C, H, W) float32 (PyTorch layout)."""
    N, C, H, W = x_nchw.shape
    Cp = _round_up(max(C, LANE), LANE)       # lane-dense channel count
    Wp = _round_up(W + 3, SUB)               # extra-left zero col + conv pads + alignment
    Wo = _round_up(W, SUB)                   # 8-aligned output width
    TH, n_tiles = _pick_row_tile(H, Wp, Wo, Cp)
    R1 = TH + 5
    Hpad = n_tiles * TH

    # Input slab: NHWC, bf16, zero-padded (2 extra cols left, >=1 right; 2 rows top),
    # pre-sliced into per-tile row blocks so a plain BlockSpec auto-pipelines it.
    x = jnp.transpose(x_nchw, (0, 2, 3, 1)).astype(jnp.float32)
    xpad = jnp.pad(x, ((0, 0),
                       (2, Hpad + 3 - H),
                       (2, Wp - W - 2),
                       (0, Cp - C))).astype(jnp.bfloat16)
    row_idx = jnp.arange(n_tiles)[:, None] * TH + jnp.arange(R1)[None, :]
    xslab = xpad[:, row_idx].reshape(N * n_tiles, R1, Wp, Cp)

    # ---- fold BatchNorms (eval) and pack weights into per-tap (Cin, Cout) slabs ----
    f32 = jnp.float32

    def pad_vec(v, fill=0.0):
        return jnp.pad(v.astype(f32), (0, Cp - C), constant_values=fill)

    def bn_affine(g, be, m, v):
        s = pad_vec(g, 1.0) / jnp.sqrt(pad_vec(v, 1.0) + BN_EPS)
        t = pad_vec(be) - pad_vec(m) * s
        return s, t

    s1, t1 = bn_affine(params["g1"], params["be1"], params["m1"], params["v1"])
    s2, t2 = bn_affine(params["g2"], params["be2"], params["m2"], params["v2"])

    def pad_w(w):                                  # (C,C,3,3) -> (Cp,Cp,3,3)
        return jnp.pad(w.astype(f32), ((0, Cp - C), (0, Cp - C), (0, 0), (0, 0)))

    w1p, w2p = pad_w(params["w1"]), pad_w(params["w2"])
    b1 = pad_vec(params["b1"])
    b2 = pad_vec(params["b2"])

    # Fold BN1 (per-channel affine on conv2's input) into conv2:
    #   conv2(s1*h + t1) == conv2_{w2*s1}(h) + sum_{taps} w2 @ t1 ;
    # conv2's zero padding then becomes padding with p1 = -t1/s1.
    w2f = w2p * s1[None, :, None, None]
    b2f = b2 + jnp.einsum("oiyx,i->o", w2p, t1)
    p1 = -t1 / s1

    def to_taps(w):                                # (Cp,Cp,3,3) -> (9, Cin, Cout) bf16
        return (jnp.transpose(w, (2, 3, 1, 0))
                .reshape(KSIZE * KSIZE, Cp, Cp).astype(jnp.bfloat16))

    w1t, w2t = to_taps(w1p), to_taps(w2f)
    row = lambda v: v.reshape(1, Cp)

    kernel = _make_kernel(H, W, TH, Wp, Wo, Cp, n_tiles)

    wspec = pl.BlockSpec((KSIZE * KSIZE, Cp, Cp), lambda n, t: (0, 0, 0))
    vspec = pl.BlockSpec((1, Cp), lambda n, t: (0, 0))

    flops = int(2 * KSIZE * KSIZE * Cp * Cp * ((TH + 2) * Wp + TH * Wp) * N * n_tiles)
    bytes_accessed = int(xslab.size * 2 + N * Hpad * Wo * Cp * 4
                         + 2 * KSIZE * KSIZE * Cp * Cp * 2)

    out = pl.pallas_call(
        kernel,
        out_shape=jax.ShapeDtypeStruct((N, Hpad, Wo, Cp), jnp.float32),
        grid_spec=pltpu.PrefetchScalarGridSpec(
            num_scalar_prefetch=0,
            grid=(N, n_tiles),
            in_specs=[
                pl.BlockSpec((1, R1, Wp, Cp),
                             lambda n, t: (n * n_tiles + t, 0, 0, 0)),
                wspec, vspec, vspec,               # conv1 weights / bias / BN1 pad value
                wspec, vspec, vspec, vspec,        # conv2 (BN1 folded) / bias / BN2
            ],
            out_specs=pl.BlockSpec((1, TH, Wo, Cp), lambda n, t: (n, t, 0, 0)),
            scratch_shapes=[pltpu.VMEM((TH + 3, Wp, Cp), jnp.bfloat16)],
        ),
        compiler_params=pltpu.CompilerParams(
            dimension_semantics=("parallel", "parallel"),
            vmem_limit_bytes=40 * 1024 * 1024),
        cost_estimate=pl.CostEstimate(flops=flops, transcendentals=0,
                                      bytes_accessed=bytes_accessed),
    )(xslab, w1t, row(b1), row(p1), w2t, row(b2f), row(s2), row(t2))

    out = out[:, :H, :W, :C]
    return jnp.transpose(out, (0, 3, 1, 2))        # back to NCHW


def resblock_reference(x, p):
    """Pure-JAX reference (eval mode), NCHW like PyTorch."""
    def conv(t, w, b):
        y = jax.lax.conv_general_dilated(
            t, w, (1, 1), ((1, 1), (1, 1)),
            dimension_numbers=("NCHW", "OIHW", "NCHW"),
            precision=jax.lax.Precision.HIGHEST)
        return y + b.reshape(1, -1, 1, 1)

    def bn(t, g, be, m, v):
        g, be, m, v = (a.reshape(1, -1, 1, 1) for a in (g, be, m, v))
        return (t - m) / jnp.sqrt(v + BN_EPS) * g + be

    lrelu = lambda t: jnp.where(t >= 0, t, NEG_SLOPE * t)
    out = conv(x, p["w1"], p["b1"])
    out = lrelu(out)
    out = bn(out, p["g1"], p["be1"], p["m1"], p["v1"])
    out = conv(out, p["w2"], p["b2"])
    out = x + out
    out = lrelu(out)
    out = bn(out, p["g2"], p["be2"], p["m2"], p["v2"])
    return out


if __name__ == "__main__":
    key = jax.random.PRNGKey(0)
    N, C, H, W = 2, 8, 16, 16          # small shapes; module default channels=64
    ks = jax.random.split(key, 16)

    bound = 1.0 / np.sqrt(C * KSIZE * KSIZE)   # PyTorch Conv2d init bound (shape-wise)
    params = {
        "w1": jax.random.uniform(ks[0], (C, C, KSIZE, KSIZE), jnp.float32, -bound, bound),
        "b1": jax.random.uniform(ks[1], (C,), jnp.float32, -bound, bound),
        "w2": jax.random.uniform(ks[2], (C, C, KSIZE, KSIZE), jnp.float32, -bound, bound),
        "b2": jax.random.uniform(ks[3], (C,), jnp.float32, -bound, bound),
        # BatchNorm params / running stats (non-trivial, to exercise the folded paths)
        "g1": 1.0 + 0.1 * jax.random.normal(ks[4], (C,), jnp.float32),
        "be1": 0.1 * jax.random.normal(ks[5], (C,), jnp.float32),
        "m1": 0.1 * jax.random.normal(ks[6], (C,), jnp.float32),
        "v1": 1.0 + 0.1 * jnp.abs(jax.random.normal(ks[7], (C,), jnp.float32)),
        "g2": 1.0 + 0.1 * jax.random.normal(ks[8], (C,), jnp.float32),
        "be2": 0.1 * jax.random.normal(ks[9], (C,), jnp.float32),
        "m2": 0.1 * jax.random.normal(ks[10], (C,), jnp.float32),
        "v2": 1.0 + 0.1 * jnp.abs(jax.random.normal(ks[11], (C,), jnp.float32)),
    }

    x = jax.random.normal(ks[12], (N, C, H, W), jnp.float32)

    fwd = jax.jit(resblock_forward)
    out = jax.block_until_ready(fwd(x, params))
    ref = jax.block_until_ready(resblock_reference(x, params))

    # bf16 MXU operands, bf16 input slab / residual and the bf16 intermediate buffer
    # drift slightly from the f32 HIGHEST reference; this tolerance covers it.
    np.testing.assert_allclose(np.asarray(out), np.asarray(ref), rtol=2e-2, atol=3e-2)

    print("KERNEL_OK")
</pallas_src>

<mosaic_0001>
module attributes {stable_mosaic.version = 11 : i64} {
  func.func @kernel(%arg0: i32, %arg1: i32, %arg2: memref<1x21x24x128xbf16, #tpu.memory_space<vmem>>, %arg3: memref<9x128x128xbf16, #tpu.memory_space<vmem>>, %arg4: memref<1x128xf32, #tpu.memory_space<vmem>>, %arg5: memref<1x128xf32, #tpu.memory_space<vmem>>, %arg6: memref<9x128x128xbf16, #tpu.memory_space<vmem>>, %arg7: memref<1x128xf32, #tpu.memory_space<vmem>>, %arg8: memref<1x128xf32, #tpu.memory_space<vmem>>, %arg9: memref<1x128xf32, #tpu.memory_space<vmem>>, %arg10: memref<1x16x16x128xf32, #tpu.memory_space<vmem>>, %arg11: memref<19x24x128xbf16, #tpu.memory_space<vmem>>) attributes {dimension_semantics = [#tpu.dimension_semantics<parallel>, #tpu.dimension_semantics<parallel>], iteration_bounds = array<i64: 2, 1>, scalar_prefetch = 0 : i64, scratch_operands = 1 : i64, tpu.core_type = #tpu.core_type<tc>, window_params = [{transform_indices = @transform_0, window_bounds = array<i64: 1, 21, 24, 128>}, {pipeline_mode = #tpu.pipeline_mode<synchronous>, transform_indices = @transform_1, window_bounds = array<i64: 9, 128, 128>}, {pipeline_mode = #tpu.pipeline_mode<synchronous>, transform_indices = @transform_2, window_bounds = array<i64: 1, 128>}, {pipeline_mode = #tpu.pipeline_mode<synchronous>, transform_indices = @transform_3, window_bounds = array<i64: 1, 128>}, {pipeline_mode = #tpu.pipeline_mode<synchronous>, transform_indices = @transform_4, window_bounds = array<i64: 9, 128, 128>}, {pipeline_mode = #tpu.pipeline_mode<synchronous>, transform_indices = @transform_5, window_bounds = array<i64: 1, 128>}, {pipeline_mode = #tpu.pipeline_mode<synchronous>, transform_indices = @transform_6, window_bounds = array<i64: 1, 128>}, {pipeline_mode = #tpu.pipeline_mode<synchronous>, transform_indices = @transform_7, window_bounds = array<i64: 1, 128>}, {transform_indices = @transform_8, window_bounds = array<i64: 1, 16, 16, 128>}]} {
    %c0 = arith.constant 0 : index
    %c0_0 = arith.constant 0 : index
    %c0_1 = arith.constant 0 : index
    %c0_2 = arith.constant 0 : index
    %0 = vector.load %arg2[%c0, %c0_0, %c0_1, %c0_2] : memref<1x21x24x128xbf16, #tpu.memory_space<vmem>>, vector<1x21x24x128xbf16>
    %1 = vector.shape_cast %0 : vector<1x21x24x128xbf16> to vector<504x128xbf16>
    %cst = arith.constant 0.000000e+00 : f32
    %2 = vector.broadcast %cst : f32 to vector<432x128xf32>
    %3 = vector.extract_strided_slice %1 {offsets = [0, 0], sizes = [432, 128], strides = [1, 1]} : vector<504x128xbf16> to vector<432x128xbf16>
    %c0_3 = arith.constant 0 : index
    %c0_4 = arith.constant 0 : index
    %c0_5 = arith.constant 0 : index
    %4 = vector.load %arg3[%c0_3, %c0_4, %c0_5] : memref<9x128x128xbf16, #tpu.memory_space<vmem>>, vector<1x128x128xbf16>
    %5 = vector.shape_cast %4 : vector<1x128x128xbf16> to vector<128x128xbf16>
    %cst_6 = arith.constant dense<0.000000e+00> : vector<432x128xf32>
    %6 = tpu.matmul %3, %5, %cst_6 {dimension_numbers = #tpu.dot_dimension_numbers<[1], [0], [0], [1], [0, 0, 1, 1], [], []>} : vector<432x128xbf16>, vector<128x128xbf16>, vector<432x128xf32> -> vector<432x128xf32>
    %7 = arith.addf %2, %6 : vector<432x128xf32>
    %8 = vector.extract_strided_slice %1 {offsets = [1, 0], sizes = [432, 128], strides = [1, 1]} : vector<504x128xbf16> to vector<432x128xbf16>
    %c1 = arith.constant 1 : index
    %c0_7 = arith.constant 0 : index
    %c0_8 = arith.constant 0 : index
    %9 = vector.load %arg3[%c1, %c0_7, %c0_8] : memref<9x128x128xbf16, #tpu.memory_space<vmem>>, vector<1x128x128xbf16>
    %10 = vector.shape_cast %9 : vector<1x128x128xbf16> to vector<128x128xbf16>
    %cst_9 = arith.constant dense<0.000000e+00> : vector<432x128xf32>
    %11 = tpu.matmul %8, %10, %cst_9 {dimension_numbers = #tpu.dot_dimension_numbers<[1], [0], [0], [1], [0, 0, 1, 1], [], []>} : vector<432x128xbf16>, vector<128x128xbf16>, vector<432x128xf32> -> vector<432x128xf32>
    %12 = arith.addf %7, %11 : vector<432x128xf32>
    %13 = vector.extract_strided_slice %1 {offsets = [2, 0], sizes = [432, 128], strides = [1, 1]} : vector<504x128xbf16> to vector<432x128xbf16>
    %c2 = arith.constant 2 : index
    %c0_10 = arith.constant 0 : index
    %c0_11 = arith.constant 0 : index
    %14 = vector.load %arg3[%c2, %c0_10, %c0_11] : memref<9x128x128xbf16, #tpu.memory_space<vmem>>, vector<1x128x128xbf16>
    %15 = vector.shape_cast %14 : vector<1x128x128xbf16> to vector<128x128xbf16>
    %cst_12 = arith.constant dense<0.000000e+00> : vector<432x128xf32>
    %16 = tpu.matmul %13, %15, %cst_12 {dimension_numbers = #tpu.dot_dimension_numbers<[1], [0], [0], [1], [0, 0, 1, 1], [], []>} : vector<432x128xbf16>, vector<128x128xbf16>, vector<432x128xf32> -> vector<432x128xf32>
    %17 = arith.addf %12, %16 : vector<432x128xf32>
    %18 = vector.extract_strided_slice %1 {offsets = [24, 0], sizes = [432, 128], strides = [1, 1]} : vector<504x128xbf16> to vector<432x128xbf16>
    %c3 = arith.constant 3 : index
    %c0_13 = arith.constant 0 : index
    %c0_14 = arith.constant 0 : index
    %19 = vector.load %arg3[%c3, %c0_13, %c0_14] : memref<9x128x128xbf16, #tpu.memory_space<vmem>>, vector<1x128x128xbf16>
    %20 = vector.shape_cast %19 : vector<1x128x128xbf16> to vector<128x128xbf16>
    %cst_15 = arith.constant dense<0.000000e+00> : vector<432x128xf32>
    %21 = tpu.matmul %18, %20, %cst_15 {dimension_numbers = #tpu.dot_dimension_numbers<[1], [0], [0], [1], [0, 0, 1, 1], [], []>} : vector<432x128xbf16>, vector<128x128xbf16>, vector<432x128xf32> -> vector<432x128xf32>
    %22 = arith.addf %17, %21 : vector<432x128xf32>
    %23 = vector.extract_strided_slice %1 {offsets = [25, 0], sizes = [432, 128], strides = [1, 1]} : vector<504x128xbf16> to vector<432x128xbf16>
    %c4 = arith.constant 4 : index
    %c0_16 = arith.constant 0 : index
    %c0_17 = arith.constant 0 : index
    %24 = vector.load %arg3[%c4, %c0_16, %c0_17] : memref<9x128x128xbf16, #tpu.memory_space<vmem>>, vector<1x128x128xbf16>
    %25 = vector.shape_cast %24 : vector<1x128x128xbf16> to vector<128x128xbf16>
    %cst_18 = arith.constant dense<0.000000e+00> : vector<432x128xf32>
    %26 = tpu.matmul %23, %25, %cst_18 {dimension_numbers = #tpu.dot_dimension_numbers<[1], [0], [0], [1], [0, 0, 1, 1], [], []>} : vector<432x128xbf16>, vector<128x128xbf16>, vector<432x128xf32> -> vector<432x128xf32>
    %27 = arith.addf %22, %26 : vector<432x128xf32>
    %28 = vector.extract_strided_slice %1 {offsets = [26, 0], sizes = [432, 128], strides = [1, 1]} : vector<504x128xbf16> to vector<432x128xbf16>
    %c5 = arith.constant 5 : index
    %c0_19 = arith.constant 0 : index
    %c0_20 = arith.constant 0 : index
    %29 = vector.load %arg3[%c5, %c0_19, %c0_20] : memref<9x128x128xbf16, #tpu.memory_space<vmem>>, vector<1x128x128xbf16>
    %30 = vector.shape_cast %29 : vector<1x128x128xbf16> to vector<128x128xbf16>
    %cst_21 = arith.constant dense<0.000000e+00> : vector<432x128xf32>
    %31 = tpu.matmul %28, %30, %cst_21 {dimension_numbers = #tpu.dot_dimension_numbers<[1], [0], [0], [1], [0, 0, 1, 1], [], []>} : vector<432x128xbf16>, vector<128x128xbf16>, vector<432x128xf32> -> vector<432x128xf32>
    %32 = arith.addf %27, %31 : vector<432x128xf32>
    %33 = vector.extract_strided_slice %1 {offsets = [48, 0], sizes = [432, 128], strides = [1, 1]} : vector<504x128xbf16> to vector<432x128xbf16>
    %c6 = arith.constant 6 : index
    %c0_22 = arith.constant 0 : index
    %c0_23 = arith.constant 0 : index
    %34 = vector.load %arg3[%c6, %c0_22, %c0_23] : memref<9x128x128xbf16, #tpu.memory_space<vmem>>, vector<1x128x128xbf16>
    %35 = vector.shape_cast %34 : vector<1x128x128xbf16> to vector<128x128xbf16>
    %cst_24 = arith.constant dense<0.000000e+00> : vector<432x128xf32>
    %36 = tpu.matmul %33, %35, %cst_24 {dimension_numbers = #tpu.dot_dimension_numbers<[1], [0], [0], [1], [0, 0, 1, 1], [], []>} : vector<432x128xbf16>, vector<128x128xbf16>, vector<432x128xf32> -> vector<432x128xf32>
    %37 = arith.addf %32, %36 : vector<432x128xf32>
    %38 = vector.extract_strided_slice %1 {offsets = [49, 0], sizes = [432, 128], strides = [1, 1]} : vector<504x128xbf16> to vector<432x128xbf16>
    %c7 = arith.constant 7 : index
    %c0_25 = arith.constant 0 : index
    %c0_26 = arith.constant 0 : index
    %39 = vector.load %arg3[%c7, %c0_25, %c0_26] : memref<9x128x128xbf16, #tpu.memory_space<vmem>>, vector<1x128x128xbf16>
    %40 = vector.shape_cast %39 : vector<1x128x128xbf16> to vector<128x128xbf16>
    %cst_27 = arith.constant dense<0.000000e+00> : vector<432x128xf32>
    %41 = tpu.matmul %38, %40, %cst_27 {dimension_numbers = #tpu.dot_dimension_numbers<[1], [0], [0], [1], [0, 0, 1, 1], [], []>} : vector<432x128xbf16>, vector<128x128xbf16>, vector<432x128xf32> -> vector<432x128xf32>
    %42 = arith.addf %37, %41 : vector<432x128xf32>
    %43 = vector.extract_strided_slice %1 {offsets = [50, 0], sizes = [432, 128], strides = [1, 1]} : vector<504x128xbf16> to vector<432x128xbf16>
    %c8 = arith.constant 8 : index
    %c0_28 = arith.constant 0 : index
    %c0_29 = arith.constant 0 : index
    %44 = vector.load %arg3[%c8, %c0_28, %c0_29] : memref<9x128x128xbf16, #tpu.memory_space<vmem>>, vector<1x128x128xbf16>
    %45 = vector.shape_cast %44 : vector<1x128x128xbf16> to vector<128x128xbf16>
    %cst_30 = arith.constant dense<0.000000e+00> : vector<432x128xf32>
    %46 = tpu.matmul %43, %45, %cst_30 {dimension_numbers = #tpu.dot_dimension_numbers<[1], [0], [0], [1], [0, 0, 1, 1], [], []>} : vector<432x128xbf16>, vector<128x128xbf16>, vector<432x128xf32> -> vector<432x128xf32>
    %47 = arith.addf %42, %46 : vector<432x128xf32>
    %c0_31 = arith.constant 0 : index
    %c0_32 = arith.constant 0 : index
    %48 = vector.load %arg4[%c0_31, %c0_32] : memref<1x128xf32, #tpu.memory_space<vmem>>, vector<1x128xf32>
    %49 = vector.broadcast %48 : vector<1x128xf32> to vector<432x128xf32>
    %50 = arith.addf %47, %49 : vector<432x128xf32>
    %cst_33 = arith.constant 0.000000e+00 : f32
    %51 = vector.broadcast %cst_33 : f32 to vector<432x128xf32>
    %52 = arith.cmpf oge, %50, %51 : vector<432x128xf32>
    %cst_34 = arith.constant 3.000000e-01 : f32
    %53 = vector.broadcast %cst_34 : f32 to vector<432x128xf32>
    %54 = arith.mulf %53, %50 : vector<432x128xf32>
    %55 = arith.select %52, %50, %54 : vector<432x128xi1>, vector<432x128xf32>
    %c0_35 = arith.constant 0 : index
    %c0_36 = arith.constant 0 : index
    %56 = vector.load %arg5[%c0_35, %c0_36] : memref<1x128xf32, #tpu.memory_space<vmem>>, vector<1x128xf32>
    %57 = arith.truncf %56 : vector<1x128xf32> to vector<1x128xbf16>
    %58 = vector.shape_cast %57 : vector<1x128xbf16> to vector<1x1x128xbf16>
    %59 = vector.shape_cast %55 : vector<432x128xf32> to vector<18x24x128xf32>
    %60 = arith.truncf %59 : vector<18x24x128xf32> to vector<18x24x128xbf16>
    %c0_37 = arith.constant 0 : index
    %c0_38 = arith.constant 0 : index
    %c0_39 = arith.constant 0 : index
    %61 = vector.load %arg11[%c0_37, %c0_38, %c0_39] : memref<19x24x128xbf16, #tpu.memory_space<vmem>>, vector<18x24x128xbf16>
    tpu.vector_store %arg11[%c0_37, %c0_38, %c0_39], %60 {strides = array<i32>} : memref<19x24x128xbf16, #tpu.memory_space<vmem>>, vector<18x24x128xbf16>,
    %cst_40 = arith.constant 0.000000e+00 : bf16
    %62 = vector.broadcast %cst_40 : bf16 to vector<1x24x128xbf16>
    %c18 = arith.constant 18 : index
    %c0_41 = arith.constant 0 : index
    %c0_42 = arith.constant 0 : index
    %63 = vector.load %arg11[%c18, %c0_41, %c0_42] : memref<19x24x128xbf16, #tpu.memory_space<vmem>>, vector<1x24x128xbf16>
    tpu.vector_store %arg11[%c18, %c0_41, %c0_42], %62 {strides = array<i32>} : memref<19x24x128xbf16, #tpu.memory_space<vmem>>, vector<1x24x128xbf16>,
    %64 = vector.shape_cast %58 : vector<1x1x128xbf16> to vector<1x1x128xbf16>
    %65 = vector.broadcast %64 : vector<1x1x128xbf16> to vector<19x1x128xbf16>
    %c0_43 = arith.constant 0 : index
    %c0_44 = arith.constant 0 : index
    %c0_45 = arith.constant 0 : index
    %66 = vector.load %arg11[%c0_43, %c0_44, %c0_45] : memref<19x24x128xbf16, #tpu.memory_space<vmem>>, vector<19x1x128xbf16>
    tpu.vector_store %arg11[%c0_43, %c0_44, %c0_45], %65 {strides = array<i32>} : memref<19x24x128xbf16, #tpu.memory_space<vmem>>, vector<19x1x128xbf16>,
    %67 = vector.shape_cast %58 : vector<1x1x128xbf16> to vector<1x1x128xbf16>
    %68 = vector.broadcast %67 : vector<1x1x128xbf16> to vector<19x1x128xbf16>
    %c0_46 = arith.constant 0 : index
    %c17 = arith.constant 17 : index
    %c0_47 = arith.constant 0 : index
    %69 = vector.load %arg11[%c0_46, %c17, %c0_47] : memref<19x24x128xbf16, #tpu.memory_space<vmem>>, vector<19x1x128xbf16>
    tpu.vector_store %arg11[%c0_46, %c17, %c0_47], %68 {strides = array<i32>} : memref<19x24x128xbf16, #tpu.memory_space<vmem>>, vector<19x1x128xbf16>,
    %c0_i32 = arith.constant 0 : i32
    %70 = arith.cmpi eq, %arg1, %c0_i32 : i32
    %71 = arith.extui %70 : i1 to i32
    %c0_i32_48 = arith.constant 0 : i32
    %72 = arith.cmpi ne, %71, %c0_i32_48 : i32
    scf.if %72 {
      %146 = vector.shape_cast %58 : vector<1x1x128xbf16> to vector<1x1x128xbf16>
      %147 = vector.broadcast %146 : vector<1x1x128xbf16> to vector<1x24x128xbf16>
      %c0_103 = arith.constant 0 : index
      %c0_104 = arith.constant 0 : index
      %c0_105 = arith.constant 0 : index
      %148 = vector.load %arg11[%c0_103, %c0_104, %c0_105] : memref<19x24x128xbf16, #tpu.memory_space<vmem>>, vector<1x24x128xbf16>
      tpu.vector_store %arg11[%c0_103, %c0_104, %c0_105], %147 {strides = array<i32>} : memref<19x24x128xbf16, #tpu.memory_space<vmem>>, vector<1x24x128xbf16>,
    } else {
    }
    %c0_i32_49 = arith.constant 0 : i32
    %73 = arith.cmpi eq, %arg1, %c0_i32_49 : i32
    %74 = arith.extui %73 : i1 to i32
    %c0_i32_50 = arith.constant 0 : i32
    %75 = arith.cmpi ne, %74, %c0_i32_50 : i32
    scf.if %75 {
      %146 = vector.shape_cast %58 : vector<1x1x128xbf16> to vector<1x1x128xbf16>
      %147 = vector.broadcast %146 : vector<1x1x128xbf16> to vector<1x24x128xbf16>
      %c17_103 = arith.constant 17 : index
      %c0_104 = arith.constant 0 : index
      %c0_105 = arith.constant 0 : index
      %148 = vector.load %arg11[%c17_103, %c0_104, %c0_105] : memref<19x24x128xbf16, #tpu.memory_space<vmem>>, vector<1x24x128xbf16>
      tpu.vector_store %arg11[%c17_103, %c0_104, %c0_105], %147 {strides = array<i32>} : memref<19x24x128xbf16, #tpu.memory_space<vmem>>, vector<1x24x128xbf16>,
    } else {
    }
    %c0_51 = arith.constant 0 : index
    %c0_52 = arith.constant 0 : index
    %c0_53 = arith.constant 0 : index
    %76 = vector.load %arg11[%c0_51, %c0_52, %c0_53] : memref<19x24x128xbf16, #tpu.memory_space<vmem>>, vector<19x24x128xbf16>
    %77 = vector.shape_cast %76 : vector<19x24x128xbf16> to vector<456x128xbf16>
    %cst_54 = arith.constant 0.000000e+00 : f32
    %78 = vector.broadcast %cst_54 : f32 to vector<384x128xf32>
    %79 = vector.extract_strided_slice %77 {offsets = [0, 0], sizes = [384, 128], strides = [1, 1]} : vector<456x128xbf16> to vector<384x128xbf16>
    %c0_55 = arith.constant 0 : index
    %c0_56 = arith.constant 0 : index
    %c0_57 = arith.constant 0 : index
    %80 = vector.load %arg6[%c0_55, %c0_56, %c0_57] : memref<9x128x128xbf16, #tpu.memory_space<vmem>>, vector<1x128x128xbf16>
    %81 = vector.shape_cast %80 : vector<1x128x128xbf16> to vector<128x128xbf16>
    %cst_58 = arith.constant dense<0.000000e+00> : vector<384x128xf32>
    %82 = tpu.matmul %79, %81, %cst_58 {dimension_numbers = #tpu.dot_dimension_numbers<[1], [0], [0], [1], [0, 0, 1, 1], [], []>} : vector<384x128xbf16>, vector<128x128xbf16>, vector<384x128xf32> -> vector<384x128xf32>
    %83 = arith.addf %78, %82 : vector<384x128xf32>
    %84 = vector.extract_strided_slice %77 {offsets = [1, 0], sizes = [384, 128], strides = [1, 1]} : vector<456x128xbf16> to vector<384x128xbf16>
    %c1_59 = arith.constant 1 : index
    %c0_60 = arith.constant 0 : index
    %c0_61 = arith.constant 0 : index
    %85 = vector.load %arg6[%c1_59, %c0_60, %c0_61] : memref<9x128x128xbf16, #tpu.memory_space<vmem>>, vector<1x128x128xbf16>
    %86 = vector.shape_cast %85 : vector<1x128x128xbf16> to vector<128x128xbf16>
    %cst_62 = arith.constant dense<0.000000e+00> : vector<384x128xf32>
    %87 = tpu.matmul %84, %86, %cst_62 {dimension_numbers = #tpu.dot_dimension_numbers<[1], [0], [0], [1], [0, 0, 1, 1], [], []>} : vector<384x128xbf16>, vector<128x128xbf16>, vector<384x128xf32> -> vector<384x128xf32>
    %88 = arith.addf %83, %87 : vector<384x128xf32>
    %89 = vector.extract_strided_slice %77 {offsets = [2, 0], sizes = [384, 128], strides = [1, 1]} : vector<456x128xbf16> to vector<384x128xbf16>
    %c2_63 = arith.constant 2 : index
    %c0_64 = arith.constant 0 : index
    %c0_65 = arith.constant 0 : index
    %90 = vector.load %arg6[%c2_63, %c0_64, %c0_65] : memref<9x128x128xbf16, #tpu.memory_space<vmem>>, vector<1x128x128xbf16>
    %91 = vector.shape_cast %90 : vector<1x128x128xbf16> to vector<128x128xbf16>
    %cst_66 = arith.constant dense<0.000000e+00> : vector<384x128xf32>
    %92 = tpu.matmul %89, %91, %cst_66 {dimension_numbers = #tpu.dot_dimension_numbers<[1], [0], [0], [1], [0, 0, 1, 1], [], []>} : vector<384x128xbf16>, vector<128x128xbf16>, vector<384x128xf32> -> vector<384x128xf32>
    %93 = arith.addf %88, %92 : vector<384x128xf32>
    %94 = vector.extract_strided_slice %77 {offsets = [24, 0], sizes = [384, 128], strides = [1, 1]} : vector<456x128xbf16> to vector<384x128xbf16>
    %c3_67 = arith.constant 3 : index
    %c0_68 = arith.constant 0 : index
    %c0_69 = arith.constant 0 : index
    %95 = vector.load %arg6[%c3_67, %c0_68, %c0_69] : memref<9x128x128xbf16, #tpu.memory_space<vmem>>, vector<1x128x128xbf16>
    %96 = vector.shape_cast %95 : vector<1x128x128xbf16> to vector<128x128xbf16>
    %cst_70 = arith.constant dense<0.000000e+00> : vector<384x128xf32>
    %97 = tpu.matmul %94, %96, %cst_70 {dimension_numbers = #tpu.dot_dimension_numbers<[1], [0], [0], [1], [0, 0, 1, 1], [], []>} : vector<384x128xbf16>, vector<128x128xbf16>, vector<384x128xf32> -> vector<384x128xf32>
    %98 = arith.addf %93, %97 : vector<384x128xf32>
    %99 = vector.extract_strided_slice %77 {offsets = [25, 0], sizes = [384, 128], strides = [1, 1]} : vector<456x128xbf16> to vector<384x128xbf16>
    %c4_71 = arith.constant 4 : index
    %c0_72 = arith.constant 0 : index
    %c0_73 = arith.constant 0 : index
    %100 = vector.load %arg6[%c4_71, %c0_72, %c0_73] : memref<9x128x128xbf16, #tpu.memory_space<vmem>>, vector<1x128x128xbf16>
    %101 = vector.shape_cast %100 : vector<1x128x128xbf16> to vector<128x128xbf16>
    %cst_74 = arith.constant dense<0.000000e+00> : vector<384x128xf32>
    %102 = tpu.matmul %99, %101, %cst_74 {dimension_numbers = #tpu.dot_dimension_numbers<[1], [0], [0], [1], [0, 0, 1, 1], [], []>} : vector<384x128xbf16>, vector<128x128xbf16>, vector<384x128xf32> -> vector<384x128xf32>
    %103 = arith.addf %98, %102 : vector<384x128xf32>
    %104 = vector.extract_strided_slice %77 {offsets = [26, 0], sizes = [384, 128], strides = [1, 1]} : vector<456x128xbf16> to vector<384x128xbf16>
    %c5_75 = arith.constant 5 : index
    %c0_76 = arith.constant 0 : index
    %c0_77 = arith.constant 0 : index
    %105 = vector.load %arg6[%c5_75, %c0_76, %c0_77] : memref<9x128x128xbf16, #tpu.memory_space<vmem>>, vector<1x128x128xbf16>
    %106 = vector.shape_cast %105 : vector<1x128x128xbf16> to vector<128x128xbf16>
    %cst_78 = arith.constant dense<0.000000e+00> : vector<384x128xf32>
    %107 = tpu.matmul %104, %106, %cst_78 {dimension_numbers = #tpu.dot_dimension_numbers<[1], [0], [0], [1], [0, 0, 1, 1], [], []>} : vector<384x128xbf16>, vector<128x128xbf16>, vector<384x128xf32> -> vector<384x128xf32>
    %108 = arith.addf %103, %107 : vector<384x128xf32>
    %109 = vector.extract_strided_slice %77 {offsets = [48, 0], sizes = [384, 128], strides = [1, 1]} : vector<456x128xbf16> to vector<384x128xbf16>
    %c6_79 = arith.constant 6 : index
    %c0_80 = arith.constant 0 : index
    %c0_81 = arith.constant 0 : index
    %110 = vector.load %arg6[%c6_79, %c0_80, %c0_81] : memref<9x128x128xbf16, #tpu.memory_space<vmem>>, vector<1x128x128xbf16>
    %111 = vector.shape_cast %110 : vector<1x128x128xbf16> to vector<128x128xbf16>
    %cst_82 = arith.constant dense<0.000000e+00> : vector<384x128xf32>
    %112 = tpu.matmul %109, %111, %cst_82 {dimension_numbers = #tpu.dot_dimension_numbers<[1], [0], [0], [1], [0, 0, 1, 1], [], []>} : vector<384x128xbf16>, vector<128x128xbf16>, vector<384x128xf32> -> vector<384x128xf32>
    %113 = arith.addf %108, %112 : vector<384x128xf32>
    %114 = vector.extract_strided_slice %77 {offsets = [49, 0], sizes = [384, 128], strides = [1, 1]} : vector<456x128xbf16> to vector<384x128xbf16>
    %c7_83 = arith.constant 7 : index
    %c0_84 = arith.constant 0 : index
    %c0_85 = arith.constant 0 : index
    %115 = vector.load %arg6[%c7_83, %c0_84, %c0_85] : memref<9x128x128xbf16, #tpu.memory_space<vmem>>, vector<1x128x128xbf16>
    %116 = vector.shape_cast %115 : vector<1x128x128xbf16> to vector<128x128xbf16>
    %cst_86 = arith.constant dense<0.000000e+00> : vector<384x128xf32>
    %117 = tpu.matmul %114, %116, %cst_86 {dimension_numbers = #tpu.dot_dimension_numbers<[1], [0], [0], [1], [0, 0, 1, 1], [], []>} : vector<384x128xbf16>, vector<128x128xbf16>, vector<384x128xf32> -> vector<384x128xf32>
    %118 = arith.addf %113, %117 : vector<384x128xf32>
    %119 = vector.extract_strided_slice %77 {offsets = [50, 0], sizes = [384, 128], strides = [1, 1]} : vector<456x128xbf16> to vector<384x128xbf16>
    %c8_87 = arith.constant 8 : index
    %c0_88 = arith.constant 0 : index
    %c0_89 = arith.constant 0 : index
    %120 = vector.load %arg6[%c8_87, %c0_88, %c0_89] : memref<9x128x128xbf16, #tpu.memory_space<vmem>>, vector<1x128x128xbf16>
    %121 = vector.shape_cast %120 : vector<1x128x128xbf16> to vector<128x128xbf16>
    %cst_90 = arith.constant dense<0.000000e+00> : vector<384x128xf32>
    %122 = tpu.matmul %119, %121, %cst_90 {dimension_numbers = #tpu.dot_dimension_numbers<[1], [0], [0], [1], [0, 0, 1, 1], [], []>} : vector<384x128xbf16>, vector<128x128xbf16>, vector<384x128xf32> -> vector<384x128xf32>
    %123 = arith.addf %118, %122 : vector<384x128xf32>
    %c0_91 = arith.constant 0 : index
    %c0_92 = arith.constant 0 : index
    %124 = vector.load %arg7[%c0_91, %c0_92] : memref<1x128xf32, #tpu.memory_space<vmem>>, vector<1x128xf32>
    %125 = vector.broadcast %124 : vector<1x128xf32> to vector<384x128xf32>
    %126 = arith.addf %123, %125 : vector<384x128xf32>
    %127 = vector.extract_strided_slice %1 {offsets = [50, 0], sizes = [384, 128], strides = [1, 1]} : vector<504x128xbf16> to vector<384x128xbf16>
    %128 = arith.extf %127 : vector<384x128xbf16> to vector<384x128xf32>
    %129 = arith.addf %126, %128 : vector<384x128xf32>
    %cst_93 = arith.constant 0.000000e+00 : f32
    %130 = vector.broadcast %cst_93 : f32 to vector<384x128xf32>
    %131 = arith.cmpf oge, %129, %130 : vector<384x128xf32>
    %cst_94 = arith.constant 3.000000e-01 : f32
    %132 = vector.broadcast %cst_94 : f32 to vector<384x128xf32>
    %133 = arith.mulf %132, %129 : vector<384x128xf32>
    %134 = arith.select %131, %129, %133 : vector<384x128xi1>, vector<384x128xf32>
    %c0_95 = arith.constant 0 : index
    %c0_96 = arith.constant 0 : index
    %135 = vector.load %arg8[%c0_95, %c0_96] : memref<1x128xf32, #tpu.memory_space<vmem>>, vector<1x128xf32>
    %136 = vector.broadcast %135 : vector<1x128xf32> to vector<384x128xf32>
    %137 = arith.mulf %134, %136 : vector<384x128xf32>
    %c0_97 = arith.constant 0 : index
    %c0_98 = arith.constant 0 : index
    %138 = vector.load %arg9[%c0_97, %c0_98] : memref<1x128xf32, #tpu.memory_space<vmem>>, vector<1x128xf32>
    %139 = vector.broadcast %138 : vector<1x128xf32> to vector<384x128xf32>
    %140 = arith.addf %137, %139 : vector<384x128xf32>
    %141 = vector.shape_cast %140 : vector<384x128xf32> to vector<16x24x128xf32>
    %142 = vector.extract_strided_slice %141 {offsets = [0, 0, 0], sizes = [16, 16, 128], strides = [1, 1, 1]} : vector<16x24x128xf32> to vector<16x16x128xf32>
    %c0_99 = arith.constant 0 : index
    %c0_100 = arith.constant 0 : index
    %c0_101 = arith.constant 0 : index
    %c0_102 = arith.constant 0 : index
    %143 = vector.load %arg10[%c0_99, %c0_100, %c0_101, %c0_102] : memref<1x16x16x128xf32, #tpu.memory_space<vmem>>, vector<1x16x16x128xf32>
    %144 = vector.shape_cast %143 : vector<1x16x16x128xf32> to vector<16x16x128xf32>
    %145 = vector.shape_cast %142 : vector<16x16x128xf32> to vector<1x16x16x128xf32>
    tpu.vector_store %arg10[%c0_99, %c0_100, %c0_101, %c0_102], %145 {strides = array<i32>} : memref<1x16x16x128xf32, #tpu.memory_space<vmem>>, vector<1x16x16x128xf32>,
    return
  }
  func.func @transform_0(%arg0: i32, %arg1: i32) -> (i32, i32, i32, i32) {
    %c1_i32 = arith.constant 1 : i32
    %0 = arith.muli %arg0, %c1_i32 : i32
    %1 = arith.addi %0, %arg1 : i32
    %c0_i32 = arith.constant 0 : i32
    %c0_i32_0 = arith.constant 0 : i32
    %c0_i32_1 = arith.constant 0 : i32
    %c0_i32_2 = arith.constant 0 : i32
    return %1, %c0_i32, %c0_i32_0, %c0_i32_1 : i32, i32, i32, i32
  }
  func.func @transform_1(%arg0: i32, %arg1: i32) -> (i32, i32, i32) {
    %c0_i32 = arith.constant 0 : i32
    %c0_i32_0 = arith.constant 0 : i32
    %c0_i32_1 = arith.constant 0 : i32
    %c0_i32_2 = arith.constant 0 : i32
    return %c0_i32, %c0_i32_0, %c0_i32_1 : i32, i32, i32
  }
  func.func @transform_2(%arg0: i32, %arg1: i32) -> (i32, i32) {
    %c0_i32 = arith.constant 0 : i32
    %c0_i32_0 = arith.constant 0 : i32
    %c0_i32_1 = arith.constant 0 : i32
    return %c0_i32, %c0_i32_0 : i32, i32
  }
  func.func @transform_3(%arg0: i32, %arg1: i32) -> (i32, i32) {
    %c0_i32 = arith.constant 0 : i32
    %c0_i32_0 = arith.constant 0 : i32
    %c0_i32_1 = arith.constant 0 : i32
    return %c0_i32, %c0_i32_0 : i32, i32
  }
  func.func @transform_4(%arg0: i32, %arg1: i32) -> (i32, i32, i32) {
    %c0_i32 = arith.constant 0 : i32
    %c0_i32_0 = arith.constant 0 : i32
    %c0_i32_1 = arith.constant 0 : i32
    %c0_i32_2 = arith.constant 0 : i32
    return %c0_i32, %c0_i32_0, %c0_i32_1 : i32, i32, i32
  }
  func.func @transform_5(%arg0: i32, %arg1: i32) -> (i32, i32) {
    %c0_i32 = arith.constant 0 : i32
    %c0_i32_0 = arith.constant 0 : i32
    %c0_i32_1 = arith.constant 0 : i32
    return %c0_i32, %c0_i32_0 : i32, i32
  }
  func.func @transform_6(%arg0: i32, %arg1: i32) -> (i32, i32) {
    %c0_i32 = arith.constant 0 : i32
    %c0_i32_0 = arith.constant 0 : i32
    %c0_i32_1 = arith.constant 0 : i32
    return %c0_i32, %c0_i32_0 : i32, i32
  }
  func.func @transform_7(%arg0: i32, %arg1: i32) -> (i32, i32) {
    %c0_i32 = arith.constant 0 : i32
    %c0_i32_0 = arith.constant 0 : i32
    %c0_i32_1 = arith.constant 0 : i32
    return %c0_i32, %c0_i32_0 : i32, i32
  }
  func.func @transform_8(%arg0: i32, %arg1: i32) -> (i32, i32, i32, i32) {
    %c0_i32 = arith.constant 0 : i32
    %c0_i32_0 = arith.constant 0 : i32
    %c0_i32_1 = arith.constant 0 : i32
    return %arg0, %arg1, %c0_i32, %c0_i32_0 : i32, i32, i32, i32
  }
}

</mosaic_0001>

<bundles_post_ra>
// kernel: resblock_forward.1
= control target key start
LH: loop header
LB: loop body
LE: loop exit
PB: predicated region body
PF: predicated region fallthrough
CT: control target
= control target key end

     0   :  { %s12926_s27 = smov 0   ;;  %s12928_s28 = smov 0   ;;  %s18077_s0 = inlined_call_operand.vmem [shape: bf16[2,21,24,128], index: 0, kind: input, shape index: {}]   ;;  %s18078_s1 = inlined_call_operand.vmem [shape: bf16[9,128,128], index: 1, kind: input, shape index: {}]   ;;  %s18079_s2 = inlined_call_operand.vmem [shape: f32[1,128], index: 2, kind: input, shape index: {}]   ;;  %s18080_s3 = inlined_call_operand.vmem [shape: f32[1,128], index: 3, kind: input, shape index: {}]   ;;  %s18081_s4 = inlined_call_operand.vmem [shape: bf16[9,128,128], index: 4, kind: input, shape index: {}]   ;;  %s18082_s5 = inlined_call_operand.vmem [shape: f32[1,128], index: 5, kind: input, shape index: {}]   ;;  %s18083_s6 = inlined_call_operand.vmem [shape: f32[1,128], index: 6, kind: input, shape index: {}]   ;;  %s18084_s7 = inlined_call_operand.vmem [shape: f32[1,128], index: 7, kind: input, shape index: {}]   ;;  %s18085_s8 = inlined_call_operand.vmem [shape: f32[2,16,16,128], index: 8, kind: output, shape index: {}]  }
   0x1   :  { %s12930_s29 = smov 0  }
   0x2 LB: > { %s30_s30 = sadd.s32 1, %s12872_s28  ;;  %p9379_p0 = scmp.ge.s32.totalorder %s12876_s29, 1  ;;  %s12876_s29 = sphi %s12930_s29, %s18_s29   ;;  %s12872_s28 = sphi %s12928_s28, %s19044_s28   ;;  %s12868_s27 = sphi %s12926_s27, %s19043_s27  }
   0x3   : > { %p32_p1 = scmp.ge.s32.totalorder %s30_s30, 2  ;;  %p280_p2 = scmp.lt.s32.totalorder %s12876_s29, 3 }
   0x5   : > { %s19046_s30 = smov (%p32_p1, %s30_s30), 0  ;;  %p281_p3 = pnand %p9379_p0, %p280_p2 }
   0x7   : > { %284 = sbr.rel (%p281_p3) target bundleno = 2092 (0x82c), region = 52 }
   0xe   : > { %v12515_v0 = vld [vmem:[%s18078_s1 + $0x40] sm:$0xff]   ;;  %v18145_v1 = vmov 0.0   ;;  %v12516_v2 = vld [vmem:[%s18078_s1 + $0x48] sm:$0xff]   ;;  %vm12879_vm0 = vmmov 0   ;;  %p321_p4 = scmp.lt.s32.totalorder %s12868_s27, 1  ;;  %v12517_v3 = vld [vmem:[%s18078_s1 + $0x50] sm:$0xff]  }
   0xf   : > { %10779 = vmatprep.subr.bf16.mxu0 %v18145_v1  ;;  %12471 = vmatprep.subr.bf16.mxu1 %v18145_v1  ;;  %v12518_v4 = vld [vmem:[%s18078_s1 + $0x58] sm:$0xff]   ;;  %v12525_v5 = vld [vmem:[%s18078_s1] sm:$0xff]   ;;  %v12979_v6 = vld [vmem:[%s18078_s1 + $0x8] sm:$0xff]   ;;  %vm571_vm1 = vsmask.f32 7424  ;;  %vm1457_vm2 = vcmask 1046528  }
  0x10   : > { %10780 = vmatpush3.bf16.msra.mxu0 %v12515_v0  ;;  %10795 = vmatprep.mubr.msk.bf16.mxu0 %vm12879_vm0, %v18145_v1  ;;  %s19048_s27 = smov (!%p321_p4, %s12868_s27), 1  ;;  %v12519_v7 = vld [vmem:[%s18078_s1 + $0x60] sm:$0xff]   ;;  %v12993_v11 = vld [vmem:[%s18078_s1 + $0x10] sm:$0xff]   ;;  %v12520_v12 = vld [vmem:[%s18078_s1 + $0x68] sm:$0xff]   ;;  %vm5064_vm5 = vcmask 1040384  }
  0x11   : > { %10781 = vmatprep.subr.bf16.mxu0 %v18145_v1  ;;  %10935 = vmatprep.mubr.msk.bf16.mxu1 %vm12879_vm0, %v18145_v1  ;;  %s12487_s15 = smul.u32 252, %s19048_s27  ;;  %v13006_v15 = vld [vmem:[%s18078_s1 + $0x18] sm:$0xff]   ;;  %v12521_v16 = vld [vmem:[%s18078_s1 + $0x70] sm:$0xff]   ;;  %v12531_v22 = vld [vmem:[%s18078_s1 + $0x20] sm:$0xff]   ;;  %vm5065_vm6 = vsmask.f32 256 }
  0x12   : > { %12479 = vmatpush3.bf16.msra.mxu1 %v12525_v5  ;;  %v12522_v23 = vld [vmem:[%s18078_s1 + $0x78] sm:$0xff]   ;;  %v12532_v27 = vld [vmem:[%s18078_s1 + $0x28] sm:$0xff]   ;;  %v12534_v33 = vld [vmem:[%s18078_s1 + $0x30] sm:$0xff]   ;;  %vm5131_vm10 = vsmask.f32 7938  ;;  %s9959_s24 = sshll.u32 %s19048_s27, 8 }
  0x13   : > { %s12967_s18 = scalar_lea.vmem %s18077_s0, %s12487_s15  ;;  %12472 = vmatprep.subr.bf16.mxu1 %v18145_v1  ;;  %v12535_v39 = vld [vmem:[%s18078_s1 + $0x38] sm:$0xff]   ;;  %vm15850_vm9 = vmand %vm5064_vm5, %vm5065_vm6  ;;  %s17839_s10 = scalar_lea.vmem %s18085_s8, %s9959_s24 }
  0x14   : > { %10782 = vmatpush3.bf16.msra.mxu0 %v12516_v2  ;;  %v12523_v8 = vld [vmem:[%s12967_s18] sm:$0xff]   ;;  %v341_v9 = vld [vmem:[%s12967_s18 + $0x8] sm:$0xf]  ;;  %v342_v10 = vld [vmem:[%s12967_s18 + $0xc] sm:$0xf] }
  0x15   : > { %10783 = vmatprep.subr.bf16.mxu0 %v18145_v1  ;;  %v12999_v13 = vcombine.low %v341_v9, %v342_v10  ;;  %v575_v14 = vshll.u32 %v12523_v8, 16  ;;  %v573_v17 = vshrl.u32 %v12523_v8, 16  ;;  %v343_v20 = vld [vmem:[%s12967_s18 + $0x10] sm:$0xf]  ;;  %v344_v21 = vld [vmem:[%s12967_s18 + $0x14] sm:$0xf]  ;;  %vm15866_vm13 = vmand %vm5064_vm5, %vm5131_vm10 }
  0x16   : > { %12480 = vmatpush3.bf16.msra.mxu1 %v12979_v6  ;;  %v13024_v26 = vcombine.low %v343_v20, %v344_v21  ;;  %v345_v31 = vld [vmem:[%s12967_s18 + $0x18] sm:$0xf]  ;;  %v346_v32 = vld [vmem:[%s12967_s18 + $0x1c] sm:$0xf]  ;;  %v347_v37 = vld [vmem:[%s12967_s18 + $0x20] sm:$0xf] }
  0x17   : > { %12473 = vmatprep.subr.bf16.mxu1 %v18145_v1  ;;  %v577_v18 = vrot.slane %v575_v14, 1  ;;  %v580_v19 = vshll.u32 %v12999_v13, 16  ;;  %v584_v29 = vshrl.u32 %v12999_v13, 16  ;;  %v13043_v36 = vcombine.low %v345_v31, %v346_v32  ;;  %v348_v38 = vld [vmem:[%s12967_s18 + $0x24] sm:$0xf] }
  0x18   : > { %10784 = vmatpush3.bf16.msra.mxu0 %v12517_v3  ;;  %v588_v30 = vshll.u32 %v13024_v26, 16  ;;  %v592_v41 = vshrl.u32 %v13024_v26, 16  ;;  %v13056_v43 = vcombine.low %v347_v37, %v348_v38  ;;  %v349_v48 = vld [vmem:[%s12967_s18 + $0x28] sm:$0xf]  ;;  %v350_v49 = vld [vmem:[%s12967_s18 + $0x2c] sm:$0xf] }
  0x19   : > { %10785 = vmatprep.subr.bf16.mxu0 %v18145_v1  ;;  %v578_v24 = vor.u32 %v577_v18, %v573_v17  ;;  %v582_v25 = vrot.slane %v580_v19, 1  ;;  %18284 = vst [vmem:[#allocation3_spill] sm:$0xff] %v13043_v36  ;;  %v596_v42 = vshll.u32 %v13043_v36, 16  ;;  %v600_v46 = vshrl.u32 %v13043_v36, 16  ;;  %v351_v54 = vld [vmem:[%s12967_s18 + $0x30] sm:$0xf] }
  0x1a   : > { %12481 = vmatpush3.bf16.msra.mxu1 %v12993_v11  ;;  %v590_v35 = vrot.slane %v588_v30, 1  ;;  %18285 = vst [vmem:[#allocation4_spill] sm:$0xff] %v13056_v43  ;;  %v604_v47 = vshll.u32 %v13056_v43, 16  ;;  %v13074_v51 = vcombine.low %v349_v48, %v350_v49  ;;  %v352_v55 = vld [vmem:[%s12967_s18 + $0x34] sm:$0xf]  ;;  %v608_v57 = vshrl.u32 %v13056_v43, 16 }
  0x1b   : > { %12474 = vmatprep.subr.bf16.mxu1 %v18145_v1  ;;  %v583_v28 = vsel %vm571_vm1, %v578_v24, %v582_v25  ;;  %v586_v34 = vor.u32 %v584_v29, %v582_v25  ;;  %v598_v45 = vrot.slane %v596_v42, 1  ;;  %v13091_v59 = vcombine.low %v351_v54, %v352_v55  ;;  %v353_v62 = vld [vmem:[%s12967_s18 + $0x38] sm:$0xf]  ;;  %v354_v63 = vld [vmem:[%s12967_s18 + $0x3c] sm:$0xf] }
  0x1c   : > { %10786 = vmatpush3.bf16.msra.mxu0 %v12518_v4  ;;  %v594_v44 = vor.u32 %v592_v41, %v590_v35  ;;  %18286 = vst [vmem:[#allocation5_spill] sm:$0xff] %v13074_v51  ;;  %v606_v53 = vrot.slane %v604_v47, 1  ;;  %v612_v58 = vshll.u32 %v13074_v51, 16  ;;  %v616_v2 = vshrl.u32 %v13074_v51, 16  ;;  %v356_v8 = vld [vmem:[%s12967_s18 + $0x44] sm:$0xf] }
  0x1d   : > { %10787 = vmatprep.subr.bf16.mxu0 %v18145_v1  ;;  %v591_v40 = vsel %vm571_vm1, %v586_v34, %v590_v35  ;;  %v602_v52 = vor.u32 %v600_v46, %v598_v45  ;;  %18288 = vst [vmem:[#allocation7_spill] sm:$0xff] %v13091_v59  ;;  %v620_v3 = vshll.u32 %v13091_v59, 16  ;;  %v13108_v4 = vcombine.low %v353_v62, %v354_v63  ;;  %v358_v17 = vld [vmem:[%s12967_s18 + $0x4c] sm:$0xf]  ;;  %v359_v24 = vld [vmem:[%s12967_s18 + $0x50] sm:$0xf] }
  0x1e   : > { %12482 = vmatpush3.bf16.msra.mxu1 %v13006_v15  ;;  %v599_v50 = vsel %vm571_vm1, %v594_v44, %v598_v45  ;;  %v610_v60 = vor.u32 %v608_v57, %v606_v53  ;;  %v614_v61 = vrot.slane %v612_v58, 1  ;;  %v624_v10 = vshrl.u32 %v13091_v59, 16  ;;  %v360_v25 = vld [vmem:[%s12967_s18 + $0x54] sm:$0xf]  ;;  %v362_v34 = vld [vmem:[%s12967_s18 + $0x5c] sm:$0xf] }
  0x1f   : > { %12475 = vmatprep.subr.bf16.mxu1 %v18145_v1  ;;  %v13085_v56 = vsel %vm571_vm1, %v602_v52, %v606_v53  ;;  %18290 = vst [vmem:[#allocation9_spill] sm:$0xff] %v13108_v4  ;;  %v632_v19 = vshrl.u32 %v13108_v4, 16  ;;  %v13153_v30 = vcombine.low %v359_v24, %v360_v25  ;;  %v364_v41 = vld [vmem:[%s12967_s18 + $0x64] sm:$0xf]  ;;  %v365_v45 = vld [vmem:[%s12967_s18 + $0x68] sm:$0xf] }
  0x20   : > { %10788 = vmatpush3.bf16.msra.mxu0 %v12519_v7  ;;  %18287 = vst [vmem:[#allocation6_spill] sm:$0xff] %v13085_v56  ;;  %v13102_v0 = vsel %vm571_vm1, %v610_v60, %v614_v61  ;;  %v355_v7 = vld [vmem:[%s12967_s18 + $0x40] sm:$0xf]  ;;  %v366_v46 = vld [vmem:[%s12967_s18 + $0x6c] sm:$0xf]  ;;  %v12564_v24 = vld [vmem:[%s18078_s1 + $0xd0] sm:$0xff]  }
  0x21   : > { %10789 = vmatprep.subr.bf16.mxu0 %v18145_v1  ;;  %18289 = vst [vmem:[#allocation8_spill] sm:$0xff] %v13102_v0  ;;  %18296 = vst [vmem:[#allocation15_spill] sm:$0xff] %v13153_v30  ;;  %v652_v38 = vshll.u32 %v13153_v30, 16  ;;  %v656_v48 = vshrl.u32 %v13153_v30, 16  ;;  %v13196_v55 = vcombine.low %v365_v45, %v366_v46  ;;  %v13293_v45 = vld [vmem:[%s12967_s18 + $0x88] sm:$0xf] }
  0x22   : > { %12483 = vmatpush3.bf16.msra.mxu1 %v12531_v22  ;;  %v13296_v46 = vld [vmem:[%s12967_s18 + $0x8c] sm:$0xf] }
  0x23   : > { %12476 = vmatprep.subr.bf16.mxu1 %v18145_v1  ;;  %v654_v44 = vrot.slane %v652_v38, 1  ;;  %18301 = vst [vmem:[#allocation20_spill] sm:$0xff] %v13196_v55  ;;  %v676_v62 = vshll.u32 %v13196_v55, 16 }
  0x24   : > { %10790 = vmatpush3.bf16.msra.mxu0 %v12520_v12  ;;  %v13123_v12 = vcombine.low %v355_v7, %v356_v8 }
  0x25   : > { %10791 = vmatprep.subr.bf16.mxu0 %v18145_v1  ;;  %v658_v52 = vor.u32 %v656_v48, %v654_v44  ;;  %v678_v8 = vrot.slane %v676_v62, 1 }
  0x26   : > { %12484 = vmatpush3.bf16.msra.mxu1 %v12532_v27  ;;  %18292 = vst [vmem:[#allocation11_spill] sm:$0xff] %v13123_v12  ;;  %v636_v20 = vshll.u32 %v13123_v12, 16 }
  0x27   : > { %12477 = vmatprep.subr.bf16.mxu1 %v18145_v1 }
  0x28   : > { %10792 = vmatpush3.bf16.msra.mxu0 %v12521_v16  ;;  %v357_v16 = vld [vmem:[%s12967_s18 + $0x48] sm:$0xf] }
  0x29   : > { %10793 = vmatprep.subr.bf16.mxu0 %v18145_v1  ;;  %v13138_v21 = vcombine.low %v357_v16, %v358_v17 }
  0x2a   : > { %12485 = vmatpush3.bf16.msra.mxu1 %v12534_v33 }
  0x2b   : > { %12478 = vmatprep.subr.bf16.mxu1 %v18145_v1  ;;  %18294 = vst [vmem:[#allocation13_spill] sm:$0xff] %v13138_v21  ;;  %v644_v29 = vshll.u32 %v13138_v21, 16  ;;  %v648_v37 = vshrl.u32 %v13138_v21, 16 }
  0x2c   : > { %10794 = vmatpush3.bf16.msra.mxu0 %v12522_v23  ;;  %v638_v23 = vrot.slane %v636_v20, 1 }
  0x2d   : > { %10903 = vmatprep.subr.bf16.mxu0 %v18145_v1  ;;  %v646_v32 = vrot.slane %v644_v29, 1  ;;  %v13267_v29 = vld [vmem:[%s12967_s18 + $0x84] sm:$0xf] }
  0x2e   : > { %12486 = vmatpush3.bf16.msra.mxu1 %v12535_v39 }
  0x2f   : > { %10796 = vmatmul.mubr.bf16.vlgmr.msra.gmra.mrb[0].mxu0 %v583_v28  ;;  %11151 = vmatprep.subr.bf16.mxu1 %v18145_v1  ;;  %v640_v28 = vshrl.u32 %v13123_v12, 16  ;;  %v650_v42 = vor.u32 %v648_v37, %v646_v32 }
  0x30   : > { %10904 = vmatpush3.bf16.msra.mxu0 %v12525_v5  ;;  %10799 = vmatprep.mubr.msk.bf16.mxu0 %vm12879_vm0, %v18145_v1  ;;  %v618_v5 = vor.u32 %v616_v2, %v614_v61  ;;  %v13212_v2 = vld [vmem:[%s12967_s18 + $0x70] sm:$0xf] }
  0x31   : > { %10905 = vmatprep.subr.bf16.mxu0 %v18145_v1  ;;  %10936 = vmatmul.mubr.bf16.vlgmr.msra.gmra.mrb[0].mxu1 %v13056_v43  ;;  %v642_v31 = vor.u32 %v640_v28, %v638_v23  ;;  %v13185_v47 = vsel %vm571_vm1, %v650_v42, %v654_v44  ;;  %v13264_v28 = vld [vmem:[%s12967_s18 + $0x80] sm:$0xf] }
  0x32   : > { %10939 = vmatprep.mubr.msk.bf16.mxu1 %vm12879_vm0, %v18145_v1  ;;  %18299 = vst [vmem:[#allocation18_spill] sm:$0xff] %v13185_v47  ;;  %v13282_v37 = vcombine.low %v13264_v28, %v13267_v29  ;;  %v12568_v42 = vld [vmem:[%s18078_s1 + $0xe0] sm:$0xff]  }
  0x33   : > { %v13165_v35 = vsel %vm571_vm1, %v642_v31, %v646_v32 }
  0x34   : > { %10906 = vmatpush3.bf16.msra.mxu0 %v12979_v6  ;;  %v622_v6 = vrot.slane %v620_v3, 1  ;;  %18297 = vst [vmem:[#allocation16_spill] sm:$0xff] %v13165_v35  ;;  %v13215_v3 = vld [vmem:[%s12967_s18 + $0x74] sm:$0xf]  ;;  %18308 = vst [vmem:[#allocation27_spill] sm:$0xff] %v13282_v37 }
  0x35   : > { %10907 = vmatprep.subr.bf16.mxu0 %v18145_v1 }
  0x36   : > { %v13118_v9 = vsel %vm571_vm1, %v618_v5, %v622_v6  ;;  %v626_v14 = vor.u32 %v624_v10, %v622_v6  ;;  %v13225_v6 = vcombine.low %v13212_v2, %v13215_v3  ;;  %v12560_v10 = vld [vmem:[%s18078_s1 + $0xc0] sm:$0xff]  }
  0x37   : > { %10800 = vmatmul.mubr.bf16.gmra.mrb[4].mxu0 %v591_v40  ;;  %18291 = vst [vmem:[#allocation10_spill] sm:$0xff] %v13118_v9  ;;  %v13174_v40 = vld [vmem:[%s12967_s18 + $0x60] sm:$0xf]  ;;  %11152 = vmatpush3.bf16.msra.mxu1 %v12560_v10  ;;  %v12574_v10 = vld [vmem:[%s18078_s1 + $0xf8] sm:$0xff]  }
  0x38   : > { %10803 = vmatprep.mubr.msk.bf16.mxu0 %vm12879_vm0, %v18145_v1  ;;  %10908 = vmatpush3.bf16.msra.mxu0 %v12993_v11  ;;  %v628_v11 = vshll.u32 %v13108_v4, 16  ;;  %18304 = vst [vmem:[#allocation23_spill] sm:$0xff] %v13225_v6  ;;  %v684_v17 = vshll.u32 %v13225_v6, 16  ;;  %v688_v25 = vshrl.u32 %v13225_v6, 16 }
  0x39   : > { %10909 = vmatprep.subr.bf16.mxu0 %v18145_v1  ;;  %10940 = vmatmul.mubr.bf16.gmra.mrb[4].mxu1 %v13074_v51 }
  0x3a   : > { %10943 = vmatprep.mubr.msk.bf16.mxu1 %vm12879_vm0, %v18145_v1  ;;  %11153 = vmatprep.subr.bf16.mxu1 %v18145_v1 }
  0x3c   : > { %10910 = vmatpush3.bf16.msra.mxu0 %v13006_v15  ;;  %v630_v15 = vrot.slane %v628_v11, 1  ;;  %v680_v11 = vshrl.u32 %v13196_v55, 16 }
  0x3d   : > { %10911 = vmatprep.subr.bf16.mxu0 %v18145_v1 }
  0x3e   : > { %v13133_v18 = vsel %vm571_vm1, %v626_v14, %v630_v15  ;;  %v13235_v14 = vld [vmem:[%s12967_s18 + $0x78] sm:$0xf] }
  0x3f   : > { %10804 = vmatmul.mubr.bf16.gmra.mrb[8].mxu0 %v599_v50  ;;  %18293 = vst [vmem:[#allocation12_spill] sm:$0xff] %v13133_v18  ;;  %v13190_v50 = vcombine.low %v13174_v40, %v364_v41 }
  0x40   : > { %10807 = vmatprep.mubr.msk.bf16.mxu0 %vm12879_vm0, %v18145_v1  ;;  %10912 = vmatpush3.bf16.msra.mxu0 %v12531_v22  ;;  %v634_v22 = vor.u32 %v632_v19, %v630_v15  ;;  %v13238_v15 = vld [vmem:[%s12967_s18 + $0x7c] sm:$0xf]  ;;  %v12562_v19 = vld [vmem:[%s18078_s1 + $0xc8] sm:$0xff]  }
  0x41   : > { %10913 = vmatprep.subr.bf16.mxu0 %v18145_v1  ;;  %10944 = vmatmul.mubr.bf16.gmra.mrb[8].mxu1 %v13091_v59  ;;  %18300 = vst [vmem:[#allocation19_spill] sm:$0xff] %v13190_v50  ;;  %v668_v54 = vshll.u32 %v13190_v50, 16  ;;  %v672_v58 = vshrl.u32 %v13190_v50, 16  ;;  %v13253_v20 = vcombine.low %v13235_v14, %v13238_v15 }
  0x42   : > { %10947 = vmatprep.mubr.msk.bf16.mxu1 %vm12879_vm0, %v18145_v1  ;;  %11154 = vmatpush3.bf16.msra.mxu1 %v12562_v19 }
  0x43   : > { %v670_v61 = vrot.slane %v668_v54, 1  ;;  %18306 = vst [vmem:[#allocation25_spill] sm:$0xff] %v13253_v20  ;;  %11155 = vmatprep.subr.bf16.mxu1 %v18145_v1  ;;  %v692_v32 = vshll.u32 %v13253_v20, 16  ;;  %v696_v44 = vshrl.u32 %v13253_v20, 16 }
  0x44   : > { %10914 = vmatpush3.bf16.msra.mxu0 %v12532_v27  ;;  %v13148_v27 = vsel %vm571_vm1, %v634_v22, %v638_v23  ;;  %v682_v22 = vor.u32 %v680_v11, %v678_v8  ;;  %v686_v23 = vrot.slane %v684_v17, 1 }
  0x45   : > { %10915 = vmatprep.subr.bf16.mxu0 %v18145_v1  ;;  %18295 = vst [vmem:[#allocation14_spill] sm:$0xff] %v13148_v27  ;;  %v674_v7 = vor.u32 %v672_v58, %v670_v61  ;;  %v694_v41 = vrot.slane %v692_v32, 1  ;;  %v12572_v58 = vld [vmem:[%s18078_s1 + $0xf0] sm:$0xff]   ;;  %v13357_v32 = vld [vmem:[%s12967_s18 + $0x9c] sm:$0xf] }
  0x46   : > { %11156 = vmatpush3.bf16.msra.mxu1 %v12564_v24  ;;  %v13273_v31 = vsel %vm571_vm1, %v682_v22, %v686_v23  ;;  %v690_v38 = vor.u32 %v688_v25, %v686_v23  ;;  %v13354_v25 = vld [vmem:[%s12967_s18 + $0x98] sm:$0xf] }
  0x47   : > { %10808 = vmatmul.mubr.bf16.gmra.mrb[12].mxu0 %v13085_v56  ;;  %v13244_v16 = vsel %vm571_vm1, %v674_v7, %v678_v8  ;;  %11157 = vmatprep.subr.bf16.mxu1 %v18145_v1  ;;  %18307 = vst [vmem:[#allocation26_spill] sm:$0xff] %v13273_v31  ;;  %v698_v54 = vor.u32 %v696_v44, %v694_v41  ;;  %v13332_v8 = vld [vmem:[%s12967_s18 + $0x94] sm:$0xf]  ;;  %v13522_v56 = vld [vmem:[%s12967_s18 + $0xd8] sm:$0xf] }
  0x48   : > { %10811 = vmatprep.mubr.msk.bf16.mxu0 %vm12879_vm0, %v18145_v1  ;;  %10916 = vmatpush3.bf16.msra.mxu0 %v12534_v33  ;;  %v13159_v33 = vld [vmem:[%s12967_s18 + $0x58] sm:$0xf]  ;;  %18305 = vst [vmem:[#allocation24_spill] sm:$0xff] %v13244_v16  ;;  %v13302_v48 = vsel %vm571_vm1, %v690_v38, %v694_v41  ;;  %18332 = vst [vmem:[#allocation51_spill] sm:$0xff] %v13522_v56 }
  0x49   : > { %10917 = vmatprep.subr.bf16.mxu0 %v18145_v1  ;;  %10948 = vmatmul.mubr.bf16.gmra.mrb[12].mxu1 %v13108_v4  ;;  %18309 = vst [vmem:[#allocation28_spill] sm:$0xff] %v13302_v48 }
  0x4a   : > { %10951 = vmatprep.mubr.msk.bf16.mxu1 %vm12879_vm0, %v18145_v1 }
  0x4c   : > { %10918 = vmatpush3.bf16.msra.mxu0 %v12535_v39  ;;  %v13171_v39 = vcombine.low %v13159_v33, %v362_v34  ;;  %v12566_v34 = vld [vmem:[%s18078_s1 + $0xd8] sm:$0xff]  }
  0x4d   : > { %11027 = vmatprep.subr.bf16.mxu0 %v18145_v1  ;;  %11158 = vmatpush3.bf16.msra.mxu1 %v12566_v34  ;;  %v13362_v34 = vcombine.low %v13354_v25, %v13357_v32 }
  0x4e   : > { %18298 = vst [vmem:[#allocation17_spill] sm:$0xff] %v13171_v39  ;;  %v660_v49 = vshll.u32 %v13171_v39, 16  ;;  %v664_v57 = vshrl.u32 %v13171_v39, 16  ;;  %11159 = vmatprep.subr.bf16.mxu1 %v18145_v1 }
  0x4f   : > { %10812 = vmatmul.mubr.bf16.gmra.mrb[16].mxu0 %v13102_v0  ;;  %18314 = vst [vmem:[#allocation33_spill] sm:$0xff] %v13362_v34 }
  0x50   : > { %10815 = vmatprep.mubr.msk.bf16.mxu0 %vm12879_vm0, %v18145_v1  ;;  %v662_v53 = vrot.slane %v660_v49, 1  ;;  %v700_v49 = vshll.u32 %v13282_v37, 16 }
  0x51   : > { %10952 = vmatmul.mubr.bf16.gmra.mrb[16].mxu1 %v13123_v12 }
  0x52   : > { %10955 = vmatprep.mubr.msk.bf16.mxu1 %vm12879_vm0, %v18145_v1  ;;  %v13204_v60 = vsel %vm571_vm1, %v658_v52, %v662_v53  ;;  %v666_v63 = vor.u32 %v664_v57, %v662_v53  ;;  %11160 = vmatpush3.bf16.msra.mxu1 %v12568_v42  ;;  %v12570_v52 = vld [vmem:[%s18078_s1 + $0xe8] sm:$0xff]   ;;  %v13311_v53 = vcombine.low %v13293_v45, %v13296_v46  ;;  %v702_v57 = vrot.slane %v700_v49, 1 }
  0x53   : > { %18302 = vst [vmem:[#allocation21_spill] sm:$0xff] %v13204_v60  ;;  %11161 = vmatprep.subr.bf16.mxu1 %v18145_v1  ;;  %v724_v49 = vshll.u32 %v13362_v34, 16 }
  0x54   : > { %v13220_v5 = vsel %vm571_vm1, %v666_v63, %v670_v61  ;;  %18310 = vst [vmem:[#allocation29_spill] sm:$0xff] %v13311_v53  ;;  %v13323_v61 = vld [vmem:[%s12967_s18 + $0x90] sm:$0xf]  ;;  %v13327_v62 = vsel %vm571_vm1, %v698_v54, %v702_v57  ;;  %v704_v63 = vshrl.u32 %v13282_v37, 16  ;;  %v708_v7 = vshll.u32 %v13311_v53, 16 }
  0x55   : > { %18303 = vst [vmem:[#allocation22_spill] sm:$0xff] %v13220_v5  ;;  %18311 = vst [vmem:[#allocation30_spill] sm:$0xff] %v13327_v62  ;;  %v13340_v11 = vcombine.low %v13323_v61, %v13332_v8  ;;  %v712_v23 = vshrl.u32 %v13311_v53, 16  ;;  %v13378_v54 = vld [vmem:[%s12967_s18 + $0xa4] sm:$0xf] }
  0x56   : > { %11162 = vmatpush3.bf16.msra.mxu1 %v12570_v52  ;;  %v706_v17 = vor.u32 %v704_v63, %v702_v57  ;;  %v710_v19 = vrot.slane %v708_v7, 1  ;;  %v13375_v52 = vld [vmem:[%s12967_s18 + $0xa0] sm:$0xf]  ;;  %v726_v63 = vrot.slane %v724_v49, 1 }
  0x57   : > { %10816 = vmatmul.mubr.bf16.gmra.mrb[20].mxu0 %v13118_v9  ;;  %11163 = vmatprep.subr.bf16.mxu1 %v18145_v1  ;;  %18312 = vst [vmem:[#allocation31_spill] sm:$0xff] %v13340_v11  ;;  %v716_v24 = vshll.u32 %v13340_v11, 16  ;;  %v720_v44 = vshrl.u32 %v13340_v11, 16  ;;  %v13383_v57 = vcombine.low %v13375_v52, %v13378_v54  ;;  %v13504_v9 = vld [vmem:[%s12967_s18 + $0xd4] sm:$0xf] }
  0x58   : > { %10819 = vmatprep.mubr.msk.bf16.mxu0 %vm12879_vm0, %v18145_v1  ;;  %v13349_v22 = vsel %vm571_vm1, %v706_v17, %v710_v19  ;;  %v714_v38 = vor.u32 %v712_v23, %v710_v19  ;;  %v13396_v19 = vld [vmem:[%s12967_s18 + $0xa8] sm:$0xf]  ;;  %v13399_v23 = vld [vmem:[%s12967_s18 + $0xac] sm:$0xf]  ;;  %18329 = vst [vmem:[#allocation48_spill] sm:$0xff] %v13504_v9 }
  0x59   : > { %10956 = vmatmul.mubr.bf16.gmra.mrb[20].mxu1 %v13138_v21  ;;  %18313 = vst [vmem:[#allocation32_spill] sm:$0xff] %v13349_v22  ;;  %v718_v41 = vrot.slane %v716_v24, 1  ;;  %18316 = vst [vmem:[#allocation35_spill] sm:$0xff] %v13383_v57  ;;  %v732_v17 = vshll.u32 %v13383_v57, 16  ;;  %v13404_v24 = vcombine.low %v13396_v19, %v13399_v23  ;;  %v736_v49 = vshrl.u32 %v13383_v57, 16 }
  0x5a   : > { %10959 = vmatprep.mubr.msk.bf16.mxu1 %vm12879_vm0, %v18145_v1  ;;  %11164 = vmatpush3.bf16.msra.mxu1 %v12572_v58 }
  0x5b   : > { %11165 = vmatprep.subr.bf16.mxu1 %v18145_v1  ;;  %v13370_v42 = vsel %vm571_vm1, %v714_v38, %v718_v41  ;;  %v722_v58 = vor.u32 %v720_v44, %v718_v41  ;;  %18318 = vst [vmem:[#allocation37_spill] sm:$0xff] %v13404_v24  ;;  %v734_v41 = vrot.slane %v732_v17, 1 }
  0x5c   : > { %18315 = vst [vmem:[#allocation34_spill] sm:$0xff] %v13370_v42 }
  0x5d   : > { %v13391_v7 = vsel %vm571_vm1, %v722_v58, %v726_v63  ;;  %v740_v58 = vshll.u32 %v13404_v24, 16 }
  0x5e   : > { %11166 = vmatpush3.bf16.msra.mxu1 %v12574_v10  ;;  %18317 = vst [vmem:[#allocation36_spill] sm:$0xff] %v13391_v7  ;;  %v728_v10 = vshrl.u32 %v13362_v34, 16 }
  0x5f   : > { %10820 = vmatmul.mubr.bf16.gmra.mrb[24].mxu0 %v13133_v18  ;;  %11399 = vmatprep.subr.bf16.mxu1 %v18145_v1  ;;  %v742_v17 = vrot.slane %v740_v58, 1  ;;  %v13501_v18 = vld [vmem:[%s12967_s18 + $0xd0] sm:$0xf] }
  0x60   : > { %10823 = vmatprep.mubr.msk.bf16.mxu0 %vm12879_vm0, %v18145_v1  ;;  %v730_v38 = vor.u32 %v728_v10, %v726_v63  ;;  %v738_v10 = vor.u32 %v736_v49, %v734_v41 }
  0x61   : > { %10960 = vmatmul.mubr.bf16.gmra.mrb[24].mxu1 %v13153_v30 }
  0x62   : > { %10963 = vmatprep.mubr.msk.bf16.mxu1 %vm12879_vm0, %v18145_v1  ;;  %v13412_v44 = vsel %vm571_vm1, %v730_v38, %v734_v41  ;;  %v13433_v38 = vsel %vm571_vm1, %v738_v10, %v742_v17 }
  0x63   : > { %18319 = vst [vmem:[#allocation38_spill] sm:$0xff] %v13412_v44  ;;  %18321 = vst [vmem:[#allocation40_spill] sm:$0xff] %v13433_v38 }
  0x67   : > { %10824 = vmatmul.mubr.bf16.gmra.mrb[28].mxu0 %v13148_v27 }
  0x68   : > { %10827 = vmatprep.mubr.msk.bf16.mxu0 %vm12879_vm0, %v18145_v1 }
  0x69   : > { %10964 = vmatmul.mubr.bf16.gmra.mrb[28].mxu1 %v13171_v39 }
  0x6a   : > { %10967 = vmatprep.mubr.msk.bf16.mxu1 %vm12879_vm0, %v18145_v1 }
  0x6f   : > { %10828 = vmatmul.mubr.bf16.gmra.mrb[32].mxu0 %v13165_v35  ;;  %v13483_v35 = vld [vmem:[%s12967_s18 + $0xcc] sm:$0xf] }
  0x70   : > { %10831 = vmatprep.mubr.msk.bf16.mxu0 %vm12879_vm0, %v18145_v1  ;;  %18326 = vst [vmem:[#allocation45_spill] sm:$0xff] %v13483_v35 }
  0x71   : > { %10968 = vmatmul.mubr.bf16.gmra.mrb[32].mxu1 %v13190_v50 }
  0x72   : > { %10971 = vmatprep.mubr.msk.bf16.mxu1 %vm12879_vm0, %v18145_v1 }
  0x77   : > { %10832 = vmatmul.mubr.bf16.gmra.mrb[36].mxu0 %v13185_v47  ;;  %v13480_v47 = vld [vmem:[%s12967_s18 + $0xc8] sm:$0xf] }
  0x78   : > { %10835 = vmatprep.mubr.msk.bf16.mxu0 %vm12879_vm0, %v18145_v1 }
  0x79   : > { %10972 = vmatmul.mubr.bf16.gmra.mrb[36].mxu1 %v13196_v55 }
  0x7a   : > { %10975 = vmatprep.mubr.msk.bf16.mxu1 %vm12879_vm0, %v18145_v1 }
  0x7f   : > { %10836 = vmatmul.mubr.bf16.gmra.mrb[40].mxu0 %v13204_v60 }
  0x80   : > { %10839 = vmatprep.mubr.msk.bf16.mxu0 %vm12879_vm0, %v18145_v1 }
  0x81   : > { %10976 = vmatmul.mubr.bf16.gmra.mrb[40].mxu1 %v13225_v6 }
  0x82   : > { %10979 = vmatprep.mubr.msk.bf16.mxu1 %vm12879_vm0, %v18145_v1 }
  0x87   : > { %10840 = vmatmul.mubr.bf16.gmra.mrb[44].mxu0 %v13220_v5  ;;  %v13462_v5 = vld [vmem:[%s12967_s18 + $0xc4] sm:$0xf] }
  0x88   : > { %10843 = vmatprep.mubr.msk.bf16.mxu0 %vm12879_vm0, %v18145_v1 }
  0x89   : > { %10980 = vmatmul.mubr.bf16.gmra.mrb[44].mxu1 %v13253_v20 }
  0x8a   : > { %10983 = vmatprep.mubr.msk.bf16.mxu1 %vm12879_vm0, %v18145_v1 }
  0x8f   : > { %10844 = vmatmul.mubr.bf16.gmra.mrb[48].mxu0 %v13244_v16  ;;  %v13459_v16 = vld [vmem:[%s12967_s18 + $0xc0] sm:$0xf] }
  0x90   : > { %10847 = vmatprep.mubr.msk.bf16.mxu0 %vm12879_vm0, %v18145_v1 }
  0x91   : > { %10984 = vmatmul.mubr.bf16.gmra.mrb[48].mxu1 %v13282_v37 }
  0x92   : > { %10987 = vmatprep.mubr.msk.bf16.mxu1 %vm12879_vm0, %v18145_v1 }
  0x97   : > { %10848 = vmatmul.mubr.bf16.gmra.mrb[52].mxu0 %v13273_v31 }
  0x98   : > { %10851 = vmatprep.mubr.msk.bf16.mxu0 %vm12879_vm0, %v18145_v1 }
  0x99   : > { %10988 = vmatmul.mubr.bf16.gmra.mrb[52].mxu1 %v13311_v53 }
  0x9a   : > { %10991 = vmatprep.mubr.msk.bf16.mxu1 %vm12879_vm0, %v18145_v1 }
  0x9f   : > { %10852 = vmatmul.mubr.bf16.gmra.mrb[56].mxu0 %v13302_v48  ;;  %v13441_v48 = vld [vmem:[%s12967_s18 + $0xbc] sm:$0xf] }
  0xa0   : > { %10855 = vmatprep.mubr.msk.bf16.mxu0 %vm12879_vm0, %v18145_v1 }
  0xa1   : > { %10992 = vmatmul.mubr.bf16.gmra.mrb[56].mxu1 %v13340_v11 }
  0xa2   : > { %10995 = vmatprep.mubr.msk.bf16.mxu1 %vm12879_vm0, %v18145_v1 }
  0xa7   : > { %10856 = vmatmul.mubr.bf16.gmra.mrb[60].mxu0 %v13327_v62  ;;  %v13438_v62 = vld [vmem:[%s12967_s18 + $0xb8] sm:$0xf] }
  0xa8   : > { %10859 = vmatprep.mubr.msk.bf16.mxu0 %vm12879_vm0, %v18145_v1  ;;  %v13446_v41 = vcombine.low %v13438_v62, %v13441_v48 }
  0xa9   : > { %10996 = vmatmul.mubr.bf16.gmra.mrb[60].mxu1 %v13362_v34 }
  0xaa   : > { %10999 = vmatprep.mubr.msk.bf16.mxu1 %vm12879_vm0, %v18145_v1  ;;  %18322 = vst [vmem:[#allocation41_spill] sm:$0xff] %v13446_v41  ;;  %v756_v31 = vshll.u32 %v13446_v41, 16 }
  0xaf   : > { %10860 = vmatmul.mubr.bf16.gmra.mrb[64].mxu0 %v13349_v22 }
  0xb0   : > { %10863 = vmatprep.mubr.msk.bf16.mxu0 %vm12879_vm0, %v18145_v1 }
  0xb1   : > { %11000 = vmatmul.mubr.bf16.gmra.mrb[64].mxu1 %v13383_v57  ;;  %v12787_v57 = vld [vmem:[%s12967_s18 + $0x40] sm:$0xf] }
  0xb2   : > { %11003 = vmatprep.mubr.msk.bf16.mxu1 %vm12879_vm0, %v18145_v1 }
  0xb7   : > { %10864 = vmatmul.mubr.bf16.gmra.mrb[68].mxu0 %v13370_v42  ;;  %v13420_v42 = vld [vmem:[%s12967_s18 + $0xb4] sm:$0xf] }
  0xb8   : > { %10867 = vmatprep.mubr.msk.bf16.mxu0 %vm12879_vm0, %v18145_v1 }
  0xb9   : > { %11004 = vmatmul.mubr.bf16.gmra.mrb[68].mxu1 %v13404_v24 }
  0xba   : > { %11007 = vmatprep.mubr.msk.bf16.mxu1 %vm12879_vm0, %v18145_v1 }
  0xbf   : > { %10868 = vmatmul.mubr.bf16.gmra.mrb[72].mxu0 %v13391_v7  ;;  %v13417_v7 = vld [vmem:[%s12967_s18 + $0xb0] sm:$0xf] }
  0xc0   : > { %10871 = vmatprep.mubr.msk.bf16.mxu0 %vm12879_vm0, %v18145_v1  ;;  %v13425_v63 = vcombine.low %v13417_v7, %v13420_v42 }
  0xc2   : > { %18320 = vst [vmem:[#allocation39_spill] sm:$0xff] %v13425_v63  ;;  %11008 = vmatmul.mubr.bf16.gmra.mrb[72].mxu1 %v13425_v63  ;;  %v748_v22 = vshll.u32 %v13425_v63, 16 }
  0xc3   : > { %11011 = vmatprep.mubr.msk.bf16.mxu1 %vm12879_vm0, %v18145_v1 }
  0xc4   : > { %v750_v58 = vrot.slane %v748_v22, 1  ;;  %v13467_v22 = vcombine.low %v13459_v16, %v13462_v5 }
  0xc6   : > { %18324 = vst [vmem:[#allocation43_spill] sm:$0xff] %v13467_v22  ;;  %v764_v60 = vshll.u32 %v13467_v22, 16 }
  0xc7   : > { %10872 = vmatmul.mubr.bf16.gmra.mrb[76].mxu0 %v13412_v44  ;;  %v744_v44 = vshrl.u32 %v13404_v24, 16 }
  0xc8   : > { %10875 = vmatprep.mubr.msk.bf16.mxu0 %vm12879_vm0, %v18145_v1 }
  0xc9   : > { %v746_v49 = vor.u32 %v744_v44, %v742_v17  ;;  %v758_v17 = vrot.slane %v756_v31, 1  ;;  %v13488_v31 = vcombine.low %v13480_v47, %v13483_v35  ;;  %v12788_v35 = vld [vmem:[%s12967_s18 + $0x44] sm:$0xf] }
  0xca   : > { %11012 = vmatmul.mubr.bf16.gmra.mrb[76].mxu1 %v13446_v41 }
  0xcb   : > { %11015 = vmatprep.mubr.msk.bf16.mxu1 %vm12879_vm0, %v18145_v1  ;;  %v13454_v10 = vsel %vm571_vm1, %v746_v49, %v750_v58  ;;  %18327 = vst [vmem:[#allocation46_spill] sm:$0xff] %v13488_v31  ;;  %v772_v27 = vshll.u32 %v13488_v31, 16  ;;  %v776_v0 = vshrl.u32 %v13488_v31, 16 }
  0xcc   : > { %18323 = vst [vmem:[#allocation42_spill] sm:$0xff] %v13454_v10 }
  0xcf   : > { %10876 = vmatmul.mubr.bf16.gmra.mrb[80].mxu0 %v13433_v38  ;;  %v752_v38 = vshrl.u32 %v13425_v63, 16 }
  0xd0   : > { %10879 = vmatprep.mubr.msk.bf16.mxu0 %vm12879_vm0, %v18145_v1 }
  0xd1   : > { %v754_v44 = vor.u32 %v752_v38, %v750_v58  ;;  %v766_v58 = vrot.slane %v764_v60, 1  ;;  %v13509_v60 = vcombine.low %v13501_v18, %v13504_v9 }
  0xd2   : > { %11016 = vmatmul.mubr.bf16.gmra.mrb[80].mxu1 %v13467_v22 }
  0xd3   : > { %11019 = vmatprep.mubr.msk.bf16.mxu1 %vm12879_vm0, %v18145_v1  ;;  %v13475_v49 = vsel %vm571_vm1, %v754_v44, %v758_v17  ;;  %18330 = vst [vmem:[#allocation49_spill] sm:$0xff] %v13509_v60 }
  0xd4   : > { %18325 = vst [vmem:[#allocation44_spill] sm:$0xff] %v13475_v49 }
  0xd7   : > { %10880 = vmatmul.mubr.bf16.gmra.mrb[84].mxu0 %v13454_v10  ;;  %v760_v10 = vshrl.u32 %v13446_v41, 16  ;;  %v12774_v41 = vld [vmem:[%s12967_s18 + $0x10] sm:$0xf] }
  0xd8   : > { %10883 = vmatprep.mubr.msk.bf16.mxu0 %vm12879_vm0, %v18145_v1 }
  0xd9   : > { %v762_v38 = vor.u32 %v760_v10, %v758_v17  ;;  %v774_v17 = vrot.slane %v772_v27, 1 }
  0xda   : > { %11020 = vmatmul.mubr.bf16.gmra.mrb[84].mxu1 %v13488_v31 }
  0xdb   : > { %11023 = vmatprep.mubr.msk.bf16.mxu1 %vm12879_vm0, %v18145_v1  ;;  %v13496_v44 = vsel %vm571_vm1, %v762_v38, %v766_v58  ;;  %v778_v27 = vor.u32 %v776_v0, %v774_v17  ;;  %v12775_v0 = vld [vmem:[%s12967_s18 + $0x14] sm:$0xf] }
  0xdc   : > { %18328 = vst [vmem:[#allocation47_spill] sm:$0xff] %v13496_v44 }
  0xdf   : > { %10884 = vmatmul.mubr.bf16.gmra.mrb[88].mxu0 %v13475_v49  ;;  %v768_v49 = vshrl.u32 %v13467_v22, 16  ;;  %v12773_v22 = vld [vmem:[%s12967_s18 + $0xc] sm:$0xf] }
  0xe0   : > { %10887 = vmatprep.mubr.msk.bf16.mxu0 %vm12879_vm0, %v18145_v1 }
  0xe1   : > { %v770_v10 = vor.u32 %v768_v49, %v766_v58  ;;  %v13526_v49 = vcombine.low %v12773_v22, %v12774_v41  ;;  %v784_v22 = vshrl.u32 %v13509_v60, 16 }
  0xe2   : > { %11024 = vmatmul.mubr.bf16.gmra.mrb[88].mxu1 %v13509_v60 }
  0xe3   : > { %11167 = vmatprep.mubr.msk.bf16.mxu1 %vm12879_vm0, %v18145_v1  ;;  %v13517_v38 = vsel %vm571_vm1, %v770_v10, %v774_v17  ;;  %18333 = vst [vmem:[#allocation52_spill] sm:$0xff] %v13526_v49  ;;  %v13533_v10 = vcombine.low %v13522_v56, %v13522_v56 }
  0xe4   : > { %18331 = vst [vmem:[#allocation50_spill] sm:$0xff] %v13517_v38 }
  0xe5   : > { %18334 = vst [vmem:[#allocation53_spill] sm:$0xff] %v13533_v10 }
  0xe7   : > { %10888 = vmatmul.mubr.bf16.gmra.mrb[92].mxu0 %v13496_v44  ;;  %v780_v44 = vshll.u32 %v13509_v60, 16 }
  0xe8   : > { %10891 = vmatprep.mubr.msk.bf16.mxu0 %vm12879_vm0, %v18145_v1 }
  0xe9   : > { %v782_v58 = vrot.slane %v780_v44, 1  ;;  %v12776_v44 = vld [vmem:[%s12967_s18 + $0x18] sm:$0xf] }
  0xea   : > { %11168 = vmatmul.mubr.bf16.vlgmr.msra.gmra.mrb[92].mxu1 %v13526_v49  ;;  %v13545_v17 = vcombine.low %v12775_v0, %v12776_v44  ;;  %v12777_v0 = vld [vmem:[%s12967_s18 + $0x1c] sm:$0xf]  ;;  %v12778_v44 = vld [vmem:[%s12967_s18 + $0x20] sm:$0xf]  ;;  %v12785_v49 = vld [vmem:[%s12967_s18 + $0x38] sm:$0xf] }
  0xeb   : > { %11171 = vmatprep.mubr.msk.bf16.mxu1 %vm12879_vm0, %v18145_v1  ;;  %v13539_v41 = vsel %vm571_vm1, %v778_v27, %v782_v58  ;;  %v13550_v31 = vor.u32 %v784_v22, %v782_v58 }
  0xec   : > { %18335 = vst [vmem:[#allocation54_spill] sm:$0xff] %v13539_v41  ;;  %18336 = vst [vmem:[#allocation55_spill] sm:$0xff] %v13545_v17 }
  0xed   : > { %18337 = vst [vmem:[#allocation56_spill] sm:$0xff] %v13550_v31 }
  0xef   : > { %10892 = vmatmul.mubr.bf16.gmra.mrb[96].mxu0 %v13517_v38  ;;  %v788_v38 = vshll.u32 %v13533_v10, 16  ;;  %v13578_v10 = vld [vmem:[%s12967_s18] sm:$0xff]  }
  0xf0   : > { %10895 = vmatprep.mubr.msk.bf16.mxu0 %vm12879_vm0, %v18145_v1 }
  0xf1   : > { %v790_v63 = vrot.slane %v788_v38, 1 }
  0xf2   : > { %11172 = vmatmul.mubr.bf16.gmra.mrb[96].mxu1 %v13545_v17 }
  0xf3   : > { %11175 = vmatprep.mubr.msk.bf16.mxu1 %vm12879_vm0, %v18145_v1  ;;  %v791_v27 = vsel %vm571_vm1, %v13550_v31, %v790_v63  ;;  %v12559_v63 = vld [vmem:[%s18078_s1 + $0x80] sm:$0xff]  }
  0xf7   : > { %10896 = vmatmul.mubr.bf16.gmra.mrb[100].mxu0 %v13539_v41  ;;  %v13559_v41 = vcombine.low %v12777_v0, %v12778_v44  ;;  %v12779_v44 = vld [vmem:[%s12967_s18 + $0x24] sm:$0xf] }
  0xf8   : > { %10899 = vmatprep.mubr.msk.bf16.mxu0 %vm12879_vm0, %v18145_v1 }
  0xf9   : > { %18338 = vst [vmem:[#allocation57_spill] sm:$0xff] %v13559_v41 }
  0xfa   : > { %11176 = vmatmul.mubr.bf16.gmra.mrb[100].mxu1 %v13559_v41  ;;  %v12782_v41 = vld [vmem:[%s12967_s18 + $0x2c] sm:$0xf] }
  0xfb   : > { %11179 = vmatprep.mubr.msk.bf16.mxu1 %vm12879_vm0, %v18145_v1 }
  0xff   : > { %10900 = vmatmul.mubr.bf16.gmra.mrb[104].mxu0 %v791_v27  ;;  %v12780_v27 = vld [vmem:[%s12967_s18 + $0x28] sm:$0xf] }
 0x100   : > { %10919 = vmatprep.mubr.msk.bf16.mxu0 %vm12879_vm0, %v18145_v1  ;;  %v13575_v31 = vcombine.low %v12779_v44, %v12780_v27 }
 0x102   : > { %v13564_v38 = vpop.f32.mrb[0].mxu0  ;;  %18341 = vst [vmem:[#allocation60_spill] sm:$0xff] %v13575_v31  ;;  %11180 = vmatmul.mubr.bf16.gmra.mrb[104].mxu1 %v13575_v31  ;;  %v12783_v31 = vld [vmem:[%s12967_s18 + $0x30] sm:$0xf] }
 0x103   : > { %18339 = vst [vmem:[#allocation58_spill] sm:$0xff] %v13564_v38  ;;  %v10797_v58 = vpop.f32.mrb[1].mxu0  ;;  %11183 = vmatprep.mubr.msk.bf16.mxu1 %vm12879_vm0, %v18145_v1  ;;  %v13600_v17 = vcombine.low %v12782_v41, %v12783_v31 }
 0x104   : > { %v13568_v22 = vpop.f32.mrb[2].mxu0  ;;  %v12561_v58 = vld [vmem:[%s18078_s1 + $0x88] sm:$0xff]   ;;  %v1257_v60 = vpop.f32.mrb[0].mxu1 }
 0x105   : > { %18340 = vst [vmem:[#allocation59_spill] sm:$0xff] %v13568_v22  ;;  %v10798_v0 = vpop.f32.mrb[3].mxu0  ;;  %v10937_v38 = vpop.f32.mrb[1].mxu1  ;;  %18344 = vst [vmem:[#allocation63_spill] sm:$0xff] %v13600_v17 }
 0x107   : > { %10920 = vmatmul.mubr.bf16.vlgmr.msra.gmra.mrb[108].mxu0 %v13578_v10 }
 0x108   : > { %11028 = vmatpush3.bf16.msra.mxu0 %v12559_v63  ;;  %10923 = vmatprep.mubr.msk.bf16.mxu0 %vm12879_vm0, %v18145_v1  ;;  %v12563_v63 = vld [vmem:[%s18078_s1 + $0x90] sm:$0xff]  }
 0x109   : > { %11029 = vmatprep.subr.bf16.mxu0 %v18145_v1 }
 0x10a   : > { %v13588_v0 = vpop.f32.mrb[4].mxu0  ;;  %11184 = vmatmul.mubr.bf16.gmra.mrb[108].mxu1 %v13600_v17  ;;  %v12784_v17 = vld [vmem:[%s12967_s18 + $0x34] sm:$0xf] }
 0x10b   : > { %18342 = vst [vmem:[#allocation61_spill] sm:$0xff] %v13588_v0  ;;  %v10801_v44 = vpop.f32.mrb[5].mxu0  ;;  %v1260_v0 = vpop.f32.mrb[2].mxu1  ;;  %11187 = vmatprep.mubr.msk.bf16.mxu1 %vm12879_vm0, %v18145_v1 }
 0x10c   : > { %v13592_v27 = vpop.f32.mrb[6].mxu0  ;;  %11030 = vmatpush3.bf16.msra.mxu0 %v12561_v58  ;;  %v10938_v44 = vpop.f32.mrb[3].mxu1  ;;  %v12565_v58 = vld [vmem:[%s18078_s1 + $0x98] sm:$0xff]  }
 0x10d   : > { %18343 = vst [vmem:[#allocation62_spill] sm:$0xff] %v13592_v27  ;;  %v10802_v22 = vpop.f32.mrb[7].mxu0  ;;  %11031 = vmatprep.subr.bf16.mxu0 %v18145_v1 }
 0x10e   : > { %v12567_v22 = vld [vmem:[%s18078_s1 + $0xa0] sm:$0xff]  }
 0x10f   : > { %10924 = vmatmul.mubr.bf16.gmra.mrb[112].mxu0 %v12999_v13 }
 0x110   : > { %11032 = vmatpush3.bf16.msra.mxu0 %v12563_v63  ;;  %10927 = vmatprep.mubr.msk.bf16.mxu0 %vm12879_vm0, %v18145_v1  ;;  %v13619_v63 = vpop.f32.mrb[4].mxu1 }
 0x111   : > { %11033 = vmatprep.subr.bf16.mxu0 %v18145_v1  ;;  %v10941_v27 = vpop.f32.mrb[5].mxu1 }
 0x112   : > { %v13610_v31 = vpop.f32.mrb[8].mxu0  ;;  %v13626_v24 = vpop.f32.mrb[6].mxu1 }
 0x113   : > { %18345 = vst [vmem:[#allocation64_spill] sm:$0xff] %v13610_v31  ;;  %v10805_v41 = vpop.f32.mrb[9].mxu0  ;;  %v13624_v31 = vcombine.low %v12784_v17, %v12785_v49 }
 0x114   : > { %v13614_v38 = vpop.f32.mrb[10].mxu0  ;;  %11034 = vmatpush3.bf16.msra.mxu0 %v12565_v58  ;;  %v10942_v41 = vpop.f32.mrb[7].mxu1  ;;  %v12569_v58 = vld [vmem:[%s18078_s1 + $0xa8] sm:$0xff]  }
 0x115   : > { %18346 = vst [vmem:[#allocation65_spill] sm:$0xff] %v13614_v38  ;;  %v10806_v44 = vpop.f32.mrb[11].mxu0  ;;  %11035 = vmatprep.subr.bf16.mxu0 %v18145_v1  ;;  %18347 = vst [vmem:[#allocation66_spill] sm:$0xff] %v13624_v31  ;;  %11188 = vmatmul.mubr.bf16.gmra.mrb[112].mxu1 %v13624_v31  ;;  %v12786_v31 = vld [vmem:[%s12967_s18 + $0x3c] sm:$0xf] }
 0x116   : > { %11191 = vmatprep.mubr.msk.bf16.mxu1 %vm12879_vm0, %v18145_v1  ;;  %v13645_v44 = vpop.f32.mrb[8].mxu1 }
 0x117   : > { %10928 = vmatmul.mubr.bf16.gmra.mrb[116].mxu0 %v13024_v26  ;;  %v10945_v38 = vpop.f32.mrb[9].mxu1 }
 0x118   : > { %11036 = vmatpush3.bf16.msra.mxu0 %v12567_v22  ;;  %10931 = vmatprep.mubr.msk.bf16.mxu0 %vm12879_vm0, %v18145_v1  ;;  %v12571_v22 = vld [vmem:[%s18078_s1 + $0xb0] sm:$0xff]   ;;  %v13652_v9 = vpop.f32.mrb[10].mxu1  ;;  %v1459_v38 = vrot.slane %v12999_v13, 1  ;;  %v12575_v13 = vld [vmem:[%s18078_s1 + $0x100] sm:$0xff]  }
 0x119   : > { %11037 = vmatprep.subr.bf16.mxu0 %v18145_v1 }
 0x11a   : > { %v13636_v49 = vpop.f32.mrb[12].mxu0 }
 0x11b   : > { %18348 = vst [vmem:[#allocation67_spill] sm:$0xff] %v13636_v49  ;;  %v10809_v17 = vpop.f32.mrb[13].mxu0  ;;  %v13650_v49 = vcombine.low %v12786_v31, %v12787_v57 }
 0x11c   : > { %v13640_v27 = vpop.f32.mrb[14].mxu0  ;;  %11038 = vmatpush3.bf16.msra.mxu0 %v12569_v58  ;;  %v10946_v17 = vpop.f32.mrb[11].mxu1  ;;  %v12573_v58 = vld [vmem:[%s18078_s1 + $0xb8] sm:$0xff]  }
 0x11d   : > { %18349 = vst [vmem:[#allocation68_spill] sm:$0xff] %v13640_v27  ;;  %v10810_v41 = vpop.f32.mrb[15].mxu0  ;;  %11039 = vmatprep.subr.bf16.mxu0 %v18145_v1  ;;  %18350 = vst [vmem:[#allocation69_spill] sm:$0xff] %v13650_v49  ;;  %11192 = vmatmul.mubr.bf16.gmra.mrb[116].mxu1 %v13650_v49  ;;  %v13672_v27 = vpop.f32.mrb[12].mxu1 }
 0x11e   : > { %v1458_v41 = vrot.slane %v13578_v10, 1  ;;  %11195 = vmatprep.mubr.msk.bf16.mxu1 %vm12879_vm0, %v18145_v1  ;;  %v10949_v34 = vpop.f32.mrb[13].mxu1 }
 0x11f   : > { %10932 = vmatmul.mubr.bf16.gmra.mrb[120].mxu0 %v13043_v36 }
 0x120   : > { %11040 = vmatpush3.bf16.msra.mxu0 %v12571_v22  ;;  %11043 = vmatprep.mubr.msk.bf16.mxu0 %vm12879_vm0, %v18145_v1  ;;  %v1460_v10 = vsel %vm1457_vm2, %v1458_v41, %v1459_v38  ;;  %v1461_v41 = vrot.slane %v13024_v26, 1 }
 0x121   : > { %11041 = vmatprep.subr.bf16.mxu0 %v18145_v1 }
 0x122   : > { %v933_v57 = vpop.f32.mrb[16].mxu0  ;;  %v1462_v26 = vsel %vm1457_vm2, %v1459_v38, %v1461_v41 }
 0x123   : > { %v13666_v31 = vadd.f32 %v1257_v60, %v933_v57  ;;  %v10813_v22 = vpop.f32.mrb[17].mxu0  ;;  %v12789_v60 = vld [vmem:[%s12967_s18 + $0x48] sm:$0xf] }
 0x124   : > { %v936_v17 = vpop.f32.mrb[18].mxu0  ;;  %11042 = vmatpush3.bf16.msra.mxu0 %v12573_v58  ;;  %v13679_v57 = vcombine.low %v12788_v35, %v12789_v60  ;;  %v13681_v22 = vpop.f32.mrb[14].mxu1 }
 0x125   : > { %18351 = vst [vmem:[#allocation70_spill] sm:$0xff] %v13666_v31  ;;  %v13674_v56 = vadd.f32 %v1260_v0, %v936_v17  ;;  %v10814_v49 = vpop.f32.mrb[19].mxu0  ;;  %11275 = vmatprep.subr.bf16.mxu0 %v18145_v1  ;;  %v10950_v58 = vpop.f32.mrb[15].mxu1  ;;  %v12580_v0 = vld [vmem:[%s18078_s1 + $0x108] sm:$0xff]   ;;  %v12792_v31 = vld [vmem:[%s12967_s18 + $0x54] sm:$0xf] }
 0x126   : > { %11196 = vmatmul.mubr.bf16.gmra.mrb[120].mxu1 %v13679_v57 }
 0x127   : > { %18352 = vst [vmem:[#allocation71_spill] sm:$0xff] %v13674_v56  ;;  %11044 = vmatmul.mubr.bf16.vlgmr.msra.gmra.mrb[124].mxu0 %v1460_v10  ;;  %11199 = vmatprep.mubr.msk.bf16.mxu1 %vm12879_vm0, %v18145_v1  ;;  %v13697_v10 = vpop.f32.mrb[16].mxu1 }
 0x128   : > { %11276 = vmatpush3.bf16.msra.mxu0 %v12575_v13  ;;  %11047 = vmatprep.mubr.msk.bf16.mxu0 %vm12879_vm0, %v18145_v1  ;;  %v12584_v13 = vld [vmem:[%s18078_s1 + $0x110] sm:$0xff]   ;;  %v10953_v56 = vpop.f32.mrb[17].mxu1 }
 0x129   : > { %11277 = vmatprep.subr.bf16.mxu0 %v18145_v1  ;;  %v12589_v56 = vld [vmem:[%s18078_s1 + $0x118] sm:$0xff]  }
 0x12a   : > { %v941_v35 = vpop.f32.mrb[20].mxu0 }
 0x12b   : > { %v13694_v34 = vadd.f32 %v13619_v63, %v941_v35  ;;  %v10817_v49 = vpop.f32.mrb[21].mxu0  ;;  %v12790_v63 = vld [vmem:[%s12967_s18 + $0x4c] sm:$0xf]  ;;  %v12791_v35 = vld [vmem:[%s12967_s18 + $0x50] sm:$0xf] }
 0x12c   : > { %v944_v17 = vpop.f32.mrb[22].mxu0  ;;  %11278 = vmatpush3.bf16.msra.mxu0 %v12580_v0  ;;  %v13708_v49 = vcombine.low %v12790_v63, %v12791_v35  ;;  %v1463_v0 = vrot.slane %v13043_v36, 1  ;;  %v12593_v35 = vld [vmem:[%s18078_s1 + $0x120] sm:$0xff]  }
 0x12d   : > { %18353 = vst [vmem:[#allocation72_spill] sm:$0xff] %v13694_v34  ;;  %v13703_v60 = vadd.f32 %v13626_v24, %v944_v17  ;;  %v10818_v58 = vpop.f32.mrb[23].mxu0  ;;  %11279 = vmatprep.subr.bf16.mxu0 %v18145_v1  ;;  %v1292_v34 = vpop.f32.mrb[18].mxu1 }
 0x12e   : > { %v10954_v38 = vpop.f32.mrb[19].mxu1  ;;  %11200 = vmatmul.mubr.bf16.gmra.mrb[124].mxu1 %v13708_v49 }
 0x12f   : > { %18354 = vst [vmem:[#allocation73_spill] sm:$0xff] %v13703_v60  ;;  %11048 = vmatmul.mubr.bf16.gmra.mrb[128].mxu0 %v1462_v26  ;;  %11203 = vmatprep.mubr.msk.bf16.mxu1 %vm12879_vm0, %v18145_v1  ;;  %v1297_v63 = vpop.f32.mrb[20].mxu1 }
 0x130   : > { %11051 = vmatprep.mubr.msk.bf16.mxu0 %vm12879_vm0, %v18145_v1  ;;  %11280 = vmatpush3.bf16.msra.mxu0 %v12584_v13  ;;  %v1464_v13 = vsel %vm1457_vm2, %v1461_v41, %v1463_v0  ;;  %v10957_v60 = vpop.f32.mrb[21].mxu1 }
 0x131   : > { %11281 = vmatprep.subr.bf16.mxu0 %v18145_v1  ;;  %v13732_v1 = vcombine.low %v12792_v31, %v13159_v33 }
 0x132   : > { %v949_v24 = vpop.f32.mrb[24].mxu0 }
 0x133   : > { %v13721_v17 = vadd.f32 %v13645_v44, %v949_v24  ;;  %v10821_v26 = vpop.f32.mrb[25].mxu0  ;;  %v18356_v44 = vmov 0.0   ;;  %v1300_v24 = vpop.f32.mrb[22].mxu1 }
 0x134   : > { %v952_v58 = vpop.f32.mrb[26].mxu0  ;;  %11282 = vmatpush3.bf16.msra.mxu0 %v12589_v56  ;;  %v10958_v41 = vpop.f32.mrb[23].mxu1  ;;  %v1465_v56 = vrot.slane %v13056_v43, 1  ;;  %v12793_v43 = vld [vmem:[%s12967_s18 + $0x5c] sm:$0xf] }
 0x135   : > { %v13728_v38 = vadd.f32 %v13652_v9, %v952_v58  ;;  %v10822_v36 = vpop.f32.mrb[27].mxu0  ;;  %11283 = vmatprep.subr.bf16.mxu0 %v18356_v44  ;;  %v1305_v58 = vpop.f32.mrb[24].mxu1 }
 0x136   : > { %v12597_v36 = vld [vmem:[%s18078_s1 + $0x128] sm:$0xff]   ;;  %11204 = vmatmul.mubr.bf16.gmra.mrb[128].mxu1 %v13732_v1  ;;  %v13749_v26 = vsel %vm1457_vm2, %v1463_v0, %v1465_v56  ;;  %v10961_v41 = vpop.f32.mrb[25].mxu1 }
 0x137   : > { %18355 = vst [vmem:[#allocation74_spill] sm:$0xff] %v13728_v38  ;;  %11052 = vmatmul.mubr.bf16.gmra.mrb[132].mxu0 %v1464_v13  ;;  %11207 = vmatprep.mubr.msk.bf16.mxu1 %vm12879_vm0, %v18356_v44  ;;  %18358 = vst [vmem:[#allocation76_spill] sm:$0xff] %v13749_v26  ;;  %v13756_v38 = vcombine.low %v12793_v43, %v13174_v40 }
 0x138   : > { %11055 = vmatprep.mubr.msk.bf16.mxu0 %vm12879_vm0, %v18356_v44  ;;  %11284 = vmatpush3.bf16.msra.mxu0 %v12593_v35 }
 0x139   : > { %11285 = vmatprep.subr.bf16.mxu0 %v18356_v44 }
 0x13a   : > { %v957_v9 = vpop.f32.mrb[28].mxu0 }
 0x13b   : > { %v13746_v33 = vadd.f32 %v13672_v27, %v957_v9  ;;  %v10825_v31 = vpop.f32.mrb[29].mxu0  ;;  %v1308_v27 = vpop.f32.mrb[26].mxu1 }
 0x13c   : > { %v960_v60 = vpop.f32.mrb[30].mxu0  ;;  %11286 = vmatpush3.bf16.msra.mxu0 %v12597_v36  ;;  %v10962_v0 = vpop.f32.mrb[27].mxu1 }
 0x13d   : > { %18357 = vst [vmem:[#allocation75_spill] sm:$0xff] %v13746_v33  ;;  %v13752_v13 = vadd.f32 %v13681_v22, %v960_v60  ;;  %v10826_v35 = vpop.f32.mrb[31].mxu0  ;;  %11287 = vmatprep.subr.bf16.mxu0 %v18356_v44  ;;  %v1467_v22 = vrot.slane %v13074_v51, 1  ;;  %v1313_v60 = vpop.f32.mrb[28].mxu1  ;;  %v12795_v51 = vld [vmem:[%s12967_s18 + $0x68] sm:$0xf] }
 0x13e   : > { %11208 = vmatmul.mubr.bf16.gmra.mrb[132].mxu1 %v13756_v38  ;;  %v10965_v0 = vpop.f32.mrb[29].mxu1 }
 0x13f   : > { %18359 = vst [vmem:[#allocation77_spill] sm:$0xff] %v13752_v13  ;;  %11056 = vmatmul.mubr.bf16.gmra.mrb[136].mxu0 %v13749_v26  ;;  %11211 = vmatprep.mubr.msk.bf16.mxu1 %vm12879_vm0, %v18356_v44  ;;  %v13770_v31 = vsel %vm1457_vm2, %v1465_v56, %v1467_v22  ;;  %v12794_v26 = vld [vmem:[%s12967_s18 + $0x64] sm:$0xf]  ;;  %v1316_v33 = vpop.f32.mrb[30].mxu1  ;;  %v1469_v56 = vrot.slane %v13091_v59, 1 }
 0x140   : > { %11059 = vmatprep.mubr.msk.bf16.mxu0 %vm12879_vm0, %v18356_v44  ;;  %18360 = vst [vmem:[#allocation78_spill] sm:$0xff] %v13770_v31  ;;  %v13776_v13 = vcombine.low %v12794_v26, %v12795_v51  ;;  %v12602_v26 = vld [vmem:[%s18078_s1 + $0x130] sm:$0xff]   ;;  %v12796_v59 = vld [vmem:[%s12967_s18 + $0x6c] sm:$0xf] }
 0x141   : > { %11288 = vmatpush3.bf16.msra.mxu0 %v12602_v26 }
 0x142   : > { %v965_v36 = vpop.f32.mrb[32].mxu0  ;;  %11289 = vmatprep.subr.bf16.mxu0 %v18356_v44 }
 0x143   : > { %v13767_v43 = vadd.f32 %v13697_v10, %v965_v36  ;;  %v10829_v40 = vpop.f32.mrb[33].mxu0  ;;  %v10966_v10 = vpop.f32.mrb[31].mxu1 }
 0x144   : > { %v968_v9 = vpop.f32.mrb[34].mxu0 }
 0x145   : > { %v13772_v35 = vadd.f32 %v1292_v34, %v968_v9  ;;  %v10830_v41 = vpop.f32.mrb[35].mxu0  ;;  %v13791_v9 = vsel %vm1457_vm2, %v1467_v22, %v1469_v56  ;;  %v1471_v22 = vrot.slane %v13108_v4, 1 }
 0x146   : > { %11212 = vmatmul.mubr.bf16.gmra.mrb[136].mxu1 %v13776_v13  ;;  %18362 = vst [vmem:[#allocation80_spill] sm:$0xff] %v13791_v9  ;;  %v1321_v41 = vpop.f32.mrb[32].mxu1 }
 0x147   : > { %18361 = vst [vmem:[#allocation79_spill] sm:$0xff] %v13772_v35  ;;  %11060 = vmatmul.mubr.bf16.gmra.mrb[140].mxu0 %v13770_v31  ;;  %11215 = vmatprep.mubr.msk.bf16.mxu1 %vm12879_vm0, %v18356_v44  ;;  %v10969_v31 = vpop.f32.mrb[33].mxu1  ;;  %v13797_v35 = vcombine.low %v12796_v59, %v13212_v2 }
 0x148   : > { %11063 = vmatprep.mubr.msk.bf16.mxu0 %vm12879_vm0, %v18356_v44 }
 0x14a   : > { %v973_v34 = vpop.f32.mrb[36].mxu0 }
 0x14b   : > { %v13785_v36 = vadd.f32 %v1297_v63, %v973_v34  ;;  %v10833_v51 = vpop.f32.mrb[37].mxu0  ;;  %v1324_v63 = vpop.f32.mrb[34].mxu1 }
 0x14c   : > { %v976_v40 = vpop.f32.mrb[38].mxu0  ;;  %v10970_v34 = vpop.f32.mrb[35].mxu1  ;;  %v13810_v51 = vsel %vm1457_vm2, %v1469_v56, %v1471_v22 }
 0x14d   : > { %v13793_v0 = vadd.f32 %v1300_v24, %v976_v40  ;;  %v10834_v10 = vpop.f32.mrb[39].mxu0  ;;  %18364 = vst [vmem:[#allocation82_spill] sm:$0xff] %v13810_v51  ;;  %v1329_v26 = vpop.f32.mrb[36].mxu1 }
 0x14e   : > { %11216 = vmatmul.mubr.bf16.gmra.mrb[140].mxu1 %v13797_v35  ;;  %v10973_v34 = vpop.f32.mrb[37].mxu1 }
 0x14f   : > { %18363 = vst [vmem:[#allocation81_spill] sm:$0xff] %v13793_v0  ;;  %11064 = vmatmul.mubr.bf16.gmra.mrb[144].mxu0 %v13791_v9  ;;  %11219 = vmatprep.mubr.msk.bf16.mxu1 %vm12879_vm0, %v18356_v44  ;;  %v13816_v9 = vcombine.low %v13215_v3, %v13235_v14  ;;  %v1332_v4 = vpop.f32.mrb[38].mxu1  ;;  %v13836_v34 = vcombine.low %v13238_v15, %v13264_v28 }
 0x150   : > { %11067 = vmatprep.mubr.msk.bf16.mxu0 %vm12879_vm0, %v18356_v44  ;;  %v10974_v0 = vpop.f32.mrb[39].mxu1 }
 0x152   : > { %v981_v24 = vpop.f32.mrb[40].mxu0 }
 0x153   : > { %v13807_v59 = vadd.f32 %v1305_v58, %v981_v24  ;;  %v10837_v2 = vpop.f32.mrb[41].mxu0  ;;  %v1473_v58 = vrot.slane %v13123_v12, 1 }
 0x154   : > { %v984_v31 = vpop.f32.mrb[42].mxu0  ;;  %v13830_v2 = vpop.f32.mrb[40].mxu1 }
 0x155   : > { %v13812_v40 = vadd.f32 %v1308_v27, %v984_v31  ;;  %v10838_v10 = vpop.f32.mrb[43].mxu0  ;;  %v13828_v14 = vsel %vm1457_vm2, %v1471_v22, %v1473_v58  ;;  %v1475_v22 = vrot.slane %v13138_v21, 1 }
 0x156   : > { %11220 = vmatmul.mubr.bf16.gmra.mrb[144].mxu1 %v13816_v9  ;;  %18366 = vst [vmem:[#allocation84_spill] sm:$0xff] %v13828_v14  ;;  %v10977_v10 = vpop.f32.mrb[41].mxu1 }
 0x157   : > { %11068 = vmatmul.mubr.bf16.gmra.mrb[148].mxu0 %v13810_v51  ;;  %11223 = vmatprep.mubr.msk.bf16.mxu1 %vm12879_vm0, %v18356_v44  ;;  %v13838_v51 = vpop.f32.mrb[42].mxu1  ;;  %v12608_v10 = vld [vmem:[%s18078_s1 + $0x148] sm:$0xff]  }
 0x158   : > { %11071 = vmatprep.mubr.msk.bf16.mxu0 %vm12879_vm0, %v18356_v44 }
 0x15a   : > { %v989_v56 = vpop.f32.mrb[44].mxu0 }
 0x15b   : > { %v13825_v27 = vadd.f32 %v1313_v60, %v989_v56  ;;  %v10841_v24 = vpop.f32.mrb[45].mxu0  ;;  %v10978_v60 = vpop.f32.mrb[43].mxu1 }
 0x15c   : > { %v992_v3 = vpop.f32.mrb[46].mxu0 }
 0x15d   : > { %18365 = vst [vmem:[#allocation83_spill] sm:$0xff] %v13825_v27  ;;  %v13832_v0 = vadd.f32 %v1316_v33, %v992_v3  ;;  %v10842_v31 = vpop.f32.mrb[47].mxu0  ;;  %v12606_v33 = vld [vmem:[%s18078_s1 + $0x140] sm:$0xff]   ;;  %v13854_v3 = vsel %vm1457_vm2, %v1473_v58, %v1475_v22 }
 0x15e   : > { %11224 = vmatmul.mubr.bf16.gmra.mrb[148].mxu1 %v13836_v34  ;;  %18369 = vst [vmem:[#allocation87_spill] sm:$0xff] %v13854_v3  ;;  %v13856_v31 = vpop.f32.mrb[44].mxu1 }
 0x15f   : > { %18367 = vst [vmem:[#allocation85_spill] sm:$0xff] %v13832_v0  ;;  %11072 = vmatmul.mubr.bf16.gmra.mrb[152].mxu0 %v13828_v14  ;;  %11227 = vmatprep.mubr.msk.bf16.mxu1 %vm12879_vm0, %v18356_v44  ;;  %v10981_v21 = vpop.f32.mrb[45].mxu1 }
 0x160   : > { %11075 = vmatprep.mubr.msk.bf16.mxu0 %vm12879_vm0, %v18356_v44  ;;  %11400 = vmatpush3.bf16.msra.mxu1 %v12606_v33  ;;  %v12607_v33 = vld [vmem:[%s18078_s1 + $0x138] sm:$0xff]   ;;  %v13870_v58 = vpop.f32.mrb[46].mxu1  ;;  %v1477_v21 = vrot.slane %v13153_v30, 1 }
 0x161   : > { %11401 = vmatprep.subr.bf16.mxu1 %v18356_v44  ;;  %11290 = vmatpush3.bf16.msra.mxu0 %v12607_v33  ;;  %v12611_v33 = vld [vmem:[%s18078_s1 + $0x158] sm:$0xff]  }
 0x162   : > { %v997_v56 = vpop.f32.mrb[48].mxu0  ;;  %11523 = vmatprep.subr.bf16.mxu0 %v18356_v44 }
 0x163   : > { %v13850_v15 = vadd.f32 %v1321_v41, %v997_v56  ;;  %v10845_v28 = vpop.f32.mrb[49].mxu0  ;;  %v13865_v41 = vcombine.low %v13267_v29, %v13293_v45  ;;  %v10982_v56 = vpop.f32.mrb[47].mxu1  ;;  %v12610_v29 = vld [vmem:[%s18078_s1 + $0x150] sm:$0xff]  }
 0x164   : > { %v1000_v24 = vpop.f32.mrb[50].mxu0  ;;  %11402 = vmatpush3.bf16.msra.mxu1 %v12608_v10  ;;  %v13890_v10 = vpop.f32.mrb[48].mxu1 }
 0x165   : > { %18368 = vst [vmem:[#allocation86_spill] sm:$0xff] %v13850_v15  ;;  %v13861_v60 = vadd.f32 %v1324_v63, %v1000_v24  ;;  %v10846_v14 = vpop.f32.mrb[51].mxu0  ;;  %11403 = vmatprep.subr.bf16.mxu1 %v18356_v44  ;;  %v13888_v24 = vsel %vm1457_vm2, %v1475_v22, %v1477_v21  ;;  %v10985_v30 = vpop.f32.mrb[49].mxu1 }
 0x166   : > { %11228 = vmatmul.mubr.bf16.gmra.mrb[152].mxu1 %v13865_v41  ;;  %18372 = vst [vmem:[#allocation90_spill] sm:$0xff] %v13888_v24  ;;  %v12613_v30 = vld [vmem:[%s18078_s1 + $0x160] sm:$0xff]  }
 0x167   : > { %18370 = vst [vmem:[#allocation88_spill] sm:$0xff] %v13861_v60  ;;  %11076 = vmatmul.mubr.bf16.gmra.mrb[156].mxu0 %v13854_v3  ;;  %11231 = vmatprep.mubr.msk.bf16.mxu1 %vm12879_vm0, %v18356_v44  ;;  %v18451_v60 = vld [vmem:[#allocation68_spill] sm:$0xff] }
 0x168   : > { %11079 = vmatprep.mubr.msk.bf16.mxu0 %vm12879_vm0, %v18356_v44  ;;  %11404 = vmatpush3.bf16.msra.mxu1 %v12610_v29  ;;  %v13901_v29 = vpop.f32.mrb[50].mxu1 }
 0x169   : > { %11405 = vmatprep.subr.bf16.mxu1 %v18356_v44  ;;  %v10986_v22 = vpop.f32.mrb[51].mxu1 }
 0x16a   : > { %v1005_v45 = vpop.f32.mrb[52].mxu0 }
 0x16b   : > { %v13884_v63 = vadd.f32 %v1329_v26, %v1005_v45  ;;  %v10849_v14 = vpop.f32.mrb[53].mxu0  ;;  %v13899_v26 = vcombine.low %v13296_v46, %v13323_v61 }
 0x16c   : > { %v1008_v28 = vpop.f32.mrb[54].mxu0  ;;  %11406 = vmatpush3.bf16.msra.mxu1 %v12611_v33  ;;  %v12614_v33 = vld [vmem:[%s18078_s1 + $0x168] sm:$0xff]  }
 0x16d   : > { %18371 = vst [vmem:[#allocation89_spill] sm:$0xff] %v13884_v63  ;;  %v13895_v56 = vadd.f32 %v1332_v4, %v1008_v28  ;;  %v10850_v3 = vpop.f32.mrb[55].mxu0  ;;  %11407 = vmatprep.subr.bf16.mxu1 %v18356_v44  ;;  %v1479_v4 = vrot.slane %v13171_v39, 1  ;;  %v1361_v28 = vpop.f32.mrb[52].mxu1  ;;  %v396_v39 = vld [vmem:[%s12967_s18 + $0xe4] sm:$0xf] }
 0x16e   : > { %11232 = vmatmul.mubr.bf16.gmra.mrb[156].mxu1 %v13899_v26 }
 0x16f   : > { %18373 = vst [vmem:[#allocation91_spill] sm:$0xff] %v13895_v56  ;;  %11080 = vmatmul.mubr.bf16.gmra.mrb[160].mxu0 %v13888_v24  ;;  %11235 = vmatprep.mubr.msk.bf16.mxu1 %vm12879_vm0, %v18356_v44  ;;  %v13919_v14 = vsel %vm1457_vm2, %v1477_v21, %v1479_v4  ;;  %v10989_v24 = vpop.f32.mrb[53].mxu1 }
 0x170   : > { %11083 = vmatprep.mubr.msk.bf16.mxu0 %vm12879_vm0, %v18356_v44  ;;  %11408 = vmatpush3.bf16.msra.mxu1 %v12613_v30  ;;  %18375 = vst [vmem:[#allocation93_spill] sm:$0xff] %v13919_v14 }
 0x171   : > { %11409 = vmatprep.subr.bf16.mxu1 %v18356_v44 }
 0x172   : > { %v1013_v46 = vpop.f32.mrb[56].mxu0 }
 0x173   : > { %v13915_v61 = vadd.f32 %v13830_v2, %v1013_v46  ;;  %v10853_v3 = vpop.f32.mrb[57].mxu0  ;;  %v13929_v2 = vcombine.low %v13332_v8, %v13354_v25  ;;  %v1364_v46 = vpop.f32.mrb[54].mxu1  ;;  %v12619_v8 = vld [vmem:[%s18078_s1 + $0x170] sm:$0xff]  }
 0x174   : > { %v1016_v45 = vpop.f32.mrb[58].mxu0  ;;  %11410 = vmatpush3.bf16.msra.mxu1 %v12614_v33  ;;  %v10990_v21 = vpop.f32.mrb[55].mxu1  ;;  %v13933_v3 = vld [vmem:[%s12967_s18 + $0xe0] sm:$0xf] }
 0x175   : > { %18374 = vst [vmem:[#allocation92_spill] sm:$0xff] %v13915_v61  ;;  %v13925_v22 = vadd.f32 %v13838_v51, %v1016_v45  ;;  %v10854_v30 = vpop.f32.mrb[59].mxu0  ;;  %11411 = vmatprep.subr.bf16.mxu1 %v18356_v44  ;;  %v1481_v51 = vrot.slane %v13190_v50, 1  ;;  %v13941_v24 = vcombine.low %v13933_v3, %v396_v39  ;;  %v1369_v21 = vpop.f32.mrb[56].mxu1 }
 0x176   : > { %11236 = vmatmul.mubr.bf16.gmra.mrb[160].mxu1 %v13929_v2 }
 0x177   : > { %18376 = vst [vmem:[#allocation94_spill] sm:$0xff] %v13925_v22  ;;  %11084 = vmatmul.mubr.bf16.gmra.mrb[164].mxu0 %v13919_v14  ;;  %18377 = vst [vmem:[#allocation95_spill] sm:$0xff] %v13941_v24  ;;  %11239 = vmatprep.mubr.msk.bf16.mxu1 %vm12879_vm0, %v18356_v44  ;;  %v13954_v39 = vsel %vm1457_vm2, %v1479_v4, %v1481_v51  ;;  %v12620_v14 = vld [vmem:[%s18078_s1 + $0x178] sm:$0xff]  }
 0x178   : > { %11087 = vmatprep.mubr.msk.bf16.mxu0 %vm12879_vm0, %v18356_v44  ;;  %11412 = vmatpush3.bf16.msra.mxu1 %v12619_v8  ;;  %18379 = vst [vmem:[#allocation97_spill] sm:$0xff] %v13954_v39  ;;  %v10993_v8 = vpop.f32.mrb[57].mxu1 }
 0x179   : > { %11413 = vmatprep.subr.bf16.mxu1 %v18356_v44 }
 0x17a   : > { %v1021_v25 = vpop.f32.mrb[60].mxu0 }
 0x17b   : > { %v13950_v45 = vadd.f32 %v13856_v31, %v1021_v25  ;;  %v10857_v33 = vpop.f32.mrb[61].mxu0  ;;  %v13964_v31 = vcombine.low %v13357_v32, %v13375_v52  ;;  %v1372_v25 = vpop.f32.mrb[58].mxu1 }
 0x17c   : > { %v1024_v30 = vpop.f32.mrb[62].mxu0  ;;  %11414 = vmatpush3.bf16.msra.mxu1 %v12620_v14  ;;  %v10994_v4 = vpop.f32.mrb[59].mxu1  ;;  %v1483_v33 = vrot.slane %v13196_v55, 1  ;;  %v13985_v55 = vcombine.low %v13378_v54, %v13396_v19 }
 0x17d   : > { %18378 = vst [vmem:[#allocation96_spill] sm:$0xff] %v13950_v45  ;;  %v13960_v24 = vadd.f32 %v13870_v58, %v1024_v30  ;;  %v10858_v50 = vpop.f32.mrb[63].mxu0  ;;  %11647 = vmatprep.subr.bf16.mxu1 %v18356_v44  ;;  %v1377_v30 = vpop.f32.mrb[60].mxu1 }
 0x17e   : > { %11240 = vmatmul.mubr.bf16.gmra.mrb[164].mxu1 %v13964_v31  ;;  %v13978_v14 = vsel %vm1457_vm2, %v1481_v51, %v1483_v33  ;;  %v1485_v51 = vrot.slane %v13225_v6, 1 }
 0x17f   : > { %18380 = vst [vmem:[#allocation98_spill] sm:$0xff] %v13960_v24  ;;  %11088 = vmatmul.mubr.bf16.gmra.mrb[168].mxu0 %v13954_v39  ;;  %11243 = vmatprep.mubr.msk.bf16.mxu1 %vm12879_vm0, %v18356_v44  ;;  %18382 = vst [vmem:[#allocation100_spill] sm:$0xff] %v13978_v14  ;;  %v10997_v39 = vpop.f32.mrb[61].mxu1 }
 0x180   : > { %11091 = vmatprep.mubr.msk.bf16.mxu0 %vm12879_vm0, %v18356_v44  ;;  %v1380_v12 = vpop.f32.mrb[62].mxu1  ;;  %v13997_v19 = vsel %vm1457_vm2, %v1483_v33, %v1485_v51 }
 0x181   : > { %18385 = vst [vmem:[#allocation103_spill] sm:$0xff] %v13997_v19 }
 0x182   : > { %v1029_v50 = vpop.f32.mrb[64].mxu0 }
 0x183   : > { %v13975_v32 = vadd.f32 %v13890_v10, %v1029_v50  ;;  %v10861_v52 = vpop.f32.mrb[65].mxu0  ;;  %v10998_v10 = vpop.f32.mrb[63].mxu1 }
 0x184   : > { %v1032_v58 = vpop.f32.mrb[66].mxu0  ;;  %v1385_v52 = vpop.f32.mrb[64].mxu1 }
 0x185   : > { %18381 = vst [vmem:[#allocation99_spill] sm:$0xff] %v13975_v32  ;;  %v13981_v8 = vadd.f32 %v13901_v29, %v1032_v58  ;;  %v10862_v4 = vpop.f32.mrb[67].mxu0  ;;  %v11001_v10 = vpop.f32.mrb[65].mxu1  ;;  %v18442_v32 = vld [vmem:[#allocation62_spill] sm:$0xff] }
 0x186   : > { %11244 = vmatmul.mubr.bf16.gmra.mrb[168].mxu1 %v13985_v55  ;;  %v1388_v6 = vpop.f32.mrb[66].mxu1  ;;  %v14021_v10 = vcombine.low %v13420_v42, %v13438_v62 }
 0x187   : > { %18383 = vst [vmem:[#allocation101_spill] sm:$0xff] %v13981_v8  ;;  %11092 = vmatmul.mubr.bf16.gmra.mrb[172].mxu0 %v13978_v14  ;;  %11247 = vmatprep.mubr.msk.bf16.mxu1 %vm12879_vm0, %v18356_v44  ;;  %v14003_v14 = vcombine.low %v13399_v23, %v13417_v7  ;;  %v11002_v8 = vpop.f32.mrb[67].mxu1 }
 0x188   : > { %11095 = vmatprep.mubr.msk.bf16.mxu0 %vm12879_vm0, %v18356_v44  ;;  %18391 = vst [vmem:[#allocation109_spill] sm:$0xff] %v14021_v10 }
 0x189   : > { %18387 = vst [vmem:[#allocation105_spill] sm:$0xff] %v14003_v14 }
 0x18a   : > { %v1037_v50 = vpop.f32.mrb[68].mxu0 }
 0x18b   : > { %v13994_v29 = vadd.f32 %v1361_v28, %v1037_v50  ;;  %v10865_v39 = vpop.f32.mrb[69].mxu0  ;;  %v1487_v28 = vrot.slane %v13253_v20, 1 }
 0x18c   : > { %v1040_v54 = vpop.f32.mrb[70].mxu0  ;;  %v1393_v39 = vpop.f32.mrb[68].mxu1 }
 0x18d   : > { %18384 = vst [vmem:[#allocation102_spill] sm:$0xff] %v13994_v29  ;;  %v13999_v58 = vadd.f32 %v1364_v46, %v1040_v54  ;;  %v10866_v4 = vpop.f32.mrb[71].mxu0  ;;  %v14015_v23 = vsel %vm1457_vm2, %v1485_v51, %v1487_v28 }
 0x18e   : > { %11248 = vmatmul.mubr.bf16.gmra.mrb[172].mxu1 %v14003_v14  ;;  %18389 = vst [vmem:[#allocation107_spill] sm:$0xff] %v14015_v23  ;;  %v11005_v4 = vpop.f32.mrb[69].mxu1 }
 0x18f   : > { %18386 = vst [vmem:[#allocation104_spill] sm:$0xff] %v13999_v58  ;;  %11096 = vmatmul.mubr.bf16.gmra.mrb[176].mxu0 %v13997_v19  ;;  %11251 = vmatprep.mubr.msk.bf16.mxu1 %vm12879_vm0, %v18356_v44  ;;  %v1396_v19 = vpop.f32.mrb[70].mxu1  ;;  %v14039_v4 = vcombine.low %v13441_v48, %v13459_v16 }
 0x190   : > { %11099 = vmatprep.mubr.msk.bf16.mxu0 %vm12879_vm0, %v18356_v44  ;;  %v11006_v20 = vpop.f32.mrb[71].mxu1 }
 0x191   : > { %18395 = vst [vmem:[#allocation113_spill] sm:$0xff] %v14039_v4 }
 0x192   : > { %v1045_v33 = vpop.f32.mrb[72].mxu0 }
 0x193   : > { %v14012_v46 = vadd.f32 %v1369_v21, %v1045_v33  ;;  %v10869_v50 = vpop.f32.mrb[73].mxu0  ;;  %v1489_v21 = vrot.slane %v13282_v37, 1 }
 0x194   : > { %v1048_v7 = vpop.f32.mrb[74].mxu0 }
 0x195   : > { %18388 = vst [vmem:[#allocation106_spill] sm:$0xff] %v14012_v46  ;;  %v14017_v8 = vadd.f32 %v1372_v25, %v1048_v7  ;;  %v10870_v54 = vpop.f32.mrb[75].mxu0  ;;  %v14033_v42 = vsel %vm1457_vm2, %v1487_v28, %v1489_v21  ;;  %v1401_v50 = vpop.f32.mrb[72].mxu1 }
 0x196   : > { %11252 = vmatmul.mubr.bf16.gmra.mrb[176].mxu1 %v14021_v10  ;;  %18393 = vst [vmem:[#allocation111_spill] sm:$0xff] %v14033_v42  ;;  %v11009_v54 = vpop.f32.mrb[73].mxu1 }
 0x197   : > { %18390 = vst [vmem:[#allocation108_spill] sm:$0xff] %v14017_v8  ;;  %11100 = vmatmul.mubr.bf16.gmra.mrb[180].mxu0 %v14015_v23  ;;  %11255 = vmatprep.mubr.msk.bf16.mxu1 %vm12879_vm0, %v18356_v44  ;;  %v1404_v23 = vpop.f32.mrb[74].mxu1  ;;  %v14057_v54 = vcombine.low %v13462_v5, %v13480_v47 }
 0x198   : > { %11103 = vmatprep.mubr.msk.bf16.mxu0 %vm12879_vm0, %v18356_v44  ;;  %v11010_v37 = vpop.f32.mrb[75].mxu1 }
 0x199   : > { %18399 = vst [vmem:[#allocation117_spill] sm:$0xff] %v14057_v54 }
 0x19a   : > { %v1053_v51 = vpop.f32.mrb[76].mxu0 }
 0x19b   : > { %v14030_v25 = vadd.f32 %v1377_v30, %v1053_v51  ;;  %v10873_v33 = vpop.f32.mrb[77].mxu0  ;;  %v1491_v30 = vrot.slane %v13311_v53, 1 }
 0x19c   : > { %v1056_v62 = vpop.f32.mrb[78].mxu0 }
 0x19d   : > { %18392 = vst [vmem:[#allocation110_spill] sm:$0xff] %v14030_v25  ;;  %v14035_v20 = vadd.f32 %v1380_v12, %v1056_v62  ;;  %v10874_v7 = vpop.f32.mrb[79].mxu0  ;;  %v14051_v48 = vsel %vm1457_vm2, %v1489_v21, %v1491_v30  ;;  %v1409_v33 = vpop.f32.mrb[76].mxu1 }
 0x19e   : > { %11256 = vmatmul.mubr.bf16.gmra.mrb[180].mxu1 %v14039_v4  ;;  %18397 = vst [vmem:[#allocation115_spill] sm:$0xff] %v14051_v48  ;;  %v11013_v7 = vpop.f32.mrb[77].mxu1 }
 0x19f   : > { %18394 = vst [vmem:[#allocation112_spill] sm:$0xff] %v14035_v20  ;;  %11104 = vmatmul.mubr.bf16.gmra.mrb[184].mxu0 %v14033_v42  ;;  %11259 = vmatprep.mubr.msk.bf16.mxu1 %vm12879_vm0, %v18356_v44  ;;  %v1412_v42 = vpop.f32.mrb[78].mxu1  ;;  %v18403_v7 = vld [vmem:[#allocation45_spill] sm:$0xff] }
 0x1a0   : > { %11107 = vmatprep.mubr.msk.bf16.mxu0 %vm12879_vm0, %v18356_v44  ;;  %v11014_v53 = vpop.f32.mrb[79].mxu1 }
 0x1a2   : > { %v1061_v28 = vpop.f32.mrb[80].mxu0 }
 0x1a3   : > { %v14048_v12 = vadd.f32 %v1385_v52, %v1061_v28  ;;  %v10877_v51 = vpop.f32.mrb[81].mxu0  ;;  %v1493_v52 = vrot.slane %v13340_v11, 1 }
 0x1a4   : > { %v1064_v16 = vpop.f32.mrb[82].mxu0 }
 0x1a5   : > { %18396 = vst [vmem:[#allocation114_spill] sm:$0xff] %v14048_v12  ;;  %v14053_v37 = vadd.f32 %v1388_v6, %v1064_v16  ;;  %v10878_v62 = vpop.f32.mrb[83].mxu0  ;;  %v14069_v5 = vsel %vm1457_vm2, %v1491_v30, %v1493_v52  ;;  %v1417_v51 = vpop.f32.mrb[80].mxu1 }
 0x1a6   : > { %11260 = vmatmul.mubr.bf16.gmra.mrb[184].mxu1 %v14057_v54  ;;  %18401 = vst [vmem:[#allocation119_spill] sm:$0xff] %v14069_v5  ;;  %v11017_v62 = vpop.f32.mrb[81].mxu1 }
 0x1a7   : > { %18398 = vst [vmem:[#allocation116_spill] sm:$0xff] %v14053_v37  ;;  %11108 = vmatmul.mubr.bf16.gmra.mrb[188].mxu0 %v14051_v48  ;;  %11263 = vmatprep.mubr.msk.bf16.mxu1 %vm12879_vm0, %v18356_v44  ;;  %v14075_v48 = vcombine.low %v18403_v7, %v13501_v18  ;;  %v1420_v11 = vpop.f32.mrb[82].mxu1 }
 0x1a8   : > { %11111 = vmatprep.mubr.msk.bf16.mxu0 %vm12879_vm0, %v18356_v44  ;;  %v11018_v37 = vpop.f32.mrb[83].mxu1 }
 0x1a9   : > { %18404 = vst [vmem:[#allocation45_spill] sm:$0xff] %v14075_v48 }
 0x1aa   : > { %v1069_v21 = vpop.f32.mrb[84].mxu0 }
 0x1ab   : > { %v14066_v6 = vadd.f32 %v1393_v39, %v1069_v21  ;;  %v10881_v28 = vpop.f32.mrb[85].mxu0  ;;  %v18405_v39 = vld [vmem:[#allocation33_spill] sm:$0xff] }
 0x1ac   : > { %v1072_v47 = vpop.f32.mrb[86].mxu0  ;;  %v1495_v21 = vrot.slane %v18405_v39, 1  ;;  %v18410_v39 = vld [vmem:[#allocation48_spill] sm:$0xff] }
 0x1ad   : > { %18400 = vst [vmem:[#allocation118_spill] sm:$0xff] %v14066_v6  ;;  %v14071_v53 = vadd.f32 %v1396_v19, %v1072_v47  ;;  %v10882_v16 = vpop.f32.mrb[87].mxu0  ;;  %v1425_v37 = vpop.f32.mrb[84].mxu1 }
 0x1ae   : > { %11264 = vmatmul.mubr.bf16.gmra.mrb[188].mxu1 %v14075_v48  ;;  %v14087_v47 = vsel %vm1457_vm2, %v1493_v52, %v1495_v21  ;;  %v11021_v7 = vpop.f32.mrb[85].mxu1 }
 0x1af   : > { %18402 = vst [vmem:[#allocation120_spill] sm:$0xff] %v14071_v53  ;;  %11112 = vmatmul.mubr.bf16.gmra.mrb[192].mxu0 %v14069_v5  ;;  %11267 = vmatprep.mubr.msk.bf16.mxu1 %vm12879_vm0, %v18356_v44  ;;  %18407 = vst [vmem:[#allocation122_spill] sm:$0xff] %v14087_v47  ;;  %v18409_v5 = vld [vmem:[#allocation51_spill] sm:$0xff]  ;;  %v1428_v6 = vpop.f32.mrb[86].mxu1 }
 0x1b0   : > { %11115 = vmatprep.mubr.msk.bf16.mxu0 %vm12879_vm0, %v18356_v44  ;;  %v14093_v53 = vcombine.low %v18410_v39, %v18409_v5 }
 0x1b2   : > { %v1077_v30 = vpop.f32.mrb[88].mxu0  ;;  %18411 = vst [vmem:[#allocation51_spill] sm:$0xff] %v14093_v53 }
 0x1b3   : > { %v14084_v19 = vadd.f32 %v1401_v50, %v1077_v30  ;;  %v10885_v28 = vpop.f32.mrb[89].mxu0  ;;  %v11022_v50 = vpop.f32.mrb[87].mxu1  ;;  %v18412_v30 = vld [vmem:[#allocation35_spill] sm:$0xff] }
 0x1b4   : > { %v1080_v18 = vpop.f32.mrb[90].mxu0  ;;  %v1497_v28 = vrot.slane %v18412_v30, 1 }
 0x1b5   : > { %18406 = vst [vmem:[#allocation121_spill] sm:$0xff] %v14084_v19  ;;  %v14089_v16 = vadd.f32 %v1404_v23, %v1080_v18  ;;  %v10886_v62 = vpop.f32.mrb[91].mxu0  ;;  %v394_v23 = vld [vmem:[%s12967_s18 + $0xdc] sm:$0xf]  ;;  %v1433_v7 = vpop.f32.mrb[88].mxu1 }
 0x1b6   : > { %11268 = vmatmul.mubr.bf16.gmra.mrb[192].mxu1 %v14093_v53  ;;  %v14106_v62 = vsel %vm1457_vm2, %v1495_v21, %v1497_v28  ;;  %v14111_v30 = vcombine.low %v394_v23, %v13933_v3 }
 0x1b7   : > { %18408 = vst [vmem:[#allocation123_spill] sm:$0xff] %v14089_v16  ;;  %11116 = vmatmul.mubr.bf16.gmra.mrb[196].mxu0 %v14087_v47  ;;  %11271 = vmatprep.mubr.msk.bf16.mxu1 %vm12879_vm0, %v18356_v44  ;;  %18414 = vst [vmem:[#allocation124_spill] sm:$0xff] %v14106_v62  ;;  %v11025_v16 = vpop.f32.mrb[89].mxu1 }
 0x1b8   : > { %11119 = vmatprep.mubr.msk.bf16.mxu0 %vm12879_vm0, %v18356_v44  ;;  %18416 = vst [vmem:[#allocation126_spill] sm:$0xff] %v14111_v30  ;;  %v1436_v19 = vpop.f32.mrb[90].mxu1  ;;  %v18419_v16 = vld [vmem:[#allocation55_spill] sm:$0xff] }
 0x1b9   : > { %v11026_v12 = vpop.f32.mrb[91].mxu1  ;;  %v2953_v3 = vrot.slane %v18419_v16, 1  ;;  %v2345_v10 = vshll.u32 %v18419_v16, 16 }
 0x1ba   : > { %v1085_v52 = vpop.f32.mrb[92].mxu0 }
 0x1bb   : > { %v14103_v18 = vadd.f32 %v1409_v33, %v1085_v52  ;;  %v10889_v5 = vpop.f32.mrb[93].mxu0  ;;  %v18417_v33 = vld [vmem:[#allocation37_spill] sm:$0xff] }
 0x1bc   : > { %v1088_v39 = vpop.f32.mrb[94].mxu0  ;;  %v1499_v52 = vrot.slane %v18417_v33, 1 }
 0x1bd   : > { %18413 = vst [vmem:[#allocation48_spill] sm:$0xff] %v14103_v18  ;;  %v14108_v50 = vadd.f32 %v1412_v42, %v1088_v39  ;;  %v10890_v47 = vpop.f32.mrb[95].mxu0  ;;  %v18418_v42 = vld [vmem:[#allocation52_spill] sm:$0xff] }
 0x1be   : > { %11272 = vmatmul.mubr.bf16.gmra.mrb[196].mxu1 %v14111_v30  ;;  %v2952_v47 = vrot.slane %v18418_v42, 1  ;;  %v14125_v12 = vsel %vm1457_vm2, %v1497_v28, %v1499_v52 }
 0x1bf   : > { %18415 = vst [vmem:[#allocation125_spill] sm:$0xff] %v14108_v50  ;;  %11120 = vmatmul.mubr.bf16.gmra.mrb[200].mxu0 %v14106_v62  ;;  %11415 = vmatprep.mubr.msk.bf16.mxu1 %vm12879_vm0, %v18356_v44  ;;  %18421 = vst [vmem:[#allocation55_spill] sm:$0xff] %v14125_v12  ;;  %v14127_v62 = vpop.f32.mrb[92].mxu1 }
 0x1c0   : > { %11123 = vmatprep.mubr.msk.bf16.mxu0 %vm12879_vm0, %v18356_v44  ;;  %v11169_v18 = vpop.f32.mrb[93].mxu1  ;;  %v2954_v25 = vsel %vm1457_vm2, %v2952_v47, %v2953_v3 }
 0x1c1   : > { %v14131_v20 = vpop.f32.mrb[94].mxu1 }
 0x1c2   : > { %v1093_v21 = vpop.f32.mrb[96].mxu0  ;;  %v11170_v8 = vpop.f32.mrb[95].mxu1 }
 0x1c3   : > { %v14122_v23 = vadd.f32 %v1417_v51, %v1093_v21  ;;  %v10893_v5 = vpop.f32.mrb[97].mxu0  ;;  %v18423_v51 = vld [vmem:[#allocation39_spill] sm:$0xff] }
 0x1c4   : > { %v1096_v39 = vpop.f32.mrb[98].mxu0  ;;  %v1501_v21 = vrot.slane %v18423_v51, 1 }
 0x1c5   : > { %18420 = vst [vmem:[#allocation52_spill] sm:$0xff] %v14122_v23  ;;  %v14129_v33 = vadd.f32 %v1420_v11, %v1096_v39  ;;  %v10894_v50 = vpop.f32.mrb[99].mxu0  ;;  %v18424_v11 = vld [vmem:[#allocation57_spill] sm:$0xff]  ;;  %v14146_v8 = vpop.f32.mrb[96].mxu1 }
 0x1c6   : > { %11416 = vmatmul.mubr.bf16.vlgmr.msra.gmra.mrb[200].mxu1 %v2954_v25  ;;  %v2955_v50 = vrot.slane %v18424_v11, 1  ;;  %v14144_v47 = vsel %vm1457_vm2, %v1499_v52, %v1501_v21  ;;  %v11173_v51 = vpop.f32.mrb[97].mxu1 }
 0x1c7   : > { %18422 = vst [vmem:[#allocation127_spill] sm:$0xff] %v14129_v33  ;;  %11124 = vmatmul.mubr.bf16.gmra.mrb[204].mxu0 %v14125_v12  ;;  %11419 = vmatprep.mubr.msk.bf16.mxu1 %vm12879_vm0, %v18356_v44  ;;  %18426 = vst [vmem:[#allocation128_spill] sm:$0xff] %v14144_v47  ;;  %v14150_v25 = vpop.f32.mrb[98].mxu1 }
 0x1c8   : > { %11127 = vmatprep.mubr.msk.bf16.mxu0 %vm12879_vm0, %v18356_v44  ;;  %v2956_v23 = vsel %vm1457_vm2, %v2953_v3, %v2955_v50  ;;  %v11174_v46 = vpop.f32.mrb[99].mxu1 }
 0x1ca   : > { %v1101_v28 = vpop.f32.mrb[100].mxu0 }
 0x1cb   : > { %v14141_v18 = vadd.f32 %v1425_v37, %v1101_v28  ;;  %v10897_v5 = vpop.f32.mrb[101].mxu0  ;;  %v18428_v37 = vld [vmem:[#allocation41_spill] sm:$0xff] }
 0x1cc   : > { %v1104_v39 = vpop.f32.mrb[102].mxu0  ;;  %v1503_v28 = vrot.slane %v18428_v37, 1 }
 0x1cd   : > { %18425 = vst [vmem:[#allocation57_spill] sm:$0xff] %v14141_v18  ;;  %v14148_v12 = vadd.f32 %v1428_v6, %v1104_v39  ;;  %v10898_v33 = vpop.f32.mrb[103].mxu0  ;;  %v18429_v6 = vld [vmem:[#allocation60_spill] sm:$0xff]  ;;  %v14165_v46 = vpop.f32.mrb[100].mxu1 }
 0x1ce   : > { %11420 = vmatmul.mubr.bf16.gmra.mrb[204].mxu1 %v2956_v23  ;;  %v2957_v33 = vrot.slane %v18429_v6, 1  ;;  %v14163_v3 = vsel %vm1457_vm2, %v1501_v21, %v1503_v28  ;;  %v11177_v37 = vpop.f32.mrb[101].mxu1 }
 0x1cf   : > { %18427 = vst [vmem:[#allocation129_spill] sm:$0xff] %v14148_v12  ;;  %11128 = vmatmul.mubr.bf16.gmra.mrb[208].mxu0 %v14144_v47  ;;  %11423 = vmatprep.mubr.msk.bf16.mxu1 %vm12879_vm0, %v18356_v44  ;;  %18431 = vst [vmem:[#allocation130_spill] sm:$0xff] %v14163_v3  ;;  %v14169_v23 = vpop.f32.mrb[102].mxu1  ;;  %v18435_v37 = vld [vmem:[#allocation58_spill] sm:$0xff] }
 0x1d0   : > { %11131 = vmatprep.mubr.msk.bf16.mxu0 %vm12879_vm0, %v18356_v44  ;;  %v2958_v18 = vsel %vm1457_vm2, %v2955_v50, %v2957_v33  ;;  %v11178_v30 = vpop.f32.mrb[103].mxu1 }
 0x1d2   : > { %v1109_v52 = vpop.f32.mrb[104].mxu0 }
 0x1d3   : > { %v14160_v51 = vadd.f32 %v1433_v7, %v1109_v52  ;;  %v10901_v5 = vpop.f32.mrb[105].mxu0  ;;  %v18433_v7 = vld [vmem:[#allocation43_spill] sm:$0xff] }
 0x1d4   : > { %v1112_v39 = vpop.f32.mrb[106].mxu0  ;;  %v1505_v52 = vrot.slane %v18433_v7, 1 }
 0x1d5   : > { %18430 = vst [vmem:[#allocation60_spill] sm:$0xff] %v14160_v51  ;;  %v14167_v47 = vadd.f32 %v1436_v19, %v1112_v39  ;;  %v10902_v12 = vpop.f32.mrb[107].mxu0  ;;  %v18434_v19 = vld [vmem:[#allocation63_spill] sm:$0xff]  ;;  %v14185_v30 = vpop.f32.mrb[104].mxu1 }
 0x1d6   : > { %11424 = vmatmul.mubr.bf16.gmra.mrb[208].mxu1 %v2958_v18  ;;  %v2959_v12 = vrot.slane %v18434_v19, 1  ;;  %v11181_v7 = vpop.f32.mrb[105].mxu1 }
 0x1d7   : > { %18432 = vst [vmem:[#allocation131_spill] sm:$0xff] %v14167_v47  ;;  %11132 = vmatmul.mubr.bf16.gmra.mrb[212].mxu0 %v14163_v3  ;;  %11427 = vmatprep.mubr.msk.bf16.mxu1 %vm12879_vm0, %v18356_v44  ;;  %v14183_v3 = vsel %vm1457_vm2, %v1503_v28, %v1505_v52  ;;  %v18437_v47 = vld [vmem:[#allocation59_spill] sm:$0xff]  ;;  %v14190_v58 = vpop.f32.mrb[106].mxu1  ;;  %v18440_v7 = vld [vmem:[#allocation61_spill] sm:$0xff] }
 0x1d8   : > { %11135 = vmatprep.mubr.msk.bf16.mxu0 %vm12879_vm0, %v18356_v44  ;;  %18436 = vst [vmem:[#allocation63_spill] sm:$0xff] %v14183_v3  ;;  %v2960_v29 = vsel %vm1457_vm2, %v2957_v33, %v2959_v12 }
 0x1da   : > { %v1225_v21 = vpop.f32.mrb[108].mxu0 }
 0x1db   : > { %v14180_v5 = vadd.f32 %v1225_v21, %v18435_v37  ;;  %v10921_v39 = vpop.f32.mrb[109].mxu0  ;;  %v11182_v21 = vpop.f32.mrb[107].mxu1  ;;  %v18438_v37 = vld [vmem:[#allocation46_spill] sm:$0xff] }
 0x1dc   : > { %v1228_v50 = vpop.f32.mrb[110].mxu0  ;;  %v1507_v28 = vrot.slane %v18438_v37, 1 }
 0x1dd   : > { %v14188_v51 = vadd.f32 %v1228_v50, %v18437_v47  ;;  %v10922_v18 = vpop.f32.mrb[111].mxu0  ;;  %v18439_v47 = vld [vmem:[#allocation66_spill] sm:$0xff]  ;;  %v14206_v21 = vpop.f32.mrb[108].mxu1 }
 0x1de   : > { %11428 = vmatmul.mubr.bf16.gmra.mrb[212].mxu1 %v2960_v29  ;;  %v2961_v50 = vrot.slane %v18439_v47, 1  ;;  %v11185_v37 = vpop.f32.mrb[109].mxu1 }
 0x1df   : > { %11136 = vmatmul.mubr.bf16.gmra.mrb[216].mxu0 %v14183_v3  ;;  %11431 = vmatprep.mubr.msk.bf16.mxu1 %vm12879_vm0, %v18356_v44  ;;  %v14204_v3 = vsel %vm1457_vm2, %v1505_v52, %v1507_v28  ;;  %v14211_v24 = vpop.f32.mrb[110].mxu1 }
 0x1e0   : > { %11139 = vmatprep.mubr.msk.bf16.mxu0 %vm12879_vm0, %v18356_v44  ;;  %18441 = vst [vmem:[#allocation58_spill] sm:$0xff] %v14204_v3  ;;  %v2962_v45 = vsel %vm1457_vm2, %v2959_v12, %v2961_v50 }
 0x1e2   : > { %v1233_v39 = vpop.f32.mrb[112].mxu0 }
 0x1e3   : > { %v14201_v18 = vadd.f32 %v1233_v39, %v18440_v7  ;;  %v10925_v53 = vpop.f32.mrb[113].mxu0  ;;  %v11186_v39 = vpop.f32.mrb[111].mxu1 }
 0x1e4   : > { %v1236_v33 = vpop.f32.mrb[114].mxu0  ;;  %v18443_v53 = vld [vmem:[#allocation49_spill] sm:$0xff] }
 0x1e5   : > { %v14209_v48 = vadd.f32 %v1236_v33, %v18442_v32  ;;  %v10926_v29 = vpop.f32.mrb[115].mxu0  ;;  %v14218_v52 = vrot.slane %v18443_v53, 1  ;;  %v18445_v32 = vld [vmem:[#allocation69_spill] sm:$0xff]  ;;  %v18446_v33 = vld [vmem:[#allocation64_spill] sm:$0xff] }
 0x1e6   : > { %11432 = vmatmul.mubr.bf16.gmra.mrb[216].mxu1 %v2962_v45  ;;  %v2963_v37 = vrot.slane %v18445_v32, 1  ;;  %v18448_v53 = vld [vmem:[#allocation65_spill] sm:$0xff] }
 0x1e7   : > { %11140 = vmatmul.mubr.bf16.gmra.mrb[220].mxu0 %v14204_v3  ;;  %18444 = vst [vmem:[#allocation59_spill] sm:$0xff] %v14218_v52  ;;  %11435 = vmatprep.mubr.msk.bf16.mxu1 %vm12879_vm0, %v18356_v44  ;;  %v14228_v39 = vsel %vm1457_vm2, %v1507_v28, %v14218_v52 }
 0x1e8   : > { %11143 = vmatprep.mubr.msk.bf16.mxu0 %vm12879_vm0, %v18356_v44  ;;  %18447 = vst [vmem:[#allocation66_spill] sm:$0xff] %v14228_v39  ;;  %v14230_v3 = vpop.f32.mrb[112].mxu1  ;;  %v2964_v56 = vsel %vm1457_vm2, %v2961_v50, %v2963_v37 }
 0x1e9   : > { %v11189_v61 = vpop.f32.mrb[113].mxu1 }
 0x1ea   : > { %v1241_v7 = vpop.f32.mrb[116].mxu0  ;;  %v14235_v4 = vpop.f32.mrb[114].mxu1  ;;  %v2965_v61 = vrot.slane %v13679_v57, 1 }
 0x1eb   : > { %v14224_v29 = vadd.f32 %v1241_v7, %v18446_v33  ;;  %v10929_v12 = vpop.f32.mrb[117].mxu0  ;;  %v11190_v7 = vpop.f32.mrb[115].mxu1  ;;  %v18449_v33 = vld [vmem:[#allocation53_spill] sm:$0xff] }
 0x1ec   : > { %v1244_v54 = vpop.f32.mrb[118].mxu0  ;;  %v1511_v28 = vrot.slane %v18449_v33, 1  ;;  %v2340_v12 = vshll.u32 %v18418_v42, 16 }
 0x1ed   : > { %v14233_v22 = vadd.f32 %v1244_v54, %v18448_v53  ;;  %v10930_v45 = vpop.f32.mrb[119].mxu0  ;;  %v18450_v54 = vld [vmem:[#allocation67_spill] sm:$0xff] }
 0x1ee   : > { %11436 = vmatmul.mubr.bf16.gmra.mrb[220].mxu1 %v2964_v56  ;;  %v1512_v7 = vsel %vm1457_vm2, %v14218_v52, %v1511_v28  ;;  %v2342_v33 = vrot.slane %v2340_v12, 1  ;;  %v2347_v28 = vrot.slane %v2345_v10, 1  ;;  %v2353_v10 = vshll.u32 %v18424_v11, 16 }
 0x1ef   : > { %11144 = vmatmul.mubr.bf16.gmra.mrb[224].mxu0 %v14228_v39  ;;  %11439 = vmatprep.mubr.msk.bf16.mxu1 %vm12879_vm0, %v18356_v44  ;;  %v2338_v39 = vshrl.u32 %v18418_v42, 16 }
 0x1f0   : > { %11147 = vmatprep.mubr.msk.bf16.mxu0 %vm12879_vm0, %v18356_v44  ;;  %v14253_v56 = vpop.f32.mrb[116].mxu1 }
 0x1f1   : > { %v11193_v0 = vpop.f32.mrb[117].mxu1  ;;  %v2343_v42 = vor.u32 %v2342_v33, %v2338_v39  ;;  %v2349_v39 = vshrl.u32 %v18419_v16, 16 }
 0x1f2   : > { %v1249_v63 = vpop.f32.mrb[120].mxu0  ;;  %v14258_v27 = vpop.f32.mrb[118].mxu1 }
 0x1f3   : > { %v14247_v53 = vadd.f32 %v1249_v63, %v18450_v54  ;;  %v10933_v50 = vpop.f32.mrb[121].mxu0  ;;  %v2966_v63 = vsel %vm1457_vm2, %v2963_v37, %v2965_v61  ;;  %v11194_v54 = vpop.f32.mrb[119].mxu1  ;;  %v2348_v37 = vsel %vm571_vm1, %v2343_v42, %v2347_v28  ;;  %v2351_v52 = vor.u32 %v2349_v39, %v2347_v28 }
 0x1f4   : > { %v1252_v45 = vpop.f32.mrb[122].mxu0  ;;  %v2361_v39 = vshll.u32 %v18429_v6, 16 }
 0x1f5   : > { %v14256_v15 = vadd.f32 %v1252_v45, %v18451_v60  ;;  %v10934_v14 = vpop.f32.mrb[123].mxu0  ;;  %v2967_v60 = vrot.slane %v13708_v49, 1  ;;  %v12621_v45 = vld [vmem:[%s18078_s1 + $0x180] sm:$0xff]  }
 0x1f6   : > { %11440 = vmatmul.mubr.bf16.gmra.mrb[224].mxu1 %v2966_v63 }
 0x1f7   : > { %11148 = vmatmul.mubr.bf16.gmra.mrb[228].mxu0 %v1512_v7  ;;  %11443 = vmatprep.mubr.msk.bf16.mxu1 %vm12879_vm0, %v18356_v44  ;;  %v2968_v42 = vsel %vm1457_vm2, %v2965_v61, %v2967_v60 }
 0x1f8   : > { %11291 = vmatprep.mubr.msk.bf16.mxu0 %vm12879_vm0, %v18356_v44 }
 0x1f9   : > { %v14273_v7 = vpop.f32.mrb[120].mxu1 }
 0x1fa   : > { %v1622_v12 = vpop.f32.mrb[124].mxu0  ;;  %v11197_v54 = vpop.f32.mrb[121].mxu1 }
 0x1fb   : > { %v1837_v0 = vadd.f32 %v1622_v12, %v14180_v5  ;;  %v11045_v14 = vpop.f32.mrb[125].mxu0  ;;  %v14279_v12 = vpop.f32.mrb[122].mxu1 }
 0x1fc   : > { %v1625_v50 = vpop.f32.mrb[126].mxu0  ;;  %v11198_v16 = vpop.f32.mrb[123].mxu1 }
 0x1fd   : > { %v1838_v33 = vadd.f32 %v1625_v50, %v14188_v51  ;;  %v14277_v63 = vadd.f32 %v14127_v62, %v1837_v0  ;;  %v11046_v5 = vpop.f32.mrb[127].mxu0  ;;  %v2355_v51 = vrot.slane %v2353_v10, 1  ;;  %v12622_v62 = vld [vmem:[%s18078_s1 + $0x188] sm:$0xff]   ;;  %v12623_v10 = vld [vmem:[%s18078_s1 + $0x190] sm:$0xff]  }
 0x1fe   : > { %11444 = vmatmul.mubr.bf16.gmra.mrb[228].mxu1 %v2968_v42 }
 0x1ff   : > { %v14283_v14 = vadd.f32 %v14131_v20, %v1838_v33  ;;  %11292 = vmatmul.mubr.bf16.vlgmr.msra.gmra.mrb[232].mxu0 %v2348_v37  ;;  %11447 = vmatprep.mubr.msk.bf16.mxu1 %vm12879_vm0, %v18356_v44  ;;  %v2969_v20 = vrot.slane %v13732_v1, 1  ;;  %v2356_v28 = vsel %vm571_vm1, %v2351_v52, %v2355_v51 }
 0x200   : > { %11524 = vmatpush3.bf16.msra.mxu0 %v12621_v45  ;;  %11295 = vmatprep.mubr.msk.bf16.mxu0 %vm12879_vm0, %v18356_v44  ;;  %v2357_v45 = vshrl.u32 %v18424_v11, 16 }
 0x201   : > { %11525 = vmatprep.subr.bf16.mxu0 %v18356_v44  ;;  %v14301_v33 = vpop.f32.mrb[124].mxu1  ;;  %v2970_v11 = vsel %vm1457_vm2, %v2967_v60, %v2969_v20 }
 0x202   : > { %v1630_v0 = vpop.f32.mrb[128].mxu0  ;;  %v11201_v52 = vpop.f32.mrb[125].mxu1 }
 0x203   : > { %v1839_v61 = vadd.f32 %v1630_v0, %v14201_v18  ;;  %v11049_v50 = vpop.f32.mrb[129].mxu0  ;;  %v14308_v42 = vpop.f32.mrb[126].mxu1  ;;  %v2363_v0 = vrot.slane %v2361_v39, 1 }
 0x204   : > { %v1633_v37 = vpop.f32.mrb[130].mxu0  ;;  %11526 = vmatpush3.bf16.msra.mxu0 %v12622_v62  ;;  %v11202_v62 = vpop.f32.mrb[127].mxu1 }
 0x205   : > { %v1840_v5 = vadd.f32 %v1633_v37, %v14209_v48  ;;  %v14305_v54 = vadd.f32 %v14146_v8, %v1839_v61  ;;  %v11050_v18 = vpop.f32.mrb[131].mxu0  ;;  %11527 = vmatprep.subr.bf16.mxu0 %v18356_v44  ;;  %v2359_v48 = vor.u32 %v2357_v45, %v2355_v51  ;;  %v12624_v8 = vld [vmem:[%s18078_s1 + $0x198] sm:$0xff]   ;;  %v2369_v45 = vshll.u32 %v18434_v19, 16 }
 0x206   : > { %11448 = vmatmul.mubr.bf16.gmra.mrb[232].mxu1 %v2970_v11 }
 0x207   : > { %v14312_v16 = vadd.f32 %v14150_v25, %v1840_v5  ;;  %11296 = vmatmul.mubr.bf16.gmra.mrb[236].mxu0 %v2356_v28  ;;  %11451 = vmatprep.mubr.msk.bf16.mxu1 %vm12879_vm0, %v18356_v44  ;;  %v2971_v25 = vrot.slane %v13756_v38, 1  ;;  %v2364_v51 = vsel %vm571_vm1, %v2359_v48, %v2363_v0  ;;  %v2365_v28 = vshrl.u32 %v18429_v6, 16 }
 0x208   : > { %11299 = vmatprep.mubr.msk.bf16.mxu0 %vm12879_vm0, %v18356_v44  ;;  %11528 = vmatpush3.bf16.msra.mxu0 %v12623_v10  ;;  %v12625_v10 = vld [vmem:[%s18078_s1 + $0x1a0] sm:$0xff]  }
 0x209   : > { %11529 = vmatprep.subr.bf16.mxu0 %v18356_v44  ;;  %v14327_v39 = vpop.f32.mrb[128].mxu1  ;;  %v2972_v6 = vsel %vm1457_vm2, %v2969_v20, %v2971_v25 }
 0x20a   : > { %v1638_v61 = vpop.f32.mrb[132].mxu0  ;;  %v11205_v52 = vpop.f32.mrb[129].mxu1 }
 0x20b   : > { %v1841_v60 = vadd.f32 %v1638_v61, %v14224_v29  ;;  %v11053_v50 = vpop.f32.mrb[133].mxu0  ;;  %v14337_v11 = vpop.f32.mrb[130].mxu1 }
 0x20c   : > { %v1641_v37 = vpop.f32.mrb[134].mxu0  ;;  %11530 = vmatpush3.bf16.msra.mxu0 %v12624_v8  ;;  %v11206_v48 = vpop.f32.mrb[131].mxu1  ;;  %v2371_v8 = vrot.slane %v2369_v45, 1 }
 0x20d   : > { %v1842_v5 = vadd.f32 %v1641_v37, %v14233_v22  ;;  %v14334_v18 = vadd.f32 %v14165_v46, %v1841_v60  ;;  %v11054_v29 = vpop.f32.mrb[135].mxu0  ;;  %11531 = vmatprep.subr.bf16.mxu0 %v18356_v44  ;;  %v2367_v22 = vor.u32 %v2365_v28, %v2363_v0  ;;  %v12626_v46 = vld [vmem:[%s18078_s1 + $0x1a8] sm:$0xff]   ;;  %v2373_v37 = vshrl.u32 %v18434_v19, 16 }
 0x20e   : > { %11452 = vmatmul.mubr.bf16.gmra.mrb[236].mxu1 %v2972_v6 }
 0x20f   : > { %v14341_v62 = vadd.f32 %v14169_v23, %v1842_v5  ;;  %11300 = vmatmul.mubr.bf16.gmra.mrb[240].mxu0 %v2364_v51  ;;  %11455 = vmatprep.mubr.msk.bf16.mxu1 %vm12879_vm0, %v18356_v44  ;;  %v2973_v23 = vrot.slane %v13776_v13, 1  ;;  %v2372_v0 = vsel %vm571_vm1, %v2367_v22, %v2371_v8  ;;  %v2377_v51 = vshll.u32 %v18439_v47, 16 }
 0x210   : > { %11303 = vmatprep.mubr.msk.bf16.mxu0 %vm12879_vm0, %v18356_v44  ;;  %11532 = vmatpush3.bf16.msra.mxu0 %v12625_v10  ;;  %v2975_v22 = vrot.slane %v13797_v35, 1 }
 0x211   : > { %11533 = vmatprep.subr.bf16.mxu0 %v18356_v44  ;;  %v14356_v28 = vpop.f32.mrb[132].mxu1  ;;  %v2974_v52 = vsel %vm1457_vm2, %v2971_v25, %v2973_v23  ;;  %v2379_v48 = vrot.slane %v2377_v51, 1 }
 0x212   : > { %v1646_v61 = vpop.f32.mrb[136].mxu0  ;;  %v11209_v29 = vpop.f32.mrb[133].mxu1 }
 0x213   : > { %v1843_v20 = vadd.f32 %v1646_v61, %v14247_v53  ;;  %v11057_v60 = vpop.f32.mrb[137].mxu0  ;;  %v14363_v53 = vpop.f32.mrb[134].mxu1 }
 0x214   : > { %v1649_v50 = vpop.f32.mrb[138].mxu0  ;;  %11534 = vmatpush3.bf16.msra.mxu0 %v12626_v46  ;;  %v11210_v6 = vpop.f32.mrb[135].mxu1  ;;  %v18452_v46 = vld [vmem:[#allocation70_spill] sm:$0xff]  ;;  %v2381_v60 = vshrl.u32 %v18439_v47, 16 }
 0x215   : > { %v1844_v45 = vadd.f32 %v1649_v50, %v14256_v15  ;;  %v14360_v10 = vadd.f32 %v14185_v30, %v1843_v20  ;;  %v11058_v5 = vpop.f32.mrb[139].mxu0  ;;  %11535 = vmatprep.subr.bf16.mxu0 %v18356_v44  ;;  %v2375_v15 = vor.u32 %v2373_v37, %v2371_v8  ;;  %v2385_v50 = vshll.u32 %v18445_v32, 16  ;;  %v18453_v8 = vld [vmem:[#allocation71_spill] sm:$0xff] }
 0x216   : > { %11456 = vmatmul.mubr.bf16.gmra.mrb[240].mxu1 %v2974_v52  ;;  %v2976_v52 = vsel %vm1457_vm2, %v2973_v23, %v2975_v22 }
 0x217   : > { %v14367_v19 = vadd.f32 %v14190_v58, %v1844_v45  ;;  %11304 = vmatmul.mubr.bf16.gmra.mrb[244].mxu0 %v2372_v0  ;;  %11459 = vmatprep.mubr.msk.bf16.mxu1 %vm12879_vm0, %v18356_v44  ;;  %v2380_v58 = vsel %vm571_vm1, %v2375_v15, %v2379_v48  ;;  %v2383_v15 = vor.u32 %v2381_v60, %v2379_v48  ;;  %v2389_v60 = vshrl.u32 %v18445_v32, 16 }
 0x218   : > { %11307 = vmatprep.mubr.msk.bf16.mxu0 %vm12879_vm0, %v18356_v44 }
 0x219   : > { %v14378_v0 = vpop.f32.mrb[136].mxu1 }
 0x21a   : > { %v1654_v30 = vpop.f32.mrb[140].mxu0  ;;  %v11213_v5 = vpop.f32.mrb[137].mxu1 }
 0x21b   : > { %v1845_v61 = vadd.f32 %v1654_v30, %v18452_v46  ;;  %v11061_v25 = vpop.f32.mrb[141].mxu0  ;;  %v14384_v29 = vpop.f32.mrb[138].mxu1  ;;  %v2387_v30 = vrot.slane %v2385_v50, 1 }
 0x21c   : > { %v1657_v20 = vpop.f32.mrb[142].mxu0  ;;  %v11214_v47 = vpop.f32.mrb[139].mxu1 }
 0x21d   : > { %v1846_v37 = vadd.f32 %v1657_v20, %v18453_v8  ;;  %v14382_v51 = vadd.f32 %v14206_v21, %v1845_v61  ;;  %v11062_v45 = vpop.f32.mrb[143].mxu0  ;;  %v2977_v21 = vrot.slane %v13816_v9, 1  ;;  %v18454_v61 = vld [vmem:[#allocation72_spill] sm:$0xff]  ;;  %v2393_v20 = vshll.u32 %v13679_v57, 16  ;;  %v18455_v8 = vld [vmem:[#allocation73_spill] sm:$0xff] }
 0x21e   : > { %11460 = vmatmul.mubr.bf16.gmra.mrb[244].mxu1 %v2976_v52  ;;  %v2388_v48 = vsel %vm571_vm1, %v2383_v15, %v2387_v30 }
 0x21f   : > { %v14388_v6 = vadd.f32 %v14211_v24, %v1846_v37  ;;  %11308 = vmatmul.mubr.bf16.gmra.mrb[248].mxu0 %v2380_v58  ;;  %11463 = vmatprep.mubr.msk.bf16.mxu1 %vm12879_vm0, %v18356_v44  ;;  %v12627_v24 = vld [vmem:[%s18078_s1 + $0x1b0] sm:$0xff]  }
 0x220   : > { %11311 = vmatprep.mubr.msk.bf16.mxu0 %vm12879_vm0, %v18356_v44  ;;  %11536 = vmatpush3.bf16.msra.mxu0 %v12627_v24 }
 0x221   : > { %v14402_v50 = vpop.f32.mrb[140].mxu1  ;;  %11537 = vmatprep.subr.bf16.mxu0 %v18356_v44 }
 0x222   : > { %v1662_v46 = vpop.f32.mrb[144].mxu0  ;;  %v11217_v52 = vpop.f32.mrb[141].mxu1 }
 0x223   : > { %v1847_v25 = vadd.f32 %v1662_v46, %v18454_v61  ;;  %v11065_v23 = vpop.f32.mrb[145].mxu0  ;;  %v14408_v47 = vpop.f32.mrb[142].mxu1  ;;  %v2978_v46 = vsel %vm1457_vm2, %v2975_v22, %v2977_v21  ;;  %v2395_v61 = vrot.slane %v2393_v20, 1 }
 0x224   : > { %v1665_v58 = vpop.f32.mrb[146].mxu0  ;;  %v11218_v32 = vpop.f32.mrb[143].mxu1  ;;  %v2391_v23 = vor.u32 %v2389_v60, %v2387_v30  ;;  %v18456_v60 = vld [vmem:[#allocation74_spill] sm:$0xff] }
 0x225   : > { %v1848_v37 = vadd.f32 %v1665_v58, %v18455_v8  ;;  %v14406_v45 = vadd.f32 %v14230_v3, %v1847_v25  ;;  %v11066_v5 = vpop.f32.mrb[147].mxu0  ;;  %v2979_v25 = vrot.slane %v13836_v34, 1  ;;  %v2401_v58 = vshll.u32 %v13708_v49, 16 }
 0x226   : > { %11464 = vmatmul.mubr.bf16.gmra.mrb[248].mxu1 %v2978_v46  ;;  %v2396_v30 = vsel %vm571_vm1, %v2391_v23, %v2395_v61 }
 0x227   : > { %v14413_v15 = vadd.f32 %v14235_v4, %v1848_v37  ;;  %11312 = vmatmul.mubr.bf16.gmra.mrb[252].mxu0 %v2388_v48  ;;  %11467 = vmatprep.mubr.msk.bf16.mxu1 %vm12879_vm0, %v18356_v44  ;;  %v2397_v4 = vshrl.u32 %v13679_v57, 16 }
 0x228   : > { %11315 = vmatprep.mubr.msk.bf16.mxu0 %vm12879_vm0, %v18356_v44 }
 0x229   : > { %v14424_v20 = vpop.f32.mrb[144].mxu1  ;;  %v2399_v23 = vor.u32 %v2397_v4, %v2395_v61  ;;  %v18458_v61 = vld [vmem:[#allocation77_spill] sm:$0xff] }
 0x22a   : > { %v1670_v3 = vpop.f32.mrb[148].mxu0  ;;  %v11221_v52 = vpop.f32.mrb[145].mxu1 }
 0x22b   : > { %v1849_v22 = vadd.f32 %v1670_v3, %v13721_v17  ;;  %v11069_v24 = vpop.f32.mrb[149].mxu0  ;;  %v14430_v46 = vpop.f32.mrb[146].mxu1  ;;  %v2980_v17 = vsel %vm1457_vm2, %v2977_v21, %v2979_v25  ;;  %v2403_v3 = vrot.slane %v2401_v58, 1 }
 0x22c   : > { %v1673_v48 = vpop.f32.mrb[150].mxu0  ;;  %v11222_v32 = vpop.f32.mrb[147].mxu1 }
 0x22d   : > { %v1850_v8 = vadd.f32 %v1673_v48, %v18456_v60  ;;  %v14428_v37 = vadd.f32 %v14253_v56, %v1849_v22  ;;  %v11070_v5 = vpop.f32.mrb[151].mxu0  ;;  %v2981_v56 = vrot.slane %v13865_v41, 1  ;;  %v18457_v22 = vld [vmem:[#allocation75_spill] sm:$0xff]  ;;  %v2404_v58 = vsel %vm571_vm1, %v2399_v23, %v2403_v3 }
 0x22e   : > { %11468 = vmatmul.mubr.bf16.gmra.mrb[252].mxu1 %v2980_v17 }
 0x22f   : > { %v14434_v57 = vadd.f32 %v14258_v27, %v1850_v8  ;;  %11316 = vmatmul.mubr.bf16.gmra.mrb[0].mxu0 %v2396_v30  ;;  %11471 = vmatprep.mubr.msk.bf16.mxu1 %vm12879_vm0, %v18356_v44  ;;  %v2405_v27 = vshrl.u32 %v13708_v49, 16  ;;  %v2409_v30 = vshll.u32 %v13732_v1, 16  ;;  %v2982_v32 = vsel %vm1457_vm2, %v2979_v25, %v2981_v56 }
 0x230   : > { %11319 = vmatprep.mubr.msk.bf16.mxu0 %vm12879_vm0, %v18356_v44 }
 0x231   : > { %v14445_v8 = vpop.f32.mrb[148].mxu1  ;;  %v2407_v23 = vor.u32 %v2405_v27, %v2403_v3  ;;  %v2417_v3 = vshll.u32 %v13756_v38, 16 }
 0x232   : > { %v1678_v24 = vpop.f32.mrb[152].mxu0  ;;  %v11225_v17 = vpop.f32.mrb[149].mxu1 }
 0x233   : > { %v1851_v48 = vadd.f32 %v1678_v24, %v18457_v22  ;;  %v11073_v21 = vpop.f32.mrb[153].mxu0  ;;  %v14452_v24 = vpop.f32.mrb[150].mxu1 }
 0x234   : > { %v1681_v60 = vpop.f32.mrb[154].mxu0  ;;  %v11226_v22 = vpop.f32.mrb[151].mxu1  ;;  %v2411_v21 = vrot.slane %v2409_v30, 1  ;;  %v2413_v30 = vshrl.u32 %v13732_v1, 16  ;;  %v12629_v1 = vld [vmem:[%s18078_s1 + $0x1b8] sm:$0xff]  }
 0x235   : > { %v1852_v4 = vadd.f32 %v1681_v60, %v18458_v61  ;;  %v14449_v5 = vadd.f32 %v14273_v7, %v1851_v48  ;;  %v11074_v52 = vpop.f32.mrb[155].mxu0  ;;  %v12628_v7 = vld [vmem:[%s18078_s1 + $0x1c0] sm:$0xff]   ;;  %v2983_v48 = vrot.slane %v13899_v26, 1  ;;  %11538 = vmatpush3.bf16.msra.mxu0 %v12629_v1 }
 0x236   : > { %11472 = vmatmul.mubr.bf16.gmra.mrb[0].mxu1 %v2982_v32  ;;  %v18459_v52 = vld [vmem:[#allocation79_spill] sm:$0xff]  ;;  %11771 = vmatprep.subr.bf16.mxu0 %v18356_v44 }
 0x237   : > { %v14455_v49 = vadd.f32 %v14279_v12, %v1852_v4  ;;  %11320 = vmatmul.mubr.bf16.gmra.mrb[4].mxu0 %v2404_v58  ;;  %11475 = vmatprep.mubr.msk.bf16.mxu1 %vm12879_vm0, %v18356_v44  ;;  %v2412_v58 = vsel %vm571_vm1, %v2407_v23, %v2411_v21  ;;  %v12630_v4 = vld [vmem:[%s18078_s1 + $0x1c8] sm:$0xff]   ;;  %v2984_v23 = vsel %vm1457_vm2, %v2981_v56, %v2983_v48 }
 0x238   : > { %11323 = vmatprep.mubr.msk.bf16.mxu0 %vm12879_vm0, %v18356_v44  ;;  %11648 = vmatpush3.bf16.msra.mxu1 %v12628_v7 }
 0x239   : > { %11649 = vmatprep.subr.bf16.mxu1 %v18356_v44  ;;  %v14470_v61 = vpop.f32.mrb[152].mxu1 }
 0x23a   : > { %v1686_v25 = vpop.f32.mrb[156].mxu0  ;;  %v11229_v22 = vpop.f32.mrb[153].mxu1 }
 0x23b   : > { %v1853_v12 = vadd.f32 %v1686_v25, %v13767_v43  ;;  %v11077_v60 = vpop.f32.mrb[157].mxu0  ;;  %v14482_v7 = vpop.f32.mrb[154].mxu1  ;;  %v18460_v22 = vld [vmem:[#allocation81_spill] sm:$0xff] }
 0x23c   : > { %v1689_v27 = vpop.f32.mrb[158].mxu0  ;;  %11650 = vmatpush3.bf16.msra.mxu1 %v12630_v4  ;;  %v11230_v60 = vpop.f32.mrb[155].mxu1 }
 0x23d   : > { %v1854_v17 = vadd.f32 %v1689_v27, %v18459_v52  ;;  %v14477_v43 = vadd.f32 %v14301_v33, %v1853_v12  ;;  %v11078_v32 = vpop.f32.mrb[159].mxu0  ;;  %11651 = vmatprep.subr.bf16.mxu1 %v18356_v44  ;;  %v2419_v33 = vrot.slane %v2417_v3, 1  ;;  %v2415_v12 = vor.u32 %v2413_v30, %v2411_v21  ;;  %v12631_v27 = vld [vmem:[%s18078_s1 + $0x1d0] sm:$0xff]  }
 0x23e   : > { %11476 = vmatmul.mubr.bf16.gmra.mrb[4].mxu1 %v2984_v23  ;;  %v2421_v21 = vshrl.u32 %v13756_v38, 16  ;;  %v2425_v30 = vshll.u32 %v13776_v13, 16  ;;  %v12632_v32 = vld [vmem:[%s18078_s1 + $0x1d8] sm:$0xff]  }
 0x23f   : > { %v14486_v25 = vadd.f32 %v14308_v42, %v1854_v17  ;;  %11324 = vmatmul.mubr.bf16.gmra.mrb[8].mxu0 %v2412_v58  ;;  %v2985_v42 = vrot.slane %v13929_v2, 1  ;;  %11479 = vmatprep.mubr.msk.bf16.mxu1 %vm12879_vm0, %v18356_v44  ;;  %v2420_v52 = vsel %vm571_vm1, %v2415_v12, %v2419_v33 }
 0x240   : > { %11327 = vmatprep.mubr.msk.bf16.mxu0 %vm12879_vm0, %v18356_v44  ;;  %11652 = vmatpush3.bf16.msra.mxu1 %v12631_v27 }
 0x241   : > { %11653 = vmatprep.subr.bf16.mxu1 %v18356_v44  ;;  %v14503_v17 = vpop.f32.mrb[156].mxu1  ;;  %v2986_v38 = vsel %vm1457_vm2, %v2983_v48, %v2985_v42  ;;  %v2987_v48 = vrot.slane %v13964_v31, 1 }
 0x242   : > { %v1694_v56 = vpop.f32.mrb[160].mxu0  ;;  %v11233_v60 = vpop.f32.mrb[157].mxu1 }
 0x243   : > { %v1855_v3 = vadd.f32 %v1694_v56, %v13785_v36  ;;  %v11081_v58 = vpop.f32.mrb[161].mxu0  ;;  %v14512_v27 = vpop.f32.mrb[158].mxu1 }
 0x244   : > { %v1697_v4 = vpop.f32.mrb[162].mxu0  ;;  %11654 = vmatpush3.bf16.msra.mxu1 %v12632_v32  ;;  %v11234_v56 = vpop.f32.mrb[159].mxu1  ;;  %v2427_v58 = vrot.slane %v2425_v30, 1  ;;  %v2429_v30 = vshrl.u32 %v13776_v13, 16  ;;  %v2988_v13 = vsel %vm1457_vm2, %v2985_v42, %v2987_v48  ;;  %v2989_v42 = vrot.slane %v13985_v55, 1 }
 0x245   : > { %v1856_v1 = vadd.f32 %v1697_v4, %v18460_v22  ;;  %v14510_v36 = vadd.f32 %v14327_v39, %v1855_v3  ;;  %v11082_v23 = vpop.f32.mrb[163].mxu0  ;;  %11655 = vmatprep.subr.bf16.mxu1 %v18356_v44  ;;  %v2423_v39 = vor.u32 %v2421_v21, %v2419_v33  ;;  %v12633_v3 = vld [vmem:[%s18078_s1 + $0x1e0] sm:$0xff]   ;;  %v2433_v33 = vshll.u32 %v13797_v35, 16 }
 0x246   : > { %11480 = vmatmul.mubr.bf16.gmra.mrb[8].mxu1 %v2986_v38 }
 0x247   : > { %v14516_v12 = vadd.f32 %v14337_v11, %v1856_v1  ;;  %11328 = vmatmul.mubr.bf16.gmra.mrb[12].mxu0 %v2420_v52  ;;  %11483 = vmatprep.mubr.msk.bf16.mxu1 %vm12879_vm0, %v18356_v44  ;;  %v2428_v32 = vsel %vm571_vm1, %v2423_v39, %v2427_v58  ;;  %v12634_v1 = vld [vmem:[%s18078_s1 + $0x1e8] sm:$0xff]  }
 0x248   : > { %11331 = vmatprep.mubr.msk.bf16.mxu0 %vm12879_vm0, %v18356_v44  ;;  %11656 = vmatpush3.bf16.msra.mxu1 %v12633_v3 }
 0x249   : > { %11657 = vmatprep.subr.bf16.mxu1 %v18356_v44  ;;  %v14532_v22 = vpop.f32.mrb[160].mxu1 }
 0x24a   : > { %v1702_v4 = vpop.f32.mrb[164].mxu0  ;;  %v11237_v38 = vpop.f32.mrb[161].mxu1 }
 0x24b   : > { %v1857_v11 = vadd.f32 %v1702_v4, %v13807_v59  ;;  %v11085_v52 = vpop.f32.mrb[165].mxu0  ;;  %v14541_v56 = vpop.f32.mrb[162].mxu1  ;;  %v2435_v4 = vrot.slane %v2433_v33, 1  ;;  %v2437_v33 = vshrl.u32 %v13797_v35, 16  ;;  %v2990_v35 = vsel %vm1457_vm2, %v2987_v48, %v2989_v42 }
 0x24c   : > { %v1705_v21 = vpop.f32.mrb[166].mxu0  ;;  %11658 = vmatpush3.bf16.msra.mxu1 %v12634_v1  ;;  %v11238_v3 = vpop.f32.mrb[163].mxu1 }
 0x24d   : > { %v1858_v23 = vadd.f32 %v1705_v21, %v13812_v40  ;;  %v14539_v59 = vadd.f32 %v14356_v28, %v1857_v11  ;;  %v11086_v60 = vpop.f32.mrb[167].mxu0  ;;  %11659 = vmatprep.subr.bf16.mxu1 %v18356_v44  ;;  %v2431_v40 = vor.u32 %v2429_v30, %v2427_v58  ;;  %v12635_v28 = vld [vmem:[%s18078_s1 + $0x1f0] sm:$0xff]   ;;  %v2441_v58 = vshll.u32 %v13816_v9, 16 }
 0x24e   : > { %11484 = vmatmul.mubr.bf16.gmra.mrb[12].mxu1 %v2988_v13  ;;  %v18463_v60 = vld [vmem:[#allocation85_spill] sm:$0xff] }
 0x24f   : > { %v14545_v39 = vadd.f32 %v14363_v53, %v1858_v23  ;;  %11332 = vmatmul.mubr.bf16.gmra.mrb[16].mxu0 %v2428_v32  ;;  %11487 = vmatprep.mubr.msk.bf16.mxu1 %vm12879_vm0, %v18356_v44  ;;  %v18462_v53 = vld [vmem:[#allocation83_spill] sm:$0xff]  ;;  %v2436_v32 = vsel %vm571_vm1, %v2431_v40, %v2435_v4  ;;  %v12636_v23 = vld [vmem:[%s18078_s1 + $0x1f8] sm:$0xff]  }
 0x250   : > { %11335 = vmatprep.mubr.msk.bf16.mxu0 %vm12879_vm0, %v18356_v44  ;;  %11660 = vmatpush3.bf16.msra.mxu1 %v12635_v28 }
 0x251   : > { %18461 = vst [vmem:[#allocation61_spill] sm:$0xff] %v14545_v39  ;;  %11661 = vmatprep.subr.bf16.mxu1 %v18356_v44  ;;  %v14561_v1 = vpop.f32.mrb[164].mxu1 }
 0x252   : > { %v1710_v11 = vpop.f32.mrb[168].mxu0  ;;  %v11241_v28 = vpop.f32.mrb[165].mxu1 }
 0x253   : > { %v1859_v52 = vadd.f32 %v1710_v11, %v18462_v53  ;;  %v11089_v21 = vpop.f32.mrb[169].mxu0  ;;  %v14570_v11 = vpop.f32.mrb[166].mxu1 }
 0x254   : > { %v1713_v30 = vpop.f32.mrb[170].mxu0  ;;  %11662 = vmatpush3.bf16.msra.mxu1 %v12636_v23  ;;  %v11242_v53 = vpop.f32.mrb[167].mxu1  ;;  %v2443_v21 = vrot.slane %v2441_v58, 1 }
 0x255   : > { %v1860_v38 = vadd.f32 %v1713_v30, %v18463_v60  ;;  %v14568_v13 = vadd.f32 %v14378_v0, %v1859_v52  ;;  %v11090_v3 = vpop.f32.mrb[171].mxu0  ;;  %v2439_v30 = vor.u32 %v2437_v33, %v2435_v4  ;;  %v18466_v0 = vld [vmem:[#allocation105_spill] sm:$0xff]  ;;  %v18468_v4 = vld [vmem:[#allocation88_spill] sm:$0xff] }
 0x256   : > { %11488 = vmatmul.mubr.bf16.gmra.mrb[16].mxu1 %v2990_v35  ;;  %v2991_v52 = vrot.slane %v18466_v0, 1  ;;  %v18467_v3 = vld [vmem:[#allocation86_spill] sm:$0xff] }
 0x257   : > { %18464 = vst [vmem:[#allocation62_spill] sm:$0xff] %v14568_v13  ;;  %v14574_v40 = vadd.f32 %v14384_v29, %v1860_v38  ;;  %11336 = vmatmul.mubr.bf16.gmra.mrb[20].mxu0 %v2436_v32  ;;  %11491 = vmatprep.mubr.msk.bf16.mxu1 %vm12879_vm0, %v18356_v44  ;;  %v2445_v29 = vshrl.u32 %v13816_v9, 16  ;;  %v2449_v32 = vshll.u32 %v13836_v34, 16  ;;  %v2444_v58 = vsel %vm571_vm1, %v2439_v30, %v2443_v21 }
 0x258   : > { %11339 = vmatprep.mubr.msk.bf16.mxu0 %vm12879_vm0, %v18356_v44 }
 0x259   : > { %18465 = vst [vmem:[#allocation69_spill] sm:$0xff] %v14574_v40  ;;  %v14585_v28 = vpop.f32.mrb[168].mxu1  ;;  %v2447_v30 = vor.u32 %v2445_v29, %v2443_v21  ;;  %v18473_v21 = vld [vmem:[#allocation91_spill] sm:$0xff] }
 0x25a   : > { %v1718_v60 = vpop.f32.mrb[172].mxu0  ;;  %v11245_v40 = vpop.f32.mrb[169].mxu1 }
 0x25b   : > { %v1861_v48 = vadd.f32 %v1718_v60, %v18467_v3  ;;  %v11093_v23 = vpop.f32.mrb[173].mxu0  ;;  %v14591_v13 = vpop.f32.mrb[170].mxu1  ;;  %v2992_v60 = vsel %vm1457_vm2, %v2989_v42, %v2991_v52  ;;  %v18472_v40 = vld [vmem:[#allocation89_spill] sm:$0xff] }
 0x25c   : > { %v1721_v38 = vpop.f32.mrb[174].mxu0  ;;  %v11246_v3 = vpop.f32.mrb[171].mxu1  ;;  %v2451_v23 = vrot.slane %v2449_v32, 1 }
 0x25d   : > { %v1862_v33 = vadd.f32 %v1721_v38, %v18468_v4  ;;  %v14589_v35 = vadd.f32 %v14402_v50, %v1861_v48  ;;  %v11094_v53 = vpop.f32.mrb[175].mxu0  ;;  %v18471_v38 = vld [vmem:[#allocation109_spill] sm:$0xff] }
 0x25e   : > { %11492 = vmatmul.mubr.bf16.gmra.mrb[20].mxu1 %v2992_v60  ;;  %v2993_v50 = vrot.slane %v18471_v38, 1  ;;  %v2452_v32 = vsel %vm571_vm1, %v2447_v30, %v2451_v23 }
 0x25f   : > { %18469 = vst [vmem:[#allocation64_spill] sm:$0xff] %v14589_v35  ;;  %v14595_v9 = vadd.f32 %v14408_v47, %v1862_v33  ;;  %11340 = vmatmul.mubr.bf16.gmra.mrb[24].mxu0 %v2444_v58  ;;  %11495 = vmatprep.mubr.msk.bf16.mxu1 %vm12879_vm0, %v18356_v44  ;;  %v2453_v47 = vshrl.u32 %v13836_v34, 16  ;;  %v2457_v58 = vshll.u32 %v13865_v41, 16 }
 0x260   : > { %11343 = vmatprep.mubr.msk.bf16.mxu0 %vm12879_vm0, %v18356_v44 }
 0x261   : > { %18470 = vst [vmem:[#allocation65_spill] sm:$0xff] %v14595_v9  ;;  %v14606_v53 = vpop.f32.mrb[172].mxu1  ;;  %v2455_v30 = vor.u32 %v2453_v47, %v2451_v23  ;;  %v18478_v23 = vld [vmem:[#allocation94_spill] sm:$0xff] }
 0x262   : > { %v1726_v48 = vpop.f32.mrb[176].mxu0  ;;  %v11249_v9 = vpop.f32.mrb[173].mxu1 }
 0x263   : > { %v1863_v4 = vadd.f32 %v1726_v48, %v18472_v40  ;;  %v11097_v42 = vpop.f32.mrb[177].mxu0  ;;  %v14612_v35 = vpop.f32.mrb[174].mxu1  ;;  %v2994_v48 = vsel %vm1457_vm2, %v2991_v52, %v2993_v50  ;;  %v18477_v9 = vld [vmem:[#allocation92_spill] sm:$0xff] }
 0x264   : > { %v1729_v33 = vpop.f32.mrb[178].mxu0  ;;  %v11250_v40 = vpop.f32.mrb[175].mxu1  ;;  %v2459_v42 = vrot.slane %v2457_v58, 1 }
 0x265   : > { %v1864_v29 = vadd.f32 %v1729_v33, %v18473_v21  ;;  %v14610_v60 = vadd.f32 %v14424_v20, %v1863_v4  ;;  %v11098_v3 = vpop.f32.mrb[179].mxu0  ;;  %v18476_v33 = vld [vmem:[#allocation113_spill] sm:$0xff] }
 0x266   : > { %11496 = vmatmul.mubr.bf16.gmra.mrb[24].mxu1 %v2994_v48  ;;  %v2995_v20 = vrot.slane %v18476_v33, 1  ;;  %v2460_v58 = vsel %vm571_vm1, %v2455_v30, %v2459_v42 }
 0x267   : > { %18474 = vst [vmem:[#allocation53_spill] sm:$0xff] %v14610_v60  ;;  %v14616_v34 = vadd.f32 %v14430_v46, %v1864_v29  ;;  %11344 = vmatmul.mubr.bf16.gmra.mrb[28].mxu0 %v2452_v32  ;;  %11499 = vmatprep.mubr.msk.bf16.mxu1 %vm12879_vm0, %v18356_v44  ;;  %v2461_v46 = vshrl.u32 %v13865_v41, 16  ;;  %v2465_v32 = vshll.u32 %v13899_v26, 16 }
 0x268   : > { %11347 = vmatprep.mubr.msk.bf16.mxu0 %vm12879_vm0, %v18356_v44 }
 0x269   : > { %18475 = vst [vmem:[#allocation67_spill] sm:$0xff] %v14616_v34  ;;  %v14627_v3 = vpop.f32.mrb[176].mxu1  ;;  %v2463_v30 = vor.u32 %v2461_v46, %v2459_v42  ;;  %v18483_v42 = vld [vmem:[#allocation98_spill] sm:$0xff] }
 0x26a   : > { %v1734_v4 = vpop.f32.mrb[180].mxu0  ;;  %v11253_v34 = vpop.f32.mrb[177].mxu1 }
 0x26b   : > { %v1865_v21 = vadd.f32 %v1734_v4, %v18477_v9  ;;  %v11101_v52 = vpop.f32.mrb[181].mxu0  ;;  %v14633_v60 = vpop.f32.mrb[178].mxu1  ;;  %v2996_v4 = vsel %vm1457_vm2, %v2993_v50, %v2995_v20  ;;  %v18482_v34 = vld [vmem:[#allocation96_spill] sm:$0xff] }
 0x26c   : > { %v1737_v29 = vpop.f32.mrb[182].mxu0  ;;  %v11254_v9 = vpop.f32.mrb[179].mxu1  ;;  %v2467_v52 = vrot.slane %v2465_v32, 1 }
 0x26d   : > { %v1866_v47 = vadd.f32 %v1737_v29, %v18478_v23  ;;  %v14631_v48 = vadd.f32 %v14445_v8, %v1865_v21  ;;  %v11102_v40 = vpop.f32.mrb[183].mxu0  ;;  %v18481_v29 = vld [vmem:[#allocation117_spill] sm:$0xff] }
 0x26e   : > { %11500 = vmatmul.mubr.bf16.gmra.mrb[28].mxu1 %v2996_v4  ;;  %v2997_v8 = vrot.slane %v18481_v29, 1  ;;  %v2468_v32 = vsel %vm571_vm1, %v2463_v30, %v2467_v52 }
 0x26f   : > { %18479 = vst [vmem:[#allocation68_spill] sm:$0xff] %v14631_v48  ;;  %v14637_v41 = vadd.f32 %v14452_v24, %v1866_v47  ;;  %11348 = vmatmul.mubr.bf16.gmra.mrb[32].mxu0 %v2460_v58  ;;  %11503 = vmatprep.mubr.msk.bf16.mxu1 %vm12879_vm0, %v18356_v44  ;;  %v2469_v24 = vshrl.u32 %v13899_v26, 16  ;;  %v2473_v58 = vshll.u32 %v13929_v2, 16 }
 0x270   : > { %11351 = vmatprep.mubr.msk.bf16.mxu0 %vm12879_vm0, %v18356_v44 }
 0x271   : > { %18480 = vst [vmem:[#allocation70_spill] sm:$0xff] %v14637_v41  ;;  %v14648_v40 = vpop.f32.mrb[180].mxu1  ;;  %v2471_v30 = vor.u32 %v2469_v24, %v2467_v52  ;;  %v18488_v52 = vld [vmem:[#allocation101_spill] sm:$0xff] }
 0x272   : > { %v1742_v21 = vpop.f32.mrb[184].mxu0  ;;  %v11257_v41 = vpop.f32.mrb[181].mxu1 }
 0x273   : > { %v1867_v23 = vadd.f32 %v1742_v21, %v18482_v34  ;;  %v11105_v50 = vpop.f32.mrb[185].mxu0  ;;  %v14654_v48 = vpop.f32.mrb[182].mxu1  ;;  %v2998_v21 = vsel %vm1457_vm2, %v2995_v20, %v2997_v8  ;;  %v18487_v41 = vld [vmem:[#allocation99_spill] sm:$0xff] }
 0x274   : > { %v1745_v47 = vpop.f32.mrb[186].mxu0  ;;  %v11258_v34 = vpop.f32.mrb[183].mxu1  ;;  %v2475_v50 = vrot.slane %v2473_v58, 1 }
 0x275   : > { %v1868_v46 = vadd.f32 %v1745_v47, %v18483_v42  ;;  %v14652_v4 = vadd.f32 %v14470_v61, %v1867_v23  ;;  %v11106_v9 = vpop.f32.mrb[187].mxu0  ;;  %v18486_v47 = vld [vmem:[#allocation45_spill] sm:$0xff] }
 0x276   : > { %11504 = vmatmul.mubr.bf16.gmra.mrb[32].mxu1 %v2998_v21  ;;  %v2999_v61 = vrot.slane %v18486_v47, 1  ;;  %v2476_v58 = vsel %vm571_vm1, %v2471_v30, %v2475_v50 }
 0x277   : > { %18484 = vst [vmem:[#allocation71_spill] sm:$0xff] %v14652_v4  ;;  %v14658_v26 = vadd.f32 %v14482_v7, %v1868_v46  ;;  %11352 = vmatmul.mubr.bf16.gmra.mrb[36].mxu0 %v2468_v32  ;;  %11507 = vmatprep.mubr.msk.bf16.mxu1 %vm12879_vm0, %v18356_v44  ;;  %v2477_v7 = vshrl.u32 %v13929_v2, 16  ;;  %v2481_v32 = vshll.u32 %v13964_v31, 16 }
 0x278   : > { %11355 = vmatprep.mubr.msk.bf16.mxu0 %vm12879_vm0, %v18356_v44 }
 0x279   : > { %18485 = vst [vmem:[#allocation72_spill] sm:$0xff] %v14658_v26  ;;  %v14669_v9 = vpop.f32.mrb[184].mxu1  ;;  %v2479_v30 = vor.u32 %v2477_v7, %v2475_v50  ;;  %v18493_v50 = vld [vmem:[#allocation104_spill] sm:$0xff] }
 0x27a   : > { %v1750_v23 = vpop.f32.mrb[188].mxu0  ;;  %v11261_v26 = vpop.f32.mrb[185].mxu1 }
 0x27b   : > { %v1869_v42 = vadd.f32 %v1750_v23, %v18487_v41  ;;  %v11109_v20 = vpop.f32.mrb[189].mxu0  ;;  %v14675_v4 = vpop.f32.mrb[186].mxu1  ;;  %v3000_v23 = vsel %vm1457_vm2, %v2997_v8, %v2999_v61  ;;  %v18492_v26 = vld [vmem:[#allocation102_spill] sm:$0xff] }
 0x27c   : > { %v1753_v46 = vpop.f32.mrb[190].mxu0  ;;  %v11262_v41 = vpop.f32.mrb[187].mxu1  ;;  %v2483_v20 = vrot.slane %v2481_v32, 1 }
 0x27d   : > { %v1870_v24 = vadd.f32 %v1753_v46, %v18488_v52  ;;  %v14673_v21 = vadd.f32 %v14503_v17, %v1869_v42  ;;  %v11110_v34 = vpop.f32.mrb[191].mxu0  ;;  %v18491_v46 = vld [vmem:[#allocation51_spill] sm:$0xff] }
 0x27e   : > { %11508 = vmatmul.mubr.bf16.gmra.mrb[36].mxu1 %v3000_v23  ;;  %v3001_v17 = vrot.slane %v18491_v46, 1  ;;  %v2484_v32 = vsel %vm571_vm1, %v2479_v30, %v2483_v20 }
 0x27f   : > { %18489 = vst [vmem:[#allocation73_spill] sm:$0xff] %v14673_v21  ;;  %v14679_v2 = vadd.f32 %v14512_v27, %v1870_v24  ;;  %11356 = vmatmul.mubr.bf16.gmra.mrb[40].mxu0 %v2476_v58  ;;  %11511 = vmatprep.mubr.msk.bf16.mxu1 %vm12879_vm0, %v18356_v44  ;;  %v2485_v27 = vshrl.u32 %v13964_v31, 16  ;;  %v2489_v58 = vshll.u32 %v13985_v55, 16 }
 0x280   : > { %11359 = vmatprep.mubr.msk.bf16.mxu0 %vm12879_vm0, %v18356_v44 }
 0x281   : > { %18490 = vst [vmem:[#allocation74_spill] sm:$0xff] %v14679_v2  ;;  %v14690_v34 = vpop.f32.mrb[188].mxu1  ;;  %v2487_v30 = vor.u32 %v2485_v27, %v2483_v20  ;;  %v18498_v20 = vld [vmem:[#allocation108_spill] sm:$0xff] }
 0x282   : > { %v1758_v42 = vpop.f32.mrb[192].mxu0  ;;  %v11265_v2 = vpop.f32.mrb[189].mxu1 }
 0x283   : > { %v1871_v52 = vadd.f32 %v1758_v42, %v18492_v26  ;;  %v11113_v8 = vpop.f32.mrb[193].mxu0  ;;  %v14696_v21 = vpop.f32.mrb[190].mxu1  ;;  %v3002_v42 = vsel %vm1457_vm2, %v2999_v61, %v3001_v17  ;;  %v18497_v2 = vld [vmem:[#allocation106_spill] sm:$0xff] }
 0x284   : > { %v1761_v24 = vpop.f32.mrb[194].mxu0  ;;  %v11266_v26 = vpop.f32.mrb[191].mxu1  ;;  %v2491_v8 = vrot.slane %v2489_v58, 1 }
 0x285   : > { %v1872_v7 = vadd.f32 %v1761_v24, %v18493_v50  ;;  %v14694_v23 = vadd.f32 %v14532_v22, %v1871_v52  ;;  %v11114_v41 = vpop.f32.mrb[195].mxu0  ;;  %v18496_v24 = vld [vmem:[#allocation126_spill] sm:$0xff] }
 0x286   : > { %11512 = vmatmul.mubr.bf16.gmra.mrb[40].mxu1 %v3002_v42  ;;  %v3003_v22 = vrot.slane %v18496_v24, 1 }
 0x287   : > { %18494 = vst [vmem:[#allocation75_spill] sm:$0xff] %v14694_v23  ;;  %v14700_v31 = vadd.f32 %v14541_v56, %v1872_v7  ;;  %11360 = vmatmul.mubr.bf16.gmra.mrb[44].mxu0 %v2484_v32  ;;  %11515 = vmatprep.mubr.msk.bf16.mxu1 %vm12879_vm0, %v18356_v44  ;;  %v2493_v56 = vshrl.u32 %v13985_v55, 16  ;;  %v2497_v32 = vshll.u32 %v18466_v0, 16  ;;  %v2492_v7 = vsel %vm571_vm1, %v2487_v30, %v2491_v8  ;;  %v12797_v30 = vld [vmem:[%s12967_s18 + $0xe4] sm:$0xf] }
 0x288   : > { %11363 = vmatprep.mubr.msk.bf16.mxu0 %vm12879_vm0, %v18356_v44  ;;  %v14724_v39 = vcombine.low %v12797_v30, %v12797_v30 }
 0x289   : > { %18495 = vst [vmem:[#allocation77_spill] sm:$0xff] %v14700_v31  ;;  %v14711_v41 = vpop.f32.mrb[192].mxu1 }
 0x28a   : > { %v1766_v52 = vpop.f32.mrb[196].mxu0  ;;  %v11269_v31 = vpop.f32.mrb[193].mxu1 }
 0x28b   : > { %v1873_v50 = vadd.f32 %v1766_v52, %v18497_v2  ;;  %v11117_v61 = vpop.f32.mrb[197].mxu0  ;;  %v14717_v23 = vpop.f32.mrb[194].mxu1  ;;  %v3004_v52 = vsel %vm1457_vm2, %v3001_v17, %v3003_v22  ;;  %v3005_v31 = vrot.slane %v14724_v39, 1  ;;  %v18500_v17 = vld [vmem:[#allocation110_spill] sm:$0xff] }
 0x28c   : > { %v1769_v58 = vpop.f32.mrb[198].mxu0  ;;  %v11270_v2 = vpop.f32.mrb[195].mxu1  ;;  %v2499_v61 = vrot.slane %v2497_v32, 1  ;;  %v2505_v32 = vshll.u32 %v18471_v38, 16 }
 0x28d   : > { %v1874_v27 = vadd.f32 %v1769_v58, %v18498_v20  ;;  %v14715_v42 = vadd.f32 %v14561_v1, %v1873_v50  ;;  %v11118_v26 = vpop.f32.mrb[199].mxu0  ;;  %v2495_v1 = vor.u32 %v2493_v56, %v2491_v8  ;;  %v18501_v8 = vld [vmem:[#allocation112_spill] sm:$0xff] }
 0x28e   : > { %11516 = vmatmul.mubr.bf16.gmra.mrb[44].mxu1 %v3004_v52 }
 0x28f   : > { %v14721_v55 = vadd.f32 %v14570_v11, %v1874_v27  ;;  %11364 = vmatmul.mubr.bf16.gmra.mrb[48].mxu0 %v2492_v7  ;;  %11519 = vmatprep.mubr.msk.bf16.mxu1 %vm12879_vm0, %v18356_v44  ;;  %v2501_v7 = vshrl.u32 %v18466_v0, 16  ;;  %v2500_v27 = vsel %vm571_vm1, %v2495_v1, %v2499_v61 }
 0x290   : > { %11367 = vmatprep.mubr.msk.bf16.mxu0 %vm12879_vm0, %v18356_v44 }
 0x291   : > { %18499 = vst [vmem:[#allocation79_spill] sm:$0xff] %v14721_v55  ;;  %v14735_v26 = vpop.f32.mrb[196].mxu1  ;;  %v2503_v1 = vor.u32 %v2501_v7, %v2499_v61 }
 0x292   : > { %v1774_v50 = vpop.f32.mrb[200].mxu0  ;;  %v11273_v30 = vpop.f32.mrb[197].mxu1 }
 0x293   : > { %v1875_v11 = vadd.f32 %v1774_v50, %v18500_v17  ;;  %v11121_v58 = vpop.f32.mrb[201].mxu0  ;;  %v14741_v55 = vpop.f32.mrb[198].mxu1  ;;  %v3006_v50 = vsel %vm1457_vm2, %v3003_v22, %v3005_v31  ;;  %v2509_v22 = vshrl.u32 %v18471_v38, 16 }
 0x294   : > { %v1777_v20 = vpop.f32.mrb[202].mxu0  ;;  %v11274_v17 = vpop.f32.mrb[199].mxu1  ;;  %v2507_v58 = vrot.slane %v2505_v32, 1 }
 0x295   : > { %v1876_v56 = vadd.f32 %v1777_v20, %v18501_v8  ;;  %v14739_v52 = vadd.f32 %v14585_v28, %v1875_v11  ;;  %v11122_v2 = vpop.f32.mrb[203].mxu0  ;;  %v18502_v28 = vld [vmem:[#allocation114_spill] sm:$0xff] }
 0x296   : > { %11520 = vmatmul.mubr.bf16.gmra.mrb[48].mxu1 %v3006_v50 }
 0x297   : > { %v14745_v0 = vadd.f32 %v14591_v13, %v1876_v56  ;;  %11368 = vmatmul.mubr.bf16.gmra.mrb[52].mxu0 %v2500_v27  ;;  %11663 = vmatprep.mubr.msk.bf16.mxu1 %vm12879_vm0, %v18356_v44  ;;  %v2513_v13 = vshll.u32 %v18476_v33, 16  ;;  %v2508_v27 = vsel %vm571_vm1, %v2503_v1, %v2507_v58  ;;  %v18503_v56 = vld [vmem:[#allocation116_spill] sm:$0xff]  ;;  %v2511_v1 = vor.u32 %v2509_v22, %v2507_v58 }
 0x298   : > { %11371 = vmatprep.mubr.msk.bf16.mxu0 %vm12879_vm0, %v18356_v44 }
 0x299   : > { %v14755_v32 = vpop.f32.mrb[200].mxu1 }
 0x29a   : > { %v1782_v20 = vpop.f32.mrb[204].mxu0  ;;  %v11417_v30 = vpop.f32.mrb[201].mxu1 }
 0x29b   : > { %v1877_v11 = vadd.f32 %v1782_v20, %v18502_v28  ;;  %v11125_v8 = vpop.f32.mrb[205].mxu0  ;;  %v14761_v50 = vpop.f32.mrb[202].mxu1  ;;  %v2515_v20 = vrot.slane %v2513_v13, 1  ;;  %v18504_v28 = vld [vmem:[#allocation6_spill] sm:$0xff] }
 0x29c   : > { %v1785_v31 = vpop.f32.mrb[206].mxu0  ;;  %v11418_v38 = vpop.f32.mrb[203].mxu1 }
 0x29d   : > { %v1878_v2 = vadd.f32 %v1785_v31, %v18503_v56  ;;  %v14759_v61 = vadd.f32 %v14606_v53, %v1877_v11  ;;  %v11126_v7 = vpop.f32.mrb[207].mxu0  ;;  %v18505_v53 = vld [vmem:[#allocation118_spill] sm:$0xff]  ;;  %v2517_v56 = vshrl.u32 %v18476_v33, 16  ;;  %v2516_v13 = vsel %vm571_vm1, %v2511_v1, %v2515_v20 }
 0x29e   : > { %11664 = vmatmul.mubr.bf16.vlgmr.msra.gmra.mrb[52].mxu1 %v18504_v28  ;;  %v18506_v7 = vld [vmem:[#allocation120_spill] sm:$0xff] }
 0x29f   : > { %v14764_v17 = vadd.f32 %v14612_v35, %v1878_v2  ;;  %11372 = vmatmul.mubr.bf16.gmra.mrb[56].mxu0 %v2508_v27  ;;  %11667 = vmatprep.mubr.msk.bf16.mxu1 %vm12879_vm0, %v18356_v44  ;;  %v2521_v35 = vshll.u32 %v18481_v29, 16  ;;  %v2519_v1 = vor.u32 %v2517_v56, %v2515_v20 }
 0x2a0   : > { %11375 = vmatprep.mubr.msk.bf16.mxu0 %vm12879_vm0, %v18356_v44 }
 0x2a1   : > { %v14775_v2 = vpop.f32.mrb[204].mxu1 }
 0x2a2   : > { %v1790_v8 = vpop.f32.mrb[208].mxu0  ;;  %v11421_v38 = vpop.f32.mrb[205].mxu1 }
 0x2a3   : > { %v1879_v11 = vadd.f32 %v1790_v8, %v18505_v53  ;;  %v11129_v31 = vpop.f32.mrb[209].mxu0  ;;  %v14781_v28 = vpop.f32.mrb[206].mxu1  ;;  %v2523_v53 = vrot.slane %v2521_v35, 1  ;;  %v18510_v38 = vld [vmem:[#allocation123_spill] sm:$0xff] }
 0x2a4   : > { %v1793_v27 = vpop.f32.mrb[210].mxu0  ;;  %v11422_v33 = vpop.f32.mrb[207].mxu1  ;;  %v18508_v31 = vld [vmem:[#allocation8_spill] sm:$0xff] }
 0x2a5   : > { %v1880_v58 = vadd.f32 %v1793_v27, %v18506_v7  ;;  %v14779_v22 = vadd.f32 %v14627_v3, %v1879_v11  ;;  %v11130_v30 = vpop.f32.mrb[211].mxu0  ;;  %v18509_v3 = vld [vmem:[#allocation121_spill] sm:$0xff]  ;;  %v2524_v35 = vsel %vm571_vm1, %v2519_v1, %v2523_v53 }
 0x2a6   : > { %11668 = vmatmul.mubr.bf16.gmra.mrb[56].mxu1 %v18508_v31  ;;  %v2525_v30 = vshrl.u32 %v18481_v29, 16 }
 0x2a7   : > { %v14784_v8 = vadd.f32 %v14633_v60, %v1880_v58  ;;  %11376 = vmatmul.mubr.bf16.gmra.mrb[60].mxu0 %v2516_v13  ;;  %11671 = vmatprep.mubr.msk.bf16.mxu1 %vm12879_vm0, %v18356_v44  ;;  %v2529_v60 = vshll.u32 %v18486_v47, 16 }
 0x2a8   : > { %11379 = vmatprep.mubr.msk.bf16.mxu0 %vm12879_vm0, %v18356_v44  ;;  %v2527_v1 = vor.u32 %v2525_v30, %v2523_v53 }
 0x2a9   : > { %18507 = vst [vmem:[#allocation81_spill] sm:$0xff] %v14784_v8  ;;  %v14795_v58 = vpop.f32.mrb[208].mxu1 }
 0x2aa   : > { %v1798_v27 = vpop.f32.mrb[212].mxu0  ;;  %v11425_v31 = vpop.f32.mrb[209].mxu1 }
 0x2ab   : > { %v1881_v11 = vadd.f32 %v1798_v27, %v18509_v3  ;;  %v11133_v7 = vpop.f32.mrb[213].mxu0  ;;  %v14801_v8 = vpop.f32.mrb[210].mxu1  ;;  %v2531_v3 = vrot.slane %v2529_v60, 1  ;;  %v18514_v31 = vld [vmem:[#allocation125_spill] sm:$0xff] }
 0x2ac   : > { %v1801_v13 = vpop.f32.mrb[214].mxu0  ;;  %v11426_v29 = vpop.f32.mrb[211].mxu1  ;;  %v18512_v7 = vld [vmem:[#allocation10_spill] sm:$0xff] }
 0x2ad   : > { %v1882_v20 = vadd.f32 %v1801_v13, %v18510_v38  ;;  %v14799_v56 = vadd.f32 %v14648_v40, %v1881_v11  ;;  %v11134_v33 = vpop.f32.mrb[215].mxu0  ;;  %v18513_v40 = vld [vmem:[#allocation48_spill] sm:$0xff]  ;;  %v2532_v60 = vsel %vm571_vm1, %v2527_v1, %v2531_v3 }
 0x2ae   : > { %11672 = vmatmul.mubr.bf16.gmra.mrb[60].mxu1 %v18512_v7  ;;  %v2533_v33 = vshrl.u32 %v18486_v47, 16 }
 0x2af   : > { %v14804_v27 = vadd.f32 %v14654_v48, %v1882_v20  ;;  %11380 = vmatmul.mubr.bf16.gmra.mrb[64].mxu0 %v2524_v35  ;;  %11675 = vmatprep.mubr.msk.bf16.mxu1 %vm12879_vm0, %v18356_v44  ;;  %v2537_v48 = vshll.u32 %v18491_v46, 16 }
 0x2b0   : > { %11383 = vmatprep.mubr.msk.bf16.mxu0 %vm12879_vm0, %v18356_v44  ;;  %v2535_v1 = vor.u32 %v2533_v33, %v2531_v3 }
 0x2b1   : > { %18511 = vst [vmem:[#allocation83_spill] sm:$0xff] %v14804_v27  ;;  %v14815_v20 = vpop.f32.mrb[212].mxu1 }
 0x2b2   : > { %v1806_v13 = vpop.f32.mrb[216].mxu0  ;;  %v11429_v7 = vpop.f32.mrb[213].mxu1 }
 0x2b3   : > { %v1883_v11 = vadd.f32 %v1806_v13, %v18513_v40  ;;  %v11137_v38 = vpop.f32.mrb[217].mxu0  ;;  %v14821_v27 = vpop.f32.mrb[214].mxu1  ;;  %v2539_v40 = vrot.slane %v2537_v48, 1  ;;  %v18518_v7 = vld [vmem:[#allocation127_spill] sm:$0xff] }
 0x2b4   : > { %v1809_v35 = vpop.f32.mrb[218].mxu0  ;;  %v11430_v47 = vpop.f32.mrb[215].mxu1  ;;  %v18516_v38 = vld [vmem:[#allocation12_spill] sm:$0xff] }
 0x2b5   : > { %v1884_v53 = vadd.f32 %v1809_v35, %v18514_v31  ;;  %v14819_v30 = vadd.f32 %v14669_v9, %v1883_v11  ;;  %v11138_v29 = vpop.f32.mrb[219].mxu0  ;;  %v18517_v9 = vld [vmem:[#allocation52_spill] sm:$0xff]  ;;  %v2540_v48 = vsel %vm571_vm1, %v2535_v1, %v2539_v40 }
 0x2b6   : > { %11676 = vmatmul.mubr.bf16.gmra.mrb[64].mxu1 %v18516_v38  ;;  %v2541_v29 = vshrl.u32 %v18491_v46, 16 }
 0x2b7   : > { %v14824_v13 = vadd.f32 %v14675_v4, %v1884_v53  ;;  %11384 = vmatmul.mubr.bf16.gmra.mrb[68].mxu0 %v2532_v60  ;;  %11679 = vmatprep.mubr.msk.bf16.mxu1 %vm12879_vm0, %v18356_v44  ;;  %v2545_v4 = vshll.u32 %v18496_v24, 16 }
 0x2b8   : > { %11387 = vmatprep.mubr.msk.bf16.mxu0 %vm12879_vm0, %v18356_v44  ;;  %v2543_v1 = vor.u32 %v2541_v29, %v2539_v40 }
 0x2b9   : > { %18515 = vst [vmem:[#allocation85_spill] sm:$0xff] %v14824_v13  ;;  %v14835_v53 = vpop.f32.mrb[216].mxu1 }
 0x2ba   : > { %v1814_v35 = vpop.f32.mrb[220].mxu0  ;;  %v11433_v38 = vpop.f32.mrb[217].mxu1 }
 0x2bb   : > { %v1885_v11 = vadd.f32 %v1814_v35, %v18517_v9  ;;  %v11141_v31 = vpop.f32.mrb[221].mxu0  ;;  %v14841_v13 = vpop.f32.mrb[218].mxu1  ;;  %v2547_v9 = vrot.slane %v2545_v4, 1  ;;  %v18522_v38 = vld [vmem:[#allocation129_spill] sm:$0xff] }
 0x2bc   : > { %v1817_v60 = vpop.f32.mrb[222].mxu0  ;;  %v11434_v46 = vpop.f32.mrb[219].mxu1  ;;  %v18520_v31 = vld [vmem:[#allocation14_spill] sm:$0xff] }
 0x2bd   : > { %v1886_v3 = vadd.f32 %v1817_v60, %v18518_v7  ;;  %v14839_v33 = vadd.f32 %v14690_v34, %v1885_v11  ;;  %v11142_v47 = vpop.f32.mrb[223].mxu0  ;;  %v18521_v34 = vld [vmem:[#allocation57_spill] sm:$0xff]  ;;  %v2548_v4 = vsel %vm571_vm1, %v2543_v1, %v2547_v9 }
 0x2be   : > { %11680 = vmatmul.mubr.bf16.gmra.mrb[68].mxu1 %v18520_v31  ;;  %v2549_v47 = vshrl.u32 %v18496_v24, 16 }
 0x2bf   : > { %v14844_v35 = vadd.f32 %v14696_v21, %v1886_v3  ;;  %11388 = vmatmul.mubr.bf16.gmra.mrb[72].mxu0 %v2540_v48  ;;  %11683 = vmatprep.mubr.msk.bf16.mxu1 %vm12879_vm0, %v18356_v44  ;;  %v2553_v21 = vshll.u32 %v14724_v39, 16 }
 0x2c0   : > { %11391 = vmatprep.mubr.msk.bf16.mxu0 %vm12879_vm0, %v18356_v44  ;;  %v2551_v1 = vor.u32 %v2549_v47, %v2547_v9 }
 0x2c1   : > { %18519 = vst [vmem:[#allocation105_spill] sm:$0xff] %v14844_v35  ;;  %v14855_v3 = vpop.f32.mrb[220].mxu1  ;;  %v2555_v39 = vrot.slane %v2553_v21, 1 }
 0x2c2   : > { %v1822_v60 = vpop.f32.mrb[224].mxu0  ;;  %v11437_v31 = vpop.f32.mrb[221].mxu1 }
 0x2c3   : > { %v1887_v11 = vadd.f32 %v1822_v60, %v18521_v34  ;;  %v11145_v7 = vpop.f32.mrb[225].mxu0  ;;  %v14861_v35 = vpop.f32.mrb[222].mxu1  ;;  %v18523_v34 = vld [vmem:[#allocation16_spill] sm:$0xff] }
 0x2c4   : > { %v1825_v48 = vpop.f32.mrb[226].mxu0  ;;  %v11438_v24 = vpop.f32.mrb[223].mxu1 }
 0x2c5   : > { %v1888_v40 = vadd.f32 %v1825_v48, %v18522_v38  ;;  %v14859_v29 = vadd.f32 %v14711_v41, %v1887_v11  ;;  %v11146_v46 = vpop.f32.mrb[227].mxu0  ;;  %v18524_v41 = vld [vmem:[#allocation60_spill] sm:$0xff] }
 0x2c6   : > { %11684 = vmatmul.mubr.bf16.gmra.mrb[72].mxu1 %v18523_v34 }
 0x2c7   : > { %v14864_v60 = vadd.f32 %v14717_v23, %v1888_v40  ;;  %11392 = vmatmul.mubr.bf16.gmra.mrb[76].mxu0 %v2548_v4  ;;  %11687 = vmatprep.mubr.msk.bf16.mxu1 %vm12879_vm0, %v18356_v44  ;;  %v2556_v23 = vsel %vm571_vm1, %v2551_v1, %v2555_v39  ;;  %v18525_v4 = vld [vmem:[#allocation131_spill] sm:$0xff]  ;;  %v18526_v39 = vld [vmem:[#allocation18_spill] sm:$0xff] }
 0x2c8   : > { %11395 = vmatprep.mubr.msk.bf16.mxu0 %vm12879_vm0, %v18356_v44 }
 0x2c9   : > { %v14873_v40 = vpop.f32.mrb[224].mxu1 }
 0x2ca   : > { %v1830_v7 = vpop.f32.mrb[228].mxu0  ;;  %v11441_v47 = vpop.f32.mrb[225].mxu1 }
 0x2cb   : > { %v1889_v11 = vadd.f32 %v1830_v7, %v18524_v41  ;;  %v11149_v48 = vpop.f32.mrb[229].mxu0  ;;  %v14879_v31 = vpop.f32.mrb[226].mxu1 }
 0x2cc   : > { %v1833_v38 = vpop.f32.mrb[230].mxu0  ;;  %v11442_v34 = vpop.f32.mrb[227].mxu1 }
 0x2cd   : > { %v1890_v21 = vadd.f32 %v1833_v38, %v18525_v4  ;;  %v14877_v46 = vadd.f32 %v14735_v26, %v1889_v11  ;;  %v11150_v9 = vpop.f32.mrb[231].mxu0 }
 0x2ce   : > { %11688 = vmatmul.mubr.bf16.gmra.mrb[76].mxu1 %v18526_v39 }
 0x2cf   : > { %v14882_v24 = vadd.f32 %v14741_v55, %v1890_v21  ;;  %11396 = vmatmul.mubr.bf16.gmra.mrb[80].mxu0 %v2556_v23  ;;  %11691 = vmatprep.mubr.msk.bf16.mxu1 %vm12879_vm0, %v18356_v44  ;;  %v12637_v55 = vld [vmem:[%s18078_s1 + $0x200] sm:$0xff]  }
 0x2d0   : > { %11539 = vmatprep.mubr.msk.bf16.mxu0 %vm12879_vm0, %v18356_v44 }
 0x2d1   : > { %v14893_v11 = vpop.f32.mrb[228].mxu1 }
 0x2d2   : > { %v2666_v1 = vpop.f32.mrb[232].mxu0  ;;  %v11445_v4 = vpop.f32.mrb[229].mxu1 }
 0x2d3   : > { %v2881_v26 = vadd.f32 %v2666_v1, %v14277_v63  ;;  %v11293_v7 = vpop.f32.mrb[233].mxu0  ;;  %v14899_v21 = vpop.f32.mrb[230].mxu1  ;;  %v18527_v63 = vld [vmem:[#allocation3_spill] sm:$0xff] }
 0x2d4   : > { %v2669_v41 = vpop.f32.mrb[234].mxu0  ;;  %v11446_v47 = vpop.f32.mrb[231].mxu1 }
 0x2d5   : > { %v2882_v48 = vadd.f32 %v2669_v41, %v14283_v14  ;;  %v14897_v38 = vadd.f32 %v14755_v32, %v2881_v26  ;;  %v11294_v23 = vpop.f32.mrb[235].mxu0  ;;  %v12638_v14 = vld [vmem:[%s18078_s1 + $0x208] sm:$0xff]   ;;  %v18528_v32 = vld [vmem:[#allocation21_spill] sm:$0xff] }
 0x2d6   : > { %11692 = vmatmul.mubr.bf16.gmra.mrb[80].mxu1 %v18528_v32  ;;  %v12639_v26 = vld [vmem:[%s18078_s1 + $0x210] sm:$0xff]  }
 0x2d7   : > { %v14902_v9 = vadd.f32 %v14761_v50, %v2882_v48  ;;  %11540 = vmatmul.mubr.bf16.vlgmr.msra.gmra.mrb[84].mxu0 %v18527_v63  ;;  %11695 = vmatprep.mubr.msk.bf16.mxu1 %vm12879_vm0, %v18356_v44  ;;  %v18529_v63 = vld [vmem:[#allocation4_spill] sm:$0xff] }
 0x2d8   : > { %11772 = vmatpush3.bf16.msra.mxu0 %v12637_v55  ;;  %11543 = vmatprep.mubr.msk.bf16.mxu0 %vm12879_vm0, %v18356_v44 }
 0x2d9   : > { %11773 = vmatprep.subr.bf16.mxu0 %v18356_v44  ;;  %v14918_v7 = vpop.f32.mrb[232].mxu1 }
 0x2da   : > { %v2674_v34 = vpop.f32.mrb[236].mxu0  ;;  %v11449_v23 = vpop.f32.mrb[233].mxu1 }
 0x2db   : > { %v2883_v50 = vadd.f32 %v2674_v34, %v14305_v54  ;;  %v11297_v39 = vpop.f32.mrb[237].mxu0  ;;  %v14925_v4 = vpop.f32.mrb[234].mxu1 }
 0x2dc   : > { %v2677_v1 = vpop.f32.mrb[238].mxu0  ;;  %11774 = vmatpush3.bf16.msra.mxu0 %v12638_v14  ;;  %v11450_v47 = vpop.f32.mrb[235].mxu1  ;;  %v12641_v39 = vld [vmem:[%s18078_s1 + $0x220] sm:$0xff]  }
 0x2dd   : > { %v2884_v41 = vadd.f32 %v2677_v1, %v14312_v16  ;;  %v14922_v55 = vadd.f32 %v14775_v2, %v2883_v50  ;;  %v11298_v48 = vpop.f32.mrb[239].mxu0  ;;  %11775 = vmatprep.subr.bf16.mxu0 %v18356_v44  ;;  %v12640_v16 = vld [vmem:[%s18078_s1 + $0x218] sm:$0xff]  }
 0x2de   : > { %v18530_v2 = vld [vmem:[#allocation22_spill] sm:$0xff] }
 0x2df   : > { %v14928_v54 = vadd.f32 %v14781_v28, %v2884_v41  ;;  %11544 = vmatmul.mubr.bf16.gmra.mrb[88].mxu0 %v18529_v63  ;;  %11696 = vmatmul.mubr.bf16.gmra.mrb[84].mxu1 %v18530_v2  ;;  %v18531_v63 = vld [vmem:[#allocation5_spill] sm:$0xff] }
 0x2e0   : > { %11547 = vmatprep.mubr.msk.bf16.mxu0 %vm12879_vm0, %v18356_v44  ;;  %11776 = vmatpush3.bf16.msra.mxu0 %v12639_v26 }
 0x2e1   : > { %11777 = vmatprep.subr.bf16.mxu0 %v18356_v44  ;;  %11699 = vmatprep.mubr.msk.bf16.mxu1 %vm12879_vm0, %v18356_v44  ;;  %v14941_v50 = vpop.f32.mrb[236].mxu1 }
 0x2e2   : > { %v2682_v14 = vpop.f32.mrb[240].mxu0  ;;  %v11453_v48 = vpop.f32.mrb[237].mxu1 }
 0x2e3   : > { %v2885_v28 = vadd.f32 %v2682_v14, %v14334_v18  ;;  %v11301_v32 = vpop.f32.mrb[241].mxu0  ;;  %v14951_v23 = vpop.f32.mrb[238].mxu1 }
 0x2e4   : > { %v2685_v34 = vpop.f32.mrb[242].mxu0  ;;  %11778 = vmatpush3.bf16.msra.mxu0 %v12640_v16  ;;  %v11454_v47 = vpop.f32.mrb[239].mxu1 }
 0x2e5   : > { %v2886_v1 = vadd.f32 %v2685_v34, %v14341_v62  ;;  %v14948_v26 = vadd.f32 %v14795_v58, %v2885_v28  ;;  %v11302_v41 = vpop.f32.mrb[243].mxu0  ;;  %11779 = vmatprep.subr.bf16.mxu0 %v18356_v44  ;;  %v12642_v62 = vld [vmem:[%s18078_s1 + $0x228] sm:$0xff]   ;;  %v18534_v47 = vld [vmem:[#allocation26_spill] sm:$0xff] }
 0x2e6   : > { %v18532_v58 = vld [vmem:[#allocation24_spill] sm:$0xff] }
 0x2e7   : > { %v14954_v18 = vadd.f32 %v14801_v8, %v2886_v1  ;;  %11548 = vmatmul.mubr.bf16.gmra.mrb[92].mxu0 %v18531_v63  ;;  %11700 = vmatmul.mubr.bf16.gmra.mrb[88].mxu1 %v18532_v58 }
 0x2e8   : > { %11551 = vmatprep.mubr.msk.bf16.mxu0 %vm12879_vm0, %v18356_v44  ;;  %11780 = vmatpush3.bf16.msra.mxu0 %v12641_v39 }
 0x2e9   : > { %11781 = vmatprep.subr.bf16.mxu0 %v18356_v44  ;;  %11703 = vmatprep.mubr.msk.bf16.mxu1 %vm12879_vm0, %v18356_v44  ;;  %v14967_v28 = vpop.f32.mrb[240].mxu1 }
 0x2ea   : > { %v2690_v16 = vpop.f32.mrb[244].mxu0  ;;  %v11457_v1 = vpop.f32.mrb[241].mxu1 }
 0x2eb   : > { %v2887_v8 = vadd.f32 %v2690_v16, %v14360_v10  ;;  %v11305_v2 = vpop.f32.mrb[245].mxu0  ;;  %v14974_v41 = vpop.f32.mrb[242].mxu1  ;;  %v18533_v10 = vld [vmem:[#allocation7_spill] sm:$0xff]  ;;  %v18535_v1 = vld [vmem:[#allocation9_spill] sm:$0xff] }
 0x2ec   : > { %v2693_v14 = vpop.f32.mrb[246].mxu0  ;;  %11782 = vmatpush3.bf16.msra.mxu0 %v12642_v62  ;;  %v11458_v63 = vpop.f32.mrb[243].mxu1 }
 0x2ed   : > { %v2888_v32 = vadd.f32 %v2693_v14, %v14367_v19  ;;  %v14971_v34 = vadd.f32 %v14815_v20, %v2887_v8  ;;  %v11306_v39 = vpop.f32.mrb[247].mxu0  ;;  %11783 = vmatprep.subr.bf16.mxu0 %v18356_v44 }
 0x2ef   : > { %v14977_v48 = vadd.f32 %v14821_v27, %v2888_v32  ;;  %11552 = vmatmul.mubr.bf16.gmra.mrb[96].mxu0 %v18533_v10  ;;  %11704 = vmatmul.mubr.bf16.gmra.mrb[92].mxu1 %v18534_v47 }
 0x2f0   : > { %11555 = vmatprep.mubr.msk.bf16.mxu0 %vm12879_vm0, %v18356_v44  ;;  %11707 = vmatprep.mubr.msk.bf16.mxu1 %vm12879_vm0, %v18356_v44 }
 0x2f1   : > { %v14986_v16 = vpop.f32.mrb[244].mxu1 }
 0x2f2   : > { %v2698_v19 = vpop.f32.mrb[248].mxu0  ;;  %v11461_v14 = vpop.f32.mrb[245].mxu1 }
 0x2f3   : > { %v2889_v20 = vadd.f32 %v2698_v19, %v14382_v51  ;;  %v11309_v62 = vpop.f32.mrb[249].mxu0  ;;  %v14992_v32 = vpop.f32.mrb[246].mxu1  ;;  %v18536_v51 = vld [vmem:[#allocation28_spill] sm:$0xff]  ;;  %v18537_v14 = vld [vmem:[#allocation11_spill] sm:$0xff] }
 0x2f4   : > { %v2701_v58 = vpop.f32.mrb[250].mxu0  ;;  %v11462_v10 = vpop.f32.mrb[247].mxu1 }
 0x2f5   : > { %v2890_v27 = vadd.f32 %v2701_v58, %v14388_v6  ;;  %v14990_v8 = vadd.f32 %v14835_v53, %v2889_v20  ;;  %v11310_v2 = vpop.f32.mrb[251].mxu0 }
 0x2f7   : > { %v14995_v39 = vadd.f32 %v14841_v13, %v2890_v27  ;;  %11556 = vmatmul.mubr.bf16.gmra.mrb[100].mxu0 %v18535_v1  ;;  %11708 = vmatmul.mubr.bf16.gmra.mrb[96].mxu1 %v18536_v51  ;;  %v12643_v13 = vld [vmem:[%s18078_s1 + $0x230] sm:$0xff]  }
 0x2f8   : > { %11559 = vmatprep.mubr.msk.bf16.mxu0 %vm12879_vm0, %v18356_v44  ;;  %11711 = vmatprep.mubr.msk.bf16.mxu1 %vm12879_vm0, %v18356_v44 }
 0x2f9   : > { %v15007_v19 = vpop.f32.mrb[248].mxu1  ;;  %11784 = vmatpush3.bf16.msra.mxu0 %v12643_v13 }
 0x2fa   : > { %v2706_v63 = vpop.f32.mrb[252].mxu0  ;;  %v11465_v27 = vpop.f32.mrb[249].mxu1  ;;  %11785 = vmatprep.subr.bf16.mxu0 %v18356_v44 }
 0x2fb   : > { %v2891_v6 = vadd.f32 %v2706_v63, %v14406_v45  ;;  %v11313_v53 = vpop.f32.mrb[253].mxu0  ;;  %v15013_v2 = vpop.f32.mrb[250].mxu1  ;;  %v18539_v27 = vld [vmem:[#allocation13_spill] sm:$0xff] }
 0x2fc   : > { %v2709_v47 = vpop.f32.mrb[254].mxu0  ;;  %v11466_v1 = vpop.f32.mrb[251].mxu1 }
 0x2fd   : > { %v2892_v20 = vadd.f32 %v2709_v47, %v14413_v15  ;;  %v15011_v62 = vadd.f32 %v14855_v3, %v2891_v6  ;;  %v11314_v58 = vpop.f32.mrb[255].mxu0  ;;  %v18538_v15 = vld [vmem:[#allocation30_spill] sm:$0xff] }
 0x2ff   : > { %v15017_v45 = vadd.f32 %v14861_v35, %v2892_v20  ;;  %11560 = vmatmul.mubr.bf16.gmra.mrb[104].mxu0 %v18537_v14  ;;  %11712 = vmatmul.mubr.bf16.gmra.mrb[100].mxu1 %v18538_v15 }
 0x300   : > { %11563 = vmatprep.mubr.msk.bf16.mxu0 %vm12879_vm0, %v18356_v44  ;;  %11715 = vmatprep.mubr.msk.bf16.mxu1 %vm12879_vm0, %v18356_v44 }
 0x301   : > { %v15026_v6 = vpop.f32.mrb[252].mxu1 }
 0x302   : > { %v2714_v3 = vpop.f32.mrb[0].mxu0  ;;  %v11469_v47 = vpop.f32.mrb[253].mxu1 }
 0x303   : > { %v2893_v10 = vadd.f32 %v2714_v3, %v14428_v37  ;;  %v11317_v51 = vpop.f32.mrb[1].mxu0  ;;  %v15032_v20 = vpop.f32.mrb[254].mxu1  ;;  %v18540_v37 = vld [vmem:[#allocation32_spill] sm:$0xff]  ;;  %v18542_v47 = vld [vmem:[#allocation15_spill] sm:$0xff] }
 0x304   : > { %v2717_v63 = vpop.f32.mrb[2].mxu0  ;;  %v11470_v14 = vpop.f32.mrb[255].mxu1 }
 0x305   : > { %v2894_v35 = vadd.f32 %v2717_v63, %v14434_v57  ;;  %v15030_v53 = vadd.f32 %v14873_v40, %v2893_v10  ;;  %v11318_v13 = vpop.f32.mrb[3].mxu0 }
 0x307   : > { %v15035_v58 = vadd.f32 %v14879_v31, %v2894_v35  ;;  %11564 = vmatmul.mubr.bf16.gmra.mrb[108].mxu0 %v18539_v27  ;;  %11716 = vmatmul.mubr.bf16.gmra.mrb[104].mxu1 %v18540_v37 }
 0x308   : > { %11567 = vmatprep.mubr.msk.bf16.mxu0 %vm12879_vm0, %v18356_v44  ;;  %11719 = vmatprep.mubr.msk.bf16.mxu1 %vm12879_vm0, %v18356_v44 }
 0x309   : > { %v15044_v3 = vpop.f32.mrb[0].mxu1 }
 0x30a   : > { %v2722_v1 = vpop.f32.mrb[4].mxu0  ;;  %v11473_v63 = vpop.f32.mrb[1].mxu1 }
 0x30b   : > { %v2895_v57 = vadd.f32 %v2722_v1, %v14449_v5  ;;  %v11321_v40 = vpop.f32.mrb[5].mxu0  ;;  %v15050_v35 = vpop.f32.mrb[2].mxu1  ;;  %v18543_v5 = vld [vmem:[#allocation34_spill] sm:$0xff] }
 0x30c   : > { %v2725_v15 = vpop.f32.mrb[6].mxu0  ;;  %v11474_v27 = vpop.f32.mrb[3].mxu1 }
 0x30d   : > { %v2896_v31 = vadd.f32 %v2725_v15, %v14455_v49  ;;  %v15048_v10 = vadd.f32 %v14893_v11, %v2895_v57  ;;  %v11322_v51 = vpop.f32.mrb[7].mxu0 }
 0x30f   : > { %v15053_v13 = vadd.f32 %v14899_v21, %v2896_v31  ;;  %11568 = vmatmul.mubr.bf16.gmra.mrb[112].mxu0 %v18542_v47  ;;  %11720 = vmatmul.mubr.bf16.gmra.mrb[108].mxu1 %v18543_v5  ;;  %v12644_v31 = vld [vmem:[%s18078_s1 + $0x238] sm:$0xff]  }
 0x310   : > { %11571 = vmatprep.mubr.msk.bf16.mxu0 %vm12879_vm0, %v18356_v44  ;;  %11723 = vmatprep.mubr.msk.bf16.mxu1 %vm12879_vm0, %v18356_v44 }
 0x311   : > { %18541 = vst [vmem:[#allocation86_spill] sm:$0xff] %v15053_v13  ;;  %v15062_v1 = vpop.f32.mrb[4].mxu1  ;;  %11786 = vmatpush3.bf16.msra.mxu0 %v12644_v31  ;;  %v18550_v31 = vld [vmem:[#allocation19_spill] sm:$0xff] }
 0x312   : > { %v2730_v14 = vpop.f32.mrb[8].mxu0  ;;  %v11477_v15 = vpop.f32.mrb[5].mxu1 }
 0x313   : > { %v2897_v49 = vadd.f32 %v2730_v14, %v14477_v43  ;;  %v11325_v11 = vpop.f32.mrb[9].mxu0  ;;  %v15071_v51 = vpop.f32.mrb[6].mxu1  ;;  %v18546_v43 = vld [vmem:[#allocation17_spill] sm:$0xff] }
 0x314   : > { %v2733_v37 = vpop.f32.mrb[10].mxu0  ;;  %v11478_v47 = vpop.f32.mrb[7].mxu1 }
 0x315   : > { %v2898_v21 = vadd.f32 %v2733_v37, %v14486_v25  ;;  %v15066_v57 = vadd.f32 %v14918_v7, %v2897_v49  ;;  %v11326_v40 = vpop.f32.mrb[11].mxu0  ;;  %v18547_v25 = vld [vmem:[#allocation36_spill] sm:$0xff] }
 0x317   : > { %18544 = vst [vmem:[#allocation88_spill] sm:$0xff] %v15066_v57  ;;  %v15074_v63 = vadd.f32 %v14925_v4, %v2898_v21  ;;  %11572 = vmatmul.mubr.bf16.gmra.mrb[116].mxu0 %v18546_v43  ;;  %11724 = vmatmul.mubr.bf16.gmra.mrb[112].mxu1 %v18547_v25 }
 0x318   : > { %11575 = vmatprep.mubr.msk.bf16.mxu0 %vm12879_vm0, %v18356_v44  ;;  %11727 = vmatprep.mubr.msk.bf16.mxu1 %vm12879_vm0, %v18356_v44 }
 0x319   : > { %18545 = vst [vmem:[#allocation109_spill] sm:$0xff] %v15074_v63  ;;  %v15083_v49 = vpop.f32.mrb[8].mxu1 }
 0x31a   : > { %v2738_v7 = vpop.f32.mrb[12].mxu0  ;;  %v11481_v21 = vpop.f32.mrb[9].mxu1 }
 0x31b   : > { %v2899_v27 = vadd.f32 %v2738_v7, %v14510_v36  ;;  %v11329_v5 = vpop.f32.mrb[13].mxu0  ;;  %v15089_v40 = vpop.f32.mrb[10].mxu1  ;;  %v18551_v36 = vld [vmem:[#allocation38_spill] sm:$0xff] }
 0x31c   : > { %v2741_v14 = vpop.f32.mrb[14].mxu0  ;;  %v11482_v43 = vpop.f32.mrb[11].mxu1 }
 0x31d   : > { %v2900_v4 = vadd.f32 %v2741_v14, %v14516_v12  ;;  %v15087_v11 = vadd.f32 %v14941_v50, %v2899_v27  ;;  %v11330_v37 = vpop.f32.mrb[15].mxu0 }
 0x31f   : > { %18548 = vst [vmem:[#allocation89_spill] sm:$0xff] %v15087_v11  ;;  %v15092_v15 = vadd.f32 %v14951_v23, %v2900_v4  ;;  %11576 = vmatmul.mubr.bf16.gmra.mrb[120].mxu0 %v18550_v31  ;;  %11728 = vmatmul.mubr.bf16.gmra.mrb[116].mxu1 %v18551_v36  ;;  %v18552_v23 = vld [vmem:[#allocation61_spill] sm:$0xff]  ;;  %v18555_v31 = vld [vmem:[#allocation20_spill] sm:$0xff] }
 0x320   : > { %11579 = vmatprep.mubr.msk.bf16.mxu0 %vm12879_vm0, %v18356_v44  ;;  %11731 = vmatprep.mubr.msk.bf16.mxu1 %vm12879_vm0, %v18356_v44  ;;  %v18593_v11 = vld [vmem:[#allocation33_spill] sm:$0xff] }
 0x321   : > { %18549 = vst [vmem:[#allocation91_spill] sm:$0xff] %v15092_v15  ;;  %v15101_v7 = vpop.f32.mrb[12].mxu1  ;;  %v18590_v15 = vld [vmem:[#allocation56_spill] sm:$0xff] }
 0x322   : > { %v2746_v47 = vpop.f32.mrb[16].mxu0  ;;  %v11485_v4 = vpop.f32.mrb[13].mxu1 }
 0x323   : > { %v2901_v12 = vadd.f32 %v2746_v47, %v14539_v59  ;;  %v11333_v50 = vpop.f32.mrb[17].mxu0  ;;  %v15107_v37 = vpop.f32.mrb[14].mxu1  ;;  %v18556_v59 = vld [vmem:[#allocation40_spill] sm:$0xff] }
 0x324   : > { %v2749_v25 = vpop.f32.mrb[18].mxu0  ;;  %v11486_v43 = vpop.f32.mrb[15].mxu1 }
 0x325   : > { %v2902_v27 = vadd.f32 %v2749_v25, %v18552_v23  ;;  %v15105_v5 = vadd.f32 %v14967_v28, %v2901_v12  ;;  %v11334_v14 = vpop.f32.mrb[19].mxu0  ;;  %v18557_v28 = vld [vmem:[#allocation62_spill] sm:$0xff] }
 0x327   : > { %18553 = vst [vmem:[#allocation113_spill] sm:$0xff] %v15105_v5  ;;  %v15110_v21 = vadd.f32 %v14974_v41, %v2902_v27  ;;  %11580 = vmatmul.mubr.bf16.gmra.mrb[124].mxu0 %v18555_v31  ;;  %11732 = vmatmul.mubr.bf16.gmra.mrb[120].mxu1 %v18556_v59  ;;  %v18558_v41 = vld [vmem:[#allocation69_spill] sm:$0xff]  ;;  %v18561_v59 = vld [vmem:[#allocation23_spill] sm:$0xff] }
 0x328   : > { %11583 = vmatprep.mubr.msk.bf16.mxu0 %vm12879_vm0, %v18356_v44  ;;  %11735 = vmatprep.mubr.msk.bf16.mxu1 %vm12879_vm0, %v18356_v44  ;;  %v18585_v5 = vld [vmem:[#allocation31_spill] sm:$0xff] }
 0x329   : > { %18554 = vst [vmem:[#allocation92_spill] sm:$0xff] %v15110_v21  ;;  %v15119_v25 = vpop.f32.mrb[16].mxu1 }
 0x32a   : > { %v2754_v36 = vpop.f32.mrb[20].mxu0  ;;  %v11489_v4 = vpop.f32.mrb[17].mxu1 }
 0x32b   : > { %v2903_v47 = vadd.f32 %v2754_v36, %v18557_v28  ;;  %v11337_v12 = vpop.f32.mrb[21].mxu0  ;;  %v15125_v31 = vpop.f32.mrb[18].mxu1  ;;  %v18562_v36 = vld [vmem:[#allocation42_spill] sm:$0xff] }
 0x32c   : > { %v2757_v50 = vpop.f32.mrb[22].mxu0  ;;  %v11490_v21 = vpop.f32.mrb[19].mxu1 }
 0x32d   : > { %v2904_v23 = vadd.f32 %v2757_v50, %v18558_v41  ;;  %v15123_v27 = vadd.f32 %v14986_v16, %v2903_v47  ;;  %v11338_v14 = vpop.f32.mrb[23].mxu0  ;;  %v18563_v16 = vld [vmem:[#allocation64_spill] sm:$0xff] }
 0x32f   : > { %18559 = vst [vmem:[#allocation94_spill] sm:$0xff] %v15123_v27  ;;  %v15128_v43 = vadd.f32 %v14992_v32, %v2904_v23  ;;  %11584 = vmatmul.mubr.bf16.gmra.mrb[128].mxu0 %v18561_v59  ;;  %11736 = vmatmul.mubr.bf16.gmra.mrb[124].mxu1 %v18562_v36  ;;  %v18564_v32 = vld [vmem:[#allocation65_spill] sm:$0xff] }
 0x330   : > { %11587 = vmatprep.mubr.msk.bf16.mxu0 %vm12879_vm0, %v18356_v44  ;;  %11739 = vmatprep.mubr.msk.bf16.mxu1 %vm12879_vm0, %v18356_v44 }
 0x331   : > { %18560 = vst [vmem:[#allocation117_spill] sm:$0xff] %v15128_v43  ;;  %v15137_v41 = vpop.f32.mrb[20].mxu1  ;;  %v18567_v43 = vld [vmem:[#allocation25_spill] sm:$0xff] }
 0x332   : > { %v2762_v28 = vpop.f32.mrb[24].mxu0  ;;  %v11493_v4 = vpop.f32.mrb[21].mxu1 }
 0x333   : > { %v2905_v47 = vadd.f32 %v2762_v28, %v18563_v16  ;;  %v11341_v12 = vpop.f32.mrb[25].mxu0  ;;  %v15143_v59 = vpop.f32.mrb[22].mxu1  ;;  %v18568_v28 = vld [vmem:[#allocation44_spill] sm:$0xff] }
 0x334   : > { %v2765_v50 = vpop.f32.mrb[26].mxu0  ;;  %v11494_v27 = vpop.f32.mrb[23].mxu1 }
 0x335   : > { %v2906_v23 = vadd.f32 %v2765_v50, %v18564_v32  ;;  %v15141_v14 = vadd.f32 %v15007_v19, %v2905_v47  ;;  %v11342_v21 = vpop.f32.mrb[27].mxu0  ;;  %v18569_v19 = vld [vmem:[#allocation53_spill] sm:$0xff] }
 0x337   : > { %18565 = vst [vmem:[#allocation96_spill] sm:$0xff] %v15141_v14  ;;  %v15146_v36 = vadd.f32 %v15013_v2, %v2906_v23  ;;  %11588 = vmatmul.mubr.bf16.gmra.mrb[132].mxu0 %v18567_v43  ;;  %11740 = vmatmul.mubr.bf16.gmra.mrb[128].mxu1 %v18568_v28  ;;  %v18570_v2 = vld [vmem:[#allocation67_spill] sm:$0xff] }
 0x338   : > { %11591 = vmatprep.mubr.msk.bf16.mxu0 %vm12879_vm0, %v18356_v44  ;;  %11743 = vmatprep.mubr.msk.bf16.mxu1 %vm12879_vm0, %v18356_v44 }
 0x339   : > { %18566 = vst [vmem:[#allocation98_spill] sm:$0xff] %v15146_v36  ;;  %v15155_v32 = vpop.f32.mrb[24].mxu1  ;;  %v18573_v36 = vld [vmem:[#allocation27_spill] sm:$0xff] }
 0x33a   : > { %v2770_v16 = vpop.f32.mrb[28].mxu0  ;;  %v11497_v21 = vpop.f32.mrb[25].mxu1 }
 0x33b   : > { %v2907_v47 = vadd.f32 %v2770_v16, %v18569_v19  ;;  %v11345_v12 = vpop.f32.mrb[29].mxu0  ;;  %v15161_v4 = vpop.f32.mrb[26].mxu1  ;;  %v18574_v16 = vld [vmem:[#allocation47_spill] sm:$0xff] }
 0x33c   : > { %v2773_v50 = vpop.f32.mrb[30].mxu0  ;;  %v11498_v14 = vpop.f32.mrb[27].mxu1 }
 0x33d   : > { %v2908_v23 = vadd.f32 %v2773_v50, %v18570_v2  ;;  %v15159_v43 = vadd.f32 %v15026_v6, %v2907_v47  ;;  %v11346_v27 = vpop.f32.mrb[31].mxu0  ;;  %v18575_v6 = vld [vmem:[#allocation68_spill] sm:$0xff]  ;;  %v18576_v2 = vld [vmem:[#allocation70_spill] sm:$0xff] }
 0x33f   : > { %18571 = vst [vmem:[#allocation45_spill] sm:$0xff] %v15159_v43  ;;  %v15164_v28 = vadd.f32 %v15032_v20, %v2908_v23  ;;  %11592 = vmatmul.mubr.bf16.gmra.mrb[136].mxu0 %v18573_v36  ;;  %11744 = vmatmul.mubr.bf16.gmra.mrb[132].mxu1 %v18574_v16 }
 0x340   : > { %11595 = vmatprep.mubr.msk.bf16.mxu0 %vm12879_vm0, %v18356_v44  ;;  %11747 = vmatprep.mubr.msk.bf16.mxu1 %vm12879_vm0, %v18356_v44 }
 0x341   : > { %18572 = vst [vmem:[#allocation99_spill] sm:$0xff] %v15164_v28  ;;  %v15173_v20 = vpop.f32.mrb[28].mxu1  ;;  %v18579_v28 = vld [vmem:[#allocation29_spill] sm:$0xff] }
 0x342   : > { %v2778_v19 = vpop.f32.mrb[32].mxu0  ;;  %v11501_v27 = vpop.f32.mrb[29].mxu1 }
 0x343   : > { %v2909_v47 = vadd.f32 %v2778_v19, %v18575_v6  ;;  %v11349_v12 = vpop.f32.mrb[33].mxu0  ;;  %v15179_v21 = vpop.f32.mrb[30].mxu1  ;;  %v18580_v19 = vld [vmem:[#allocation50_spill] sm:$0xff]  ;;  %v12798_v6 = vld [vmem:[%s12967_s18 + $0xd8] sm:$0xf] }
 0x344   : > { %v2781_v50 = vpop.f32.mrb[34].mxu0  ;;  %v11502_v43 = vpop.f32.mrb[31].mxu1  ;;  %v12799_v12 = vld [vmem:[%s12967_s18 + $0xdc] sm:$0xf] }
 0x345   : > { %v2910_v36 = vadd.f32 %v2781_v50, %v18576_v2  ;;  %v15177_v14 = vadd.f32 %v15044_v3, %v2909_v47  ;;  %v11350_v23 = vpop.f32.mrb[35].mxu0  ;;  %v15190_v50 = vcombine.low %v12798_v6, %v12799_v12  ;;  %v18581_v47 = vld [vmem:[#allocation71_spill] sm:$0xff]  ;;  %v18582_v43 = vld [vmem:[#allocation72_spill] sm:$0xff] }
 0x347   : > { %18577 = vst [vmem:[#allocation101_spill] sm:$0xff] %v15177_v14  ;;  %v15182_v16 = vadd.f32 %v15050_v35, %v2910_v36  ;;  %11596 = vmatmul.mubr.bf16.gmra.mrb[140].mxu0 %v18579_v28  ;;  %11748 = vmatmul.mubr.bf16.gmra.mrb[136].mxu1 %v18580_v19  ;;  %v3784_v6 = vshll.u32 %v15190_v50, 16 }
 0x348   : > { %11599 = vmatprep.mubr.msk.bf16.mxu0 %vm12879_vm0, %v18356_v44  ;;  %11751 = vmatprep.mubr.msk.bf16.mxu1 %vm12879_vm0, %v18356_v44 }
 0x349   : > { %18578 = vst [vmem:[#allocation51_spill] sm:$0xff] %v15182_v16  ;;  %v15195_v23 = vpop.f32.mrb[32].mxu1 }
 0x34a   : > { %v2786_v3 = vpop.f32.mrb[36].mxu0  ;;  %v11505_v16 = vpop.f32.mrb[33].mxu1 }
 0x34b   : > { %v2911_v2 = vadd.f32 %v2786_v3, %v18581_v47  ;;  %v11353_v35 = vpop.f32.mrb[37].mxu0  ;;  %v15201_v14 = vpop.f32.mrb[34].mxu1  ;;  %v18586_v47 = vld [vmem:[#allocation54_spill] sm:$0xff]  ;;  %v18587_v16 = vld [vmem:[#allocation73_spill] sm:$0xff] }
 0x34c   : > { %v2789_v36 = vpop.f32.mrb[38].mxu0  ;;  %v11506_v3 = vpop.f32.mrb[35].mxu1 }
 0x34d   : > { %v2912_v28 = vadd.f32 %v2789_v36, %v18582_v43  ;;  %v15199_v27 = vadd.f32 %v15062_v1, %v2911_v2  ;;  %v11354_v19 = vpop.f32.mrb[39].mxu0  ;;  %v3786_v1 = vrot.slane %v3784_v6, 1 }
 0x34f   : > { %18583 = vst [vmem:[#allocation102_spill] sm:$0xff] %v15199_v27  ;;  %v15205_v12 = vadd.f32 %v15071_v51, %v2912_v28  ;;  %11600 = vmatmul.mubr.bf16.gmra.mrb[144].mxu0 %v18585_v5  ;;  %11752 = vmatmul.mubr.bf16.gmra.mrb[140].mxu1 %v18586_v47  ;;  %v18588_v51 = vld [vmem:[#allocation74_spill] sm:$0xff]  ;;  %v3788_v47 = vshrl.u32 %v15190_v50, 16  ;;  %v3787_v6 = vsel %vm571_vm1, %v18590_v15, %v3786_v1  ;;  %v18594_v15 = vld [vmem:[#allocation75_spill] sm:$0xff] }
 0x350   : > { %11603 = vmatprep.mubr.msk.bf16.mxu0 %vm12879_vm0, %v18356_v44  ;;  %11755 = vmatprep.mubr.msk.bf16.mxu1 %vm12879_vm0, %v18356_v44 }
 0x351   : > { %18584 = vst [vmem:[#allocation104_spill] sm:$0xff] %v15205_v12  ;;  %v15214_v19 = vpop.f32.mrb[36].mxu1 }
 0x352   : > { %v2794_v35 = vpop.f32.mrb[40].mxu0  ;;  %v11509_v12 = vpop.f32.mrb[37].mxu1 }
 0x353   : > { %v2913_v2 = vadd.f32 %v2794_v35, %v18587_v16  ;;  %v11357_v36 = vpop.f32.mrb[41].mxu0  ;;  %v15221_v27 = vpop.f32.mrb[38].mxu1  ;;  %v18591_v35 = vld [vmem:[#allocation95_spill] sm:$0xff]  ;;  %v3790_v12 = vor.u32 %v3788_v47, %v3786_v1 }
 0x354   : > { %v2797_v43 = vpop.f32.mrb[42].mxu0  ;;  %v3792_v16 = vshll.u32 %v18591_v35, 16  ;;  %v3796_v57 = vshrl.u32 %v18591_v35, 16 }
 0x355   : > { %v2914_v28 = vadd.f32 %v2797_v43, %v18588_v51  ;;  %v15218_v5 = vadd.f32 %v15083_v49, %v2913_v2  ;;  %v11358_v3 = vpop.f32.mrb[43].mxu0  ;;  %v11510_v43 = vpop.f32.mrb[39].mxu1  ;;  %v15235_v51 = vld [vmem:[%s12967_s18 + $0xe8] sm:$0xff]  }
 0x356   : > { %v3794_v2 = vrot.slane %v3792_v16, 1  ;;  %v3800_v16 = vshll.u32 %v15235_v51, 16 }
 0x357   : > { %18589 = vst [vmem:[#allocation126_spill] sm:$0xff] %v15218_v5  ;;  %v15227_v36 = vadd.f32 %v15089_v40, %v2914_v28  ;;  %11604 = vmatmul.mubr.bf16.gmra.mrb[148].mxu0 %v18593_v11  ;;  %11756 = vmatmul.mubr.bf16.gmra.mrb[144].mxu1 %v3787_v6  ;;  %v18595_v11 = vld [vmem:[#allocation77_spill] sm:$0xff] }
 0x358   : > { %11607 = vmatprep.mubr.msk.bf16.mxu0 %vm12879_vm0, %v18356_v44  ;;  %11759 = vmatprep.mubr.msk.bf16.mxu1 %vm12879_vm0, %v18356_v44  ;;  %v3795_v47 = vsel %vm571_vm1, %v3790_v12, %v3794_v2 }
 0x359   : > { %18592 = vst [vmem:[#allocation106_spill] sm:$0xff] %v15227_v36  ;;  %v15238_v28 = vpop.f32.mrb[40].mxu1 }
 0x35a   : > { %v2802_v49 = vpop.f32.mrb[44].mxu0  ;;  %v11513_v63 = vpop.f32.mrb[41].mxu1 }
 0x35b   : > { %v2915_v3 = vadd.f32 %v2802_v49, %v18594_v15  ;;  %v11361_v5 = vpop.f32.mrb[45].mxu0  ;;  %v15245_v1 = vpop.f32.mrb[42].mxu1  ;;  %v18598_v49 = vld [vmem:[#allocation35_spill] sm:$0xff]  ;;  %v3798_v63 = vor.u32 %v3796_v57, %v3794_v2  ;;  %v3804_v57 = vshrl.u32 %v15235_v51, 16 }
 0x35c   : > { %v2805_v40 = vpop.f32.mrb[46].mxu0  ;;  %v11514_v15 = vpop.f32.mrb[43].mxu1 }
 0x35d   : > { %v2916_v43 = vadd.f32 %v2805_v40, %v18595_v11  ;;  %v15242_v36 = vadd.f32 %v15101_v7, %v2915_v3  ;;  %v11362_v6 = vpop.f32.mrb[47].mxu0  ;;  %v3802_v3 = vrot.slane %v3800_v16, 1  ;;  %v12646_v40 = vld [vmem:[%s12967_s18 + $0xf0] ss:$0 sps:$4 sm:$0xff]   ;;  %v18600_v16 = vld [vmem:[#allocation37_spill] sm:$0xff] }
 0x35e   : > { %v3808_v2 = vshll.u32 %v12646_v40, 16 }
 0x35f   : > { %18596 = vst [vmem:[#allocation108_spill] sm:$0xff] %v15242_v36  ;;  %v15250_v5 = vadd.f32 %v15107_v37, %v2916_v43  ;;  %11608 = vmatmul.mubr.bf16.gmra.mrb[152].mxu0 %v18598_v49  ;;  %11760 = vmatmul.mubr.bf16.gmra.mrb[148].mxu1 %v3795_v47  ;;  %v18599_v43 = vld [vmem:[#allocation79_spill] sm:$0xff]  ;;  %v3803_v13 = vsel %vm571_vm1, %v3798_v63, %v3802_v3 }
 0x360   : > { %11611 = vmatprep.mubr.msk.bf16.mxu0 %vm12879_vm0, %v18356_v44  ;;  %11763 = vmatprep.mubr.msk.bf16.mxu1 %vm12879_vm0, %v18356_v44 }
 0x361   : > { %18597 = vst [vmem:[#allocation110_spill] sm:$0xff] %v15250_v5  ;;  %v15259_v37 = vpop.f32.mrb[44].mxu1 }
 0x362   : > { %v2810_v7 = vpop.f32.mrb[48].mxu0  ;;  %v11517_v47 = vpop.f32.mrb[45].mxu1 }
 0x363   : > { %v2917_v12 = vadd.f32 %v2810_v7, %v14715_v42  ;;  %v11365_v11 = vpop.f32.mrb[49].mxu0  ;;  %v15265_v36 = vpop.f32.mrb[46].mxu1 }
 0x364   : > { %v2813_v6 = vpop.f32.mrb[50].mxu0  ;;  %v11518_v7 = vpop.f32.mrb[47].mxu1 }
 0x365   : > { %v2918_v49 = vadd.f32 %v2813_v6, %v18599_v43  ;;  %v15263_v15 = vadd.f32 %v15119_v25, %v2917_v12  ;;  %v11366_v5 = vpop.f32.mrb[51].mxu0  ;;  %v3810_v12 = vrot.slane %v3808_v2, 1 }
 0x366   : > { %v3806_v5 = vor.u32 %v3804_v57, %v3802_v3  ;;  %v18601_v57 = vld [vmem:[#allocation39_spill] sm:$0xff] }
 0x367   : > { %v15270_v42 = vadd.f32 %v15125_v31, %v2918_v49  ;;  %11612 = vmatmul.mubr.bf16.gmra.mrb[156].mxu0 %v18600_v16  ;;  %11764 = vmatmul.mubr.bf16.gmra.mrb[152].mxu1 %v3803_v13 }
 0x368   : > { %11615 = vmatprep.mubr.msk.bf16.mxu0 %vm12879_vm0, %v18356_v44  ;;  %11767 = vmatprep.mubr.msk.bf16.mxu1 %vm12879_vm0, %v18356_v44  ;;  %v3811_v16 = vsel %vm571_vm1, %v3806_v5, %v3810_v12 }
 0x369   : > { %v15278_v6 = vpop.f32.mrb[48].mxu1 }
 0x36a   : > { %v2818_v25 = vpop.f32.mrb[52].mxu0  ;;  %v11521_v47 = vpop.f32.mrb[49].mxu1 }
 0x36b   : > { %v2919_v63 = vadd.f32 %v2818_v25, %v14739_v52  ;;  %v11369_v11 = vpop.f32.mrb[53].mxu0  ;;  %v15284_v13 = vpop.f32.mrb[50].mxu1 }
 0x36c   : > { %v2821_v40 = vpop.f32.mrb[54].mxu0  ;;  %v11522_v52 = vpop.f32.mrb[51].mxu1 }
 0x36d   : > { %v2920_v31 = vadd.f32 %v2821_v40, %v14745_v0  ;;  %v15282_v43 = vadd.f32 %v15137_v41, %v2919_v63  ;;  %v11370_v49 = vpop.f32.mrb[55].mxu0 }
 0x36f   : > { %v15288_v3 = vadd.f32 %v15143_v59, %v2920_v31  ;;  %11616 = vmatmul.mubr.bf16.gmra.mrb[160].mxu0 %v18601_v57  ;;  %11768 = vmatmul.mubr.bf16.gmra.mrb[156].mxu1 %v3811_v16  ;;  %v18602_v31 = vld [vmem:[#allocation41_spill] sm:$0xff] }
 0x370   : > { %11619 = vmatprep.mubr.msk.bf16.mxu0 %vm12879_vm0, %v18356_v44  ;;  %v18603_v57 = vld [vmem:[#allocation81_spill] sm:$0xff] }
 0x371   : > { %v15294_v25 = vpop.f32.mrb[52].mxu1 }
 0x372   : > { %v2826_v0 = vpop.f32.mrb[56].mxu0  ;;  %v11665_v12 = vpop.f32.mrb[53].mxu1 }
 0x373   : > { %v2921_v41 = vadd.f32 %v2826_v0, %v14759_v61  ;;  %v11373_v2 = vpop.f32.mrb[57].mxu0  ;;  %v15300_v11 = vpop.f32.mrb[54].mxu1 }
 0x374   : > { %v2829_v7 = vpop.f32.mrb[58].mxu0  ;;  %v11666_v49 = vpop.f32.mrb[55].mxu1 }
 0x375   : > { %v2922_v63 = vadd.f32 %v2829_v7, %v14764_v17  ;;  %v15298_v5 = vadd.f32 %v15155_v32, %v2921_v41  ;;  %v11374_v59 = vpop.f32.mrb[59].mxu0 }
 0x377   : > { %v15303_v40 = vadd.f32 %v15161_v4, %v2922_v63  ;;  %11620 = vmatmul.mubr.bf16.gmra.mrb[164].mxu0 %v18602_v31  ;;  %v18604_v63 = vld [vmem:[#allocation43_spill] sm:$0xff] }
 0x378   : > { %11623 = vmatprep.mubr.msk.bf16.mxu0 %vm12879_vm0, %v18356_v44 }
 0x379   : > { %v15309_v32 = vpop.f32.mrb[56].mxu1 }
 0x37a   : > { %v2834_v61 = vpop.f32.mrb[60].mxu0  ;;  %v11669_v41 = vpop.f32.mrb[57].mxu1 }
 0x37b   : > { %v2923_v47 = vadd.f32 %v2834_v61, %v14779_v22  ;;  %v11377_v17 = vpop.f32.mrb[61].mxu0  ;;  %v15315_v2 = vpop.f32.mrb[58].mxu1  ;;  %v18605_v61 = vld [vmem:[#allocation83_spill] sm:$0xff] }
 0x37c   : > { %v2837_v16 = vpop.f32.mrb[62].mxu0  ;;  %v11670_v59 = vpop.f32.mrb[59].mxu1 }
 0x37d   : > { %v2924_v52 = vadd.f32 %v2837_v16, %v18603_v57  ;;  %v15313_v0 = vadd.f32 %v15173_v20, %v2923_v47  ;;  %v11378_v4 = vpop.f32.mrb[63].mxu0 }
 0x37e   : > { %v18606_v4 = vld [vmem:[#allocation46_spill] sm:$0xff] }
 0x37f   : > { %v15318_v7 = vadd.f32 %v15179_v21, %v2924_v52  ;;  %11624 = vmatmul.mubr.bf16.gmra.mrb[168].mxu0 %v18604_v63 }
 0x380   : > { %11627 = vmatprep.mubr.msk.bf16.mxu0 %vm12879_vm0, %v18356_v44 }
 0x381   : > { %v15324_v20 = vpop.f32.mrb[60].mxu1 }
 0x382   : > { %v2842_v22 = vpop.f32.mrb[64].mxu0  ;;  %v11673_v16 = vpop.f32.mrb[61].mxu1 }
 0x383   : > { %v2925_v12 = vadd.f32 %v2842_v22, %v14799_v56  ;;  %v11381_v31 = vpop.f32.mrb[65].mxu0  ;;  %v15330_v57 = vpop.f32.mrb[62].mxu1  ;;  %v18608_v16 = vld [vmem:[#allocation49_spill] sm:$0xff] }
 0x384   : > { %v2845_v49 = vpop.f32.mrb[66].mxu0  ;;  %v11674_v41 = vpop.f32.mrb[63].mxu1 }
 0x385   : > { %v2926_v47 = vadd.f32 %v2845_v49, %v18605_v61  ;;  %v15328_v17 = vadd.f32 %v15195_v23, %v2925_v12  ;;  %v11382_v21 = vpop.f32.mrb[67].mxu0  ;;  %v18607_v12 = vld [vmem:[#allocation85_spill] sm:$0xff] }
 0x387   : > { %v15333_v52 = vadd.f32 %v15201_v14, %v2926_v47  ;;  %11628 = vmatmul.mubr.bf16.gmra.mrb[172].mxu0 %v18606_v4 }
 0x388   : > { %11631 = vmatprep.mubr.msk.bf16.mxu0 %vm12879_vm0, %v18356_v44 }
 0x389   : > { %v15339_v23 = vpop.f32.mrb[64].mxu1 }
 0x38a   : > { %v2850_v56 = vpop.f32.mrb[68].mxu0  ;;  %v11677_v61 = vpop.f32.mrb[65].mxu1 }
 0x38b   : > { %v2927_v63 = vadd.f32 %v2850_v56, %v14819_v30  ;;  %v11385_v59 = vpop.f32.mrb[69].mxu0  ;;  %v15345_v47 = vpop.f32.mrb[66].mxu1 }
 0x38c   : > { %v2853_v22 = vpop.f32.mrb[70].mxu0  ;;  %v11678_v4 = vpop.f32.mrb[67].mxu1 }
 0x38d   : > { %v2928_v31 = vadd.f32 %v2853_v22, %v18607_v12  ;;  %v15343_v49 = vadd.f32 %v15214_v19, %v2927_v63  ;;  %v11386_v14 = vpop.f32.mrb[71].mxu0  ;;  %v18609_v63 = vld [vmem:[#allocation105_spill] sm:$0xff] }
 0x38f   : > { %v15348_v21 = vadd.f32 %v15221_v27, %v2928_v31  ;;  %11632 = vmatmul.mubr.bf16.gmra.mrb[176].mxu0 %v18608_v16 }
 0x390   : > { %11635 = vmatprep.mubr.msk.bf16.mxu0 %vm12879_vm0, %v18356_v44 }
 0x391   : > { %v15354_v19 = vpop.f32.mrb[68].mxu1 }
 0x392   : > { %v2858_v30 = vpop.f32.mrb[72].mxu0  ;;  %v11681_v31 = vpop.f32.mrb[69].mxu1 }
 0x393   : > { %v2929_v41 = vadd.f32 %v2858_v30, %v14839_v33  ;;  %v11389_v56 = vpop.f32.mrb[73].mxu0  ;;  %v15360_v14 = vpop.f32.mrb[70].mxu1 }
 0x394   : > { %v2861_v59 = vpop.f32.mrb[74].mxu0  ;;  %v11682_v16 = vpop.f32.mrb[71].mxu1 }
 0x395   : > { %v2930_v22 = vadd.f32 %v2861_v59, %v18609_v63  ;;  %v15358_v12 = vadd.f32 %v15238_v28, %v2929_v41  ;;  %v11390_v27 = vpop.f32.mrb[75].mxu0 }
 0x397   : > { %v15363_v61 = vadd.f32 %v15245_v1, %v2930_v22  ;;  %11636 = vmatmul.mubr.bf16.gmra.mrb[180].mxu0 %v15190_v50 }
 0x398   : > { %11639 = vmatprep.mubr.msk.bf16.mxu0 %vm12879_vm0, %v18356_v44 }
 0x399   : > { %v15369_v28 = vpop.f32.mrb[72].mxu1 }
 0x39a   : > { %v2866_v33 = vpop.f32.mrb[76].mxu0  ;;  %v11685_v63 = vpop.f32.mrb[73].mxu1 }
 0x39b   : > { %v2931_v4 = vadd.f32 %v2866_v33, %v14859_v29  ;;  %v11393_v30 = vpop.f32.mrb[77].mxu0  ;;  %v15375_v22 = vpop.f32.mrb[74].mxu1 }
 0x39c   : > { %v2869_v56 = vpop.f32.mrb[78].mxu0  ;;  %v11686_v31 = vpop.f32.mrb[75].mxu1 }
 0x39d   : > { %v2932_v41 = vadd.f32 %v2869_v56, %v14864_v60  ;;  %v15373_v59 = vadd.f32 %v15259_v37, %v2931_v4  ;;  %v11394_v1 = vpop.f32.mrb[79].mxu0 }
 0x39f   : > { %v15378_v27 = vadd.f32 %v15265_v36, %v2932_v41  ;;  %11640 = vmatmul.mubr.bf16.gmra.mrb[184].mxu0 %v18591_v35 }
 0x3a0   : > { %11643 = vmatprep.mubr.msk.bf16.mxu0 %vm12879_vm0, %v18356_v44 }
 0x3a1   : > { %v15384_v37 = vpop.f32.mrb[76].mxu1 }
 0x3a2   : > { %v2874_v29 = vpop.f32.mrb[80].mxu0  ;;  %v11689_v56 = vpop.f32.mrb[77].mxu1 }
 0x3a3   : > { %v2933_v16 = vadd.f32 %v2874_v29, %v14877_v46  ;;  %v11397_v60 = vpop.f32.mrb[81].mxu0  ;;  %v15390_v41 = vpop.f32.mrb[78].mxu1 }
 0x3a4   : > { %v2877_v33 = vpop.f32.mrb[82].mxu0  ;;  %v11690_v1 = vpop.f32.mrb[79].mxu1 }
 0x3a5   : > { %v2934_v4 = vadd.f32 %v2877_v33, %v14882_v24  ;;  %v11398_v30 = vpop.f32.mrb[83].mxu0  ;;  %v15388_v36 = vadd.f32 %v15278_v6, %v2933_v16 }
 0x3a7   : > { %11644 = vmatmul.mubr.bf16.gmra.mrb[188].mxu0 %v15235_v51  ;;  %v15394_v63 = vadd.f32 %v15284_v13, %v2934_v4  ;;  %v18610_v13 = vld [vmem:[#allocation76_spill] sm:$0xff] }
 0x3a8   : > { %11787 = vmatprep.mubr.msk.bf16.mxu0 %vm12879_vm0, %v18356_v44 }
 0x3a9   : > { %v15399_v60 = vpop.f32.mrb[80].mxu1 }
 0x3aa   : > { %v3494_v46 = vpop.f32.mrb[84].mxu0  ;;  %v11693_v33 = vpop.f32.mrb[81].mxu1 }
 0x3ab   : > { %v3709_v31 = vadd.f32 %v3494_v46, %v14897_v38  ;;  %v11541_v24 = vpop.f32.mrb[85].mxu0  ;;  %v15405_v30 = vpop.f32.mrb[82].mxu1  ;;  %v18611_v33 = vld [vmem:[#allocation78_spill] sm:$0xff] }
 0x3ac   : > { %v3497_v29 = vpop.f32.mrb[86].mxu0  ;;  %v11694_v4 = vpop.f32.mrb[83].mxu1 }
 0x3ad   : > { %v3710_v6 = vadd.f32 %v3497_v29, %v14902_v9  ;;  %v11542_v16 = vpop.f32.mrb[87].mxu0  ;;  %v15403_v51 = vadd.f32 %v15294_v25, %v3709_v31 }
 0x3ae   : > { %v12647_v16 = vld [vmem:[%s18081_s4 + $0x40] sm:$0xff]  }
 0x3af   : > { %11788 = vmatmul.mubr.bf16.vlgmr.msra.gmra.mrb[192].mxu0 %v18610_v13  ;;  %v15409_v56 = vadd.f32 %v15300_v11, %v3710_v6  ;;  %11895 = vmatprep.subr.bf16.mxu1 %v12647_v16 }
 0x3b0   : > { %11791 = vmatprep.mubr.msk.bf16.mxu0 %vm12879_vm0, %v18356_v44  ;;  %11896 = vmatpush3.bf16.msra.mxu1 %v12647_v16 }
 0x3b2   : > { %v3502_v38 = vpop.f32.mrb[88].mxu0  ;;  %v15414_v24 = vpop.f32.mrb[84].mxu1 }
 0x3b3   : > { %v3711_v1 = vadd.f32 %v3502_v38, %v14922_v55  ;;  %v11545_v9 = vpop.f32.mrb[89].mxu0  ;;  %v11697_v29 = vpop.f32.mrb[85].mxu1 }
 0x3b4   : > { %v3505_v46 = vpop.f32.mrb[90].mxu0  ;;  %v15423_v6 = vpop.f32.mrb[86].mxu1 }
 0x3b5   : > { %v3712_v25 = vadd.f32 %v3505_v46, %v14928_v54  ;;  %v11546_v31 = vpop.f32.mrb[91].mxu0  ;;  %v15421_v11 = vadd.f32 %v15309_v32, %v3711_v1  ;;  %v11698_v55 = vpop.f32.mrb[87].mxu1 }
 0x3b7   : > { %11792 = vmatmul.mubr.bf16.gmra.mrb[196].mxu0 %v18611_v33  ;;  %v15427_v13 = vadd.f32 %v15315_v2, %v3712_v25  ;;  %v18612_v25 = vld [vmem:[#allocation80_spill] sm:$0xff] }
 0x3b8   : > { %11795 = vmatprep.mubr.msk.bf16.mxu0 %vm12879_vm0, %v18356_v44 }
 0x3ba   : > { %v3510_v54 = vpop.f32.mrb[92].mxu0  ;;  %v15432_v32 = vpop.f32.mrb[88].mxu1 }
 0x3bb   : > { %v3713_v4 = vadd.f32 %v3510_v54, %v14948_v26  ;;  %v11549_v38 = vpop.f32.mrb[93].mxu0  ;;  %v11701_v31 = vpop.f32.mrb[89].mxu1 }
 0x3bc   : > { %v3513_v9 = vpop.f32.mrb[94].mxu0  ;;  %v15438_v2 = vpop.f32.mrb[90].mxu1 }
 0x3bd   : > { %v3714_v1 = vadd.f32 %v3513_v9, %v14954_v18  ;;  %v11550_v46 = vpop.f32.mrb[95].mxu0  ;;  %v15436_v29 = vadd.f32 %v15324_v20, %v3713_v4  ;;  %v11702_v33 = vpop.f32.mrb[91].mxu1 }
 0x3bf   : > { %11796 = vmatmul.mubr.bf16.gmra.mrb[200].mxu0 %v18612_v25  ;;  %v15442_v16 = vadd.f32 %v15330_v57, %v3714_v1  ;;  %v18613_v57 = vld [vmem:[#allocation82_spill] sm:$0xff] }
 0x3c0   : > { %11799 = vmatprep.mubr.msk.bf16.mxu0 %vm12879_vm0, %v18356_v44 }
 0x3c2   : > { %v3518_v26 = vpop.f32.mrb[96].mxu0  ;;  %v15447_v38 = vpop.f32.mrb[92].mxu1 }
 0x3c3   : > { %v3715_v55 = vadd.f32 %v3518_v26, %v14971_v34  ;;  %v11553_v18 = vpop.f32.mrb[97].mxu0  ;;  %v11705_v9 = vpop.f32.mrb[93].mxu1 }
 0x3c4   : > { %v3521_v54 = vpop.f32.mrb[98].mxu0  ;;  %v15453_v31 = vpop.f32.mrb[94].mxu1 }
 0x3c5   : > { %v3716_v20 = vadd.f32 %v3521_v54, %v14977_v48  ;;  %v11554_v4 = vpop.f32.mrb[99].mxu0  ;;  %v15451_v46 = vadd.f32 %v15339_v23, %v3715_v55  ;;  %v11706_v1 = vpop.f32.mrb[95].mxu1 }
 0x3c7   : > { %11800 = vmatmul.mubr.bf16.gmra.mrb[204].mxu0 %v18613_v57  ;;  %v15457_v25 = vadd.f32 %v15345_v47, %v3716_v20  ;;  %v18614_v47 = vld [vmem:[#allocation84_spill] sm:$0xff] }
 0x3c8   : > { %11803 = vmatprep.mubr.msk.bf16.mxu0 %vm12879_vm0, %v18356_v44 }
 0x3ca   : > { %v3526_v34 = vpop.f32.mrb[100].mxu0  ;;  %v15462_v18 = vpop.f32.mrb[96].mxu1 }
 0x3cb   : > { %v3717_v33 = vadd.f32 %v3526_v34, %v14990_v8  ;;  %v11557_v48 = vpop.f32.mrb[101].mxu0  ;;  %v11709_v54 = vpop.f32.mrb[97].mxu1  ;;  %v12648_v8 = vld [vmem:[%s18081_s4 + $0x48] sm:$0xff]  }
 0x3cc   : > { %v3529_v26 = vpop.f32.mrb[102].mxu0  ;;  %v15468_v9 = vpop.f32.mrb[98].mxu1  ;;  %11897 = vmatprep.subr.bf16.mxu1 %v12648_v8 }
 0x3cd   : > { %v3718_v23 = vadd.f32 %v3529_v26, %v14995_v39  ;;  %v11558_v55 = vpop.f32.mrb[103].mxu0  ;;  %v15466_v4 = vadd.f32 %v15354_v19, %v3717_v33  ;;  %v11710_v20 = vpop.f32.mrb[99].mxu1  ;;  %11898 = vmatpush3.bf16.msra.mxu1 %v12648_v8 }
 0x3cf   : > { %11804 = vmatmul.mubr.bf16.gmra.mrb[208].mxu0 %v18614_v47  ;;  %v15475_v57 = vadd.f32 %v15360_v14, %v3718_v23  ;;  %v18615_v23 = vld [vmem:[#allocation87_spill] sm:$0xff] }
 0x3d0   : > { %11807 = vmatprep.mubr.msk.bf16.mxu0 %vm12879_vm0, %v18356_v44 }
 0x3d2   : > { %v3534_v39 = vpop.f32.mrb[104].mxu0  ;;  %v15480_v33 = vpop.f32.mrb[100].mxu1 }
 0x3d3   : > { %v3719_v19 = vadd.f32 %v3534_v39, %v15011_v62  ;;  %v11561_v1 = vpop.f32.mrb[105].mxu0  ;;  %v11713_v55 = vpop.f32.mrb[101].mxu1 }
 0x3d4   : > { %v3537_v34 = vpop.f32.mrb[106].mxu0  ;;  %v15486_v14 = vpop.f32.mrb[102].mxu1 }
 0x3d5   : > { %v3720_v48 = vadd.f32 %v3537_v34, %v15017_v45  ;;  %v11562_v26 = vpop.f32.mrb[107].mxu0  ;;  %v15484_v54 = vadd.f32 %v15369_v28, %v3719_v19  ;;  %v11714_v47 = vpop.f32.mrb[103].mxu1 }
 0x3d7   : > { %11808 = vmatmul.mubr.bf16.gmra.mrb[212].mxu0 %v18615_v23  ;;  %v15490_v20 = vadd.f32 %v15375_v22, %v3720_v48  ;;  %v18616_v22 = vld [vmem:[#allocation90_spill] sm:$0xff] }
 0x3d8   : > { %11811 = vmatprep.mubr.msk.bf16.mxu0 %vm12879_vm0, %v18356_v44 }
 0x3da   : > { %v3542_v62 = vpop.f32.mrb[108].mxu0  ;;  %v15495_v1 = vpop.f32.mrb[104].mxu1 }
 0x3db   : > { %v3721_v8 = vadd.f32 %v3542_v62, %v15030_v53  ;;  %v11565_v45 = vpop.f32.mrb[109].mxu0  ;;  %v11717_v34 = vpop.f32.mrb[105].mxu1 }
 0x3dc   : > { %v3545_v39 = vpop.f32.mrb[110].mxu0  ;;  %v15501_v55 = vpop.f32.mrb[106].mxu1 }
 0x3dd   : > { %v3722_v28 = vadd.f32 %v3545_v39, %v15035_v58  ;;  %v11566_v19 = vpop.f32.mrb[111].mxu0  ;;  %v15499_v26 = vadd.f32 %v15384_v37, %v3721_v8  ;;  %v11718_v48 = vpop.f32.mrb[107].mxu1  ;;  %v18617_v37 = vld [vmem:[#allocation86_spill] sm:$0xff] }
 0x3df   : > { %11812 = vmatmul.mubr.bf16.gmra.mrb[216].mxu0 %v18616_v22  ;;  %v15505_v23 = vadd.f32 %v15390_v41, %v3722_v28  ;;  %v18619_v41 = vld [vmem:[#allocation93_spill] sm:$0xff] }
 0x3e0   : > { %11815 = vmatprep.mubr.msk.bf16.mxu0 %vm12879_vm0, %v18356_v44 }
 0x3e2   : > { %v3550_v53 = vpop.f32.mrb[112].mxu0  ;;  %v15510_v45 = vpop.f32.mrb[108].mxu1 }
 0x3e3   : > { %v3723_v47 = vadd.f32 %v3550_v53, %v15048_v10  ;;  %v11569_v58 = vpop.f32.mrb[113].mxu0  ;;  %v11721_v19 = vpop.f32.mrb[109].mxu1  ;;  %v18621_v53 = vld [vmem:[#allocation88_spill] sm:$0xff] }
 0x3e4   : > { %v3553_v62 = vpop.f32.mrb[114].mxu0  ;;  %v15516_v22 = vpop.f32.mrb[110].mxu1 }
 0x3e5   : > { %v3724_v8 = vadd.f32 %v3553_v62, %v18617_v37  ;;  %v11570_v39 = vpop.f32.mrb[115].mxu0  ;;  %v15514_v34 = vadd.f32 %v15399_v60, %v3723_v47  ;;  %v11722_v28 = vpop.f32.mrb[111].mxu1  ;;  %v18622_v60 = vld [vmem:[#allocation109_spill] sm:$0xff] }
 0x3e6   : > { %v18624_v28 = vld [vmem:[#allocation97_spill] sm:$0xff] }
 0x3e7   : > { %18618 = vst [vmem:[#allocation112_spill] sm:$0xff] %v15514_v34  ;;  %11816 = vmatmul.mubr.bf16.gmra.mrb[220].mxu0 %v18619_v41  ;;  %v15520_v48 = vadd.f32 %v15405_v30, %v3724_v8  ;;  %v12649_v41 = vld [vmem:[%s18081_s4 + $0x50] sm:$0xff]  }
 0x3e8   : > { %11819 = vmatprep.mubr.msk.bf16.mxu0 %vm12879_vm0, %v18356_v44  ;;  %11899 = vmatprep.subr.bf16.mxu1 %v12649_v41 }
 0x3e9   : > { %18620 = vst [vmem:[#allocation114_spill] sm:$0xff] %v15520_v48  ;;  %11900 = vmatpush3.bf16.msra.mxu1 %v12649_v41 }
 0x3ea   : > { %v3558_v10 = vpop.f32.mrb[116].mxu0  ;;  %v15525_v39 = vpop.f32.mrb[112].mxu1 }
 0x3eb   : > { %v3725_v58 = vadd.f32 %v3558_v10, %v18621_v53  ;;  %v11573_v62 = vpop.f32.mrb[117].mxu0  ;;  %v11725_v34 = vpop.f32.mrb[113].mxu1 }
 0x3ec   : > { %v3561_v37 = vpop.f32.mrb[118].mxu0  ;;  %v15534_v8 = vpop.f32.mrb[114].mxu1  ;;  %v18626_v62 = vld [vmem:[#allocation89_spill] sm:$0xff] }
 0x3ed   : > { %v3726_v47 = vadd.f32 %v3561_v37, %v18622_v60  ;;  %v11574_v19 = vpop.f32.mrb[119].mxu0  ;;  %v15532_v30 = vadd.f32 %v15414_v24, %v3725_v58  ;;  %v11726_v10 = vpop.f32.mrb[115].mxu1  ;;  %v18627_v58 = vld [vmem:[#allocation91_spill] sm:$0xff] }
 0x3ef   : > { %18623 = vst [vmem:[#allocation116_spill] sm:$0xff] %v15532_v30  ;;  %11820 = vmatmul.mubr.bf16.gmra.mrb[224].mxu0 %v18624_v28  ;;  %v15538_v53 = vadd.f32 %v15423_v6, %v3726_v47  ;;  %v18629_v47 = vld [vmem:[#allocation100_spill] sm:$0xff] }
 0x3f0   : > { %11823 = vmatprep.mubr.msk.bf16.mxu0 %vm12879_vm0, %v18356_v44 }
 0x3f1   : > { %18625 = vst [vmem:[#allocation6_spill] sm:$0xff] %v15538_v53 }
 0x3f2   : > { %v3566_v34 = vpop.f32.mrb[120].mxu0  ;;  %v15543_v24 = vpop.f32.mrb[116].mxu1 }
 0x3f3   : > { %v3727_v37 = vadd.f32 %v3566_v34, %v18626_v62  ;;  %v11577_v60 = vpop.f32.mrb[121].mxu0  ;;  %v11729_v28 = vpop.f32.mrb[117].mxu1  ;;  %v18631_v62 = vld [vmem:[#allocation113_spill] sm:$0xff] }
 0x3f4   : > { %v3569_v19 = vpop.f32.mrb[122].mxu0  ;;  %v15549_v6 = vpop.f32.mrb[118].mxu1 }
 0x3f5   : > { %v3728_v30 = vadd.f32 %v3569_v19, %v18627_v58  ;;  %v11578_v48 = vpop.f32.mrb[123].mxu0  ;;  %v15547_v10 = vadd.f32 %v15432_v32, %v3727_v37  ;;  %v11730_v53 = vpop.f32.mrb[119].mxu1  ;;  %v18632_v32 = vld [vmem:[#allocation92_spill] sm:$0xff] }
 0x3f7   : > { %18628 = vst [vmem:[#allocation118_spill] sm:$0xff] %v15547_v10  ;;  %11824 = vmatmul.mubr.bf16.gmra.mrb[228].mxu0 %v18629_v47  ;;  %v15553_v41 = vadd.f32 %v15438_v2, %v3728_v30  ;;  %v18634_v2 = vld [vmem:[#allocation103_spill] sm:$0xff] }
 0x3f8   : > { %11827 = vmatprep.mubr.msk.bf16.mxu0 %vm12879_vm0, %v18356_v44 }
 0x3f9   : > { %18630 = vst [vmem:[#allocation120_spill] sm:$0xff] %v15553_v41 }
 0x3fa   : > { %v3574_v34 = vpop.f32.mrb[124].mxu0  ;;  %v15558_v58 = vpop.f32.mrb[120].mxu1 }
 0x3fb   : > { %v3729_v60 = vadd.f32 %v3574_v34, %v18631_v62  ;;  %v11581_v19 = vpop.f32.mrb[125].mxu0  ;;  %v11733_v10 = vpop.f32.mrb[121].mxu1  ;;  %v18636_v62 = vld [vmem:[#allocation94_spill] sm:$0xff] }
 0x3fc   : > { %v3577_v48 = vpop.f32.mrb[126].mxu0  ;;  %v15564_v53 = vpop.f32.mrb[122].mxu1 }
 0x3fd   : > { %v3730_v37 = vadd.f32 %v3577_v48, %v18632_v32  ;;  %v11582_v28 = vpop.f32.mrb[127].mxu0  ;;  %v15562_v47 = vadd.f32 %v15447_v38, %v3729_v60  ;;  %v11734_v30 = vpop.f32.mrb[123].mxu1  ;;  %v18637_v38 = vld [vmem:[#allocation117_spill] sm:$0xff] }
 0x3ff   : > { %18633 = vst [vmem:[#allocation8_spill] sm:$0xff] %v15562_v47  ;;  %11828 = vmatmul.mubr.bf16.gmra.mrb[232].mxu0 %v18634_v2  ;;  %v15568_v41 = vadd.f32 %v15453_v31, %v3730_v37  ;;  %v18639_v31 = vld [vmem:[#allocation107_spill] sm:$0xff] }
 0x400   : > { %11831 = vmatprep.mubr.msk.bf16.mxu0 %vm12879_vm0, %v18356_v44 }
 0x401   : > { %18635 = vst [vmem:[#allocation121_spill] sm:$0xff] %v15568_v41 }
 0x402   : > { %v3582_v34 = vpop.f32.mrb[128].mxu0  ;;  %v15573_v10 = vpop.f32.mrb[124].mxu1 }
 0x403   : > { %v3731_v19 = vadd.f32 %v3582_v34, %v18636_v62  ;;  %v11585_v48 = vpop.f32.mrb[129].mxu0  ;;  %v11737_v47 = vpop.f32.mrb[125].mxu1  ;;  %v18641_v62 = vld [vmem:[#allocation96_spill] sm:$0xff] }
 0x404   : > { %v3585_v32 = vpop.f32.mrb[130].mxu0  ;;  %v15579_v30 = vpop.f32.mrb[126].mxu1 }
 0x405   : > { %v3732_v60 = vadd.f32 %v3585_v32, %v18637_v38  ;;  %v11586_v28 = vpop.f32.mrb[131].mxu0  ;;  %v15577_v2 = vadd.f32 %v15462_v18, %v3731_v19  ;;  %v11738_v37 = vpop.f32.mrb[127].mxu1  ;;  %v18642_v18 = vld [vmem:[#allocation98_spill] sm:$0xff] }
 0x407   : > { %18638 = vst [vmem:[#allocation123_spill] sm:$0xff] %v15577_v2  ;;  %11832 = vmatmul.mubr.bf16.gmra.mrb[236].mxu0 %v18639_v31  ;;  %v15583_v41 = vadd.f32 %v15468_v9, %v3732_v60  ;;  %v18644_v9 = vld [vmem:[#allocation111_spill] sm:$0xff] }
 0x408   : > { %11835 = vmatprep.mubr.msk.bf16.mxu0 %vm12879_vm0, %v18356_v44 }
 0x409   : > { %18640 = vst [vmem:[#allocation10_spill] sm:$0xff] %v15583_v41 }
 0x40a   : > { %v3590_v34 = vpop.f32.mrb[132].mxu0  ;;  %v15588_v47 = vpop.f32.mrb[128].mxu1 }
 0x40b   : > { %v3733_v48 = vadd.f32 %v3590_v34, %v18641_v62  ;;  %v11589_v32 = vpop.f32.mrb[133].mxu0  ;;  %v11741_v2 = vpop.f32.mrb[129].mxu1  ;;  %v18646_v62 = vld [vmem:[#allocation45_spill] sm:$0xff] }
 0x40c   : > { %v3593_v38 = vpop.f32.mrb[134].mxu0  ;;  %v15594_v37 = vpop.f32.mrb[130].mxu1 }
 0x40d   : > { %v3734_v19 = vadd.f32 %v3593_v38, %v18642_v18  ;;  %v11590_v28 = vpop.f32.mrb[135].mxu0  ;;  %v15592_v31 = vadd.f32 %v15480_v33, %v3733_v48  ;;  %v11742_v60 = vpop.f32.mrb[131].mxu1  ;;  %v18647_v33 = vld [vmem:[#allocation99_spill] sm:$0xff] }
 0x40f   : > { %18643 = vst [vmem:[#allocation48_spill] sm:$0xff] %v15592_v31  ;;  %11836 = vmatmul.mubr.bf16.gmra.mrb[240].mxu0 %v18644_v9  ;;  %v15598_v41 = vadd.f32 %v15486_v14, %v3734_v19  ;;  %v18649_v14 = vld [vmem:[#allocation115_spill] sm:$0xff] }
 0x410   : > { %11839 = vmatprep.mubr.msk.bf16.mxu0 %vm12879_vm0, %v18356_v44 }
 0x411   : > { %18645 = vst [vmem:[#allocation125_spill] sm:$0xff] %v15598_v41 }
 0x412   : > { %v3598_v34 = vpop.f32.mrb[136].mxu0  ;;  %v15603_v2 = vpop.f32.mrb[132].mxu1 }
 0x413   : > { %v3735_v32 = vadd.f32 %v3598_v34, %v18646_v62  ;;  %v11593_v38 = vpop.f32.mrb[137].mxu0  ;;  %v11745_v31 = vpop.f32.mrb[133].mxu1  ;;  %v12651_v34 = vld [vmem:[%s18081_s4 + $0xc0] sm:$0xff]  }
 0x414   : > { %v3601_v18 = vpop.f32.mrb[138].mxu0  ;;  %v15609_v60 = vpop.f32.mrb[134].mxu1  ;;  %12087 = vmatprep.subr.bf16.mxu0 %v12651_v34 }
 0x415   : > { %v3736_v48 = vadd.f32 %v3601_v18, %v18647_v33  ;;  %v11594_v28 = vpop.f32.mrb[139].mxu0  ;;  %v15607_v9 = vadd.f32 %v15495_v1, %v3735_v32  ;;  %v11746_v19 = vpop.f32.mrb[135].mxu1  ;;  %v12650_v1 = vld [vmem:[%s18081_s4 + $0x58] sm:$0xff]   ;;  %12088 = vmatpush3.bf16.msra.mxu0 %v12651_v34 }
 0x416   : > { %11901 = vmatprep.subr.bf16.mxu1 %v12650_v1  ;;  %v18651_v32 = vld [vmem:[#allocation101_spill] sm:$0xff]  ;;  %v18652_v28 = vld [vmem:[#allocation51_spill] sm:$0xff] }
 0x417   : > { %18648 = vst [vmem:[#allocation12_spill] sm:$0xff] %v15607_v9  ;;  %11840 = vmatmul.mubr.bf16.gmra.mrb[244].mxu0 %v18649_v14  ;;  %v15616_v62 = vadd.f32 %v15501_v55, %v3736_v48  ;;  %11902 = vmatpush3.bf16.msra.mxu1 %v12650_v1  ;;  %v12652_v55 = vld [vmem:[%s18081_s4 + $0xc8] sm:$0xff]  }
 0x418   : > { %11843 = vmatprep.mubr.msk.bf16.mxu0 %vm12879_vm0, %v18356_v44  ;;  %12089 = vmatprep.subr.bf16.mxu0 %v12652_v55 }
 0x419   : > { %18650 = vst [vmem:[#allocation52_spill] sm:$0xff] %v15616_v62  ;;  %12090 = vmatpush3.bf16.msra.mxu0 %v12652_v55  ;;  %v12655_v55 = vld [vmem:[%s18081_s4 + $0xd8] sm:$0xff]  }
 0x41a   : > { %v3606_v31 = vpop.f32.mrb[140].mxu0  ;;  %v15627_v48 = vpop.f32.mrb[136].mxu1 }
 0x41b   : > { %v3737_v38 = vadd.f32 %v3606_v31, %v18651_v32  ;;  %v11597_v18 = vpop.f32.mrb[141].mxu0  ;;  %v11749_v62 = vpop.f32.mrb[137].mxu1  ;;  %v18654_v31 = vld [vmem:[#allocation119_spill] sm:$0xff]  ;;  %v12653_v32 = vld [vmem:[%s18081_s4 + $0xd0] sm:$0xff]  }
 0x41c   : > { %v3609_v33 = vpop.f32.mrb[142].mxu0  ;;  %v15633_v34 = vpop.f32.mrb[138].mxu1  ;;  %12091 = vmatprep.subr.bf16.mxu0 %v12653_v32 }
 0x41d   : > { %v3738_v14 = vadd.f32 %v3609_v33, %v18652_v28  ;;  %v11598_v19 = vpop.f32.mrb[143].mxu0  ;;  %v15631_v9 = vadd.f32 %v15510_v45, %v3737_v38  ;;  %v11750_v1 = vpop.f32.mrb[139].mxu1  ;;  %12092 = vmatpush3.bf16.msra.mxu0 %v12653_v32  ;;  %v18656_v45 = vld [vmem:[#allocation102_spill] sm:$0xff] }
 0x41e   : > { %12093 = vmatprep.subr.bf16.mxu0 %v12655_v55 }
 0x41f   : > { %18653 = vst [vmem:[#allocation127_spill] sm:$0xff] %v15631_v9  ;;  %11844 = vmatmul.mubr.bf16.gmra.mrb[248].mxu0 %v18654_v31  ;;  %v15640_v18 = vadd.f32 %v15516_v22, %v3738_v14  ;;  %v12654_v22 = vld [vmem:[%s18081_s4 + $0x60] sm:$0xff]   ;;  %v18657_v14 = vld [vmem:[#allocation104_spill] sm:$0xff] }
 0x420   : > { %11847 = vmatprep.mubr.msk.bf16.mxu0 %vm12879_vm0, %v18356_v44  ;;  %11903 = vmatprep.subr.bf16.mxu1 %v12654_v22  ;;  %v12656_v9 = vld [vmem:[%s18081_s4 + $0xe0] sm:$0xff]  }
 0x421   : > { %18655 = vst [vmem:[#allocation14_spill] sm:$0xff] %v15640_v18  ;;  %12094 = vmatpush3.bf16.msra.mxu0 %v12655_v55  ;;  %11904 = vmatpush3.bf16.msra.mxu1 %v12654_v22 }
 0x422   : > { %v3614_v62 = vpop.f32.mrb[144].mxu0  ;;  %v15648_v19 = vpop.f32.mrb[140].mxu1  ;;  %12095 = vmatprep.subr.bf16.mxu0 %v12656_v9 }
 0x423   : > { %v3739_v38 = vadd.f32 %v3614_v62, %v18656_v45  ;;  %v11601_v33 = vpop.f32.mrb[145].mxu0  ;;  %v11753_v18 = vpop.f32.mrb[141].mxu1  ;;  %v18659_v45 = vld [vmem:[#allocation122_spill] sm:$0xff] }
 0x424   : > { %v3617_v28 = vpop.f32.mrb[146].mxu0  ;;  %v15657_v62 = vpop.f32.mrb[142].mxu1 }
 0x425   : > { %v3740_v31 = vadd.f32 %v3617_v28, %v18657_v14  ;;  %v11602_v1 = vpop.f32.mrb[147].mxu0  ;;  %v15655_v32 = vadd.f32 %v15525_v39, %v3739_v38  ;;  %v11754_v33 = vpop.f32.mrb[143].mxu1  ;;  %v12662_v39 = vld [vmem:[%s18081_s4 + $0x68] sm:$0xff]   ;;  %12096 = vmatpush3.bf16.msra.mxu0 %v12656_v9  ;;  %v18661_v38 = vld [vmem:[#allocation126_spill] sm:$0xff] }
 0x426   : > { %11905 = vmatprep.subr.bf16.mxu1 %v12662_v39  ;;  %v12664_v1 = vld [vmem:[%s18081_s4 + $0x70] sm:$0xff]  }
 0x427   : > { %18658 = vst [vmem:[#allocation57_spill] sm:$0xff] %v15655_v32  ;;  %11848 = vmatmul.mubr.bf16.gmra.mrb[252].mxu0 %v18659_v45  ;;  %v15664_v28 = vadd.f32 %v15534_v8, %v3740_v31  ;;  %11906 = vmatpush3.bf16.msra.mxu1 %v12662_v39  ;;  %v12663_v8 = vld [vmem:[%s18081_s4 + $0xe8] sm:$0xff]   ;;  %v18662_v45 = vld [vmem:[#allocation106_spill] sm:$0xff] }
 0x428   : > { %11851 = vmatprep.mubr.msk.bf16.mxu0 %vm12879_vm0, %v18356_v44  ;;  %12097 = vmatprep.subr.bf16.mxu0 %v12663_v8 }
 0x429   : > { %18660 = vst [vmem:[#allocation129_spill] sm:$0xff] %v15664_v28  ;;  %11907 = vmatprep.subr.bf16.mxu1 %v12664_v1  ;;  %12098 = vmatpush3.bf16.msra.mxu0 %v12663_v8 }
 0x42a   : > { %v3622_v18 = vpop.f32.mrb[148].mxu0  ;;  %v15675_v31 = vpop.f32.mrb[144].mxu1 }
 0x42b   : > { %v3741_v55 = vadd.f32 %v3622_v18, %v18661_v38  ;;  %v11605_v22 = vpop.f32.mrb[149].mxu0  ;;  %v11757_v32 = vpop.f32.mrb[145].mxu1  ;;  %v18664_v18 = vld [vmem:[#allocation124_spill] sm:$0xff]  ;;  %11908 = vmatpush3.bf16.msra.mxu1 %v12664_v1 }
 0x42c   : > { %v3625_v14 = vpop.f32.mrb[150].mxu0  ;;  %v15684_v39 = vpop.f32.mrb[146].mxu1  ;;  %v12666_v22 = vld [vmem:[%s18081_s4 + $0xf0] sm:$0xff]  }
 0x42d   : > { %v3742_v33 = vadd.f32 %v3625_v14, %v18662_v45  ;;  %v11606_v28 = vpop.f32.mrb[151].mxu0  ;;  %v15682_v9 = vadd.f32 %v15543_v24, %v3741_v55  ;;  %v11758_v38 = vpop.f32.mrb[147].mxu1  ;;  %v12667_v24 = vld [vmem:[%s18081_s4 + $0x78] sm:$0xff]   ;;  %12099 = vmatprep.subr.bf16.mxu0 %v12666_v22 }
 0x42e   : > { %11909 = vmatprep.subr.bf16.mxu1 %v12667_v24  ;;  %12100 = vmatpush3.bf16.msra.mxu0 %v12666_v22  ;;  %v18666_v28 = vld [vmem:[#allocation108_spill] sm:$0xff]  ;;  %v18668_v22 = vld [vmem:[#allocation55_spill] sm:$0xff] }
 0x42f   : > { %18663 = vst [vmem:[#allocation16_spill] sm:$0xff] %v15682_v9  ;;  %11852 = vmatmul.mubr.bf16.gmra.mrb[0].mxu0 %v18664_v18  ;;  %v15691_v14 = vadd.f32 %v15549_v6, %v3742_v33  ;;  %11910 = vmatpush3.bf16.msra.mxu1 %v12667_v24  ;;  %v12668_v6 = vld [vmem:[%s18081_s4 + $0xf8] sm:$0xff]  }
 0x430   : > { %11855 = vmatprep.mubr.msk.bf16.mxu0 %vm12879_vm0, %v18356_v44  ;;  %v18667_v33 = vld [vmem:[#allocation110_spill] sm:$0xff]  ;;  %12101 = vmatprep.subr.bf16.mxu0 %v12668_v6 }
 0x431   : > { %18665 = vst [vmem:[#allocation60_spill] sm:$0xff] %v15691_v14 }
 0x432   : > { %v3630_v32 = vpop.f32.mrb[152].mxu0  ;;  %v15699_v45 = vpop.f32.mrb[148].mxu1  ;;  %12102 = vmatpush3.bf16.msra.mxu0 %v12668_v6 }
 0x433   : > { %v3743_v55 = vadd.f32 %v3630_v32, %v18666_v28  ;;  %v11609_v8 = vpop.f32.mrb[153].mxu0  ;;  %v11761_v14 = vpop.f32.mrb[149].mxu1 }
 0x434   : > { %v3633_v1 = vpop.f32.mrb[154].mxu0  ;;  %v15708_v41 = vpop.f32.mrb[150].mxu1 }
 0x435   : > { %v3744_v18 = vadd.f32 %v3633_v1, %v18667_v33  ;;  %v11610_v38 = vpop.f32.mrb[155].mxu0  ;;  %v15706_v9 = vadd.f32 %v15558_v58, %v3743_v55  ;;  %v11762_v24 = vpop.f32.mrb[151].mxu1 }
 0x437   : > { %11856 = vmatmul.mubr.bf16.gmra.mrb[4].mxu0 %v18668_v22  ;;  %v15712_v32 = vadd.f32 %v15564_v53, %v3744_v18  ;;  %v18669_v18 = vld [vmem:[#allocation128_spill] sm:$0xff] }
 0x438   : > { %11859 = vmatprep.mubr.msk.bf16.mxu0 %vm12879_vm0, %v18356_v44 }
 0x43a   : > { %v3638_v28 = vpop.f32.mrb[156].mxu0  ;;  %v15717_v58 = vpop.f32.mrb[152].mxu1 }
 0x43b   : > { %v3745_v8 = vadd.f32 %v3638_v28, %v15263_v15  ;;  %v11613_v14 = vpop.f32.mrb[157].mxu0  ;;  %v11765_v38 = vpop.f32.mrb[153].mxu1 }
 0x43c   : > { %v3641_v1 = vpop.f32.mrb[158].mxu0  ;;  %v15723_v53 = vpop.f32.mrb[154].mxu1 }
 0x43d   : > { %v3746_v55 = vadd.f32 %v3641_v1, %v15270_v42  ;;  %v11614_v33 = vpop.f32.mrb[159].mxu0  ;;  %v15721_v22 = vadd.f32 %v15573_v10, %v3745_v8  ;;  %v11766_v24 = vpop.f32.mrb[155].mxu1 }
 0x43f   : > { %11860 = vmatmul.mubr.bf16.gmra.mrb[8].mxu0 %v18669_v18  ;;  %v15727_v6 = vadd.f32 %v15579_v30, %v3746_v55  ;;  %v18670_v30 = vld [vmem:[#allocation130_spill] sm:$0xff] }
 0x440   : > { %11863 = vmatprep.mubr.msk.bf16.mxu0 %vm12879_vm0, %v18356_v44 }
 0x442   : > { %v3646_v15 = vpop.f32.mrb[160].mxu0  ;;  %v15732_v1 = vpop.f32.mrb[156].mxu1 }
 0x443   : > { %v3747_v28 = vadd.f32 %v3646_v15, %v15282_v43  ;;  %v11617_v42 = vpop.f32.mrb[161].mxu0  ;;  %v11769_v33 = vpop.f32.mrb[157].mxu1 }
 0x444   : > { %v3649_v14 = vpop.f32.mrb[162].mxu0  ;;  %v15738_v18 = vpop.f32.mrb[158].mxu1 }
 0x445   : > { %v3748_v10 = vadd.f32 %v3649_v14, %v15288_v3  ;;  %v11618_v8 = vpop.f32.mrb[163].mxu0  ;;  %v15736_v38 = vadd.f32 %v15588_v47, %v3747_v28  ;;  %v11770_v24 = vpop.f32.mrb[159].mxu1 }
 0x446   : > { %v18671_v8 = vld [vmem:[#allocation63_spill] sm:$0xff] }
 0x447   : > { %11864 = vmatmul.mubr.bf16.gmra.mrb[12].mxu0 %v18670_v30  ;;  %v15742_v55 = vadd.f32 %v15594_v37, %v3748_v10 }
 0x448   : > { %11867 = vmatprep.mubr.msk.bf16.mxu0 %vm12879_vm0, %v18356_v44 }
 0x44a   : > { %v3654_v43 = vpop.f32.mrb[164].mxu0 }
 0x44b   : > { %v3749_v15 = vadd.f32 %v3654_v43, %v15298_v5  ;;  %v11621_v3 = vpop.f32.mrb[165].mxu0 }
 0x44c   : > { %v3657_v42 = vpop.f32.mrb[166].mxu0 }
 0x44d   : > { %v3750_v14 = vadd.f32 %v3657_v42, %v15303_v40  ;;  %v11622_v47 = vpop.f32.mrb[167].mxu0  ;;  %v15749_v28 = vadd.f32 %v15603_v2, %v3749_v15  ;;  %v18672_v2 = vld [vmem:[#allocation58_spill] sm:$0xff] }
 0x44f   : > { %11868 = vmatmul.mubr.bf16.gmra.mrb[16].mxu0 %v18671_v8  ;;  %v15753_v37 = vadd.f32 %v15609_v60, %v3750_v14 }
 0x450   : > { %11871 = vmatprep.mubr.msk.bf16.mxu0 %vm12879_vm0, %v18356_v44 }
 0x452   : > { %v3662_v10 = vpop.f32.mrb[168].mxu0 }
 0x453   : > { %v3751_v33 = vadd.f32 %v3662_v10, %v15313_v0  ;;  %v11625_v5 = vpop.f32.mrb[169].mxu0 }
 0x454   : > { %v3665_v30 = vpop.f32.mrb[170].mxu0 }
 0x455   : > { %v3752_v24 = vadd.f32 %v3665_v30, %v15318_v7  ;;  %v11626_v40 = vpop.f32.mrb[171].mxu0  ;;  %v15760_v43 = vadd.f32 %v15627_v48, %v3751_v33  ;;  %v18673_v48 = vld [vmem:[#allocation66_spill] sm:$0xff] }
 0x457   : > { %11872 = vmatmul.mubr.bf16.gmra.mrb[20].mxu0 %v18672_v2  ;;  %v15764_v15 = vadd.f32 %v15633_v34, %v3752_v24  ;;  %v4184_v34 = vrot.slane %v15190_v50, 1  ;;  %v4186_v50 = vrot.slane %v18591_v35, 1  ;;  %v12800_v35 = vld [vmem:[%s12967_s18 + $0xe8] sm:$0xff]  }
 0x458   : > { %11875 = vmatprep.mubr.msk.bf16.mxu0 %vm12879_vm0, %v18356_v44 }
 0x45a   : > { %v3670_v60 = vpop.f32.mrb[172].mxu0 }
 0x45b   : > { %v3753_v3 = vadd.f32 %v3670_v60, %v15328_v17  ;;  %v11629_v0 = vpop.f32.mrb[173].mxu0 }
 0x45c   : > { %v3673_v42 = vpop.f32.mrb[174].mxu0 }
 0x45d   : > { %v3754_v14 = vadd.f32 %v3673_v42, %v15333_v52  ;;  %v11630_v7 = vpop.f32.mrb[175].mxu0  ;;  %v15771_v47 = vadd.f32 %v15648_v19, %v3753_v3  ;;  %v18674_v52 = vld [vmem:[#allocation59_spill] sm:$0xff] }
 0x45e   : > { %v4185_v30 = vsel %vm1457_vm2, %v18674_v52, %v4184_v34 }
 0x45f   : > { %11876 = vmatmul.mubr.bf16.gmra.mrb[24].mxu0 %v18673_v48  ;;  %v15775_v8 = vadd.f32 %v15657_v62, %v3754_v14 }
 0x460   : > { %11879 = vmatprep.mubr.msk.bf16.mxu0 %vm12879_vm0, %v18356_v44 }
 0x462   : > { %v3678_v10 = vpop.f32.mrb[176].mxu0 }
 0x463   : > { %v3755_v17 = vadd.f32 %v3678_v10, %v15343_v49  ;;  %v11633_v33 = vpop.f32.mrb[177].mxu0 }
 0x464   : > { %v3681_v5 = vpop.f32.mrb[178].mxu0  ;;  %v12801_v33 = vld [vmem:[%s12967_s18 + $0xf0] ss:$0 sps:$4 sm:$0xff]  }
 0x465   : > { %v3756_v19 = vadd.f32 %v3681_v5, %v15348_v21  ;;  %v11634_v24 = vpop.f32.mrb[179].mxu0  ;;  %v15785_v40 = vadd.f32 %v15675_v31, %v3755_v17  ;;  %v4187_v21 = vsel %vm1457_vm2, %v4184_v34, %v4186_v50  ;;  %v4190_v5 = vrot.slane %v12801_v33, 1 }
 0x467   : > { %11880 = vmatmul.mubr.bf16.gmra.mrb[28].mxu0 %v4185_v30  ;;  %v15788_v62 = vadd.f32 %v15684_v39, %v3756_v19  ;;  %v5197_v19 = vlaneseq }
 0x468   : > { %11883 = vmatprep.mubr.msk.bf16.mxu0 %vm12879_vm0, %v18356_v44 }
 0x46a   : > { %v3686_v49 = vpop.f32.mrb[180].mxu0 }
 0x46b   : > { %v3757_v2 = vadd.f32 %v3686_v49, %v15358_v12  ;;  %v11637_v60 = vpop.f32.mrb[181].mxu0  ;;  %v4188_v12 = vrot.slane %v12800_v35, 1 }
 0x46c   : > { %v3689_v3 = vpop.f32.mrb[182].mxu0 }
 0x46d   : > { %v3758_v31 = vadd.f32 %v3689_v3, %v15363_v61  ;;  %v11638_v0 = vpop.f32.mrb[183].mxu0  ;;  %v15797_v42 = vadd.f32 %v15699_v45, %v3757_v2  ;;  %v4189_v61 = vsel %vm1457_vm2, %v4186_v50, %v4188_v12 }
 0x46f   : > { %11884 = vmatmul.mubr.bf16.gmra.mrb[32].mxu0 %v4187_v21  ;;  %v15800_v39 = vadd.f32 %v15708_v41, %v3758_v31 }
 0x470   : > { %11887 = vmatprep.mubr.msk.bf16.mxu0 %vm12879_vm0, %v18356_v44 }
 0x472   : > { %v3694_v14 = vpop.f32.mrb[184].mxu0 }
 0x473   : > { %v3759_v7 = vadd.f32 %v3694_v14, %v15373_v59  ;;  %v11641_v48 = vpop.f32.mrb[185].mxu0 }
 0x474   : > { %v3697_v34 = vpop.f32.mrb[186].mxu0 }
 0x475   : > { %v3760_v45 = vadd.f32 %v3697_v34, %v15378_v27  ;;  %v11642_v10 = vpop.f32.mrb[187].mxu0  ;;  %v15809_v17 = vadd.f32 %v15717_v58, %v3759_v7  ;;  %v4191_v27 = vsel %vm1457_vm2, %v4188_v12, %v4190_v5 }
 0x477   : > { %11888 = vmatmul.mubr.bf16.gmra.mrb[36].mxu0 %v4189_v61  ;;  %v15812_v41 = vadd.f32 %v15723_v53, %v3760_v45  ;;  %v5198_v53 = vshrl.u32 %v5197_v19, 7 }
 0x478   : > { %11891 = vmatprep.mubr.msk.bf16.mxu0 %vm12879_vm0, %v18356_v44  ;;  %v4770_v44 = vld [vmem:[%s18080_s3] sm:$0x1] }
 0x479   : > { %v5199_v31 = vsub.s32 0, %v5198_v53 }
 0x47a   : > { %v3702_v59 = vpop.f32.mrb[188].mxu0 }
 0x47b   : > { %v3761_v52 = vadd.f32 %v3702_v59, %v15388_v36  ;;  %v11645_v30 = vpop.f32.mrb[189].mxu0  ;;  %v15829_v36 = vpack.c.bf16 %v4770_v44, %v4770_v44 }
 0x47c   : > { %v3705_v24 = vpop.f32.mrb[190].mxu0 }
 0x47d   : > { %v3762_v58 = vadd.f32 %v3705_v24, %v15394_v63  ;;  %v11646_v50 = vpop.f32.mrb[191].mxu0  ;;  %v15821_v49 = vadd.f32 %v15732_v1, %v3761_v52  ;;  %v15834_v63 = vld [vmem:[%s18079_s2] ss:$0 sm:$0xff]  ;;  %v5195_v21 = vpack.i.b16 %v15829_v36, %v15829_v36 }
 0x47f   : > { %11892 = vmatmul.mubr.bf16.gmra.mrb[40].mxu0 %v4191_v27  ;;  %v15827_v2 = vadd.f32 %v15738_v18, %v3762_v58  ;;  %v5200_v48 = vrot.slane %v5195_v21, %v5199_v31 }
 0x481   : > { %v15842_v10 = vcombine.low %v5200_v48, %v5200_v48 }
 0x482   : > { %v4278_v60 = vpop.f32.mrb[192].mxu0 }
 0x483   : > { %v4493_v1 = vadd.f32 %v4278_v60, %v15403_v51  ;;  %v11789_v3 = vpop.f32.mrb[193].mxu0 }
 0x484   : > { %v4281_v0 = vpop.f32.mrb[194].mxu0 }
 0x485   : > { %v4554_v35 = vadd.f32 %v15834_v63, %v4493_v1  ;;  %v4494_v18 = vadd.f32 %v4281_v0, %v15409_v56  ;;  %v11790_v12 = vpop.f32.mrb[195].mxu0 }
 0x487   : > { %v4662_v14 = vmul.f32 0.3, %v4554_v35  ;;  %v4555_v7 = vadd.f32 %v15834_v63, %v4494_v18  ;;  %vm4608_vm3 = vcmp.ge.f32.partialorder %v4554_v35, 0.0 }
 0x489   : > { %vm4609_vm4 = vcmp.ge.f32.partialorder %v4555_v7, 0.0  ;;  %v4663_v34 = vmul.f32 0.3, %v4555_v7  ;;  %v4716_v51 = vsel %vm4608_vm3, %v4554_v35, %v4662_v14 }
 0x48a   : > { %v4286_v61 = vpop.f32.mrb[196].mxu0 }
 0x48b   : > { %v4717_v45 = vsel %vm4609_vm4, %v4555_v7, %v4663_v34  ;;  %v4495_v33 = vadd.f32 %v4286_v61, %v15421_v11  ;;  %v11793_v5 = vpop.f32.mrb[197].mxu0  ;;  %v15863_v7 = vshll.u32 %v15829_v36, 16 }
 0x48c   : > { %v10018_v59 = vpack.c.bf16 %v4717_v45, %v4716_v51  ;;  %v4289_v52 = vpop.f32.mrb[198].mxu0 }
 0x48d   : > { %v4556_v56 = vadd.f32 %v15834_v63, %v4495_v33  ;;  %v4496_v30 = vadd.f32 %v4289_v52, %v15427_v13  ;;  %v11794_v19 = vpop.f32.mrb[199].mxu0 }
 0x48e   : > { %10019 = vst [vmem:[#allocation2] sm:$0xff] %v10018_v59  }
 0x48f   : > { %5206 = vst [vmem:[#allocation2 + $0x4] sm:$0xf] %v15842_v10  ;;  %v4664_v24 = vmul.f32 0.3, %v4556_v56  ;;  %v4557_v27 = vadd.f32 %v15834_v63, %v4496_v30  ;;  %vm4610_vm7 = vcmp.ge.f32.partialorder %v4556_v56, 0.0 }
 0x491   : > { %vm4611_vm8 = vcmp.ge.f32.partialorder %v4557_v27, 0.0  ;;  %v4665_v58 = vmul.f32 0.3, %v4557_v27  ;;  %v4718_v44 = vsel %vm4610_vm7, %v4556_v56, %v4664_v24 }
 0x492   : > { %v4294_v11 = vpop.f32.mrb[200].mxu0 }
 0x493   : > { %v4719_v13 = vsel %vm4611_vm8, %v4557_v27, %v4665_v58  ;;  %v4497_v53 = vadd.f32 %v4294_v11, %v15436_v29  ;;  %v11797_v60 = vpop.f32.mrb[201].mxu0 }
 0x494   : > { %v10023_v1 = vpack.c.bf16 %v4719_v13, %v4718_v44  ;;  %v4297_v3 = vpop.f32.mrb[202].mxu0 }
 0x495   : > { %v5067_v21 = vld [vmem:[#allocation2] sm:$0x1]  ;;  %v4558_v31 = vadd.f32 %v15834_v63, %v4497_v53  ;;  %v4498_v0 = vadd.f32 %v4297_v3, %v15442_v16  ;;  %v11798_v35 = vpop.f32.mrb[203].mxu0 }
 0x496   : > { %v5068_v18 = vsel %vm15850_vm9, %v15829_v36, %v5067_v21  ;;  %10150 = vst [vmem:[#allocation2 + $0x8] sm:$0xff] %v10023_v1  }
 0x497   : > { %5069 = vst [vmem:[#allocation2] sm:$0x1] %v5068_v18  ;;  %v4666_v12 = vmul.f32 0.3, %v4558_v31  ;;  %v4559_v14 = vadd.f32 %v15834_v63, %v4498_v0  ;;  %vm4612_vm11 = vcmp.ge.f32.partialorder %v4558_v31, 0.0 }
 0x498   : > { %5205 = vst [vmem:[#allocation2] sm:$0xf] %v15842_v10 }
 0x499   : > { %vm4613_vm12 = vcmp.ge.f32.partialorder %v4559_v14, 0.0  ;;  %v4667_v29 = vmul.f32 0.3, %v4559_v14  ;;  %v4720_v34 = vsel %vm4612_vm11, %v4558_v31, %v4666_v12 }
 0x49a   : > { %v4302_v16 = vpop.f32.mrb[204].mxu0 }
 0x49b   : > { %v4721_v61 = vsel %vm4613_vm12, %v4559_v14, %v4667_v29  ;;  %v4499_v51 = vadd.f32 %v4302_v16, %v15451_v46  ;;  %v11801_v45 = vpop.f32.mrb[205].mxu0 }
 0x49c   : > { %v10028_v33 = vpack.c.bf16 %v4721_v61, %v4720_v34  ;;  %v4305_v5 = vpop.f32.mrb[206].mxu0 }
 0x49d   : > { %v5070_v59 = vld [vmem:[#allocation2 + $0xc] sm:$0x1]  ;;  %v5133_v52 = vld [vmem:[#allocation2 + $0x8] sm:$0x1]  ;;  %v4560_v56 = vadd.f32 %v15834_v63, %v4499_v51  ;;  %v4500_v30 = vadd.f32 %v4305_v5, %v15457_v25  ;;  %v11802_v19 = vpop.f32.mrb[207].mxu0  ;;  %v15884_v25 = vld [vmem:[%s18081_s4] sm:$0xff]  }
 0x49e   : > { %v5071_v24 = vsel %vm15850_vm9, %v15829_v36, %v5070_v59  ;;  %v5134_v27 = vsel %vm15866_vm13, %v15863_v7, %v5133_v52  ;;  %10151 = vst [vmem:[#allocation2 + $0x10] sm:$0xff] %v10028_v33   ;;  %11959 = vmatprep.subr.bf16.mxu1 %v15884_v25 }
 0x49f   : > { %5072 = vst [vmem:[#allocation2 + $0xc] sm:$0x1] %v5071_v24  ;;  %5135 = vst [vmem:[#allocation2 + $0x8] sm:$0x1] %v5134_v27  ;;  %v4668_v46 = vmul.f32 0.3, %v4560_v56  ;;  %v4561_v58 = vadd.f32 %v15834_v63, %v4500_v30 }
 0x4a0   : > { %v12665_v11 = vld [vmem:[#allocation2] sm:$0xff]   ;;  %5207 = vst [vmem:[#allocation2 + $0x8] sm:$0xf] %v15842_v10  ;;  %vm4614_vm14 = vcmp.ge.f32.partialorder %v4560_v56, 0.0 }
 0x4a1   : > { %vm4615_vm15 = vcmp.ge.f32.partialorder %v4561_v58, 0.0  ;;  %v4669_v44 = vmul.f32 0.3, %v4561_v58  ;;  %v5426_v53 = vshll.u32 %v12665_v11, 16  ;;  %v4722_v60 = vsel %vm4614_vm14, %v4560_v56, %v4668_v46 }
 0x4a2   : > { %v4310_v13 = vpop.f32.mrb[208].mxu0  ;;  %v5424_v61 = vshrl.u32 %v12665_v11, 16 }
 0x4a3   : > { %v4723_v1 = vsel %vm4615_vm15, %v4561_v58, %v4669_v44  ;;  %v4501_v3 = vadd.f32 %v4310_v13, %v15466_v4  ;;  %v11805_v21 = vpop.f32.mrb[209].mxu0  ;;  %v5428_v51 = vrot.slane %v5426_v53, 1 }
 0x4a4   : > { %v10033_v31 = vpack.c.bf16 %v4723_v1, %v4722_v60  ;;  %v4313_v0 = vpop.f32.mrb[210].mxu0 }
 0x4a5   : > { %v5136_v35 = vld [vmem:[#allocation2 + $0x14] sm:$0x1]  ;;  %v4562_v18 = vadd.f32 %v15834_v63, %v4501_v3  ;;  %v4502_v12 = vadd.f32 %v4313_v0, %v15475_v57  ;;  %v11806_v14 = vpop.f32.mrb[211].mxu0  ;;  %v5216_v29 = vld [vmem:[#allocation2 + $0x10] sm:$0xf]  ;;  %v5429_v56 = vor.u32 %v5428_v51, %v5424_v61 }
 0x4a6   : > { %v5137_v16 = vsel %vm15866_vm13, %v15863_v7, %v5136_v35  ;;  %10152 = vst [vmem:[#allocation2 + $0x18] sm:$0xff] %v10033_v31   ;;  %v5215_v34 = vld [vmem:[#allocation2 + $0xc] sm:$0xf] }
 0x4a7   : > { %5138 = vst [vmem:[#allocation2 + $0x14] sm:$0x1] %v5137_v16  ;;  %v4670_v4 = vmul.f32 0.3, %v4562_v18  ;;  %v4563_v45 = vadd.f32 %v15834_v63, %v4502_v12  ;;  %v5214_v33 = vld [vmem:[#allocation2 + $0x8] sm:$0xf]  ;;  %v15894_v5 = vcombine.low %v5215_v34, %v5216_v29 }
 0x4a8   : > { %vm4616_vm0 = vcmp.ge.f32.partialorder %v4562_v18, 0.0  ;;  %v15896_v59 = vcombine.low %v5214_v33, %v5215_v34 }
 0x4a9   : > { %vm4617_vm3 = vcmp.ge.f32.partialorder %v4563_v45, 0.0  ;;  %v4671_v57 = vmul.f32 0.3, %v4563_v45  ;;  %12103 = vmatprep.mubr.bf16.mxu0 %v15894_v5  ;;  %v4724_v19 = vsel %vm4616_vm0, %v4562_v18, %v4670_v4 }
 0x4aa   : > { %v4318_v52 = vpop.f32.mrb[212].mxu0  ;;  %v5431_v30 = vshll.u32 %v15896_v59, 16  ;;  %v5435_v18 = vshrl.u32 %v15896_v59, 16 }
 0x4ab   : > { %v4725_v24 = vsel %vm4617_vm3, %v4563_v45, %v4671_v57  ;;  %v4503_v27 = vadd.f32 %v4318_v52, %v15484_v54  ;;  %v11809_v46 = vpop.f32.mrb[213].mxu0  ;;  %v12694_v57 = vld [vmem:[%s18081_s4 + $0x8] sm:$0xff]   ;;  %v6941_v52 = vshll.u32 %v15894_v5, 16 }
 0x4ac   : > { %v10038_v58 = vpack.c.bf16 %v4725_v24, %v4724_v19  ;;  %v4321_v11 = vpop.f32.mrb[214].mxu0  ;;  %v5433_v44 = vrot.slane %v5431_v30, 1 }
 0x4ad   : > { %v5073_v13 = vld [vmem:[#allocation2 + $0x18] sm:$0x1]  ;;  %v4564_v53 = vadd.f32 %v15834_v63, %v4503_v27  ;;  %v4504_v60 = vadd.f32 %v4321_v11, %v15490_v20  ;;  %v11810_v1 = vpop.f32.mrb[215].mxu0 }
 0x4ae   : > { %v5074_v3 = vsel %vm15850_vm9, %v15829_v36, %v5073_v13  ;;  %10153 = vst [vmem:[#allocation2 + $0x20] sm:$0xff] %v10038_v58   ;;  %v5217_v21 = vld [vmem:[#allocation2 + $0x14] sm:$0xf]  ;;  %v5434_v31 = vsel %vm571_vm1, %v5429_v56, %v5433_v44  ;;  %v5437_v14 = vor.u32 %v5435_v18, %v5433_v44  ;;  %v5219_v44 = vld [vmem:[#allocation2 + $0x1c] sm:$0xf] }
 0x4af   : > { %5075 = vst [vmem:[#allocation2 + $0x18] sm:$0x1] %v5074_v3  ;;  %v15907_v54 = vcombine.low %v5216_v29, %v5217_v21  ;;  %v4672_v0 = vmul.f32 0.3, %v4564_v53  ;;  %v4565_v35 = vadd.f32 %v15834_v63, %v4504_v60  ;;  %11911 = vmatprep.mubr.bf16.mxu1 %v5434_v31  ;;  %vm4618_vm4 = vcmp.ge.f32.partialorder %v4564_v53, 0.0  ;;  %v12699_v1 = vld [vmem:[%s18081_s4 + $0x10] sm:$0xff]  }
 0x4b0   : > { %v7464_v3 = vrot.slane %v15894_v5, 1  ;;  %v6943_v31 = vrot.slane %v6941_v52, 1 }
 0x4b1   : > { %v5439_v20 = vshll.u32 %v15907_v54, 16  ;;  %vm4619_vm5 = vcmp.ge.f32.partialorder %v4565_v35, 0.0  ;;  %v4673_v12 = vmul.f32 0.3, %v4565_v35  ;;  %v4726_v34 = vsel %vm4618_vm4, %v4564_v53, %v4672_v0 }
 0x4b2   : > { %v4326_v16 = vpop.f32.mrb[216].mxu0  ;;  %v5443_v0 = vshrl.u32 %v15907_v54, 16 }
 0x4b3   : > { %v4727_v61 = vsel %vm4619_vm5, %v4565_v35, %v4673_v12  ;;  %v5441_v51 = vrot.slane %v5439_v20, 1  ;;  %v4505_v4 = vadd.f32 %v4326_v16, %v15499_v26  ;;  %v11813_v29 = vpop.f32.mrb[217].mxu0  ;;  %v6939_v20 = vshrl.u32 %v15894_v5, 16 }
 0x4b4   : > { %v10043_v45 = vpack.c.bf16 %v4727_v61, %v4726_v34  ;;  %v4329_v33 = vpop.f32.mrb[218].mxu0 }
 0x4b5   : > { %v5076_v56 = vld [vmem:[#allocation2 + $0x24] sm:$0x1]  ;;  %v5139_v30 = vld [vmem:[#allocation2 + $0x20] sm:$0x1]  ;;  %v5442_v19 = vsel %vm571_vm1, %v5437_v14, %v5441_v51  ;;  %v4566_v24 = vadd.f32 %v15834_v63, %v4505_v4  ;;  %v4506_v27 = vadd.f32 %v4329_v33, %v15505_v23  ;;  %v11814_v46 = vpop.f32.mrb[219].mxu0  ;;  %v18679_v14 = vld [vmem:[#allocation112_spill] sm:$0xff]  ;;  %v5445_v61 = vor.u32 %v5443_v0, %v5441_v51 }
 0x4b6   : > { %v5077_v26 = vsel %vm15850_vm9, %v15829_v36, %v5076_v56  ;;  %v5140_v58 = vsel %vm15866_vm13, %v15863_v7, %v5139_v30  ;;  %v5218_v11 = vld [vmem:[#allocation2 + $0x18] sm:$0xf]  ;;  %10154 = vst [vmem:[#allocation2 + $0x28] sm:$0xff] %v10043_v45   ;;  %11912 = vmatmul.mubr.bf16.vlgmr.msra.gmra.mrb[160].mxu1 %v5442_v19  ;;  %v6944_v56 = vor.u32 %v6943_v31, %v6939_v20  ;;  %v18680_v46 = vld [vmem:[#allocation114_spill] sm:$0xff] }
 0x4b7   : > { %5078 = vst [vmem:[#allocation2 + $0x24] sm:$0x1] %v5077_v26  ;;  %5141 = vst [vmem:[#allocation2 + $0x20] sm:$0x1] %v5140_v58  ;;  %v15926_v13 = vcombine.low %v5218_v11, %v5219_v44  ;;  %v15928_v53 = vcombine.low %v5217_v21, %v5218_v11  ;;  %11960 = vmatpush3.bf16.msra.mxu1 %v15884_v25  ;;  %v4674_v23 = vmul.f32 0.3, %v4566_v24 }
 0x4b8   : > { %v4567_v60 = vadd.f32 %v15834_v63, %v4506_v27  ;;  %11961 = vmatprep.subr.bf16.mxu1 %v12694_v57  ;;  %vm4620_vm6 = vcmp.ge.f32.partialorder %v4566_v24, 0.0 }
 0x4b9   : > { %12104 = vmatmul.mubr.bf16.vlgmr.msra.gmra.mrb[44].mxu0 %v15928_v53  ;;  %v5447_v21 = vshll.u32 %v15926_v13, 16  ;;  %v7465_v25 = vrot.slane %v15928_v53, 1  ;;  %v6946_v12 = vshll.u32 %v15928_v53, 16  ;;  %v4728_v45 = vsel %vm4620_vm6, %v4566_v24, %v4674_v23 }
 0x4ba   : > { %vm4621_vm7 = vcmp.ge.f32.partialorder %v4567_v60, 0.0  ;;  %v4675_v35 = vmul.f32 0.3, %v4567_v60  ;;  %v4334_v18 = vpop.f32.mrb[220].mxu0  ;;  %v5451_v0 = vshrl.u32 %v15926_v13, 16 }
 0x4bb   : > { %v4507_v16 = vadd.f32 %v4334_v18, %v18679_v14  ;;  %v11817_v34 = vpop.f32.mrb[221].mxu0  ;;  %v5449_v4 = vrot.slane %v5447_v21, 1  ;;  %11962 = vmatpush3.bf16.msra.mxu1 %v12694_v57  ;;  %v15946_v29 = vsel %vm1457_vm2, %v7464_v3, %v7465_v25  ;;  %v6948_v5 = vrot.slane %v6946_v12, 1 }
 0x4bc   : > { %v4729_v33 = vsel %vm4621_vm7, %v4567_v60, %v4675_v35  ;;  %v4337_v52 = vpop.f32.mrb[222].mxu0  ;;  %11963 = vmatprep.subr.bf16.mxu1 %v12699_v1  ;;  %v12703_v35 = vld [vmem:[%s18081_s4 + $0x18] sm:$0xff]   ;;  %v6950_v12 = vshrl.u32 %v15928_v53, 16 }
 0x4bd   : > { %v5142_v30 = vld [vmem:[#allocation2 + $0x2c] sm:$0x1]  ;;  %v10048_v19 = vpack.c.bf16 %v4729_v33, %v4728_v45  ;;  %v4568_v27 = vadd.f32 %v15834_v63, %v4507_v16  ;;  %v4508_v51 = vadd.f32 %v4337_v52, %v18680_v46  ;;  %v11818_v26 = vpop.f32.mrb[223].mxu0  ;;  %v5450_v57 = vsel %vm571_vm1, %v5445_v61, %v5449_v4  ;;  %v5222_v58 = vld [vmem:[#allocation2 + $0x28] sm:$0xf] }
 0x4be   : > { %v5143_v11 = vsel %vm15866_vm13, %v15863_v7, %v5142_v30  ;;  %11915 = vmatprep.mubr.bf16.mxu1 %v5450_v57  ;;  %v5220_v24 = vld [vmem:[#allocation2 + $0x20] sm:$0xf]  ;;  %v5221_v23 = vld [vmem:[#allocation2 + $0x24] sm:$0xf]  ;;  %v15956_v60 = vsel %vm571_vm1, %v6944_v56, %v6948_v5  ;;  %v5453_v16 = vor.u32 %v5451_v0, %v5449_v4  ;;  %v6952_v52 = vor.u32 %v6950_v12, %v6948_v5 }
 0x4bf   : > { %18681 = vst [vmem:[#allocation131_spill] sm:$0xff] %v15956_v60  ;;  %5144 = vst [vmem:[#allocation2 + $0x2c] sm:$0x1] %v5143_v11  ;;  %v4676_v3 = vmul.f32 0.3, %v4568_v27  ;;  %v4569_v31 = vadd.f32 %v15834_v63, %v4508_v51  ;;  %v15960_v21 = vcombine.low %v5220_v24, %v5221_v23  ;;  %11964 = vmatpush3.bf16.msra.mxu1 %v12699_v1  ;;  %vm4622_vm8 = vcmp.ge.f32.partialorder %v4568_v27, 0.0 }
 0x4c0   : > { %10155 = vst [vmem:[#allocation2 + $0x30] sm:$0xff] %v10048_v19   ;;  %v9799_v18 = vcombine.low %v5219_v44, %v5220_v24  ;;  %v15965_v20 = vcombine.low %v5221_v23, %v5222_v58  ;;  %11965 = vmatprep.subr.bf16.mxu1 %v12703_v35  ;;  %v18682_v44 = vld [vmem:[#allocation116_spill] sm:$0xff]  ;;  %v18683_v24 = vld [vmem:[#allocation6_spill] sm:$0xff] }
 0x4c1   : > { %vm4623_vm10 = vcmp.ge.f32.partialorder %v4569_v31, 0.0  ;;  %v4677_v14 = vmul.f32 0.3, %v4569_v31  ;;  %v5455_v34 = vshll.u32 %v15960_v21, 16  ;;  %v4730_v56 = vsel %vm4622_vm8, %v4568_v27, %v4676_v3  ;;  %v18689_v60 = vld [vmem:[#allocation120_spill] sm:$0xff] }
 0x4c2   : > { %12107 = vmatprep.mubr.bf16.mxu0 %v9799_v18  ;;  %v6954_v61 = vshll.u32 %v9799_v18, 16  ;;  %v4342_v45 = vpop.f32.mrb[224].mxu0  ;;  %v7467_v1 = vrot.slane %v9799_v18, 1  ;;  %v18201_v33 = vrot.slane %v15965_v20, 1 }
 0x4c3   : > { %v4731_v30 = vsel %vm4623_vm10, %v4569_v31, %v4677_v14  ;;  %v4509_v19 = vadd.f32 %v4342_v45, %v18682_v44  ;;  %12108 = vmatmul.mubr.bf16.gmra.mrb[48].mxu0 %v15965_v20  ;;  %v11821_v46 = vpop.f32.mrb[225].mxu0  ;;  %v5457_v51 = vrot.slane %v5455_v34, 1  ;;  %11966 = vmatpush3.bf16.msra.mxu1 %v12703_v35  ;;  %v5459_v45 = vshrl.u32 %v15960_v21, 16 }
 0x4c4   : > { %v10053_v4 = vpack.c.bf16 %v4731_v30, %v4730_v56  ;;  %v6956_v26 = vrot.slane %v6954_v61, 1  ;;  %v4345_v57 = vpop.f32.mrb[226].mxu0  ;;  %v15975_v11 = vsel %vm1457_vm2, %v7465_v25, %v7467_v1  ;;  %v15980_v5 = vsel %vm1457_vm2, %v7467_v1, %v18201_v33 }
 0x4c5   : > { %v4570_v27 = vadd.f32 %v15834_v63, %v4509_v19  ;;  %v4510_v23 = vadd.f32 %v4345_v57, %v18683_v24  ;;  %v11822_v3 = vpop.f32.mrb[227].mxu0  ;;  %v15985_v31 = vsel %vm571_vm1, %v5453_v16, %v5457_v51  ;;  %v6958_v16 = vshrl.u32 %v9799_v18, 16  ;;  %v18687_v19 = vld [vmem:[#allocation118_spill] sm:$0xff] }
 0x4c6   : > { %18684 = vst [vmem:[#allocation18_spill] sm:$0xff] %v15985_v31  ;;  %10156 = vst [vmem:[#allocation2 + $0x38] sm:$0xff] %v10053_v4   ;;  %v5223_v35 = vld [vmem:[#allocation2 + $0x2c] sm:$0xf]  ;;  %11916 = vmatmul.mubr.bf16.gmra.mrb[164].mxu1 %v15985_v31  ;;  %v15989_v53 = vsel %vm571_vm1, %v6952_v52, %v6956_v26  ;;  %v6962_v61 = vshll.u32 %v15965_v20, 16  ;;  %v5461_v4 = vor.u32 %v5459_v45, %v5457_v51  ;;  %v12709_v45 = vld [vmem:[%s18081_s4 + $0x20] sm:$0xff]  }
 0x4c7   : > { %v5079_v0 = vld [vmem:[#allocation2 + $0x30] sm:$0x1]  ;;  %18685 = vst [vmem:[#allocation3_spill] sm:$0xff] %v15989_v53  ;;  %v15994_v12 = vcombine.low %v5222_v58, %v5223_v35  ;;  %v4678_v14 = vmul.f32 0.3, %v4570_v27  ;;  %v4571_v34 = vadd.f32 %v15834_v63, %v4510_v23  ;;  %vm4624_vm11 = vcmp.ge.f32.partialorder %v4570_v27, 0.0  ;;  %11967 = vmatprep.subr.bf16.mxu1 %v12709_v45 }
 0x4c8   : > { %v5080_v25 = vsel %vm15850_vm9, %v15829_v36, %v5079_v0  ;;  %v6960_v30 = vor.u32 %v6958_v16, %v6956_v26  ;;  %v6964_v44 = vrot.slane %v6962_v61, 1  ;;  %11968 = vmatpush3.bf16.msra.mxu1 %v12709_v45  ;;  %v18693_v45 = vrot.slane %v15965_v20, 1 }
 0x4c9   : > { %18686 = vst [vmem:[#allocation21_spill] sm:$0xff] %v15994_v12  ;;  %5081 = vst [vmem:[#allocation2 + $0x30] sm:$0x1] %v5080_v25  ;;  %v5463_v1 = vshll.u32 %v15994_v12, 16  ;;  %vm4625_vm12 = vcmp.ge.f32.partialorder %v4571_v34, 0.0  ;;  %v4732_v24 = vsel %vm4624_vm11, %v4570_v27, %v4678_v14 }
 0x4ca   : > { %v4679_v52 = vmul.f32 0.3, %v4571_v34  ;;  %v4350_v56 = vpop.f32.mrb[228].mxu0  ;;  %v16002_v3 = vsel %vm571_vm1, %v6960_v30, %v6964_v44  ;;  %v5225_v14 = vld [vmem:[#allocation2 + $0x34] sm:$0xf] }
 0x4cb   : > { %v4511_v58 = vadd.f32 %v4350_v56, %v18687_v19  ;;  %v11825_v46 = vpop.f32.mrb[229].mxu0  ;;  %v5465_v57 = vrot.slane %v5463_v1, 1  ;;  %18688 = vst [vmem:[#allocation4_spill] sm:$0xff] %v16002_v3  ;;  %v6966_v56 = vshrl.u32 %v15965_v20, 16  ;;  %v5467_v19 = vshrl.u32 %v15994_v12, 16 }
 0x4cc   : > { %v4733_v23 = vsel %vm4625_vm12, %v4571_v34, %v4679_v52  ;;  %v4353_v18 = vpop.f32.mrb[230].mxu0 }
 0x4cd   : > { %v5082_v0 = vld [vmem:[#allocation2 + $0x3c] sm:$0x1]  ;;  %v5145_v25 = vld [vmem:[#allocation2 + $0x38] sm:$0x1]  ;;  %v10058_v33 = vpack.c.bf16 %v4733_v23, %v4732_v24  ;;  %v4572_v53 = vadd.f32 %v15834_v63, %v4511_v58  ;;  %v4512_v31 = vadd.f32 %v4353_v18, %v18689_v60  ;;  %v11826_v26 = vpop.f32.mrb[231].mxu0  ;;  %v16007_v16 = vsel %vm571_vm1, %v5461_v4, %v5465_v57 }
 0x4ce   : > { %18690 = vst [vmem:[#allocation22_spill] sm:$0xff] %v16007_v16  ;;  %v5083_v51 = vsel %vm15850_vm9, %v15829_v36, %v5082_v0  ;;  %v5146_v27 = vsel %vm15866_vm13, %v15863_v7, %v5145_v25  ;;  %11919 = vmatprep.mubr.bf16.mxu1 %v16007_v16  ;;  %v6968_v4 = vor.u32 %v6966_v56, %v6964_v44  ;;  %v18692_v0 = vld [vmem:[#allocation8_spill] sm:$0xff]  ;;  %v18695_v56 = vld [vmem:[#allocation121_spill] sm:$0xff] }
 0x4cf   : > { %5084 = vst [vmem:[#allocation2 + $0x3c] sm:$0x1] %v5083_v51  ;;  %5147 = vst [vmem:[#allocation2 + $0x38] sm:$0x1] %v5146_v27  ;;  %v4680_v34 = vmul.f32 0.3, %v4572_v53  ;;  %v4573_v60 = vadd.f32 %v15834_v63, %v4512_v31  ;;  %v5469_v18 = vor.u32 %v5467_v19, %v5465_v57 }
 0x4d0   : > { %10157 = vst [vmem:[#allocation2 + $0x40] sm:$0xff] %v10058_v33   ;;  %v5224_v61 = vld [vmem:[#allocation2 + $0x30] sm:$0xf]  ;;  %vm4626_vm14 = vcmp.ge.f32.partialorder %v4572_v53, 0.0 }
 0x4d1   : > { %v16020_v1 = vcombine.low %v5224_v61, %v5225_v14  ;;  %v16022_v52 = vcombine.low %v5223_v35, %v5224_v61  ;;  %vm4627_vm15 = vcmp.ge.f32.partialorder %v4573_v60, 0.0  ;;  %v4681_v30 = vmul.f32 0.3, %v4573_v60  ;;  %v12715_v35 = vld [vmem:[%s18081_s4 + $0x140] sm:$0xff]  }
 0x4d2   : > { %v4358_v31 = vpop.f32.mrb[232].mxu0  ;;  %v4734_v24 = vsel %vm4626_vm14, %v4572_v53, %v4680_v34  ;;  %12215 = vmatprep.subr.bf16.mxu0 %v12715_v35 }
 0x4d3   : > { %18691 = vst [vmem:[#allocation5_spill] sm:$0xff] %v16020_v1  ;;  %12111 = vmatprep.mubr.bf16.mxu0 %v16022_v52  ;;  %v6970_v33 = vshll.u32 %v16022_v52, 16  ;;  %v5471_v58 = vshll.u32 %v16020_v1, 16  ;;  %v7471_v46 = vrot.slane %v16022_v52, 1  ;;  %v4735_v23 = vsel %vm4627_vm15, %v4573_v60, %v4681_v30  ;;  %v11829_v26 = vpop.f32.mrb[233].mxu0  ;;  %12216 = vmatpush3.bf16.msra.mxu0 %v12715_v35  ;;  %v12716_v35 = vld [vmem:[%s18081_s4 + $0x148] sm:$0xff]  }
 0x4d4   : > { %v4513_v25 = vadd.f32 %v4358_v31, %v18692_v0  ;;  %v10063_v51 = vpack.c.bf16 %v4735_v23, %v4734_v24  ;;  %v4361_v61 = vpop.f32.mrb[234].mxu0  ;;  %v5475_v0 = vshrl.u32 %v16020_v1, 16  ;;  %12217 = vmatprep.subr.bf16.mxu0 %v12716_v35  ;;  %v18701_v1 = vld [vmem:[#allocation10_spill] sm:$0xff] }
 0x4d5   : > { %v16035_v27 = vrot.slane %v6970_v33, 1  ;;  %v5473_v3 = vrot.slane %v5471_v58, 1  ;;  %v16040_v16 = vsel %vm1457_vm2, %v18693_v45, %v7471_v46  ;;  %v4514_v53 = vadd.f32 %v4361_v61, %v18695_v56  ;;  %v11830_v34 = vpop.f32.mrb[235].mxu0  ;;  %v18699_v56 = vld [vmem:[#allocation123_spill] sm:$0xff] }
 0x4d6   : > { %18694 = vst [vmem:[#allocation24_spill] sm:$0xff] %v16040_v16  ;;  %v4574_v44 = vadd.f32 %v15834_v63, %v4513_v25  ;;  %10158 = vst [vmem:[#allocation2 + $0x48] sm:$0xff] %v10063_v51   ;;  %v5226_v60 = vld [vmem:[#allocation2 + $0x38] sm:$0xf]  ;;  %v5227_v19 = vld [vmem:[#allocation2 + $0x3c] sm:$0xf] }
 0x4d7   : > { %v5148_v57 = vld [vmem:[#allocation2 + $0x44] sm:$0x1]  ;;  %v16045_v30 = vsel %vm571_vm1, %v5469_v18, %v5473_v3  ;;  %v16049_v33 = vsel %vm571_vm1, %v6968_v4, %v16035_v27  ;;  %v16054_v31 = vcombine.low %v5225_v14, %v5226_v60  ;;  %v5228_v58 = vld [vmem:[#allocation2 + $0x40] sm:$0xf]  ;;  %v4575_v23 = vadd.f32 %v15834_v63, %v4514_v53  ;;  %v12710_v14 = vld [vmem:[%s18081_s4 + $0x28] sm:$0xff]   ;;  %12218 = vmatpush3.bf16.msra.mxu0 %v12716_v35 }
 0x4d8   : > { %18696 = vst [vmem:[#allocation7_spill] sm:$0xff] %v16045_v30  ;;  %18697 = vst [vmem:[#allocation26_spill] sm:$0xff] %v16049_v33  ;;  %v5149_v20 = vsel %vm15866_vm13, %v15863_v7, %v5148_v57  ;;  %11920 = vmatmul.mubr.bf16.gmra.mrb[168].mxu1 %v16045_v30  ;;  %v4682_v24 = vmul.f32 0.3, %v4574_v44  ;;  %v16061_v18 = vcombine.low %v5226_v60, %v5227_v19  ;;  %vm4628_vm0 = vcmp.ge.f32.partialorder %v4574_v44, 0.0  ;;  %v12718_v57 = vld [vmem:[%s18081_s4 + $0x150] sm:$0xff]  }
 0x4d9   : > { %5150 = vst [vmem:[#allocation2 + $0x44] sm:$0x1] %v5149_v20  ;;  %v16063_v4 = vcombine.low %v5227_v19, %v5228_v58  ;;  %12112 = vmatmul.mubr.bf16.gmra.mrb[52].mxu0 %v16054_v31  ;;  %v7473_v25 = vrot.slane %v16054_v31, 1  ;;  %vm4629_vm3 = vcmp.ge.f32.partialorder %v4575_v23, 0.0  ;;  %v4683_v26 = vmul.f32 0.3, %v4575_v23  ;;  %11969 = vmatprep.subr.bf16.mxu1 %v12710_v14 }
 0x4da   : > { %18698 = vst [vmem:[#allocation9_spill] sm:$0xff] %v16061_v18  ;;  %v4366_v51 = vpop.f32.mrb[236].mxu0  ;;  %v5479_v61 = vshll.u32 %v16061_v18, 16  ;;  %v6974_v45 = vshrl.u32 %v16022_v52, 16  ;;  %11970 = vmatpush3.bf16.msra.mxu1 %v12710_v14  ;;  %v6978_v20 = vshll.u32 %v16054_v31, 16  ;;  %v4736_v33 = vsel %vm4628_vm0, %v4574_v44, %v4682_v24  ;;  %12219 = vmatprep.subr.bf16.mxu0 %v12718_v57 }
 0x4db   : > { %12115 = vmatprep.mubr.bf16.mxu0 %v16063_v4  ;;  %v4515_v53 = vadd.f32 %v4366_v51, %v18699_v56  ;;  %v11833_v34 = vpop.f32.mrb[237].mxu0  ;;  %v16079_v60 = vsel %vm1457_vm2, %v7471_v46, %v7473_v25  ;;  %v18209_v19 = vrot.slane %v16063_v4, 1  ;;  %v4737_v52 = vsel %vm4629_vm3, %v4575_v23, %v4683_v26  ;;  %12220 = vmatpush3.bf16.msra.mxu0 %v12718_v57 }
 0x4dc   : > { %18700 = vst [vmem:[#allocation28_spill] sm:$0xff] %v16079_v60  ;;  %v4369_v30 = vpop.f32.mrb[238].mxu0  ;;  %v5477_v51 = vor.u32 %v5475_v0, %v5473_v3  ;;  %v5481_v56 = vrot.slane %v5479_v61, 1  ;;  %v10068_v35 = vpack.c.bf16 %v4737_v52, %v4736_v33  ;;  %v6986_v3 = vshll.u32 %v16063_v4, 16 }
 0x4dd   : > { %v5085_v14 = vld [vmem:[#allocation2 + $0x48] sm:$0x1]  ;;  %v4576_v34 = vadd.f32 %v15834_v63, %v4515_v53  ;;  %v4516_v12 = vadd.f32 %v4369_v30, %v18701_v1  ;;  %v11834_v16 = vpop.f32.mrb[239].mxu0  ;;  %v16090_v46 = vsel %vm1457_vm2, %v7473_v25, %v18209_v19  ;;  %v12719_v1 = vld [vmem:[%s18081_s4 + $0x158] sm:$0xff]   ;;  %v6976_v23 = vor.u32 %v6974_v45, %v16035_v27  ;;  %v12725_v27 = vld [vmem:[%s18081_s4 + $0x160] sm:$0xff]  }
 0x4de   : > { %18702 = vst [vmem:[#allocation11_spill] sm:$0xff] %v16090_v46  ;;  %v5086_v44 = vsel %vm15850_vm9, %v15829_v36, %v5085_v14  ;;  %v16097_v24 = vsel %vm571_vm1, %v5477_v51, %v5481_v56  ;;  %10159 = vst [vmem:[#allocation2 + $0x50] sm:$0xff] %v10068_v35   ;;  %v6980_v0 = vrot.slane %v6978_v20, 1  ;;  %12221 = vmatprep.subr.bf16.mxu0 %v12719_v1  ;;  %v6982_v26 = vshrl.u32 %v16054_v31, 16  ;;  %v18706_v31 = vld [vmem:[#allocation48_spill] sm:$0xff] }
 0x4df   : > { %18703 = vst [vmem:[#allocation30_spill] sm:$0xff] %v16097_v24  ;;  %5087 = vst [vmem:[#allocation2 + $0x48] sm:$0x1] %v5086_v44  ;;  %v4684_v16 = vmul.f32 0.3, %v4576_v34  ;;  %v4577_v33 = vadd.f32 %v15834_v63, %v4516_v12  ;;  %11923 = vmatprep.mubr.bf16.mxu1 %v16097_v24  ;;  %vm4630_vm4 = vcmp.ge.f32.partialorder %v4576_v34, 0.0  ;;  %12222 = vmatpush3.bf16.msra.mxu0 %v12719_v1 }
 0x4e0   : > { %v5229_v30 = vld [vmem:[#allocation2 + $0x44] sm:$0xf]  ;;  %v16109_v53 = vsel %vm571_vm1, %v6976_v23, %v6980_v0  ;;  %v16111_v52 = vrot.slane %v6986_v3, 1  ;;  %v5483_v12 = vshrl.u32 %v16061_v18, 16  ;;  %12223 = vmatprep.subr.bf16.mxu0 %v12725_v27  ;;  %v16123_v24 = vld [vmem:[#allocation2 + $0x4c] sm:$0xf] }
 0x4e1   : > { %v16105_v25 = vcombine.low %v5228_v58, %v5229_v30  ;;  %vm4631_vm5 = vcmp.ge.f32.partialorder %v4577_v33, 0.0  ;;  %v4685_v61 = vmul.f32 0.3, %v4577_v33  ;;  %18705 = vst [vmem:[#allocation32_spill] sm:$0xff] %v16109_v53  ;;  %v6984_v58 = vor.u32 %v6982_v26, %v6980_v0  ;;  %v18708_v0 = vld [vmem:[#allocation125_spill] sm:$0xff] }
 0x4e2   : > { %v4374_v51 = vpop.f32.mrb[240].mxu0  ;;  %v4738_v45 = vsel %vm4630_vm4, %v4576_v34, %v4684_v16  ;;  %v5485_v23 = vor.u32 %v5483_v12, %v5481_v56 }
 0x4e3   : > { %18704 = vst [vmem:[#allocation13_spill] sm:$0xff] %v16105_v25  ;;  %v5487_v57 = vshll.u32 %v16105_v25, 16  ;;  %v4739_v20 = vsel %vm4631_vm5, %v4577_v33, %v4685_v61  ;;  %v4517_v14 = vadd.f32 %v4374_v51, %v18706_v31  ;;  %v11837_v35 = vpop.f32.mrb[241].mxu0  ;;  %v16121_v53 = vsel %vm571_vm1, %v6984_v58, %v16111_v52  ;;  %v12717_v58 = vld [vmem:[%s18081_s4 + $0x30] sm:$0xff]   ;;  %12224 = vmatpush3.bf16.msra.mxu0 %v12725_v27 }
 0x4e4   : > { %v10073_v44 = vpack.c.bf16 %v4739_v20, %v4738_v45  ;;  %v4377_v3 = vpop.f32.mrb[242].mxu0  ;;  %18707 = vst [vmem:[#allocation15_spill] sm:$0xff] %v16121_v53  ;;  %v12727_v45 = vld [vmem:[%s18081_s4 + $0x168] sm:$0xff]   ;;  %11971 = vmatprep.subr.bf16.mxu1 %v12717_v58  ;;  %v12726_v35 = vld [vmem:[%s18081_s4 + $0x38] sm:$0xff]  }
 0x4e5   : > { %v5489_v19 = vrot.slane %v5487_v57, 1  ;;  %v4578_v18 = vadd.f32 %v15834_v63, %v4517_v14  ;;  %v4518_v34 = vadd.f32 %v4377_v3, %v18708_v0  ;;  %v11838_v16 = vpop.f32.mrb[243].mxu0  ;;  %v5088_v33 = vld [vmem:[#allocation2 + $0x54] sm:$0x1]  ;;  %v5151_v26 = vld [vmem:[#allocation2 + $0x50] sm:$0x1]  ;;  %11972 = vmatpush3.bf16.msra.mxu1 %v12717_v58  ;;  %12225 = vmatprep.subr.bf16.mxu0 %v12727_v45 }
 0x4e6   : > { %v5230_v61 = vld [vmem:[#allocation2 + $0x48] sm:$0xf]  ;;  %10160 = vst [vmem:[#allocation2 + $0x58] sm:$0xff] %v10073_v44   ;;  %v5089_v1 = vsel %vm15850_vm9, %v15829_v36, %v5088_v33  ;;  %v5152_v12 = vsel %vm15866_vm13, %v15863_v7, %v5151_v26  ;;  %v12728_v44 = vld [vmem:[%s18081_s4 + $0x170] sm:$0xff]   ;;  %v6990_v0 = vshrl.u32 %v16063_v4, 16  ;;  %11973 = vmatprep.subr.bf16.mxu1 %v12726_v35 }
 0x4e7   : > { %v16128_v56 = vsel %vm571_vm1, %v5485_v23, %v5489_v19  ;;  %v16137_v51 = vcombine.low %v5230_v61, %v16123_v24  ;;  %v16139_v57 = vcombine.low %v5229_v30, %v5230_v61  ;;  %5090 = vst [vmem:[#allocation2 + $0x54] sm:$0x1] %v5089_v1  ;;  %5153 = vst [vmem:[#allocation2 + $0x50] sm:$0x1] %v5152_v12  ;;  %v4686_v20 = vmul.f32 0.3, %v4578_v18 }
 0x4e8   : > { %18709 = vst [vmem:[#allocation34_spill] sm:$0xff] %v16128_v56  ;;  %11924 = vmatmul.mubr.bf16.gmra.mrb[172].mxu1 %v16128_v56  ;;  %v4579_v31 = vadd.f32 %v15834_v63, %v4518_v34  ;;  %vm4632_vm6 = vcmp.ge.f32.partialorder %v4578_v18, 0.0  ;;  %v5491_v30 = vshrl.u32 %v16105_v25, 16  ;;  %v18711_v16 = vld [vmem:[#allocation12_spill] sm:$0xff]  ;;  %v18712_v12 = vrot.slane %v16063_v4, 1  ;;  %12226 = vmatpush3.bf16.msra.mxu0 %v12727_v45 }
 0x4e9   : > { %18710 = vst [vmem:[#allocation17_spill] sm:$0xff] %v16137_v51  ;;  %12116 = vmatmul.mubr.bf16.gmra.mrb[56].mxu0 %v16139_v57  ;;  %v5495_v14 = vshll.u32 %v16137_v51, 16  ;;  %v18216_v23 = vrot.slane %v16139_v57, 1  ;;  %v6994_v34 = vshll.u32 %v16139_v57, 16  ;;  %v4740_v58 = vsel %vm4632_vm6, %v4578_v18, %v4686_v20  ;;  %12227 = vmatprep.subr.bf16.mxu0 %v12728_v44  ;;  %v12729_v18 = vld [vmem:[%s18081_s4 + $0x178] sm:$0xff]  }
 0x4ea   : > { %vm4633_vm7 = vcmp.ge.f32.partialorder %v4579_v31, 0.0  ;;  %v4687_v27 = vmul.f32 0.3, %v4579_v31  ;;  %v4382_v3 = vpop.f32.mrb[244].mxu0  ;;  %v5493_v61 = vor.u32 %v5491_v30, %v5489_v19  ;;  %v6992_v46 = vor.u32 %v6990_v0, %v16111_v52  ;;  %11974 = vmatpush3.bf16.msra.mxu1 %v12726_v35 }
 0x4eb   : > { %v4519_v33 = vadd.f32 %v4382_v3, %v18711_v16  ;;  %v11841_v26 = vpop.f32.mrb[245].mxu0  ;;  %v16162_v1 = vrot.slane %v5495_v14, 1  ;;  %v16169_v53 = vsel %vm1457_vm2, %v18712_v12, %v18216_v23  ;;  %v6996_v3 = vrot.slane %v6994_v34, 1  ;;  %v18714_v14 = vld [vmem:[#allocation52_spill] sm:$0xff] }
 0x4ec   : > { %18713 = vst [vmem:[#allocation36_spill] sm:$0xff] %v16169_v53  ;;  %v4741_v56 = vsel %vm4633_vm7, %v4579_v31, %v4687_v27  ;;  %v4385_v25 = vpop.f32.mrb[246].mxu0  ;;  %v12730_v31 = vld [vmem:[%s18081_s4 + $0x80] sm:$0xff]   ;;  %12228 = vmatpush3.bf16.msra.mxu0 %v12728_v44  ;;  %v6998_v35 = vshrl.u32 %v16139_v57, 16  ;;  %v5499_v34 = vshrl.u32 %v16137_v51, 16 }
 0x4ed   : > { %v5154_v16 = vld [vmem:[#allocation2 + $0x5c] sm:$0x1]  ;;  %v10078_v19 = vpack.c.bf16 %v4741_v56, %v4740_v58  ;;  %v4580_v30 = vadd.f32 %v15834_v63, %v4519_v33  ;;  %v4520_v26 = vadd.f32 %v4385_v25, %v18714_v14  ;;  %v11842_v60 = vpop.f32.mrb[247].mxu0  ;;  %v16177_v4 = vsel %vm571_vm1, %v5493_v61, %v16162_v1  ;;  %v5234_v56 = vld [vmem:[#allocation2 + $0x58] sm:$0xf]  ;;  %12229 = vmatprep.subr.bf16.mxu0 %v12729_v18  ;;  %v18718_v14 = vld [vmem:[#allocation127_spill] sm:$0xff] }
 0x4ee   : > { %18715 = vst [vmem:[#allocation19_spill] sm:$0xff] %v16177_v4  ;;  %v5155_v52 = vsel %vm15866_vm13, %v15863_v7, %v5154_v16  ;;  %11927 = vmatprep.mubr.bf16.mxu1 %v16177_v4  ;;  %v16187_v25 = vsel %vm571_vm1, %v6992_v46, %v6996_v3  ;;  %v5232_v20 = vld [vmem:[#allocation2 + $0x50] sm:$0xf]  ;;  %v5233_v27 = vld [vmem:[#allocation2 + $0x54] sm:$0xf]  ;;  %12023 = vmatprep.subr.bf16.mxu1 %v12730_v31 }
 0x4ef   : > { %18716 = vst [vmem:[#allocation38_spill] sm:$0xff] %v16187_v25  ;;  %5156 = vst [vmem:[#allocation2 + $0x5c] sm:$0x1] %v5155_v52  ;;  %v4688_v60 = vmul.f32 0.3, %v4580_v30  ;;  %v4581_v45 = vadd.f32 %v15834_v63, %v4520_v26  ;;  %vm4634_vm8 = vcmp.ge.f32.partialorder %v4580_v30, 0.0  ;;  %v9805_v0 = vcombine.low %v16123_v24, %v5232_v20 }
 0x4f0   : > { %10161 = vst [vmem:[#allocation2 + $0x60] sm:$0xff] %v10078_v19   ;;  %v16196_v33 = vcombine.low %v5232_v20, %v5233_v27  ;;  %v16198_v61 = vcombine.low %v5233_v27, %v5234_v56  ;;  %v7000_v19 = vor.u32 %v6998_v35, %v6996_v3  ;;  %v18719_v27 = vrot.slane %v16139_v57, 1  ;;  %12230 = vmatpush3.bf16.msra.mxu0 %v12729_v18 }
 0x4f1   : > { %vm4635_vm10 = vcmp.ge.f32.partialorder %v4581_v45, 0.0  ;;  %v4689_v46 = vmul.f32 0.3, %v4581_v45  ;;  %12119 = vmatprep.mubr.bf16.mxu0 %v9805_v0  ;;  %v7002_v12 = vshll.u32 %v9805_v0, 16  ;;  %v7479_v16 = vrot.slane %v9805_v0, 1 }
 0x4f2   : > { %18717 = vst [vmem:[#allocation61_spill] sm:$0xff] %v16196_v33  ;;  %v4390_v58 = vpop.f32.mrb[248].mxu0  ;;  %v4742_v24 = vsel %vm4634_vm8, %v4580_v30, %v4688_v60  ;;  %v5503_v23 = vshll.u32 %v16196_v33, 16  ;;  %12120 = vmatmul.mubr.bf16.gmra.mrb[60].mxu0 %v16198_v61  ;;  %v18218_v3 = vrot.slane %v16198_v61, 1  ;;  %v18721_v60 = vld [vmem:[#allocation14_spill] sm:$0xff] }
 0x4f3   : > { %v4743_v44 = vsel %vm4635_vm10, %v4581_v45, %v4689_v46  ;;  %v4521_v26 = vadd.f32 %v4390_v58, %v18718_v14  ;;  %v11845_v52 = vpop.f32.mrb[249].mxu0  ;;  %v7004_v20 = vrot.slane %v7002_v12, 1  ;;  %v16207_v4 = vsel %vm1457_vm2, %v18719_v27, %v7479_v16  ;;  %v18726_v27 = vld [vmem:[#allocation57_spill] sm:$0xff] }
 0x4f4   : > { %v10083_v25 = vpack.c.bf16 %v4743_v44, %v4742_v24  ;;  %v4393_v31 = vpop.f32.mrb[250].mxu0  ;;  %18720 = vst [vmem:[#allocation20_spill] sm:$0xff] %v16207_v4  ;;  %v5505_v46 = vrot.slane %v5503_v23, 1  ;;  %v5501_v12 = vor.u32 %v5499_v34, %v16162_v1  ;;  %v16216_v57 = vsel %vm1457_vm2, %v7479_v16, %v18218_v3  ;;  %v16229_v1 = vld [vmem:[%s18079_s2] ss:$0 sm:$0xff] }
 0x4f5   : > { %v4582_v30 = vadd.f32 %v15834_v63, %v4521_v26  ;;  %v4522_v45 = vadd.f32 %v4393_v31, %v18721_v60  ;;  %v11846_v35 = vpop.f32.mrb[251].mxu0  ;;  %18722 = vst [vmem:[#allocation40_spill] sm:$0xff] %v16216_v57  ;;  %v16219_v44 = vsel %vm571_vm1, %v7000_v19, %v7004_v20  ;;  %v7006_v34 = vshrl.u32 %v9805_v0, 16  ;;  %v18727_v57 = vld [vmem:[#allocation129_spill] sm:$0xff] }
 0x4f6   : > { %10162 = vst [vmem:[#allocation2 + $0x68] sm:$0xff] %v10083_v25   ;;  %v5235_v24 = vld [vmem:[#allocation2 + $0x5c] sm:$0xf]  ;;  %18723 = vst [vmem:[#allocation62_spill] sm:$0xff] %v16219_v44  ;;  %v16233_v25 = vsel %vm571_vm1, %v5501_v12, %v5505_v46  ;;  %v5507_v16 = vshrl.u32 %v16196_v33, 16  ;;  %v7010_v31 = vshll.u32 %v16198_v61, 16 }
 0x4f7   : > { %v5091_v58 = vld [vmem:[#allocation2 + $0x60] sm:$0x1]  ;;  %v16224_v14 = vcombine.low %v5234_v56, %v5235_v24  ;;  %v4690_v23 = vmul.f32 0.3, %v4582_v30  ;;  %v4583_v18 = vadd.f32 %v16229_v1, %v4522_v45  ;;  %18725 = vst [vmem:[#allocation23_spill] sm:$0xff] %v16233_v25  ;;  %vm4636_vm11 = vcmp.ge.f32.partialorder %v4582_v30, 0.0  ;;  %11928 = vmatmul.mubr.bf16.gmra.mrb[176].mxu1 %v16233_v25 }
 0x4f8   : > { %v5092_v63 = vsel %vm15850_vm9, %v15829_v36, %v5091_v58  ;;  %v7008_v52 = vor.u32 %v7006_v34, %v7004_v20  ;;  %v5509_v35 = vor.u32 %v5507_v16, %v5505_v46  ;;  %v7012_v3 = vrot.slane %v7010_v31, 1  ;;  %v5237_v34 = vld [vmem:[#allocation2 + $0x64] sm:$0xf] }
 0x4f9   : > { %18724 = vst [vmem:[#allocation69_spill] sm:$0xff] %v16224_v14  ;;  %5093 = vst [vmem:[#allocation2 + $0x60] sm:$0x1] %v5092_v63  ;;  %v5511_v56 = vshll.u32 %v16224_v14, 16  ;;  %vm4637_vm12 = vcmp.ge.f32.partialorder %v4583_v18, 0.0  ;;  %v4744_v12 = vsel %vm4636_vm11, %v4582_v30, %v4690_v23 }
 0x4fa   : > { %v4691_v19 = vmul.f32 0.3, %v4583_v18  ;;  %v4398_v26 = vpop.f32.mrb[252].mxu0  ;;  %v16253_v23 = vsel %vm571_vm1, %v7008_v52, %v7012_v3 }
 0x4fb   : > { %v4523_v60 = vadd.f32 %v4398_v26, %v18726_v27  ;;  %v11849_v45 = vpop.f32.mrb[253].mxu0  ;;  %v5513_v58 = vrot.slane %v5511_v56, 1  ;;  %18729 = vst [vmem:[#allocation64_spill] sm:$0xff] %v16253_v23  ;;  %v18734_v23 = vld [vmem:[#allocation60_spill] sm:$0xff] }
 0x4fc   : > { %v4745_v0 = vsel %vm4637_vm12, %v4583_v18, %v4691_v19  ;;  %v4401_v63 = vpop.f32.mrb[254].mxu0  ;;  %v7014_v19 = vshrl.u32 %v16198_v61, 16  ;;  %v18731_v45 = vld [vmem:[#allocation16_spill] sm:$0xff] }
 0x4fd   : > { %v5094_v44 = vld [vmem:[#allocation2 + $0x6c] sm:$0x1]  ;;  %v5157_v25 = vld [vmem:[#allocation2 + $0x68] sm:$0x1]  ;;  %v10088_v33 = vpack.c.bf16 %v4745_v0, %v4744_v12  ;;  %v4584_v51 = vadd.f32 %v16229_v1, %v4523_v60  ;;  %v4524_v4 = vadd.f32 %v4401_v63, %v18727_v57  ;;  %v11850_v53 = vpop.f32.mrb[255].mxu0  ;;  %v16243_v20 = vsel %vm571_vm1, %v5509_v35, %v5513_v58 }
 0x4fe   : > { %18728 = vst [vmem:[#allocation42_spill] sm:$0xff] %v16243_v20  ;;  %v5095_v46 = vsel %vm15850_vm9, %v15829_v36, %v5094_v44  ;;  %v5158_v30 = vsel %vm15866_vm13, %v15863_v7, %v5157_v25  ;;  %11931 = vmatprep.mubr.bf16.mxu1 %v16243_v20  ;;  %v5515_v44 = vshrl.u32 %v16224_v14, 16  ;;  %v7016_v12 = vor.u32 %v7014_v19, %v7012_v3 }
 0x4ff   : > { %5096 = vst [vmem:[#allocation2 + $0x6c] sm:$0x1] %v5095_v46  ;;  %5159 = vst [vmem:[#allocation2 + $0x68] sm:$0x1] %v5158_v30  ;;  %v4692_v53 = vmul.f32 0.3, %v4584_v51  ;;  %v4585_v57 = vadd.f32 %v16229_v1, %v4524_v4 }
 0x500   : > { %10163 = vst [vmem:[#allocation2 + $0x70] sm:$0xff] %v10088_v33   ;;  %v5236_v18 = vld [vmem:[#allocation2 + $0x60] sm:$0xf]  ;;  %vm4638_vm14 = vcmp.ge.f32.partialorder %v4584_v51, 0.0  ;;  %v5517_v26 = vor.u32 %v5515_v44, %v5513_v58  ;;  %v18732_v58 = vrot.slane %v16198_v61, 1 }
 0x501   : > { %v16257_v16 = vcombine.low %v5236_v18, %v5237_v34  ;;  %v16259_v56 = vcombine.low %v5235_v24, %v5236_v18  ;;  %vm4639_vm15 = vcmp.ge.f32.partialorder %v4585_v57, 0.0  ;;  %v4693_v25 = vmul.f32 0.3, %v4585_v57 }
 0x502   : > { %v4406_v52 = vpop.f32.mrb[0].mxu0  ;;  %v4746_v27 = vsel %vm4638_vm14, %v4584_v51, %v4692_v53 }
 0x503   : > { %18730 = vst [vmem:[#allocation65_spill] sm:$0xff] %v16257_v16  ;;  %12123 = vmatprep.mubr.bf16.mxu0 %v16259_v56  ;;  %v7018_v33 = vshll.u32 %v16259_v56, 16  ;;  %v5519_v4 = vshll.u32 %v16257_v16, 16  ;;  %v7483_v31 = vrot.slane %v16259_v56, 1  ;;  %v4747_v60 = vsel %vm4639_vm15, %v4585_v57, %v4693_v25  ;;  %v11853_v24 = vpop.f32.mrb[1].mxu0 }
 0x504   : > { %v4525_v35 = vadd.f32 %v4406_v52, %v18731_v45  ;;  %v10093_v0 = vpack.c.bf16 %v4747_v60, %v4746_v27  ;;  %v4409_v46 = vpop.f32.mrb[2].mxu0 }
 0x505   : > { %v7020_v63 = vrot.slane %v7018_v33, 1  ;;  %v5521_v30 = vrot.slane %v5519_v4, 1  ;;  %v16270_v18 = vsel %vm1457_vm2, %v18732_v58, %v7483_v31  ;;  %v4526_v20 = vadd.f32 %v4409_v46, %v18734_v23  ;;  %v11854_v14 = vpop.f32.mrb[3].mxu0 }
 0x506   : > { %18733 = vst [vmem:[#allocation25_spill] sm:$0xff] %v16270_v18  ;;  %v4586_v44 = vadd.f32 %v16229_v1, %v4525_v35  ;;  %10164 = vst [vmem:[#allocation2 + $0x78] sm:$0xff] %v10093_v0   ;;  %v5238_v53 = vld [vmem:[#allocation2 + $0x68] sm:$0xf]  ;;  %v5239_v3 = vld [vmem:[#allocation2 + $0x6c] sm:$0xf] }
 0x507   : > { %v5160_v51 = vld [vmem:[#allocation2 + $0x74] sm:$0x1]  ;;  %v16275_v57 = vsel %vm571_vm1, %v5517_v26, %v5521_v30  ;;  %v16278_v25 = vsel %vm571_vm1, %v7016_v12, %v7020_v63  ;;  %v9808_v19 = vcombine.low %v5237_v34, %v5238_v53  ;;  %v5240_v33 = vld [vmem:[#allocation2 + $0x70] sm:$0xf]  ;;  %v4587_v23 = vadd.f32 %v16229_v1, %v4526_v20 }
 0x508   : > { %18735 = vst [vmem:[#allocation44_spill] sm:$0xff] %v16275_v57  ;;  %18736 = vst [vmem:[#allocation53_spill] sm:$0xff] %v16278_v25  ;;  %v5161_v61 = vsel %vm15866_vm13, %v15863_v7, %v5160_v51  ;;  %11932 = vmatmul.mubr.bf16.gmra.mrb[180].mxu1 %v16275_v57  ;;  %v4694_v14 = vmul.f32 0.3, %v4586_v44  ;;  %v16285_v52 = vcombine.low %v5238_v53, %v5239_v3  ;;  %vm4640_vm0 = vcmp.ge.f32.partialorder %v4586_v44, 0.0 }
 0x509   : > { %5162 = vst [vmem:[#allocation2 + $0x74] sm:$0x1] %v5161_v61  ;;  %v16287_v26 = vcombine.low %v5239_v3, %v5240_v33  ;;  %12124 = vmatmul.mubr.bf16.gmra.mrb[64].mxu0 %v9808_v19  ;;  %v5523_v4 = vshrl.u32 %v16257_v16, 16  ;;  %v7485_v27 = vrot.slane %v9808_v19, 1  ;;  %vm4641_vm3 = vcmp.ge.f32.partialorder %v4587_v23, 0.0 }
 0x50a   : > { %18737 = vst [vmem:[#allocation67_spill] sm:$0xff] %v16285_v52  ;;  %v4695_v60 = vmul.f32 0.3, %v4587_v23  ;;  %v4414_v45 = vpop.f32.mrb[4].mxu0  ;;  %v5527_v34 = vshll.u32 %v16285_v52, 16  ;;  %v7022_v35 = vshrl.u32 %v16259_v56, 16  ;;  %v4748_v58 = vsel %vm4640_vm0, %v4586_v44, %v4694_v14 }
 0x50b   : > { %12127 = vmatprep.mubr.bf16.mxu0 %v16287_v26  ;;  %v4527_v20 = vadd.f32 %v4414_v45, %v15706_v9  ;;  %v11857_v24 = vpop.f32.mrb[5].mxu0  ;;  %v16295_v12 = vsel %vm1457_vm2, %v7483_v31, %v7485_v27  ;;  %v18230_v0 = vrot.slane %v16287_v26, 1  ;;  %v7026_v46 = vshll.u32 %v9808_v19, 16 }
 0x50c   : > { %v4749_v51 = vsel %vm4641_vm3, %v4587_v23, %v4695_v60  ;;  %v4417_v53 = vpop.f32.mrb[6].mxu0  ;;  %v5525_v3 = vor.u32 %v5523_v4, %v5521_v30  ;;  %v5529_v61 = vrot.slane %v5527_v34, 1  ;;  %v7034_v44 = vshll.u32 %v16287_v26, 16 }
 0x50d   : > { %v5097_v25 = vld [vmem:[#allocation2 + $0x78] sm:$0x1]  ;;  %v10098_v57 = vpack.c.bf16 %v4749_v51, %v4748_v58  ;;  %v4588_v16 = vadd.f32 %v16229_v1, %v4527_v20  ;;  %v4528_v56 = vadd.f32 %v4417_v53, %v15712_v32  ;;  %v11858_v18 = vpop.f32.mrb[7].mxu0  ;;  %v16303_v9 = vsel %vm1457_vm2, %v7485_v27, %v18230_v0 }
 0x50e   : > { %v5098_v31 = vsel %vm15850_vm9, %v15829_v36, %v5097_v25  ;;  %v16310_v30 = vsel %vm571_vm1, %v5525_v3, %v5529_v61  ;;  %v7024_v18 = vor.u32 %v7022_v35, %v7020_v63  ;;  %v7028_v4 = vrot.slane %v7026_v46, 1 }
 0x50f   : > { %18738 = vst [vmem:[#allocation27_spill] sm:$0xff] %v16310_v30  ;;  %5099 = vst [vmem:[#allocation2 + $0x78] sm:$0x1] %v5098_v31  ;;  %v4696_v14 = vmul.f32 0.3, %v4588_v16  ;;  %v4589_v32 = vadd.f32 %v16229_v1, %v4528_v56  ;;  %11935 = vmatprep.mubr.bf16.mxu1 %v16310_v30  ;;  %vm4642_vm4 = vcmp.ge.f32.partialorder %v4588_v16, 0.0 }
 0x510   : > { %10165 = vst [vmem:[#allocation2 + $0x80] sm:$0xff] %v10098_v57   ;;  %v5241_v23 = vld [vmem:[#allocation2 + $0x74] sm:$0xf]  ;;  %v7030_v60 = vshrl.u32 %v9808_v19, 16  ;;  %v16317_v45 = vsel %vm571_vm1, %v7024_v18, %v7028_v4  ;;  %v7036_v34 = vrot.slane %v7034_v44, 1  ;;  %v5531_v57 = vshrl.u32 %v16285_v52, 16 }
 0x511   : > { %v16314_v27 = vcombine.low %v5240_v33, %v5241_v23  ;;  %vm4643_vm5 = vcmp.ge.f32.partialorder %v4589_v32, 0.0  ;;  %v4697_v25 = vmul.f32 0.3, %v4589_v32  ;;  %18740 = vst [vmem:[#allocation68_spill] sm:$0xff] %v16317_v45  ;;  %v4750_v51 = vsel %vm4642_vm4, %v4588_v16, %v4696_v14  ;;  %v5243_v31 = vld [vmem:[#allocation2 + $0x7c] sm:$0xf] }
 0x512   : > { %v4422_v20 = vpop.f32.mrb[8].mxu0  ;;  %v7032_v58 = vor.u32 %v7030_v60, %v7028_v4  ;;  %v5533_v46 = vor.u32 %v5531_v57, %v5529_v61 }
 0x513   : > { %18739 = vst [vmem:[#allocation47_spill] sm:$0xff] %v16314_v27  ;;  %v5535_v24 = vshll.u32 %v16314_v27, 16  ;;  %v4751_v53 = vsel %vm4643_vm5, %v4589_v32, %v4697_v25  ;;  %v4529_v63 = vadd.f32 %v4422_v20, %v15721_v22  ;;  %v11861_v35 = vpop.f32.mrb[9].mxu0  ;;  %v5539_v25 = vshrl.u32 %v16314_v27, 16 }
 0x514   : > { %v10103_v33 = vpack.c.bf16 %v4751_v53, %v4750_v51  ;;  %v4425_v19 = vpop.f32.mrb[10].mxu0  ;;  %v16323_v56 = vsel %vm571_vm1, %v7032_v58, %v7036_v34 }
 0x515   : > { %v5537_v3 = vrot.slane %v5535_v24, 1  ;;  %18741 = vst [vmem:[#allocation70_spill] sm:$0xff] %v16323_v56  ;;  %v4590_v44 = vadd.f32 %v16229_v1, %v4529_v63  ;;  %v4530_v18 = vadd.f32 %v4425_v19, %v15727_v6  ;;  %v11862_v0 = vpop.f32.mrb[11].mxu0  ;;  %v7038_v24 = vshrl.u32 %v16287_v26, 16 }
 0x516   : > { %v5242_v16 = vld [vmem:[#allocation2 + $0x78] sm:$0xf]  ;;  %10166 = vst [vmem:[#allocation2 + $0x88] sm:$0xff] %v10103_v33   ;;  %v18744_v33 = vrot.slane %v16287_v26, 1 }
 0x517   : > { %v5100_v45 = vld [vmem:[#allocation2 + $0x84] sm:$0x1]  ;;  %v5163_v4 = vld [vmem:[#allocation2 + $0x80] sm:$0x1]  ;;  %v16328_v22 = vsel %vm571_vm1, %v5533_v46, %v5537_v3  ;;  %v16336_v32 = vcombine.low %v5242_v16, %v5243_v31  ;;  %v16338_v60 = vcombine.low %v5241_v23, %v5242_v16  ;;  %v4698_v6 = vmul.f32 0.3, %v4590_v44 }
 0x518   : > { %18742 = vst [vmem:[#allocation29_spill] sm:$0xff] %v16328_v22  ;;  %v5101_v61 = vsel %vm15850_vm9, %v15829_v36, %v5100_v45  ;;  %v5164_v14 = vsel %vm15866_vm13, %v15863_v7, %v5163_v4  ;;  %11936 = vmatmul.mubr.bf16.gmra.mrb[184].mxu1 %v16328_v22  ;;  %v4591_v0 = vadd.f32 %v16229_v1, %v4530_v18  ;;  %vm4644_vm6 = vcmp.ge.f32.partialorder %v4590_v44, 0.0 }
 0x519   : > { %18743 = vst [vmem:[#allocation50_spill] sm:$0xff] %v16336_v32  ;;  %5102 = vst [vmem:[#allocation2 + $0x84] sm:$0x1] %v5101_v61  ;;  %12128 = vmatmul.mubr.bf16.gmra.mrb[68].mxu0 %v16338_v60  ;;  %v5543_v45 = vshll.u32 %v16336_v32, 16  ;;  %v7489_v57 = vrot.slane %v16338_v60, 1  ;;  %v7042_v58 = vshll.u32 %v16338_v60, 16  ;;  %v5541_v63 = vor.u32 %v5539_v25, %v5537_v3 }
 0x51a   : > { %5165 = vst [vmem:[#allocation2 + $0x80] sm:$0x1] %v5164_v14  ;;  %vm4645_vm7 = vcmp.ge.f32.partialorder %v4591_v0, 0.0  ;;  %v4699_v20 = vmul.f32 0.3, %v4591_v0  ;;  %v4430_v23 = vpop.f32.mrb[12].mxu0  ;;  %v4752_v19 = vsel %vm4644_vm6, %v4590_v44, %v4698_v6  ;;  %v7040_v16 = vor.u32 %v7038_v24, %v7036_v34 }
 0x51b   : > { %v4531_v51 = vadd.f32 %v4430_v23, %v15736_v38  ;;  %v11865_v53 = vpop.f32.mrb[13].mxu0  ;;  %v5545_v35 = vrot.slane %v5543_v45, 1  ;;  %v16352_v46 = vsel %vm1457_vm2, %v18744_v33, %v7489_v57  ;;  %v7044_v61 = vrot.slane %v7042_v58, 1 }
 0x51c   : > { %v4753_v18 = vsel %vm4645_vm7, %v4591_v0, %v4699_v20  ;;  %v4433_v4 = vpop.f32.mrb[14].mxu0  ;;  %v7046_v20 = vshrl.u32 %v16338_v60, 16  ;;  %v5547_v24 = vshrl.u32 %v16336_v32, 16 }
 0x51d   : > { %v5166_v14 = vld [vmem:[#allocation2 + $0x8c] sm:$0x1]  ;;  %v10108_v56 = vpack.c.bf16 %v4753_v18, %v4752_v19  ;;  %v4592_v22 = vadd.f32 %v16229_v1, %v4531_v51  ;;  %v4532_v30 = vadd.f32 %v4433_v4, %v15742_v55  ;;  %v11866_v38 = vpop.f32.mrb[15].mxu0  ;;  %v16357_v3 = vsel %vm571_vm1, %v5541_v63, %v5545_v35  ;;  %v5246_v55 = vld [vmem:[#allocation2 + $0x88] sm:$0xf] }
 0x51e   : > { %18745 = vst [vmem:[#allocation71_spill] sm:$0xff] %v16357_v3  ;;  %v5167_v26 = vsel %vm15866_vm13, %v15863_v7, %v5166_v14  ;;  %11939 = vmatprep.mubr.bf16.mxu1 %v16357_v3  ;;  %v16364_v44 = vsel %vm571_vm1, %v7040_v16, %v7044_v61 }
 0x51f   : > { %18746 = vst [vmem:[#allocation72_spill] sm:$0xff] %v16364_v44  ;;  %5168 = vst [vmem:[#allocation2 + $0x8c] sm:$0x1] %v5167_v26  ;;  %v4700_v34 = vmul.f32 0.3, %v4592_v22  ;;  %v4593_v6 = vadd.f32 %v16229_v1, %v4532_v30  ;;  %vm4646_vm8 = vcmp.ge.f32.partialorder %v4592_v22, 0.0  ;;  %v7048_v30 = vor.u32 %v7046_v20, %v7044_v61 }
 0x520   : > { %10167 = vst [vmem:[#allocation2 + $0x90] sm:$0xff] %v10108_v56   ;;  %v5245_v25 = vld [vmem:[#allocation2 + $0x84] sm:$0xf] }
 0x521   : > { %v5244_v0 = vld [vmem:[#allocation2 + $0x80] sm:$0xf]  ;;  %vm4647_vm10 = vcmp.ge.f32.partialorder %v4593_v6, 0.0  ;;  %v4701_v23 = vmul.f32 0.3, %v4593_v6  ;;  %v16371_v51 = vcombine.low %v5245_v25, %v5246_v55  ;;  %v4754_v33 = vsel %vm4646_vm8, %v4592_v22, %v4700_v34 }
 0x522   : > { %v9811_v45 = vcombine.low %v5243_v31, %v5244_v0  ;;  %v16369_v58 = vcombine.low %v5244_v0, %v5245_v25  ;;  %v4438_v53 = vpop.f32.mrb[16].mxu0 }
 0x523   : > { %v4755_v19 = vsel %vm4647_vm10, %v4593_v6, %v4701_v23  ;;  %v4533_v18 = vadd.f32 %v4438_v53, %v15749_v28  ;;  %v11869_v31 = vpop.f32.mrb[17].mxu0  ;;  %v18233_v26 = vrot.slane %v16371_v51, 1  ;;  %v5549_v6 = vor.u32 %v5547_v24, %v5545_v35 }
 0x524   : > { %18747 = vst [vmem:[#allocation31_spill] sm:$0xff] %v16369_v58  ;;  %12131 = vmatprep.mubr.bf16.mxu0 %v9811_v45  ;;  %v7050_v56 = vshll.u32 %v9811_v45, 16  ;;  %v7491_v63 = vrot.slane %v9811_v45, 1  ;;  %v5551_v60 = vshll.u32 %v16369_v58, 16  ;;  %v10113_v4 = vpack.c.bf16 %v4755_v19, %v4754_v33  ;;  %v4441_v14 = vpop.f32.mrb[18].mxu0 }
 0x525   : > { %12132 = vmatmul.mubr.bf16.gmra.mrb[72].mxu0 %v16371_v51  ;;  %v4594_v0 = vadd.f32 %v16229_v1, %v4533_v18  ;;  %v4534_v22 = vadd.f32 %v4441_v14, %v15753_v37  ;;  %v11870_v61 = vpop.f32.mrb[19].mxu0  ;;  %v7054_v24 = vshrl.u32 %v9811_v45, 16  ;;  %v7058_v18 = vshll.u32 %v16371_v51, 16 }
 0x526   : > { %v7052_v16 = vrot.slane %v7050_v56, 1  ;;  %v16377_v38 = vsel %vm1457_vm2, %v7489_v57, %v7491_v63  ;;  %v5553_v34 = vrot.slane %v5551_v60, 1  ;;  %10168 = vst [vmem:[#allocation2 + $0x98] sm:$0xff] %v10113_v4   ;;  %v5247_v25 = vld [vmem:[#allocation2 + $0x8c] sm:$0xf]  ;;  %v16385_v20 = vsel %vm1457_vm2, %v7491_v63, %v18233_v26 }
 0x527   : > { %v5103_v28 = vld [vmem:[#allocation2 + $0x90] sm:$0x1]  ;;  %v16393_v56 = vcombine.low %v5246_v55, %v5247_v25  ;;  %v4702_v37 = vmul.f32 0.3, %v4594_v0  ;;  %v4595_v53 = vadd.f32 %v16229_v1, %v4534_v22  ;;  %vm4648_vm11 = vcmp.ge.f32.partialorder %v4594_v0, 0.0 }
 0x528   : > { %v16388_v57 = vsel %vm571_vm1, %v7048_v30, %v7052_v16  ;;  %v5104_v23 = vsel %vm15850_vm9, %v15829_v36, %v5103_v28  ;;  %v16397_v35 = vsel %vm571_vm1, %v5549_v6, %v5553_v34  ;;  %v5555_v63 = vshrl.u32 %v16369_v58, 16 }
 0x529   : > { %18748 = vst [vmem:[#allocation54_spill] sm:$0xff] %v16388_v57  ;;  %18749 = vst [vmem:[#allocation73_spill] sm:$0xff] %v16393_v56  ;;  %11940 = vmatmul.mubr.bf16.gmra.mrb[188].mxu1 %v16397_v35  ;;  %v5559_v30 = vshll.u32 %v16393_v56, 16  ;;  %vm4649_vm12 = vcmp.ge.f32.partialorder %v4595_v53, 0.0  ;;  %v4703_v33 = vmul.f32 0.3, %v4595_v53  ;;  %v7056_v55 = vor.u32 %v7054_v24, %v7052_v16 }
 0x52a   : > { %5105 = vst [vmem:[#allocation2 + $0x90] sm:$0x1] %v5104_v23  ;;  %18750 = vst [vmem:[#allocation74_spill] sm:$0xff] %v16397_v35  ;;  %v4446_v19 = vpop.f32.mrb[20].mxu0  ;;  %v5557_v4 = vor.u32 %v5555_v63, %v5553_v34  ;;  %v4756_v22 = vsel %vm4648_vm11, %v4594_v0, %v4702_v37  ;;  %v7060_v28 = vrot.slane %v7058_v18, 1  ;;  %v5563_v24 = vshrl.u32 %v16393_v56, 16 }
 0x52b   : > { %v4535_v31 = vadd.f32 %v4446_v19, %v15760_v43  ;;  %v11873_v60 = vpop.f32.mrb[21].mxu0  ;;  %v5561_v14 = vrot.slane %v5559_v30, 1  ;;  %v4757_v45 = vsel %vm4649_vm12, %v4595_v53, %v4703_v33  ;;  %v16428_v19 = vld [vmem:[%s18081_s4 + $0x1c0] sm:$0xff]  }
 0x52c   : > { %v4449_v61 = vpop.f32.mrb[22].mxu0  ;;  %v10118_v26 = vpack.c.bf16 %v4757_v45, %v4756_v22  ;;  %v16417_v34 = vsel %vm571_vm1, %v7056_v55, %v7060_v28  ;;  %12343 = vmatprep.subr.bf16.mxu0 %v16428_v19 }
 0x52d   : > { %v5106_v6 = vld [vmem:[#allocation2 + $0x9c] sm:$0x1]  ;;  %v5169_v23 = vld [vmem:[#allocation2 + $0x98] sm:$0x1]  ;;  %v4596_v57 = vadd.f32 %v16229_v1, %v4535_v31  ;;  %v4536_v44 = vadd.f32 %v4449_v61, %v15764_v15  ;;  %v11874_v35 = vpop.f32.mrb[23].mxu0  ;;  %v16407_v16 = vsel %vm571_vm1, %v5557_v4, %v5561_v14  ;;  %18752 = vst [vmem:[#allocation95_spill] sm:$0xff] %v16417_v34  ;;  %v5565_v55 = vor.u32 %v5563_v24, %v5561_v14 }
 0x52e   : > { %18751 = vst [vmem:[#allocation56_spill] sm:$0xff] %v16407_v16  ;;  %v5107_v43 = vsel %vm15850_vm9, %v15829_v36, %v5106_v6  ;;  %v5170_v0 = vsel %vm15866_vm13, %v15863_v7, %v5169_v23  ;;  %11943 = vmatprep.mubr.bf16.mxu1 %v16407_v16  ;;  %10169 = vst [vmem:[#allocation2 + $0xa0] sm:$0xff] %v10118_v26   ;;  %v5249_v35 = vld [vmem:[#allocation2 + $0x94] sm:$0xf]  ;;  %v7062_v26 = vshrl.u32 %v16371_v51, 16 }
 0x52f   : > { %5108 = vst [vmem:[#allocation2 + $0x9c] sm:$0x1] %v5107_v43  ;;  %5171 = vst [vmem:[#allocation2 + $0x98] sm:$0x1] %v5170_v0  ;;  %v4704_v15 = vmul.f32 0.3, %v4596_v57  ;;  %v4597_v37 = vadd.f32 %v16229_v1, %v4536_v44 }
 0x530   : > { %vm4650_vm14 = vcmp.ge.f32.partialorder %v4596_v57, 0.0  ;;  %v7064_v61 = vor.u32 %v7062_v26, %v7060_v28  ;;  %v18754_v0 = vrot.slane %v16371_v51, 1 }
 0x531   : > { %v5248_v53 = vld [vmem:[#allocation2 + $0x90] sm:$0xf]  ;;  %vm4651_vm15 = vcmp.ge.f32.partialorder %v4597_v37, 0.0  ;;  %v4705_v33 = vmul.f32 0.3, %v4597_v37  ;;  %v4758_v60 = vsel %vm4650_vm14, %v4596_v57, %v4704_v15 }
 0x532   : > { %v16421_v63 = vcombine.low %v5248_v53, %v5249_v35  ;;  %v16423_v30 = vcombine.low %v5247_v25, %v5248_v53  ;;  %v4454_v18 = vpop.f32.mrb[24].mxu0 }
 0x533   : > { %v4759_v4 = vsel %vm4651_vm15, %v4597_v37, %v4705_v33  ;;  %v4537_v22 = vadd.f32 %v4454_v18, %v15771_v47  ;;  %v11877_v45 = vpop.f32.mrb[25].mxu0 }
 0x534   : > { %18753 = vst [vmem:[#allocation33_spill] sm:$0xff] %v16421_v63  ;;  %12135 = vmatprep.mubr.bf16.mxu0 %v16423_v30  ;;  %v7066_v44 = vshll.u32 %v16423_v30, 16  ;;  %v5567_v31 = vshll.u32 %v16421_v63, 16  ;;  %v7495_v25 = vrot.slane %v16423_v30, 1  ;;  %v10123_v6 = vpack.c.bf16 %v4759_v4, %v4758_v60  ;;  %v4457_v14 = vpop.f32.mrb[26].mxu0 }
 0x535   : > { %v4598_v24 = vadd.f32 %v16229_v1, %v4537_v22  ;;  %v4538_v57 = vadd.f32 %v4457_v14, %v15775_v8  ;;  %v11878_v15 = vpop.f32.mrb[27].mxu0  ;;  %v5172_v37 = vld [vmem:[#allocation2 + $0xa4] sm:$0x1]  ;;  %v5252_v18 = vld [vmem:[#allocation2 + $0xa0] sm:$0xf]  ;;  %v5571_v4 = vshrl.u32 %v16421_v63, 16 }
 0x536   : > { %v7068_v23 = vrot.slane %v7066_v44, 1  ;;  %v5569_v43 = vrot.slane %v5567_v31, 1  ;;  %v16440_v53 = vsel %vm1457_vm2, %v18754_v0, %v7495_v25  ;;  %10170 = vst [vmem:[#allocation2 + $0xa8] sm:$0xff] %v10123_v6   ;;  %v5250_v47 = vld [vmem:[#allocation2 + $0x98] sm:$0xf]  ;;  %v5173_v51 = vsel %vm15866_vm13, %v15863_v7, %v5172_v37 }
 0x537   : > { %v5251_v28 = vld [vmem:[#allocation2 + $0x9c] sm:$0xf]  ;;  %v9814_v44 = vcombine.low %v5249_v35, %v5250_v47  ;;  %5174 = vst [vmem:[#allocation2 + $0xa4] sm:$0x1] %v5173_v51  ;;  %v4706_v8 = vmul.f32 0.3, %v4598_v24  ;;  %v4599_v31 = vadd.f32 %v16229_v1, %v4538_v57 }
 0x538   : > { %v16445_v33 = vsel %vm571_vm1, %v5565_v55, %v5569_v43  ;;  %v16448_v26 = vsel %vm571_vm1, %v7064_v61, %v7068_v23  ;;  %v16455_v60 = vcombine.low %v5250_v47, %v5251_v28  ;;  %v16457_v55 = vcombine.low %v5251_v28, %v5252_v18 }
 0x539   : > { %18755 = vst [vmem:[#allocation75_spill] sm:$0xff] %v16445_v33  ;;  %18756 = vst [vmem:[#allocation77_spill] sm:$0xff] %v16448_v26  ;;  %11944 = vmatmul.mubr.bf16.gmra.mrb[192].mxu1 %v16445_v33  ;;  %vm4652_vm0 = vcmp.ge.f32.partialorder %v4598_v24, 0.0  ;;  %12136 = vmatmul.mubr.bf16.gmra.mrb[76].mxu0 %v9814_v44  ;;  %v7497_v22 = vrot.slane %v9814_v44, 1  ;;  %vm4653_vm3 = vcmp.ge.f32.partialorder %v4599_v31, 0.0  ;;  %v7070_v6 = vshrl.u32 %v16423_v30, 16 }
 0x53a   : > { %18757 = vst [vmem:[#allocation35_spill] sm:$0xff] %v16455_v60  ;;  %v4707_v45 = vmul.f32 0.3, %v4599_v31  ;;  %v4462_v61 = vpop.f32.mrb[28].mxu0  ;;  %12139 = vmatprep.mubr.bf16.mxu0 %v16457_v55  ;;  %v5575_v35 = vshll.u32 %v16455_v60, 16  ;;  %v18240_v15 = vrot.slane %v16457_v55, 1  ;;  %v4760_v47 = vsel %vm4652_vm0, %v4598_v24, %v4706_v8 }
 0x53b   : > { %v4539_v14 = vadd.f32 %v4462_v61, %v15785_v40  ;;  %v11881_v0 = vpop.f32.mrb[29].mxu0  ;;  %v16465_v57 = vsel %vm1457_vm2, %v7495_v25, %v7497_v22  ;;  %v7074_v37 = vshll.u32 %v9814_v44, 16  ;;  %v5573_v26 = vor.u32 %v5571_v4, %v5569_v43 }
 0x53c   : > { %v4761_v28 = vsel %vm4653_vm3, %v4599_v31, %v4707_v45  ;;  %v4465_v51 = vpop.f32.mrb[30].mxu0  ;;  %v5577_v34 = vrot.slane %v5575_v35, 1  ;;  %v16473_v40 = vsel %vm1457_vm2, %v7497_v22, %v18240_v15  ;;  %v7082_v24 = vshll.u32 %v16457_v55, 16 }
 0x53d   : > { %v5109_v33 = vld [vmem:[#allocation2 + $0xa8] sm:$0x1]  ;;  %v10128_v16 = vpack.c.bf16 %v4761_v28, %v4760_v47  ;;  %v4600_v3 = vadd.f32 %v16229_v1, %v4539_v14  ;;  %v4540_v30 = vadd.f32 %v4465_v51, %v15788_v62  ;;  %v11882_v63 = vpop.f32.mrb[31].mxu0  ;;  %v7076_v4 = vrot.slane %v7074_v37, 1 }
 0x53e   : > { %v5110_v25 = vsel %vm15850_vm9, %v15829_v36, %v5109_v33  ;;  %v16480_v43 = vsel %vm571_vm1, %v5573_v26, %v5577_v34  ;;  %v5253_v31 = vld [vmem:[#allocation2 + $0xa4] sm:$0xf]  ;;  %v7072_v63 = vor.u32 %v7070_v6, %v7068_v23  ;;  %v7078_v45 = vshrl.u32 %v9814_v44, 16 }
 0x53f   : > { %18758 = vst [vmem:[#allocation79_spill] sm:$0xff] %v16480_v43  ;;  %5111 = vst [vmem:[#allocation2 + $0xa8] sm:$0x1] %v5110_v25  ;;  %v4708_v8 = vmul.f32 0.3, %v4600_v3  ;;  %v4601_v62 = vadd.f32 %v16229_v1, %v4540_v30  ;;  %11947 = vmatprep.mubr.bf16.mxu1 %v16480_v43  ;;  %vm4654_vm4 = vcmp.ge.f32.partialorder %v4600_v3, 0.0  ;;  %v16484_v22 = vcombine.low %v5252_v18, %v5253_v31 }
 0x540   : > { %10171 = vst [vmem:[#allocation2 + $0xb0] sm:$0xff] %v10128_v16   ;;  %v16487_v61 = vsel %vm571_vm1, %v7072_v63, %v7076_v4  ;;  %v7084_v26 = vrot.slane %v7082_v24, 1  ;;  %v5579_v16 = vshrl.u32 %v16455_v60, 16  ;;  %v7080_v0 = vor.u32 %v7078_v45, %v7076_v4  ;;  %v5255_v25 = vld [vmem:[#allocation2 + $0xac] sm:$0xf] }
 0x541   : > { %18759 = vst [vmem:[#allocation37_spill] sm:$0xff] %v16484_v22  ;;  %vm4655_vm5 = vcmp.ge.f32.partialorder %v4601_v62, 0.0  ;;  %v4709_v33 = vmul.f32 0.3, %v4601_v62  ;;  %18760 = vst [vmem:[#allocation39_spill] sm:$0xff] %v16487_v61  ;;  %v5583_v14 = vshll.u32 %v16484_v22, 16  ;;  %v4762_v47 = vsel %vm4654_vm4, %v4600_v3, %v4708_v8 }
 0x542   : > { %v4470_v35 = vpop.f32.mrb[32].mxu0  ;;  %v5581_v37 = vor.u32 %v5579_v16, %v5577_v34  ;;  %v16493_v30 = vsel %vm571_vm1, %v7080_v0, %v7084_v26 }
 0x543   : > { %v4763_v28 = vsel %vm4655_vm5, %v4601_v62, %v4709_v33  ;;  %v4541_v23 = vadd.f32 %v4470_v35, %v15797_v42  ;;  %v11885_v6 = vpop.f32.mrb[33].mxu0  ;;  %v5585_v51 = vrot.slane %v5583_v14, 1  ;;  %18761 = vst [vmem:[#allocation41_spill] sm:$0xff] %v16493_v30  ;;  %v5587_v33 = vshrl.u32 %v16484_v22, 16 }
 0x544   : > { %v10133_v18 = vpack.c.bf16 %v4763_v28, %v4762_v47  ;;  %v4473_v44 = vpop.f32.mrb[34].mxu0  ;;  %v7086_v14 = vshrl.u32 %v16457_v55, 16 }
 0x545   : > { %v4602_v24 = vadd.f32 %v16229_v1, %v4541_v23  ;;  %v4542_v63 = vadd.f32 %v4473_v44, %v15800_v39  ;;  %v11886_v15 = vpop.f32.mrb[35].mxu0  ;;  %v16498_v42 = vsel %vm571_vm1, %v5581_v37, %v5585_v51  ;;  %v5589_v23 = vor.u32 %v5587_v33, %v5585_v51 }
 0x546   : > { %v5254_v3 = vld [vmem:[#allocation2 + $0xa8] sm:$0xf]  ;;  %10172 = vst [vmem:[#allocation2 + $0xb8] sm:$0xff] %v10133_v18   ;;  %18762 = vst [vmem:[#allocation81_spill] sm:$0xff] %v16498_v42  ;;  %11948 = vmatmul.mubr.bf16.gmra.mrb[196].mxu1 %v16498_v42  ;;  %v18764_v18 = vrot.slane %v16457_v55, 1 }
 0x547   : > { %v5112_v61 = vld [vmem:[#allocation2 + $0xb4] sm:$0x1]  ;;  %v5175_v4 = vld [vmem:[#allocation2 + $0xb0] sm:$0x1]  ;;  %v16506_v62 = vcombine.low %v5254_v3, %v5255_v25  ;;  %v16508_v45 = vcombine.low %v5253_v31, %v5254_v3  ;;  %v4710_v39 = vmul.f32 0.3, %v4602_v24  ;;  %v4603_v15 = vadd.f32 %v16229_v1, %v4542_v63 }
 0x548   : > { %v5113_v34 = vsel %vm15850_vm9, %v15829_v36, %v5112_v61  ;;  %v5176_v8 = vsel %vm15866_vm13, %v15863_v7, %v5175_v4  ;;  %vm4656_vm6 = vcmp.ge.f32.partialorder %v4602_v24, 0.0  ;;  %v7088_v3 = vor.u32 %v7086_v14, %v7084_v26  ;;  %v18885_v50 = vld [vmem:[#allocation39_spill] sm:$0xff] }
 0x549   : > { %18763 = vst [vmem:[#allocation43_spill] sm:$0xff] %v16506_v62  ;;  %5114 = vst [vmem:[#allocation2 + $0xb4] sm:$0x1] %v5113_v34  ;;  %12140 = vmatmul.mubr.bf16.gmra.mrb[80].mxu0 %v16508_v45  ;;  %v5591_v61 = vshll.u32 %v16506_v62, 16  ;;  %v7501_v16 = vrot.slane %v16508_v45, 1  ;;  %vm4657_vm7 = vcmp.ge.f32.partialorder %v4603_v15, 0.0  ;;  %v4764_v44 = vsel %vm4656_vm6, %v4602_v24, %v4710_v39 }
 0x54a   : > { %5177 = vst [vmem:[#allocation2 + $0xb0] sm:$0x1] %v5176_v8  ;;  %v4711_v35 = vmul.f32 0.3, %v4603_v15  ;;  %v4478_v31 = vpop.f32.mrb[36].mxu0  ;;  %v7090_v0 = vshll.u32 %v16508_v45, 16 }
 0x54b   : > { %v4543_v47 = vadd.f32 %v4478_v31, %v15809_v17  ;;  %v11889_v28 = vpop.f32.mrb[37].mxu0  ;;  %v5593_v6 = vrot.slane %v5591_v61, 1  ;;  %v16522_v37 = vsel %vm1457_vm2, %v18764_v18, %v7501_v16  ;;  %v5595_v14 = vshrl.u32 %v16506_v62, 16 }
 0x54c   : > { %v4765_v63 = vsel %vm4657_vm7, %v4603_v15, %v4711_v35  ;;  %v4481_v4 = vpop.f32.mrb[38].mxu0  ;;  %v7092_v34 = vrot.slane %v7090_v0, 1  ;;  %v7094_v35 = vshrl.u32 %v16508_v45, 16 }
 0x54d   : > { %v5178_v8 = vld [vmem:[#allocation2 + $0xbc] sm:$0x1]  ;;  %v10138_v30 = vpack.c.bf16 %v4765_v63, %v4764_v44  ;;  %v4604_v42 = vadd.f32 %v16229_v1, %v4543_v47  ;;  %v4544_v43 = vadd.f32 %v4481_v4, %v15812_v41  ;;  %v16527_v17 = vsel %vm571_vm1, %v5589_v23, %v5593_v6  ;;  %v11890_v51 = vpop.f32.mrb[39].mxu0  ;;  %v5258_v41 = vld [vmem:[#allocation2 + $0xb8] sm:$0xf] }
 0x54e   : > { %v5179_v55 = vsel %vm15866_vm13, %v15863_v7, %v5178_v8  ;;  %11951 = vmatprep.mubr.bf16.mxu1 %v16527_v17  ;;  %v16534_v24 = vsel %vm571_vm1, %v7088_v3, %v7092_v34 }
 0x54f   : > { %5180 = vst [vmem:[#allocation2 + $0xbc] sm:$0x1] %v5179_v55  ;;  %10173 = vst [vmem:[#allocation2 + $0xc0] sm:$0xff] %v10138_v30   ;;  %v4712_v26 = vmul.f32 0.3, %v4604_v42  ;;  %v4605_v39 = vadd.f32 %v16229_v1, %v4544_v43  ;;  %vm4658_vm8 = vcmp.ge.f32.partialorder %v4604_v42, 0.0  ;;  %v7096_v43 = vor.u32 %v7094_v35, %v7092_v34 }
 0x550   : > { %v5257_v33 = vld [vmem:[#allocation2 + $0xb4] sm:$0xf] }
 0x551   : > { %v5256_v15 = vld [vmem:[#allocation2 + $0xb0] sm:$0xf]  ;;  %vm4659_vm10 = vcmp.ge.f32.partialorder %v4605_v39, 0.0  ;;  %v4713_v31 = vmul.f32 0.3, %v4605_v39  ;;  %v16541_v47 = vcombine.low %v5257_v33, %v5258_v41  ;;  %v4766_v18 = vsel %vm4658_vm8, %v4604_v42, %v4712_v26 }
 0x552   : > { %v9817_v61 = vcombine.low %v5255_v25, %v5256_v15  ;;  %v16539_v0 = vcombine.low %v5256_v15, %v5257_v33  ;;  %v4486_v28 = vpop.f32.mrb[40].mxu0 }
 0x553   : > { %v4767_v44 = vsel %vm4659_vm10, %v4605_v39, %v4713_v31  ;;  %v4545_v63 = vadd.f32 %v4486_v28, %v15821_v49  ;;  %v11893_v25 = vpop.f32.mrb[41].mxu0  ;;  %v7505_v55 = vrot.slane %v16541_v47, 1  ;;  %v5597_v39 = vor.u32 %v5595_v14, %v5593_v6 }
 0x554   : > { %18765 = vst [vmem:[#allocation83_spill] sm:$0xff] %v16539_v0  ;;  %12143 = vmatprep.mubr.bf16.mxu0 %v9817_v61  ;;  %v7098_v30 = vshll.u32 %v9817_v61, 16  ;;  %v7503_v23 = vrot.slane %v9817_v61, 1  ;;  %v5599_v45 = vshll.u32 %v16539_v0, 16  ;;  %v10143_v4 = vpack.c.bf16 %v4767_v44, %v4766_v18  ;;  %v4489_v8 = vpop.f32.mrb[42].mxu0 }
 0x555   : > { %12144 = vmatmul.mubr.bf16.gmra.mrb[84].mxu0 %v16541_v47  ;;  %v4606_v15 = vadd.f32 %v16229_v1, %v4545_v63  ;;  %v4546_v42 = vadd.f32 %v4489_v8, %v15827_v2  ;;  %v11894_v26 = vpop.f32.mrb[43].mxu0  ;;  %v7102_v6 = vshrl.u32 %v9817_v61, 16  ;;  %v5603_v14 = vshrl.u32 %v16539_v0, 16 }
 0x556   : > { %v7100_v3 = vrot.slane %v7098_v30, 1  ;;  %v16547_v51 = vsel %vm1457_vm2, %v7501_v16, %v7503_v23  ;;  %v5601_v34 = vrot.slane %v5599_v45, 1  ;;  %v5115_v49 = vld [vmem:[#allocation2 + $0xc0] sm:$0x1]  ;;  %10174 = vst [vmem:[#allocation2 + $0xc8] sm:$0xff] %v10143_v4   ;;  %v16553_v35 = vsel %vm1457_vm2, %v7503_v23, %v7505_v55 }
 0x557   : > { %v5259_v33 = vld [vmem:[#allocation2 + $0xbc] sm:$0xf]  ;;  %v5116_v16 = vsel %vm15850_vm9, %v15829_v36, %v5115_v49  ;;  %v4714_v2 = vmul.f32 0.3, %v4606_v15  ;;  %v4607_v28 = vadd.f32 %v16229_v1, %v4546_v42  ;;  %vm4660_vm11 = vcmp.ge.f32.partialorder %v4606_v15, 0.0 }
 0x558   : > { %v16556_v31 = vsel %vm571_vm1, %v7096_v43, %v7100_v3  ;;  %v16561_v30 = vcombine.low %v5258_v41, %v5259_v33  ;;  %5117 = vst [vmem:[#allocation2 + $0xc0] sm:$0x1] %v5116_v16  ;;  %v16565_v18 = vsel %vm571_vm1, %v5597_v39, %v5601_v34  ;;  %v7104_v44 = vor.u32 %v7102_v6, %v7100_v3  ;;  %v5261_v39 = vld [vmem:[#allocation2 + $0xc4] sm:$0xf] }
 0x559   : > { %11952 = vmatmul.mubr.bf16.gmra.mrb[200].mxu1 %v16565_v18  ;;  %vm4661_vm12 = vcmp.ge.f32.partialorder %v4607_v28, 0.0  ;;  %v4715_v43 = vmul.f32 0.3, %v4607_v28  ;;  %v7106_v41 = vshll.u32 %v16541_v47, 16  ;;  %v5605_v63 = vor.u32 %v5603_v14, %v5601_v34 }
 0x55a   : > { %18766 = vst [vmem:[#allocation46_spill] sm:$0xff] %v16561_v30  ;;  %v5607_v23 = vshll.u32 %v16561_v30, 16  ;;  %v4768_v45 = vsel %vm4660_vm11, %v4606_v15, %v4714_v2  ;;  %v5611_v6 = vshrl.u32 %v16561_v30, 16 }
 0x55b   : > { %v4769_v1 = vsel %vm4661_vm12, %v4607_v28, %v4715_v43  ;;  %v7108_v4 = vrot.slane %v7106_v41, 1 }
 0x55c   : > { %v5609_v25 = vrot.slane %v5607_v23, 1  ;;  %v10148_v61 = vpack.c.bf16 %v4769_v1, %v4768_v45 }
 0x55d   : > { %v5118_v8 = vld [vmem:[#allocation2 + $0xcc] sm:$0x1]  ;;  %v5181_v42 = vld [vmem:[#allocation2 + $0xc8] sm:$0x1]  ;;  %v16582_v15 = vsel %vm571_vm1, %v7104_v44, %v7108_v4  ;;  %v7110_v44 = vshrl.u32 %v16541_v47, 16 }
 0x55e   : > { %v16572_v26 = vsel %vm571_vm1, %v5605_v63, %v5609_v25  ;;  %v5119_v49 = vsel %vm15850_vm9, %v15829_v36, %v5118_v8  ;;  %v5182_v3 = vsel %vm15866_vm13, %v15863_v7, %v5181_v42  ;;  %10175 = vst [vmem:[#allocation2 + $0xd0] sm:$0xff] %v10148_v61   ;;  %v16593_v41 = vor.u32 %v5611_v6, %v5609_v25 }
 0x55f   : > { %11955 = vmatprep.mubr.bf16.mxu1 %v16572_v26  ;;  %5120 = vst [vmem:[#allocation2 + $0xcc] sm:$0x1] %v5119_v49  ;;  %5183 = vst [vmem:[#allocation2 + $0xc8] sm:$0x1] %v5182_v3  ;;  %v5260_v34 = vld [vmem:[#allocation2 + $0xc0] sm:$0xf]  ;;  %v7112_v8 = vor.u32 %v7110_v44, %v7108_v4 }
 0x560   : > { %5209 = vst [vmem:[#allocation2 + $0xcc] sm:$0xf] %v15842_v10  ;;  %5210 = vst [vmem:[#allocation2 + $0xd0] sm:$0xf] %v15842_v10  ;;  %v16586_v16 = vcombine.low %v5260_v34, %v5260_v34  ;;  %v9819_v2 = vcombine.low %v5259_v33, %v5260_v34  ;;  %v16588_v28 = vcombine.low %v5260_v34, %v5261_v39  ;;  %v16610_v4 = vld [vmem:[#allocation2] sm:$0xff]  }
 0x562   : > { %18767 = vst [vmem:[#allocation85_spill] sm:$0xff] %v16588_v28  ;;  %v5615_v14 = vshll.u32 %v16586_v16, 16  ;;  %12147 = vmatprep.mubr.bf16.mxu0 %v9819_v2  ;;  %v7114_v23 = vshll.u32 %v9819_v2, 16  ;;  %v7507_v43 = vrot.slane %v9819_v2, 1 }
 0x564   : > { %v5617_v63 = vrot.slane %v5615_v14, 1  ;;  %v7116_v45 = vrot.slane %v7114_v23, 1  ;;  %v16596_v1 = vsel %vm1457_vm2, %v7505_v55, %v7507_v43  ;;  %v7118_v14 = vshrl.u32 %v9819_v2, 16  ;;  %v12731_v2 = vld [vmem:[%s18081_s4 + $0x88] sm:$0xff]  }
 0x565   : > { %v5184_v33 = vld [vmem:[#allocation2 + $0xd4] sm:$0x1] }
 0x566   : > { %v5262_v42 = vld [vmem:[#allocation2 + $0xc8] sm:$0xf]  ;;  %v5618_v61 = vsel %vm571_vm1, %v16593_v41, %v5617_v63  ;;  %v16601_v49 = vsel %vm571_vm1, %v7112_v8, %v7116_v45  ;;  %v5185_v47 = vsel %vm15866_vm13, %v15863_v7, %v5184_v33  ;;  %v7120_v63 = vor.u32 %v7118_v14, %v7116_v45  ;;  %v12734_v14 = vld [vmem:[%s18081_s4 + $0xa0] sm:$0xff]  }
 0x567   : > { %v5263_v25 = vld [vmem:[#allocation2 + $0xcc] sm:$0xf]  ;;  %v16606_v3 = vcombine.low %v5261_v39, %v5262_v42  ;;  %11956 = vmatmul.mubr.bf16.gmra.mrb[204].mxu1 %v5618_v61  ;;  %5186 = vst [vmem:[#allocation2 + $0xd4] sm:$0x1] %v5185_v47  ;;  %v12804_v61 = vld [vmem:[%s18081_s4 + $0x80] sm:$0xff]   ;;  %v12732_v47 = vld [vmem:[%s18081_s4 + $0x90] sm:$0xff]  }
 0x568   : > { %v16608_v55 = vcombine.low %v5262_v42, %v5263_v25  ;;  %11975 = vmatprep.mubr.bf16.mxu1 %v16610_v4  ;;  %v16613_v34 = vcombine.low %v5263_v25, %v5263_v25  ;;  %5211 = vst [vmem:[#allocation2 + $0xd4] sm:$0xf] %v15842_v10  ;;  %v12739_v25 = vld [vmem:[%s18081_s4 + $0x1d0] sm:$0xff]  }
 0x569   : > { %12148 = vmatmul.mubr.bf16.gmra.mrb[88].mxu0 %v16606_v3  ;;  %v18243_v6 = vrot.slane %v16606_v3, 1  ;;  %v7122_v39 = vshll.u32 %v16606_v3, 16  ;;  %v7126_v10 = vshrl.u32 %v16606_v3, 16 }
 0x56a   : > { %18768 = vst [vmem:[#allocation49_spill] sm:$0xff] %v16608_v55  ;;  %12231 = vmatprep.mubr.bf16.mxu0 %v15946_v29  ;;  %v7130_v23 = vshll.u32 %v16613_v34, 16 }
 0x56b   : > { %v16624_v44 = vsel %vm1457_vm2, %v7507_v43, %v18243_v6  ;;  %v7124_v8 = vrot.slane %v7122_v39, 1  ;;  %v12737_v43 = vld [vmem:[%s18081_s4 + $0x1c8] sm:$0xff]  }
 0x56c   : > { %v7132_v33 = vrot.slane %v7130_v23, 1  ;;  %v18772_v39 = vld [vmem:[#allocation28_spill] sm:$0xff]  ;;  %v12741_v23 = vld [vmem:[%s18081_s4 + $0x1e0] sm:$0xff]  }
 0x56d   : > { %v16631_v42 = vsel %vm571_vm1, %v7120_v63, %v7124_v8  ;;  %v7128_v29 = vor.u32 %v7126_v10, %v7124_v8  ;;  %v12735_v63 = vld [vmem:[%s18081_s4 + $0xa8] sm:$0xff]   ;;  %v18773_v8 = vld [vmem:[#allocation21_spill] sm:$0xff] }
 0x56e   : > { %18769 = vst [vmem:[#allocation105_spill] sm:$0xff] %v16631_v42  ;;  %v12744_v10 = vld [vmem:[%s18081_s4 + $0x1e8] sm:$0xff]  }
 0x56f   : > { %11976 = vmatmul.mubr.bf16.vlgmr.msra.gmra.mrb[208].mxu1 %v15896_v59  ;;  %v16638_v45 = vsel %vm571_vm1, %v7128_v29, %v7132_v33  ;;  %v18774_v33 = vld [vmem:[#allocation5_spill] sm:$0xff] }
 0x570   : > { %18770 = vst [vmem:[#allocation76_spill] sm:$0xff] %v16638_v45  ;;  %11979 = vmatprep.mubr.bf16.mxu1 %v15907_v54  ;;  %12024 = vmatpush3.bf16.msra.mxu1 %v12804_v61  ;;  %v12738_v29 = vld [vmem:[%s18081_s4 + $0xb0] sm:$0xff]  }
 0x571   : > { %12232 = vmatmul.mubr.bf16.vlgmr.msra.gmra.mrb[92].mxu0 %v15975_v11  ;;  %12025 = vmatprep.subr.bf16.mxu1 %v12731_v2  ;;  %v12733_v11 = vld [vmem:[%s18081_s4 + $0x98] sm:$0xff]   ;;  %v12745_v61 = vld [vmem:[%s18081_s4 + $0x1f0] sm:$0xff]  }
 0x572   : > { %12235 = vmatprep.mubr.bf16.mxu0 %v15980_v5  ;;  %12344 = vmatpush3.bf16.msra.mxu0 %v16428_v19  ;;  %v12740_v5 = vld [vmem:[%s18081_s4 + $0x1d8] sm:$0xff]   ;;  %v18771_v19 = vld [vmem:[#allocation24_spill] sm:$0xff] }
 0x573   : > { %12345 = vmatprep.subr.bf16.mxu0 %v12737_v43 }
 0x574   : > { %12026 = vmatpush3.bf16.msra.mxu1 %v12731_v2  ;;  %v18775_v2 = vld [vmem:[#allocation11_spill] sm:$0xff] }
 0x575   : > { %12027 = vmatprep.subr.bf16.mxu1 %v12732_v47 }
 0x576   : > { %12346 = vmatpush3.bf16.msra.mxu0 %v12737_v43  ;;  %v18776_v43 = vld [vmem:[#allocation36_spill] sm:$0xff] }
 0x577   : > { %11980 = vmatmul.mubr.bf16.gmra.mrb[212].mxu1 %v15926_v13  ;;  %12347 = vmatprep.subr.bf16.mxu0 %v12739_v25 }
 0x578   : > { %11983 = vmatprep.mubr.bf16.mxu1 %v15960_v21  ;;  %12028 = vmatpush3.bf16.msra.mxu1 %v12732_v47  ;;  %v12742_v47 = vld [vmem:[%s18081_s4 + $0xb8] sm:$0xff]  }
 0x579   : > { %12236 = vmatmul.mubr.bf16.gmra.mrb[96].mxu0 %v18771_v19  ;;  %12029 = vmatprep.subr.bf16.mxu1 %v12733_v11 }
 0x57a   : > { %12239 = vmatprep.mubr.bf16.mxu0 %v18772_v39  ;;  %12348 = vmatpush3.bf16.msra.mxu0 %v12739_v25  ;;  %v18777_v25 = vld [vmem:[#allocation9_spill] sm:$0xff]  ;;  %v16697_v39 = vld [vmem:[%s18081_s4 + $0x100] sm:$0xff]  }
 0x57b   : > { %12349 = vmatprep.subr.bf16.mxu0 %v12740_v5 }
 0x57c   : > { %12030 = vmatpush3.bf16.msra.mxu1 %v12733_v11  ;;  %v12746_v11 = vld [vmem:[%s18081_s4 + $0x1f8] sm:$0xff]  }
 0x57d   : > { %12031 = vmatprep.subr.bf16.mxu1 %v12734_v14 }
 0x57e   : > { %12350 = vmatpush3.bf16.msra.mxu0 %v12740_v5  ;;  %v18778_v5 = vld [vmem:[#allocation13_spill] sm:$0xff] }
 0x57f   : > { %11984 = vmatmul.mubr.bf16.gmra.mrb[216].mxu1 %v18773_v8  ;;  %12351 = vmatprep.subr.bf16.mxu0 %v12741_v23 }
 0x580   : > { %11987 = vmatprep.mubr.bf16.mxu1 %v18774_v33  ;;  %12032 = vmatpush3.bf16.msra.mxu1 %v12734_v14  ;;  %v18779_v14 = vld [vmem:[#allocation20_spill] sm:$0xff] }
 0x581   : > { %12240 = vmatmul.mubr.bf16.gmra.mrb[100].mxu0 %v18775_v2  ;;  %12033 = vmatprep.subr.bf16.mxu1 %v12735_v63 }
 0x582   : > { %12243 = vmatprep.mubr.bf16.mxu0 %v18776_v43  ;;  %12352 = vmatpush3.bf16.msra.mxu0 %v12741_v23 }
 0x583   : > { %12353 = vmatprep.subr.bf16.mxu0 %v12744_v10 }
 0x584   : > { %12034 = vmatpush3.bf16.msra.mxu1 %v12735_v63  ;;  %v18780_v63 = vld [vmem:[#allocation40_spill] sm:$0xff] }
 0x585   : > { %12035 = vmatprep.subr.bf16.mxu1 %v12738_v29 }
 0x586   : > { %12354 = vmatpush3.bf16.msra.mxu0 %v12744_v10 }
 0x587   : > { %11988 = vmatmul.mubr.bf16.gmra.mrb[220].mxu1 %v18777_v25  ;;  %12355 = vmatprep.subr.bf16.mxu0 %v12745_v61 }
 0x588   : > { %11991 = vmatprep.mubr.bf16.mxu1 %v18778_v5  ;;  %12036 = vmatpush3.bf16.msra.mxu1 %v12738_v29 }
 0x589   : > { %v11913_v19 = vpop.f32.mrb[160].mxu1  ;;  %12244 = vmatmul.mubr.bf16.gmra.mrb[104].mxu0 %v18779_v14  ;;  %12037 = vmatprep.subr.bf16.mxu1 %v12742_v47  ;;  %v18783_v14 = vld [vmem:[#allocation17_spill] sm:$0xff] }
 0x58a   : > { %v16699_v23 = vpop.f32.mrb[161].mxu1  ;;  %12247 = vmatprep.mubr.bf16.mxu0 %v18780_v63  ;;  %12356 = vmatpush3.bf16.msra.mxu0 %v12745_v61  ;;  %v18785_v63 = vld [vmem:[#allocation61_spill] sm:$0xff] }
 0x58b   : > { %v16702_v10 = vpop.f32.mrb[162].mxu1  ;;  %12357 = vmatprep.subr.bf16.mxu0 %v12746_v11  ;;  %v18786_v61 = vld [vmem:[#allocation25_spill] sm:$0xff] }
 0x58c   : > { %v16704_v2 = vpop.f32.mrb[163].mxu1  ;;  %v12105_v29 = vpop.f32.mrb[44].mxu0  ;;  %12038 = vmatpush3.bf16.msra.mxu1 %v12742_v47  ;;  %v18788_v47 = vld [vmem:[#allocation69_spill] sm:$0xff] }
 0x58d   : > { %v16706_v43 = vpop.f32.mrb[45].mxu0  ;;  %12151 = vmatprep.subr.bf16.mxu1 %v16697_v39 }
 0x58e   : > { %18781 = vst [vmem:[#allocation78_spill] sm:$0xff] %v16706_v43  ;;  %v16709_v19 = vpop.f32.mrb[46].mxu0  ;;  %12358 = vmatpush3.bf16.msra.mxu0 %v12746_v11  ;;  %v18790_v43 = vld [vmem:[#allocation65_spill] sm:$0xff] }
 0x58f   : > { %18782 = vst [vmem:[#allocation80_spill] sm:$0xff] %v16709_v19  ;;  %11992 = vmatmul.mubr.bf16.gmra.mrb[224].mxu1 %v18783_v14  ;;  %v16712_v6 = vpop.f32.mrb[47].mxu0 }
 0x590   : > { %18784 = vst [vmem:[#allocation82_spill] sm:$0xff] %v16712_v6  ;;  %11995 = vmatprep.mubr.bf16.mxu1 %v18785_v63 }
 0x591   : > { %12248 = vmatmul.mubr.bf16.gmra.mrb[108].mxu0 %v18786_v61 }
 0x592   : > { %12251 = vmatprep.mubr.bf16.mxu0 %v16295_v12 }
 0x596   : > { %v16717_v45 = vpop.f32.mrb[48].mxu0 }
 0x597   : > { %18787 = vst [vmem:[#allocation84_spill] sm:$0xff] %v16717_v45  ;;  %11996 = vmatmul.mubr.bf16.gmra.mrb[228].mxu1 %v18788_v47  ;;  %v16720_v29 = vpop.f32.mrb[49].mxu0  ;;  %v18794_v45 = vld [vmem:[#allocation33_spill] sm:$0xff] }
 0x598   : > { %18789 = vst [vmem:[#allocation87_spill] sm:$0xff] %v16720_v29  ;;  %11999 = vmatprep.mubr.bf16.mxu1 %v18790_v43  ;;  %v16723_v19 = vpop.f32.mrb[50].mxu0 }
 0x599   : > { %18791 = vst [vmem:[#allocation90_spill] sm:$0xff] %v16723_v19  ;;  %v6729_v11 = vpop.f32.mrb[51].mxu0  ;;  %v16725_v42 = vpop.f32.mrb[164].mxu1  ;;  %12252 = vmatmul.mubr.bf16.gmra.mrb[112].mxu0 %v16303_v9 }
 0x59a   : > { %v16728_v6 = vpop.f32.mrb[165].mxu1  ;;  %12255 = vmatprep.mubr.bf16.mxu0 %v16352_v46 }
 0x59b   : > { %v16731_v12 = vpop.f32.mrb[166].mxu1 }
 0x59c   : > { %v5743_v61 = vpop.f32.mrb[167].mxu1 }
 0x59f   : > { %12000 = vmatmul.mubr.bf16.gmra.mrb[232].mxu1 %v16285_v52 }
 0x5a0   : > { %12003 = vmatprep.mubr.bf16.mxu1 %v16314_v27 }
 0x5a1   : > { %12256 = vmatmul.mubr.bf16.gmra.mrb[116].mxu0 %v16377_v38 }
 0x5a2   : > { %12259 = vmatprep.mubr.bf16.mxu0 %v16385_v20 }
 0x5a7   : > { %12004 = vmatmul.mubr.bf16.gmra.mrb[236].mxu1 %v16336_v32 }
 0x5a8   : > { %12007 = vmatprep.mubr.bf16.mxu1 %v16369_v58 }
 0x5a9   : > { %12260 = vmatmul.mubr.bf16.gmra.mrb[120].mxu0 %v16440_v53 }
 0x5aa   : > { %12263 = vmatprep.mubr.bf16.mxu0 %v16465_v57 }
 0x5ab   : > { %v16740_v9 = vpop.f32.mrb[168].mxu1 }
 0x5ac   : > { %v5755_v46 = vpop.f32.mrb[169].mxu1  ;;  %v16743_v61 = vpop.f32.mrb[52].mxu0 }
 0x5ad   : > { %v11922_v11 = vpop.f32.mrb[170].mxu1  ;;  %18792 = vst [vmem:[#allocation86_spill] sm:$0xff] %v16743_v61  ;;  %v6741_v29 = vpop.f32.mrb[53].mxu0 }
 0x5ae   : > { %v16745_v19 = vpop.f32.mrb[171].mxu1  ;;  %v12114_v38 = vpop.f32.mrb[54].mxu0 }
 0x5af   : > { %12008 = vmatmul.mubr.bf16.gmra.mrb[240].mxu1 %v16393_v56  ;;  %v16748_v20 = vpop.f32.mrb[55].mxu0 }
 0x5b0   : > { %18793 = vst [vmem:[#allocation93_spill] sm:$0xff] %v16748_v20  ;;  %12011 = vmatprep.mubr.bf16.mxu1 %v18794_v45 }
 0x5b1   : > { %12264 = vmatmul.mubr.bf16.gmra.mrb[124].mxu0 %v16473_v40 }
 0x5b2   : > { %12267 = vmatprep.mubr.bf16.mxu0 %v16522_v37 }
 0x5b7   : > { %12012 = vmatmul.mubr.bf16.gmra.mrb[244].mxu1 %v16455_v60 }
 0x5b8   : > { %12015 = vmatprep.mubr.bf16.mxu1 %v16484_v22 }
 0x5b9   : > { %12268 = vmatmul.mubr.bf16.gmra.mrb[128].mxu0 %v16547_v51  ;;  %v6198_v51 = vrot.slane %v16610_v4, 1 }
 0x5ba   : > { %12271 = vmatprep.mubr.bf16.mxu0 %v16553_v35  ;;  %v6199_v35 = vrot.slane %v15896_v59, 1  ;;  %v6201_v59 = vrot.slane %v15907_v54, 1 }
 0x5bb   : > { %v11925_v53 = vpop.f32.mrb[172].mxu1 }
 0x5bc   : > { %v16757_v57 = vpop.f32.mrb[173].mxu1  ;;  %v12117_v46 = vpop.f32.mrb[56].mxu0  ;;  %v7511_v53 = vrot.slane %v16613_v34, 1  ;;  %v18802_v34 = vld [vmem:[#allocation18_spill] sm:$0xff] }
 0x5bd   : > { %v16759_v29 = vpop.f32.mrb[174].mxu1  ;;  %v16763_v38 = vpop.f32.mrb[57].mxu0 }
 0x5be   : > { %v16761_v11 = vpop.f32.mrb[175].mxu1  ;;  %18795 = vst [vmem:[#allocation88_spill] sm:$0xff] %v16763_v38  ;;  %v16765_v40 = vpop.f32.mrb[58].mxu0 }
 0x5bf   : > { %18796 = vst [vmem:[#allocation109_spill] sm:$0xff] %v16765_v40  ;;  %12016 = vmatmul.mubr.bf16.gmra.mrb[248].mxu1 %v16506_v62  ;;  %v16768_v37 = vpop.f32.mrb[59].mxu0  ;;  %v6200_v40 = vsel %vm1457_vm2, %v6198_v51, %v6199_v35 }
 0x5c0   : > { %18797 = vst [vmem:[#allocation97_spill] sm:$0xff] %v16768_v37  ;;  %12019 = vmatprep.mubr.bf16.mxu1 %v16539_v0  ;;  %v18799_v37 = vrot.slane %v16606_v3, 1  ;;  %v12748_v3 = vld [vmem:[%s18081_s4 + $0x108] sm:$0xff]  }
 0x5c1   : > { %12272 = vmatmul.mubr.bf16.gmra.mrb[132].mxu0 %v16596_v1 }
 0x5c2   : > { %12275 = vmatprep.mubr.bf16.mxu0 %v16624_v44  ;;  %v7512_v38 = vsel %vm1457_vm2, %v18799_v37, %v7511_v53  ;;  %v6203_v44 = vrot.slane %v15926_v13, 1  ;;  %v18803_v53 = vld [vmem:[#allocation22_spill] sm:$0xff] }
 0x5c4   : > { %v6204_v54 = vsel %vm1457_vm2, %v6201_v59, %v6203_v44 }
 0x5c5   : > { %v16776_v46 = vpop.f32.mrb[60].mxu0 }
 0x5c6   : > { %18798 = vst [vmem:[#allocation89_spill] sm:$0xff] %v16776_v46  ;;  %v16783_v20 = vpop.f32.mrb[61].mxu0 }
 0x5c7   : > { %12020 = vmatmul.mubr.bf16.gmra.mrb[252].mxu1 %v16561_v30  ;;  %18800 = vst [vmem:[#allocation91_spill] sm:$0xff] %v16783_v20  ;;  %v16785_v1 = vpop.f32.mrb[62].mxu0 }
 0x5c8   : > { %12039 = vmatprep.mubr.bf16.mxu1 %v6200_v40  ;;  %18801 = vst [vmem:[#allocation100_spill] sm:$0xff] %v16785_v1  ;;  %v6773_v4 = vpop.f32.mrb[63].mxu0  ;;  %v6202_v40 = vsel %vm1457_vm2, %v6199_v35, %v6201_v59  ;;  %v18804_v1 = vld [vmem:[#allocation7_spill] sm:$0xff]  ;;  %v6207_v35 = vrot.slane %v18773_v8, 1  ;;  %v12750_v59 = vld [vmem:[%s18081_s4 + $0x118] sm:$0xff]  }
 0x5c9   : > { %12276 = vmatmul.mubr.bf16.gmra.mrb[136].mxu0 %v7512_v38  ;;  %v12749_v4 = vld [vmem:[%s18081_s4 + $0x110] sm:$0xff]  }
 0x5ca   : > { %12359 = vmatprep.mubr.bf16.mxu0 %v18802_v34  ;;  %v16790_v46 = vpop.f32.mrb[176].mxu1  ;;  %v6205_v34 = vrot.slane %v15960_v21, 1 }
 0x5cb   : > { %v16792_v51 = vpop.f32.mrb[177].mxu1 }
 0x5cc   : > { %v16798_v37 = vpop.f32.mrb[178].mxu1 }
 0x5cd   : > { %v5787_v38 = vpop.f32.mrb[179].mxu1 }
 0x5ce   : > { %v6209_v38 = vrot.slane %v18774_v33, 1 }
 0x5cf   : > { %12040 = vmatmul.mubr.bf16.vlgmr.msra.gmra.mrb[0].mxu1 %v6202_v40  ;;  %v16817_v40 = vsel %vm1457_vm2, %v6205_v34, %v6207_v35 }
 0x5d0   : > { %12043 = vmatprep.mubr.bf16.mxu1 %v6204_v54  ;;  %12152 = vmatpush3.bf16.msra.mxu1 %v16697_v39  ;;  %v16813_v39 = vsel %vm1457_vm2, %v6203_v44, %v6205_v34  ;;  %18806 = vst [vmem:[#allocation92_spill] sm:$0xff] %v16817_v40  ;;  %v18808_v44 = vld [vmem:[#allocation34_spill] sm:$0xff]  ;;  %v6211_v34 = vrot.slane %v18777_v25, 1  ;;  %v16837_v61 = vsel %vm1457_vm2, %v6207_v35, %v6209_v38  ;;  %v6213_v35 = vrot.slane %v18778_v5, 1 }
 0x5d1   : > { %12360 = vmatmul.mubr.bf16.vlgmr.msra.gmra.mrb[140].mxu0 %v18803_v53  ;;  %12153 = vmatprep.subr.bf16.mxu1 %v12748_v3  ;;  %18805 = vst [vmem:[#allocation113_spill] sm:$0xff] %v16813_v39  ;;  %18810 = vst [vmem:[#allocation94_spill] sm:$0xff] %v16837_v61 }
 0x5d2   : > { %12363 = vmatprep.mubr.bf16.mxu0 %v18804_v1  ;;  %v18807_v1 = vld [vmem:[#allocation30_spill] sm:$0xff] }
 0x5d4   : > { %12154 = vmatpush3.bf16.msra.mxu1 %v12748_v3  ;;  %v12751_v3 = vld [vmem:[%s18081_s4 + $0x120] sm:$0xff]  }
 0x5d5   : > { %12155 = vmatprep.subr.bf16.mxu1 %v12749_v4 }
 0x5d7   : > { %12044 = vmatmul.mubr.bf16.gmra.mrb[4].mxu1 %v16813_v39 }
 0x5d8   : > { %12047 = vmatprep.mubr.bf16.mxu1 %v16817_v40  ;;  %12156 = vmatpush3.bf16.msra.mxu1 %v12749_v4  ;;  %v12752_v40 = vld [vmem:[%s18081_s4 + $0x128] sm:$0xff]  }
 0x5d9   : > { %12364 = vmatmul.mubr.bf16.gmra.mrb[144].mxu0 %v18807_v1  ;;  %12157 = vmatprep.subr.bf16.mxu1 %v12750_v59 }
 0x5da   : > { %12367 = vmatprep.mubr.bf16.mxu0 %v18808_v44  ;;  %v16841_v44 = vsel %vm1457_vm2, %v6209_v38, %v6211_v34  ;;  %v12754_v38 = vld [vmem:[%s18081_s4 + $0x138] sm:$0xff]  }
 0x5db   : > { %v16825_v54 = vpop.f32.mrb[180].mxu1  ;;  %18811 = vst [vmem:[#allocation117_spill] sm:$0xff] %v16841_v44 }
 0x5dc   : > { %v5799_v53 = vpop.f32.mrb[181].mxu1  ;;  %v16829_v20 = vpop.f32.mrb[64].mxu0  ;;  %12158 = vmatpush3.bf16.msra.mxu1 %v12750_v59  ;;  %v18813_v59 = vld [vmem:[#allocation19_spill] sm:$0xff] }
 0x5dd   : > { %v11934_v39 = vpop.f32.mrb[182].mxu1  ;;  %18809 = vst [vmem:[#allocation103_spill] sm:$0xff] %v16829_v20  ;;  %v6785_v1 = vpop.f32.mrb[65].mxu0  ;;  %12159 = vmatprep.subr.bf16.mxu1 %v12751_v3  ;;  %v12753_v53 = vld [vmem:[%s18081_s4 + $0x130] sm:$0xff]  }
 0x5de   : > { %v16831_v4 = vpop.f32.mrb[183].mxu1  ;;  %v12126_v33 = vpop.f32.mrb[66].mxu0  ;;  %v6215_v1 = vrot.slane %v18783_v14, 1 }
 0x5df   : > { %12048 = vmatmul.mubr.bf16.gmra.mrb[8].mxu1 %v16837_v61  ;;  %v16843_v39 = vpop.f32.mrb[67].mxu0  ;;  %v18814_v33 = vld [vmem:[#allocation23_spill] sm:$0xff]  ;;  %v18818_v61 = vld [vmem:[#allocation44_spill] sm:$0xff] }
 0x5e0   : > { %18812 = vst [vmem:[#allocation107_spill] sm:$0xff] %v16843_v39  ;;  %12051 = vmatprep.mubr.bf16.mxu1 %v16841_v44  ;;  %12160 = vmatpush3.bf16.msra.mxu1 %v12751_v3  ;;  %v16857_v3 = vsel %vm1457_vm2, %v6211_v34, %v6213_v35  ;;  %v6217_v44 = vrot.slane %v18785_v63, 1 }
 0x5e1   : > { %12368 = vmatmul.mubr.bf16.gmra.mrb[148].mxu0 %v18813_v59  ;;  %12161 = vmatprep.subr.bf16.mxu1 %v12752_v40  ;;  %18815 = vst [vmem:[#allocation96_spill] sm:$0xff] %v16857_v3  ;;  %v16861_v59 = vsel %vm1457_vm2, %v6213_v35, %v6215_v1  ;;  %v6219_v35 = vrot.slane %v18788_v47, 1 }
 0x5e2   : > { %12371 = vmatprep.mubr.bf16.mxu0 %v18814_v33  ;;  %18816 = vst [vmem:[#allocation98_spill] sm:$0xff] %v16861_v59  ;;  %v18817_v33 = vld [vmem:[#allocation42_spill] sm:$0xff]  ;;  %v16883_v20 = vsel %vm1457_vm2, %v6215_v1, %v6217_v44  ;;  %v6223_v1 = vrot.slane %v16285_v52, 1 }
 0x5e3   : > { %18820 = vst [vmem:[#allocation45_spill] sm:$0xff] %v16883_v20 }
 0x5e4   : > { %12162 = vmatpush3.bf16.msra.mxu1 %v12752_v40  ;;  %v16868_v40 = vld [vmem:[%s18081_s4 + $0x180] sm:$0xff]  }
 0x5e5   : > { %12163 = vmatprep.subr.bf16.mxu1 %v12753_v53 }
 0x5e7   : > { %12052 = vmatmul.mubr.bf16.gmra.mrb[12].mxu1 %v16857_v3 }
 0x5e8   : > { %12055 = vmatprep.mubr.bf16.mxu1 %v16861_v59  ;;  %12164 = vmatpush3.bf16.msra.mxu1 %v12753_v53 }
 0x5e9   : > { %12372 = vmatmul.mubr.bf16.gmra.mrb[152].mxu0 %v18817_v33  ;;  %12165 = vmatprep.subr.bf16.mxu1 %v12754_v38 }
 0x5ea   : > { %12375 = vmatprep.mubr.bf16.mxu0 %v18818_v61  ;;  %v16889_v61 = vsel %vm1457_vm2, %v6217_v44, %v6219_v35 }
 0x5eb   : > { %v11937_v34 = vpop.f32.mrb[184].mxu1  ;;  %18822 = vst [vmem:[#allocation115_spill] sm:$0xff] %v16889_v61 }
 0x5ec   : > { %v16872_v3 = vpop.f32.mrb[185].mxu1  ;;  %v12129_v53 = vpop.f32.mrb[68].mxu0  ;;  %12166 = vmatpush3.bf16.msra.mxu1 %v12754_v38  ;;  %v18824_v38 = vld [vmem:[#allocation27_spill] sm:$0xff] }
 0x5ed   : > { %v16875_v39 = vpop.f32.mrb[186].mxu1  ;;  %v16879_v59 = vpop.f32.mrb[69].mxu0  ;;  %12279 = vmatprep.subr.bf16.mxu1 %v16868_v40  ;;  %v6221_v53 = vrot.slane %v18790_v43, 1 }
 0x5ee   : > { %v16877_v33 = vpop.f32.mrb[187].mxu1  ;;  %18819 = vst [vmem:[#allocation111_spill] sm:$0xff] %v16879_v59  ;;  %v16885_v34 = vpop.f32.mrb[70].mxu0  ;;  %v18825_v59 = vld [vmem:[#allocation29_spill] sm:$0xff] }
 0x5ef   : > { %18821 = vst [vmem:[#allocation99_spill] sm:$0xff] %v16885_v34  ;;  %12056 = vmatmul.mubr.bf16.gmra.mrb[16].mxu1 %v16883_v20  ;;  %v16891_v47 = vpop.f32.mrb[71].mxu0  ;;  %v16899_v63 = vsel %vm1457_vm2, %v6219_v35, %v6221_v53  ;;  %v16905_v44 = vsel %vm1457_vm2, %v6221_v53, %v6223_v1  ;;  %v18832_v35 = vld [vmem:[#allocation74_spill] sm:$0xff] }
 0x5f0   : > { %18823 = vst [vmem:[#allocation101_spill] sm:$0xff] %v16891_v47  ;;  %12059 = vmatprep.mubr.bf16.mxu1 %v16889_v61  ;;  %18826 = vst [vmem:[#allocation51_spill] sm:$0xff] %v16899_v63  ;;  %v18831_v61 = vld [vmem:[#allocation71_spill] sm:$0xff] }
 0x5f1   : > { %12376 = vmatmul.mubr.bf16.gmra.mrb[156].mxu0 %v18824_v38  ;;  %18828 = vst [vmem:[#allocation102_spill] sm:$0xff] %v16905_v44 }
 0x5f2   : > { %12379 = vmatprep.mubr.bf16.mxu0 %v18825_v59  ;;  %v6225_v59 = vrot.slane %v16314_v27, 1 }
 0x5f4   : > { %v16921_v53 = vsel %vm1457_vm2, %v6223_v1, %v6225_v59 }
 0x5f5   : > { %18833 = vst [vmem:[#allocation126_spill] sm:$0xff] %v16921_v53 }
 0x5f7   : > { %12060 = vmatmul.mubr.bf16.gmra.mrb[20].mxu1 %v16899_v63 }
 0x5f8   : > { %v16901_v34 = vpop.f32.mrb[72].mxu0  ;;  %12063 = vmatprep.mubr.bf16.mxu1 %v16905_v44 }
 0x5f9   : > { %18827 = vst [vmem:[#allocation119_spill] sm:$0xff] %v16901_v34  ;;  %v16907_v20 = vpop.f32.mrb[73].mxu0  ;;  %12380 = vmatmul.mubr.bf16.gmra.mrb[160].mxu0 %v18831_v61  ;;  %v6227_v34 = vrot.slane %v16336_v32, 1  ;;  %v6231_v32 = vrot.slane %v16393_v56, 1  ;;  %v6235_v56 = vrot.slane %v16455_v60, 1 }
 0x5fa   : > { %18829 = vst [vmem:[#allocation104_spill] sm:$0xff] %v16907_v20  ;;  %v16910_v38 = vpop.f32.mrb[74].mxu0  ;;  %12383 = vmatprep.mubr.bf16.mxu0 %v18832_v35  ;;  %v6229_v35 = vrot.slane %v16369_v58, 1 }
 0x5fb   : > { %18830 = vst [vmem:[#allocation122_spill] sm:$0xff] %v16910_v38  ;;  %v6817_v47 = vpop.f32.mrb[75].mxu0  ;;  %v16927_v61 = vsel %vm1457_vm2, %v6225_v59, %v6227_v34  ;;  %v18836_v38 = vld [vmem:[#allocation75_spill] sm:$0xff] }
 0x5fc   : > { %v16916_v52 = vpop.f32.mrb[188].mxu1  ;;  %18834 = vst [vmem:[#allocation106_spill] sm:$0xff] %v16927_v61  ;;  %v18835_v47 = vld [vmem:[#allocation56_spill] sm:$0xff]  ;;  %v16935_v1 = vsel %vm1457_vm2, %v6227_v34, %v6229_v35  ;;  %v18839_v59 = vld [vmem:[#allocation79_spill] sm:$0xff] }
 0x5fd   : > { %v16918_v63 = vpop.f32.mrb[189].mxu1  ;;  %18837 = vst [vmem:[#allocation124_spill] sm:$0xff] %v16935_v1 }
 0x5fe   : > { %v16923_v20 = vpop.f32.mrb[190].mxu1 }
 0x5ff   : > { %v5831_v44 = vpop.f32.mrb[191].mxu1  ;;  %12064 = vmatmul.mubr.bf16.gmra.mrb[24].mxu1 %v16921_v53  ;;  %v18840_v53 = vld [vmem:[#allocation81_spill] sm:$0xff] }
 0x600   : > { %12067 = vmatprep.mubr.bf16.mxu1 %v16927_v61  ;;  %v16939_v44 = vsel %vm1457_vm2, %v6229_v35, %v6231_v32 }
 0x601   : > { %12384 = vmatmul.mubr.bf16.gmra.mrb[164].mxu0 %v18835_v47  ;;  %18838 = vst [vmem:[#allocation108_spill] sm:$0xff] %v16939_v44  ;;  %v6233_v47 = vrot.slane %v18794_v45, 1 }
 0x602   : > { %12387 = vmatprep.mubr.bf16.mxu0 %v18836_v38 }
 0x603   : > { %v16953_v27 = vsel %vm1457_vm2, %v6231_v32, %v6233_v47  ;;  %v6239_v32 = vrot.slane %v16506_v62, 1  ;;  %v8175_v62 = vshrl.u32 %v16608_v55, 16 }
 0x604   : > { %18842 = vst [vmem:[#allocation55_spill] sm:$0xff] %v16953_v27 }
 0x607   : > { %12068 = vmatmul.mubr.bf16.gmra.mrb[28].mxu1 %v16935_v1 }
 0x608   : > { %12071 = vmatprep.mubr.bf16.mxu1 %v16939_v44 }
 0x609   : > { %12388 = vmatmul.mubr.bf16.gmra.mrb[168].mxu0 %v18839_v59  ;;  %v16957_v59 = vsel %vm1457_vm2, %v6233_v47, %v6235_v56 }
 0x60a   : > { %12391 = vmatprep.mubr.bf16.mxu0 %v18840_v53  ;;  %18843 = vst [vmem:[#allocation128_spill] sm:$0xff] %v16957_v59  ;;  %v8163_v53 = vshll.u32 %v16588_v28, 16 }
 0x60c   : > { %v16944_v61 = vpop.f32.mrb[192].mxu1  ;;  %v16948_v58 = vpop.f32.mrb[76].mxu0 }
 0x60d   : > { %v5843_v38 = vpop.f32.mrb[193].mxu1  ;;  %18841 = vst [vmem:[#allocation110_spill] sm:$0xff] %v16948_v58  ;;  %v6829_v35 = vpop.f32.mrb[77].mxu0 }
 0x60e   : > { %v11946_v34 = vpop.f32.mrb[194].mxu1  ;;  %v12138_v44 = vpop.f32.mrb[78].mxu0  ;;  %v6237_v38 = vrot.slane %v16484_v22, 1 }
 0x60f   : > { %v16950_v1 = vpop.f32.mrb[195].mxu1  ;;  %12072 = vmatmul.mubr.bf16.gmra.mrb[32].mxu1 %v16953_v27  ;;  %v16959_v45 = vpop.f32.mrb[79].mxu0  ;;  %v8165_v44 = vrot.slane %v8163_v53, 1  ;;  %v16967_v34 = vld [vmem:[#allocation2 + $0xd0] sm:$0xff]  }
 0x610   : > { %18844 = vst [vmem:[#allocation130_spill] sm:$0xff] %v16959_v45  ;;  %12075 = vmatprep.mubr.bf16.mxu1 %v16957_v59  ;;  %v16970_v47 = vsel %vm1457_vm2, %v6235_v56, %v6237_v38  ;;  %v16974_v35 = vsel %vm1457_vm2, %v6237_v38, %v6239_v32  ;;  %v8179_v53 = vshll.u32 %v16967_v34, 16  ;;  %v6241_v59 = vrot.slane %v16539_v0, 1 }
 0x611   : > { %12392 = vmatmul.mubr.bf16.gmra.mrb[172].mxu0 %v16527_v17  ;;  %18845 = vst [vmem:[#allocation63_spill] sm:$0xff] %v16970_v47  ;;  %18846 = vst [vmem:[#allocation58_spill] sm:$0xff] %v16974_v35  ;;  %v8171_v17 = vshll.u32 %v16608_v55, 16  ;;  %v16986_v38 = vrot.slane %v16561_v30, 1  ;;  %v8167_v45 = vshrl.u32 %v16588_v28, 16  ;;  %v18874_v55 = vld [vmem:[#allocation68_spill] sm:$0xff] }
 0x612   : > { %12395 = vmatprep.mubr.bf16.mxu0 %v16565_v18  ;;  %v8166_v18 = vsel %vm571_vm1, %v16593_v41, %v8165_v44  ;;  %v16996_v0 = vrot.slane %v8179_v53, 1 }
 0x613   : > { %18847 = vst [vmem:[#allocation66_spill] sm:$0xff] %v16986_v38 }
 0x617   : > { %12076 = vmatmul.mubr.bf16.gmra.mrb[36].mxu1 %v16970_v47  ;;  %v8173_v47 = vrot.slane %v8171_v17, 1  ;;  %v17006_v17 = vsel %vm1457_vm2, %v6241_v59, %v16986_v38 }
 0x618   : > { %12079 = vmatprep.mubr.bf16.mxu1 %v16974_v35  ;;  %18851 = vst [vmem:[#allocation116_spill] sm:$0xff] %v17006_v17 }
 0x619   : > { %12396 = vmatmul.mubr.bf16.gmra.mrb[176].mxu0 %v16572_v26  ;;  %v11949_v56 = vpop.f32.mrb[196].mxu1  ;;  %v8177_v28 = vor.u32 %v8175_v62, %v8173_v47  ;;  %v18855_v62 = vld [vmem:[#allocation131_spill] sm:$0xff] }
 0x61a   : > { %12399 = vmatprep.mubr.bf16.mxu0 %v8166_v18  ;;  %v16983_v27 = vpop.f32.mrb[197].mxu1  ;;  %v16999_v18 = vsel %vm1457_vm2, %v6239_v32, %v6241_v59  ;;  %v8169_v56 = vor.u32 %v8167_v45, %v8165_v44  ;;  %v6245_v45 = vrot.slane %v16586_v16, 1  ;;  %v12757_v16 = vld [vmem:[%s18081_s4 + $0x188] sm:$0xff]  }
 0x61b   : > { %v16989_v35 = vpop.f32.mrb[198].mxu1  ;;  %18849 = vst [vmem:[#allocation112_spill] sm:$0xff] %v16999_v18  ;;  %v8182_v32 = vsel %vm571_vm1, %v8177_v28, %v16996_v0 }
 0x61c   : > { %v12141_v26 = vpop.f32.mrb[80].mxu0  ;;  %v16991_v58 = vpop.f32.mrb[199].mxu1  ;;  %v8174_v53 = vsel %vm571_vm1, %v8169_v56, %v8173_v47  ;;  %v6246_v44 = vsel %vm1457_vm2, %v16986_v38, %v6245_v45  ;;  %v18857_v45 = vld [vmem:[#allocation3_spill] sm:$0xff]  ;;  %v18859_v38 = vld [vmem:[#allocation26_spill] sm:$0xff] }
 0x61d   : > { %v16993_v41 = vpop.f32.mrb[81].mxu0 }
 0x61e   : > { %18848 = vst [vmem:[#allocation59_spill] sm:$0xff] %v16993_v41  ;;  %v17001_v30 = vpop.f32.mrb[82].mxu0 }
 0x61f   : > { %18850 = vst [vmem:[#allocation114_spill] sm:$0xff] %v17001_v30  ;;  %12080 = vmatmul.mubr.bf16.gmra.mrb[40].mxu1 %v16999_v18  ;;  %v17008_v26 = vpop.f32.mrb[83].mxu0  ;;  %v18864_v30 = vld [vmem:[#allocation38_spill] sm:$0xff] }
 0x620   : > { %18852 = vst [vmem:[#allocation6_spill] sm:$0xff] %v17008_v26  ;;  %12083 = vmatprep.mubr.bf16.mxu1 %v17006_v17 }
 0x621   : > { %12400 = vmatmul.mubr.bf16.gmra.mrb[180].mxu0 %v8174_v53 }
 0x622   : > { %12403 = vmatprep.mubr.bf16.mxu0 %v8182_v32 }
 0x627   : > { %12084 = vmatmul.mubr.bf16.gmra.mrb[44].mxu1 %v6246_v44  ;;  %v18858_v44 = vld [vmem:[#allocation4_spill] sm:$0xff] }
 0x628   : > { %v17017_v18 = vpop.f32.mrb[84].mxu0  ;;  %12167 = vmatprep.mubr.bf16.mxu1 %v18855_v62  ;;  %v12758_v62 = vld [vmem:[%s18081_s4 + $0x190] sm:$0xff]  }
 0x629   : > { %18853 = vst [vmem:[#allocation118_spill] sm:$0xff] %v17017_v18  ;;  %v17019_v59 = vpop.f32.mrb[85].mxu0 }
 0x62a   : > { %18854 = vst [vmem:[#allocation120_spill] sm:$0xff] %v17019_v59  ;;  %v17022_v17 = vpop.f32.mrb[86].mxu0 }
 0x62b   : > { %18856 = vst [vmem:[#allocation8_spill] sm:$0xff] %v17022_v17  ;;  %v6861_v47 = vpop.f32.mrb[87].mxu0 }
 0x62c   : > { %v17024_v56 = vpop.f32.mrb[200].mxu1  ;;  %v12759_v47 = vld [vmem:[%s18081_s4 + $0x198] sm:$0xff]  }
 0x62d   : > { %v17026_v53 = vpop.f32.mrb[201].mxu1 }
 0x62e   : > { %v17031_v28 = vpop.f32.mrb[202].mxu1 }
 0x62f   : > { %v5875_v32 = vpop.f32.mrb[203].mxu1  ;;  %12168 = vmatmul.mubr.bf16.vlgmr.msra.gmra.mrb[48].mxu1 %v18857_v45 }
 0x630   : > { %12171 = vmatprep.mubr.bf16.mxu1 %v18858_v44  ;;  %12280 = vmatpush3.bf16.msra.mxu1 %v16868_v40  ;;  %v18860_v32 = vld [vmem:[#allocation32_spill] sm:$0xff]  ;;  %v12760_v40 = vld [vmem:[%s18081_s4 + $0x1a0] sm:$0xff]  }
 0x631   : > { %12281 = vmatprep.subr.bf16.mxu1 %v12757_v16 }
 0x634   : > { %12282 = vmatpush3.bf16.msra.mxu1 %v12757_v16 }
 0x635   : > { %12283 = vmatprep.subr.bf16.mxu1 %v12758_v62 }
 0x637   : > { %12172 = vmatmul.mubr.bf16.gmra.mrb[52].mxu1 %v18859_v38  ;;  %v12761_v38 = vld [vmem:[%s18081_s4 + $0x1a8] sm:$0xff]  }
 0x638   : > { %12175 = vmatprep.mubr.bf16.mxu1 %v18860_v32  ;;  %12284 = vmatpush3.bf16.msra.mxu1 %v12758_v62  ;;  %v18862_v32 = vld [vmem:[#allocation15_spill] sm:$0xff] }
 0x639   : > { %12285 = vmatprep.subr.bf16.mxu1 %v12759_v47 }
 0x63a   : > { %v17047_v45 = vpop.f32.mrb[204].mxu1 }
 0x63b   : > { %v5887_v44 = vpop.f32.mrb[205].mxu1 }
 0x63c   : > { %v11958_v17 = vpop.f32.mrb[206].mxu1  ;;  %v17049_v16 = vpop.f32.mrb[88].mxu0  ;;  %12286 = vmatpush3.bf16.msra.mxu1 %v12759_v47 }
 0x63d   : > { %18861 = vst [vmem:[#allocation121_spill] sm:$0xff] %v17049_v16  ;;  %v17051_v59 = vpop.f32.mrb[207].mxu1  ;;  %v6873_v18 = vpop.f32.mrb[89].mxu0  ;;  %12287 = vmatprep.subr.bf16.mxu1 %v12760_v40  ;;  %v12762_v17 = vld [vmem:[%s18081_s4 + $0x1b0] sm:$0xff]  }
 0x63e   : > { %v12150_v62 = vpop.f32.mrb[90].mxu0 }
 0x63f   : > { %12176 = vmatmul.mubr.bf16.gmra.mrb[56].mxu1 %v18862_v32  ;;  %v17057_v26 = vpop.f32.mrb[91].mxu0 }
 0x640   : > { %18863 = vst [vmem:[#allocation123_spill] sm:$0xff] %v17057_v26  ;;  %12179 = vmatprep.mubr.bf16.mxu1 %v18864_v30  ;;  %12288 = vmatpush3.bf16.msra.mxu1 %v12760_v40  ;;  %v12763_v30 = vld [vmem:[%s18081_s4 + $0x1b8] sm:$0xff]  }
 0x641   : > { %12289 = vmatprep.subr.bf16.mxu1 %v12761_v38 }
 0x642   : > { %v11977_v47 = vpop.f32.mrb[208].mxu1 }
 0x643   : > { %v6006_v18 = vpop.f32.mrb[209].mxu1 }
 0x644   : > { %v17064_v44 = vadd.f32 %v6006_v18, %v16699_v23  ;;  %v11978_v16 = vpop.f32.mrb[210].mxu1  ;;  %v12233_v41 = vpop.f32.mrb[92].mxu0  ;;  %12290 = vmatpush3.bf16.msra.mxu1 %v12761_v38  ;;  %v18867_v23 = vld [vmem:[#allocation62_spill] sm:$0xff]  ;;  %v18869_v38 = vld [vmem:[#allocation64_spill] sm:$0xff] }
 0x645   : > { %v17067_v62 = vadd.f32 %v11978_v16, %v16702_v10  ;;  %v6009_v32 = vpop.f32.mrb[211].mxu1  ;;  %v17069_v26 = vpop.f32.mrb[93].mxu0  ;;  %12291 = vmatprep.subr.bf16.mxu1 %v12762_v17  ;;  %v17086_v10 = vld [vmem:[%s18081_s4 + $0x200] sm:$0xff]  }
 0x646   : > { %18865 = vst [vmem:[#allocation10_spill] sm:$0xff] %v17069_v26  ;;  %v17075_v40 = vadd.f32 %v6009_v32, %v16704_v2  ;;  %v17077_v47 = vpop.f32.mrb[94].mxu0 }
 0x647   : > { %18866 = vst [vmem:[#allocation48_spill] sm:$0xff] %v17077_v47  ;;  %12180 = vmatmul.mubr.bf16.gmra.mrb[60].mxu1 %v18867_v23  ;;  %v17080_v41 = vpop.f32.mrb[95].mxu0 }
 0x648   : > { %18868 = vst [vmem:[#allocation125_spill] sm:$0xff] %v17080_v41  ;;  %12183 = vmatprep.mubr.bf16.mxu1 %v18869_v38  ;;  %12292 = vmatpush3.bf16.msra.mxu1 %v12762_v17 }
 0x649   : > { %12293 = vmatprep.subr.bf16.mxu1 %v12763_v30 }
 0x64a   : > { %v11981_v16 = vpop.f32.mrb[212].mxu1 }
 0x64b   : > { %v17089_v18 = vadd.f32 %v11981_v16, %v16725_v42  ;;  %v6021_v2 = vpop.f32.mrb[213].mxu1  ;;  %v18873_v42 = vld [vmem:[#allocation53_spill] sm:$0xff] }
 0x64c   : > { %v17092_v32 = vadd.f32 %v6021_v2, %v16728_v6  ;;  %v11982_v23 = vpop.f32.mrb[214].mxu1  ;;  %v17094_v47 = vpop.f32.mrb[96].mxu0  ;;  %12294 = vmatpush3.bf16.msra.mxu1 %v12763_v30 }
 0x64d   : > { %18870 = vst [vmem:[#allocation12_spill] sm:$0xff] %v17094_v47  ;;  %v17097_v17 = vadd.f32 %v11982_v23, %v16731_v12  ;;  %v6024_v38 = vpop.f32.mrb[215].mxu1  ;;  %v17099_v41 = vpop.f32.mrb[97].mxu0  ;;  %12407 = vmatprep.subr.bf16.mxu1 %v17086_v10 }
 0x64e   : > { %18871 = vst [vmem:[#allocation52_spill] sm:$0xff] %v17099_v41  ;;  %v17102_v26 = vpop.f32.mrb[98].mxu0 }
 0x64f   : > { %18872 = vst [vmem:[#allocation127_spill] sm:$0xff] %v17102_v26  ;;  %12184 = vmatmul.mubr.bf16.gmra.mrb[64].mxu1 %v18873_v42  ;;  %v7637_v16 = vpop.f32.mrb[99].mxu0  ;;  %v18875_v26 = vld [vmem:[#allocation70_spill] sm:$0xff] }
 0x650   : > { %12187 = vmatprep.mubr.bf16.mxu1 %v18874_v55  ;;  %v18876_v16 = vld [vmem:[#allocation72_spill] sm:$0xff] }
 0x652   : > { %v11985_v6 = vpop.f32.mrb[216].mxu1 }
 0x653   : > { %v17107_v2 = vadd.f32 %v11985_v6, %v16740_v9  ;;  %v6036_v30 = vpop.f32.mrb[217].mxu1  ;;  %v12880_v9 = vmov 0  }
 0x654   : > { %v11986_v47 = vpop.f32.mrb[218].mxu1  ;;  %v17109_v12 = vpop.f32.mrb[100].mxu0  ;;  %5061 = vst [vmem:[#allocation2 + $0xd8] sm:$0xf] %v12880_v9  ;;  %5063 = vst [vmem:[#allocation2 + $0xe0] sm:$0xf] %v12880_v9 }
 0x655   : > { %v6038_v23 = vpop.f32.mrb[219].mxu1  ;;  %v7649_v38 = vpop.f32.mrb[101].mxu0  ;;  %v18881_v9 = vld [vmem:[#allocation95_spill] sm:$0xff] }
 0x656   : > { %v17112_v41 = vadd.f32 %v6038_v23, %v16745_v19  ;;  %v12242_v22 = vpop.f32.mrb[102].mxu0 }
 0x657   : > { %12188 = vmatmul.mubr.bf16.gmra.mrb[68].mxu1 %v18875_v26  ;;  %v17115_v42 = vpop.f32.mrb[103].mxu0 }
 0x658   : > { %12191 = vmatprep.mubr.bf16.mxu1 %v18876_v16  ;;  %v18879_v16 = vld [vmem:[#allocation54_spill] sm:$0xff] }
 0x65a   : > { %v11989_v55 = vpop.f32.mrb[220].mxu1 }
 0x65b   : > { %v6050_v60 = vpop.f32.mrb[221].mxu1 }
 0x65c   : > { %v17119_v47 = vadd.f32 %v6050_v60, %v16757_v57  ;;  %v11990_v6 = vpop.f32.mrb[222].mxu1  ;;  %v12245_v30 = vpop.f32.mrb[104].mxu0  ;;  %v5121_v57 = vld [vmem:[#allocation2 + $0xd8] sm:$0x1] }
 0x65d   : > { %v17122_v19 = vadd.f32 %v11990_v6, %v16759_v29  ;;  %v6053_v22 = vpop.f32.mrb[223].mxu1  ;;  %v17124_v23 = vpop.f32.mrb[105].mxu0  ;;  %v5122_v6 = vsel %vm15850_vm9, %v15829_v36, %v5121_v57  ;;  %v5187_v36 = vld [vmem:[#allocation2 + $0xe0] sm:$0x1] }
 0x65e   : > { %18877 = vst [vmem:[#allocation14_spill] sm:$0xff] %v17124_v23  ;;  %v17127_v26 = vadd.f32 %v6053_v22, %v16761_v11  ;;  %v17129_v38 = vpop.f32.mrb[106].mxu0  ;;  %5123 = vst [vmem:[#allocation2 + $0xd8] sm:$0x1] %v5122_v6  ;;  %v5188_v57 = vsel %vm15866_vm13, %v15863_v7, %v5187_v36  ;;  %v18887_v36 = vld [vmem:[#allocation41_spill] sm:$0xff] }
 0x65f   : > { %18878 = vst [vmem:[#allocation57_spill] sm:$0xff] %v17129_v38  ;;  %12192 = vmatmul.mubr.bf16.gmra.mrb[72].mxu1 %v18879_v16  ;;  %v17132_v55 = vpop.f32.mrb[107].mxu0  ;;  %5189 = vst [vmem:[#allocation2 + $0xe0] sm:$0x1] %v5188_v57 }
 0x660   : > { %18880 = vst [vmem:[#allocation129_spill] sm:$0xff] %v17132_v55  ;;  %12195 = vmatprep.mubr.bf16.mxu1 %v18881_v9 }
 0x662   : > { %v11993_v60 = vpop.f32.mrb[224].mxu1 }
 0x663   : > { %v17136_v30 = vadd.f32 %v11993_v60, %v16790_v46  ;;  %v6065_v29 = vpop.f32.mrb[225].mxu1  ;;  %v18884_v60 = vld [vmem:[#allocation77_spill] sm:$0xff] }
 0x664   : > { %v17142_v11 = vadd.f32 %v6065_v29, %v16792_v51  ;;  %v11994_v22 = vpop.f32.mrb[226].mxu1  ;;  %v17144_v38 = vpop.f32.mrb[108].mxu0  ;;  %v8183_v51 = vshrl.u32 %v16967_v34, 16 }
 0x665   : > { %v17147_v16 = vadd.f32 %v11994_v22, %v16798_v37  ;;  %v6068_v9 = vpop.f32.mrb[227].mxu1  ;;  %v17149_v55 = vpop.f32.mrb[109].mxu0  ;;  %v17162_v22 = vld [vmem:[#allocation2 + $0xd8] ss:$0 sps:$4 sm:$0xff]  }
 0x666   : > { %18882 = vst [vmem:[#allocation16_spill] sm:$0xff] %v17149_v55  ;;  %v17151_v46 = vpop.f32.mrb[110].mxu0  ;;  %18886 = vst [vmem:[#allocation24_spill] sm:$0xff] %v17162_v22  ;;  %v8187_v55 = vshll.u32 %v17162_v22, 16 }
 0x667   : > { %18883 = vst [vmem:[#allocation60_spill] sm:$0xff] %v17151_v46  ;;  %12196 = vmatmul.mubr.bf16.gmra.mrb[76].mxu1 %v18884_v60  ;;  %v7681_v23 = vpop.f32.mrb[111].mxu0 }
 0x668   : > { %12199 = vmatprep.mubr.bf16.mxu1 %v18885_v50  ;;  %v8185_v23 = vor.u32 %v8183_v51, %v16996_v0  ;;  %v8189_v57 = vrot.slane %v8187_v55, 1 }
 0x66a   : > { %v11997_v29 = vpop.f32.mrb[228].mxu1 }
 0x66b   : > { %v17160_v37 = vadd.f32 %v11997_v29, %v16825_v54  ;;  %v6080_v6 = vpop.f32.mrb[229].mxu1  ;;  %v8190_v29 = vsel %vm571_vm1, %v8185_v23, %v8189_v57  ;;  %vm8937_vm1 = vcmask 1045504  }
 0x66c   : > { %v11998_v9 = vpop.f32.mrb[230].mxu1  ;;  %v17164_v60 = vpop.f32.mrb[112].mxu0  ;;  %12404 = vmatmul.mubr.bf16.gmra.mrb[184].mxu0 %v8190_v29 }
 0x66d   : > { %v6082_v50 = vpop.f32.mrb[231].mxu1  ;;  %v7693_v46 = vpop.f32.mrb[113].mxu0 }
 0x66e   : > { %v17169_v48 = vadd.f32 %v6082_v50, %v16831_v4  ;;  %v12254_v7 = vpop.f32.mrb[114].mxu0 }
 0x66f   : > { %12200 = vmatmul.mubr.bf16.gmra.mrb[80].mxu1 %v18887_v36  ;;  %v17172_v54 = vpop.f32.mrb[115].mxu0 }
 0x670   : > { %12203 = vmatprep.mubr.bf16.mxu1 %v16534_v24 }
 0x672   : > { %v12001_v6 = vpop.f32.mrb[232].mxu1 }
 0x673   : > { %v6094_v0 = vpop.f32.mrb[233].mxu1 }
 0x674   : > { %v17177_v46 = vadd.f32 %v6094_v0, %v16872_v3  ;;  %v12002_v51 = vpop.f32.mrb[234].mxu1  ;;  %v12257_v9 = vpop.f32.mrb[116].mxu0 }
 0x675   : > { %v17180_v4 = vadd.f32 %v12002_v51, %v16875_v39  ;;  %v6097_v50 = vpop.f32.mrb[235].mxu1  ;;  %v17182_v7 = vpop.f32.mrb[117].mxu0 }
 0x676   : > { %v17185_v55 = vadd.f32 %v6097_v50, %v16877_v33  ;;  %v17187_v24 = vpop.f32.mrb[118].mxu0 }
 0x677   : > { %12204 = vmatmul.mubr.bf16.gmra.mrb[84].mxu1 %v16556_v31  ;;  %v17190_v23 = vpop.f32.mrb[119].mxu0 }
 0x678   : > { %12207 = vmatprep.mubr.bf16.mxu1 %v16582_v15 }
 0x67a   : > { %v12005_v3 = vpop.f32.mrb[236].mxu1 }
 0x67b   : > { %v17194_v36 = vadd.f32 %v12005_v3, %v16916_v52  ;;  %v6109_v39 = vpop.f32.mrb[237].mxu1  ;;  %v18889_v52 = vld [vmem:[#allocation105_spill] sm:$0xff] }
 0x67c   : > { %v17197_v57 = vadd.f32 %v6109_v39, %v16918_v63  ;;  %v12006_v29 = vpop.f32.mrb[238].mxu1  ;;  %v17199_v6 = vpop.f32.mrb[120].mxu0 }
 0x67d   : > { %v17202_v33 = vadd.f32 %v12006_v29, %v16923_v20  ;;  %v6112_v0 = vpop.f32.mrb[239].mxu1  ;;  %v17204_v31 = vpop.f32.mrb[121].mxu0 }
 0x67e   : > { %v17206_v51 = vpop.f32.mrb[122].mxu0 }
 0x67f   : > { %18888 = vst [vmem:[#allocation28_spill] sm:$0xff] %v17206_v51  ;;  %12208 = vmatmul.mubr.bf16.gmra.mrb[88].mxu1 %v16601_v49  ;;  %v7725_v15 = vpop.f32.mrb[123].mxu0  ;;  %v18890_v51 = vld [vmem:[#allocation76_spill] sm:$0xff] }
 0x680   : > { %12211 = vmatprep.mubr.bf16.mxu1 %v18889_v52 }
 0x682   : > { %v12009_v9 = vpop.f32.mrb[240].mxu1 }
 0x683   : > { %v17211_v63 = vadd.f32 %v12009_v9, %v16944_v61  ;;  %v6124_v50 = vpop.f32.mrb[241].mxu1 }
 0x684   : > { %v12010_v3 = vpop.f32.mrb[242].mxu1  ;;  %v17213_v39 = vpop.f32.mrb[124].mxu0 }
 0x685   : > { %v6126_v20 = vpop.f32.mrb[243].mxu1  ;;  %v7737_v29 = vpop.f32.mrb[125].mxu0 }
 0x686   : > { %v17216_v0 = vadd.f32 %v6126_v20, %v16950_v1  ;;  %v12266_v22 = vpop.f32.mrb[126].mxu0 }
 0x687   : > { %12212 = vmatmul.mubr.bf16.gmra.mrb[92].mxu1 %v18890_v51  ;;  %v17219_v49 = vpop.f32.mrb[127].mxu0  ;;  %v12765_v22 = vld [vmem:[%s18081_s4 + $0x208] sm:$0xff]  }
 0x688   : > { %12295 = vmatprep.mubr.bf16.mxu1 %v15926_v13 }
 0x68a   : > { %v12013_v15 = vpop.f32.mrb[244].mxu1 }
 0x68b   : > { %v6138_v52 = vpop.f32.mrb[245].mxu1 }
 0x68c   : > { %v17223_v61 = vadd.f32 %v6138_v52, %v16983_v27  ;;  %v12014_v9 = vpop.f32.mrb[246].mxu1  ;;  %v12269_v50 = vpop.f32.mrb[128].mxu0 }
 0x68d   : > { %v17226_v3 = vadd.f32 %v12014_v9, %v16989_v35  ;;  %v6141_v29 = vpop.f32.mrb[247].mxu1  ;;  %v17228_v1 = vpop.f32.mrb[129].mxu0  ;;  %v12766_v35 = vld [vmem:[%s18081_s4 + $0x210] sm:$0xff]  }
 0x68e   : > { %v17234_v51 = vadd.f32 %v6141_v29, %v16991_v58  ;;  %v17236_v13 = vpop.f32.mrb[130].mxu0 }
 0x68f   : > { %12296 = vmatmul.mubr.bf16.vlgmr.msra.gmra.mrb[96].mxu1 %v15960_v21  ;;  %v17239_v27 = vpop.f32.mrb[131].mxu0 }
 0x690   : > { %12299 = vmatprep.mubr.bf16.mxu1 %v18773_v8  ;;  %12408 = vmatpush3.bf16.msra.mxu1 %v17086_v10 }
 0x691   : > { %12409 = vmatprep.subr.bf16.mxu1 %v12765_v22 }
 0x692   : > { %v12017_v20 = vpop.f32.mrb[248].mxu1 }
 0x693   : > { %v17247_v15 = vadd.f32 %v12017_v20, %v17024_v56  ;;  %v6153_v58 = vpop.f32.mrb[249].mxu1  ;;  %v12767_v56 = vld [vmem:[%s18081_s4 + $0x218] sm:$0xff]  }
 0x694   : > { %v17250_v52 = vadd.f32 %v6153_v58, %v17026_v53  ;;  %v12018_v21 = vpop.f32.mrb[250].mxu1  ;;  %v17252_v9 = vpop.f32.mrb[132].mxu0  ;;  %12410 = vmatpush3.bf16.msra.mxu1 %v12765_v22  ;;  %v18894_v20 = vld [vmem:[#allocation5_spill] sm:$0xff] }
 0x695   : > { %18891 = vst [vmem:[#allocation21_spill] sm:$0xff] %v17252_v9  ;;  %v17255_v8 = vadd.f32 %v12018_v21, %v17031_v28  ;;  %v6156_v10 = vpop.f32.mrb[251].mxu1  ;;  %v17257_v50 = vpop.f32.mrb[133].mxu0  ;;  %12411 = vmatprep.subr.bf16.mxu1 %v12766_v35  ;;  %v12768_v28 = vld [vmem:[%s18081_s4 + $0x220] sm:$0xff]  }
 0x696   : > { %18892 = vst [vmem:[#allocation11_spill] sm:$0xff] %v17257_v50  ;;  %v17262_v29 = vpop.f32.mrb[134].mxu0 }
 0x697   : > { %18893 = vst [vmem:[#allocation36_spill] sm:$0xff] %v17262_v29  ;;  %12300 = vmatmul.mubr.bf16.gmra.mrb[100].mxu1 %v18894_v20  ;;  %v7769_v53 = vpop.f32.mrb[135].mxu0 }
 0x698   : > { %12303 = vmatprep.mubr.bf16.mxu1 %v18777_v25  ;;  %12412 = vmatpush3.bf16.msra.mxu1 %v12766_v35  ;;  %v12769_v25 = vld [vmem:[%s18081_s4 + $0x228] sm:$0xff]  }
 0x699   : > { %12413 = vmatprep.subr.bf16.mxu1 %v12767_v56 }
 0x69a   : > { %v12021_v22 = vpop.f32.mrb[252].mxu1 }
 0x69b   : > { %v17270_v58 = vadd.f32 %v12021_v22, %v17047_v45  ;;  %v6168_v21 = vpop.f32.mrb[253].mxu1 }
 0x69c   : > { %v12022_v10 = vpop.f32.mrb[254].mxu1  ;;  %v17272_v50 = vpop.f32.mrb[136].mxu0  ;;  %12414 = vmatpush3.bf16.msra.mxu1 %v12767_v56  ;;  %v12770_v56 = vld [vmem:[%s18081_s4 + $0x230] sm:$0xff]  }
 0x69d   : > { %18895 = vst [vmem:[#allocation9_spill] sm:$0xff] %v17272_v50  ;;  %v6170_v29 = vpop.f32.mrb[255].mxu1  ;;  %v7781_v20 = vpop.f32.mrb[137].mxu0  ;;  %12415 = vmatprep.subr.bf16.mxu1 %v12768_v28 }
 0x69e   : > { %v17278_v35 = vadd.f32 %v6170_v29, %v17051_v59  ;;  %v12278_v53 = vpop.f32.mrb[138].mxu0 }
 0x69f   : > { %12304 = vmatmul.mubr.bf16.gmra.mrb[104].mxu1 %v18778_v5  ;;  %v17281_v45 = vpop.f32.mrb[139].mxu0 }
 0x6a0   : > { %18896 = vst [vmem:[#allocation13_spill] sm:$0xff] %v17281_v45  ;;  %12307 = vmatprep.mubr.bf16.mxu1 %v18783_v14  ;;  %12416 = vmatpush3.bf16.msra.mxu1 %v12768_v28  ;;  %v12771_v14 = vld [vmem:[%s18081_s4 + $0x238] sm:$0xff]  }
 0x6a1   : > { %12417 = vmatprep.subr.bf16.mxu1 %v12769_v25 }
 0x6a2   : > { %v12041_v22 = vpop.f32.mrb[0].mxu1 }
 0x6a3   : > { %v6353_v21 = vpop.f32.mrb[1].mxu1  ;;  %v18899_v22 = vld [vmem:[#allocation78_spill] sm:$0xff] }
 0x6a4   : > { %v6528_v10 = vadd.f32 %v6353_v21, %v17064_v44  ;;  %v12042_v20 = vpop.f32.mrb[2].mxu1  ;;  %v12361_v59 = vpop.f32.mrb[140].mxu0  ;;  %12418 = vmatpush3.bf16.msra.mxu1 %v12769_v25  ;;  %v18900_v44 = vld [vmem:[#allocation61_spill] sm:$0xff] }
 0x6a5   : > { %v6530_v29 = vadd.f32 %v12042_v20, %v17067_v62  ;;  %v6356_v5 = vpop.f32.mrb[3].mxu1  ;;  %v17289_v53 = vpop.f32.mrb[141].mxu0  ;;  %12419 = vmatprep.subr.bf16.mxu1 %v12770_v56  ;;  %v18902_v62 = vld [vmem:[#allocation80_spill] sm:$0xff]  ;;  %v18903_v20 = vld [vmem:[#allocation69_spill] sm:$0xff]  ;;  %v18904_v59 = vld [vmem:[#allocation82_spill] sm:$0xff] }
 0x6a6   : > { %18897 = vst [vmem:[#allocation20_spill] sm:$0xff] %v17289_v53  ;;  %v6529_v28 = vadd.f32 %v6356_v5, %v17075_v40  ;;  %v17295_v45 = vpop.f32.mrb[142].mxu0  ;;  %v17298_v50 = vadd.f32 %v18899_v22, %v6528_v10 }
 0x6a7   : > { %18898 = vst [vmem:[#allocation40_spill] sm:$0xff] %v17295_v45  ;;  %12308 = vmatmul.mubr.bf16.gmra.mrb[108].mxu1 %v18900_v44  ;;  %v17301_v25 = vpop.f32.mrb[143].mxu0  ;;  %v17304_v21 = vadd.f32 %v18902_v62, %v6530_v29 }
 0x6a8   : > { %18901 = vst [vmem:[#allocation17_spill] sm:$0xff] %v17301_v25  ;;  %12311 = vmatprep.mubr.bf16.mxu1 %v18903_v20  ;;  %12420 = vmatpush3.bf16.msra.mxu1 %v12770_v56  ;;  %v17308_v53 = vadd.f32 %v18904_v59, %v6529_v28  ;;  %v18907_v56 = vld [vmem:[#allocation84_spill] sm:$0xff]  ;;  %v18909_v59 = vld [vmem:[#allocation87_spill] sm:$0xff] }
 0x6a9   : > { %12421 = vmatprep.subr.bf16.mxu1 %v12771_v14 }
 0x6aa   : > { %v12045_v40 = vpop.f32.mrb[4].mxu1 }
 0x6ab   : > { %v6532_v5 = vadd.f32 %v12045_v40, %v17089_v18  ;;  %v6368_v45 = vpop.f32.mrb[5].mxu1 }
 0x6ac   : > { %v6531_v10 = vadd.f32 %v6368_v45, %v17092_v32  ;;  %v12046_v22 = vpop.f32.mrb[6].mxu1  ;;  %v17312_v44 = vpop.f32.mrb[144].mxu0  ;;  %12422 = vmatpush3.bf16.msra.mxu1 %v12771_v14  ;;  %v18910_v32 = vld [vmem:[#allocation90_spill] sm:$0xff]  ;;  %v18911_v14 = vld [vmem:[#allocation67_spill] sm:$0xff] }
 0x6ad   : > { %18905 = vst [vmem:[#allocation25_spill] sm:$0xff] %v17312_v44  ;;  %v6533_v29 = vadd.f32 %v12046_v22, %v17097_v17  ;;  %v6371_v62 = vpop.f32.mrb[7].mxu1  ;;  %v17315_v25 = vpop.f32.mrb[145].mxu0  ;;  %v17318_v20 = vadd.f32 %v18907_v56, %v6532_v5  ;;  %v18960_v44 = vld [vmem:[#allocation130_spill] sm:$0xff] }
 0x6ae   : > { %18906 = vst [vmem:[#allocation65_spill] sm:$0xff] %v17315_v25  ;;  %v17320_v28 = vpop.f32.mrb[146].mxu0  ;;  %v17323_v9 = vadd.f32 %v18909_v59, %v6531_v10  ;;  %v18913_v25 = vld [vmem:[#allocation86_spill] sm:$0xff] }
 0x6af   : > { %18908 = vst [vmem:[#allocation18_spill] sm:$0xff] %v17320_v28  ;;  %12312 = vmatmul.mubr.bf16.gmra.mrb[112].mxu1 %v18790_v43  ;;  %v8295_v18 = vpop.f32.mrb[147].mxu0  ;;  %v17327_v45 = vadd.f32 %v18910_v32, %v6533_v29  ;;  %v18916_v32 = vld [vmem:[#allocation50_spill] sm:$0xff] }
 0x6b0   : > { %12315 = vmatprep.mubr.bf16.mxu1 %v18911_v14  ;;  %v18914_v18 = vld [vmem:[#allocation47_spill] sm:$0xff]  ;;  %v18917_v14 = vld [vmem:[#allocation93_spill] sm:$0xff] }
 0x6b2   : > { %v12049_v17 = vpop.f32.mrb[8].mxu1 }
 0x6b3   : > { %v6535_v40 = vadd.f32 %v12049_v17, %v17107_v2  ;;  %v6383_v22 = vpop.f32.mrb[9].mxu1 }
 0x6b4   : > { %v12050_v62 = vpop.f32.mrb[10].mxu1  ;;  %v17331_v5 = vpop.f32.mrb[148].mxu0 }
 0x6b5   : > { %18912 = vst [vmem:[#allocation22_spill] sm:$0xff] %v17331_v5  ;;  %v6385_v56 = vpop.f32.mrb[11].mxu1  ;;  %v8307_v28 = vpop.f32.mrb[149].mxu0  ;;  %v17334_v10 = vadd.f32 %v18913_v25, %v6535_v40 }
 0x6b6   : > { %v6534_v43 = vadd.f32 %v6385_v56, %v17112_v41  ;;  %v12370_v59 = vpop.f32.mrb[150].mxu0 }
 0x6b7   : > { %12316 = vmatmul.mubr.bf16.gmra.mrb[116].mxu1 %v18914_v18  ;;  %v17338_v29 = vpop.f32.mrb[151].mxu0  ;;  %v18920_v18 = vld [vmem:[#allocation88_spill] sm:$0xff] }
 0x6b8   : > { %18915 = vst [vmem:[#allocation7_spill] sm:$0xff] %v17338_v29  ;;  %12319 = vmatprep.mubr.bf16.mxu1 %v18916_v32  ;;  %v17342_v2 = vadd.f32 %v18917_v14, %v6534_v43  ;;  %v18921_v43 = vld [vmem:[#allocation31_spill] sm:$0xff] }
 0x6b9   : > { %v18935_v29 = vld [vmem:[#allocation103_spill] sm:$0xff] }
 0x6ba   : > { %v12053_v17 = vpop.f32.mrb[12].mxu1 }
 0x6bb   : > { %v6397_v22 = vpop.f32.mrb[13].mxu1  ;;  %v18923_v17 = vld [vmem:[#allocation109_spill] sm:$0xff] }
 0x6bc   : > { %v6536_v62 = vadd.f32 %v6397_v22, %v17119_v47  ;;  %v12054_v28 = vpop.f32.mrb[14].mxu1  ;;  %v12373_v5 = vpop.f32.mrb[152].mxu0 }
 0x6bd   : > { %v6538_v25 = vadd.f32 %v12054_v28, %v17122_v19  ;;  %v6400_v40 = vpop.f32.mrb[15].mxu1  ;;  %v17346_v41 = vpop.f32.mrb[153].mxu0  ;;  %v18924_v5 = vld [vmem:[#allocation73_spill] sm:$0xff] }
 0x6be   : > { %18918 = vst [vmem:[#allocation30_spill] sm:$0xff] %v17346_v41  ;;  %v6537_v56 = vadd.f32 %v6400_v40, %v17127_v26  ;;  %v17349_v59 = vpop.f32.mrb[154].mxu0  ;;  %v17352_v32 = vadd.f32 %v18920_v18, %v6536_v62  ;;  %v18925_v19 = vld [vmem:[#allocation97_spill] sm:$0xff] }
 0x6bf   : > { %18919 = vst [vmem:[#allocation34_spill] sm:$0xff] %v17349_v59  ;;  %12320 = vmatmul.mubr.bf16.gmra.mrb[120].mxu1 %v18921_v43  ;;  %v17355_v14 = vpop.f32.mrb[155].mxu0  ;;  %v17358_v47 = vadd.f32 %v18923_v17, %v6538_v25  ;;  %v18928_v25 = vld [vmem:[#allocation89_spill] sm:$0xff] }
 0x6c0   : > { %18922 = vst [vmem:[#allocation19_spill] sm:$0xff] %v17355_v14  ;;  %12323 = vmatprep.mubr.bf16.mxu1 %v18924_v5  ;;  %v17362_v22 = vadd.f32 %v18925_v19, %v6537_v56  ;;  %v18930_v56 = vld [vmem:[#allocation91_spill] sm:$0xff] }
 0x6c2   : > { %v12057_v28 = vpop.f32.mrb[16].mxu1 }
 0x6c3   : > { %v6540_v26 = vadd.f32 %v12057_v28, %v17136_v30  ;;  %v6412_v40 = vpop.f32.mrb[17].mxu1  ;;  %v18931_v30 = vld [vmem:[#allocation33_spill] sm:$0xff] }
 0x6c4   : > { %v6539_v59 = vadd.f32 %v6412_v40, %v17142_v11  ;;  %v12058_v62 = vpop.f32.mrb[18].mxu1  ;;  %v17366_v18 = vpop.f32.mrb[156].mxu0  ;;  %v18932_v11 = vld [vmem:[#allocation100_spill] sm:$0xff] }
 0x6c5   : > { %18926 = vst [vmem:[#allocation23_spill] sm:$0xff] %v17366_v18  ;;  %v6541_v43 = vadd.f32 %v12058_v62, %v17147_v16  ;;  %v6415_v14 = vpop.f32.mrb[19].mxu1  ;;  %v17369_v41 = vpop.f32.mrb[157].mxu0  ;;  %v17372_v17 = vadd.f32 %v18928_v25, %v6540_v26  ;;  %v18933_v18 = vld [vmem:[#allocation35_spill] sm:$0xff] }
 0x6c6   : > { %18927 = vst [vmem:[#allocation42_spill] sm:$0xff] %v17369_v41  ;;  %v17374_v5 = vpop.f32.mrb[158].mxu0  ;;  %v17377_v19 = vadd.f32 %v18930_v56, %v6539_v59 }
 0x6c7   : > { %18929 = vst [vmem:[#allocation44_spill] sm:$0xff] %v17374_v5  ;;  %12324 = vmatmul.mubr.bf16.gmra.mrb[124].mxu1 %v18931_v30  ;;  %v8339_v28 = vpop.f32.mrb[159].mxu0  ;;  %v17381_v40 = vadd.f32 %v18932_v11, %v6541_v43  ;;  %v18939_v11 = vld [vmem:[#allocation107_spill] sm:$0xff] }
 0x6c8   : > { %12327 = vmatprep.mubr.bf16.mxu1 %v18933_v18  ;;  %v18936_v28 = vld [vmem:[#allocation37_spill] sm:$0xff]  ;;  %v18938_v18 = vld [vmem:[#allocation43_spill] sm:$0xff] }
 0x6ca   : > { %v12061_v16 = vpop.f32.mrb[20].mxu1 }
 0x6cb   : > { %v6543_v14 = vadd.f32 %v12061_v16, %v17160_v37  ;;  %v6427_v62 = vpop.f32.mrb[21].mxu1 }
 0x6cc   : > { %v12062_v41 = vpop.f32.mrb[22].mxu1  ;;  %v17385_v26 = vpop.f32.mrb[160].mxu0 }
 0x6cd   : > { %18934 = vst [vmem:[#allocation27_spill] sm:$0xff] %v17385_v26  ;;  %v6429_v25 = vpop.f32.mrb[23].mxu1  ;;  %v8351_v5 = vpop.f32.mrb[161].mxu0  ;;  %v17388_v59 = vadd.f32 %v18935_v29, %v6543_v14 }
 0x6ce   : > { %v6542_v56 = vadd.f32 %v6429_v25, %v17169_v48  ;;  %v12382_v30 = vpop.f32.mrb[162].mxu0 }
 0x6cf   : > { %12328 = vmatmul.mubr.bf16.gmra.mrb[128].mxu1 %v18936_v28  ;;  %v17392_v43 = vpop.f32.mrb[163].mxu0  ;;  %v18942_v28 = vld [vmem:[#allocation111_spill] sm:$0xff] }
 0x6d0   : > { %18937 = vst [vmem:[#allocation29_spill] sm:$0xff] %v17392_v43  ;;  %12331 = vmatprep.mubr.bf16.mxu1 %v18938_v18  ;;  %v17396_v37 = vadd.f32 %v18939_v11, %v6542_v56  ;;  %v18943_v56 = vld [vmem:[#allocation83_spill] sm:$0xff]  ;;  %v18957_v43 = vld [vmem:[#allocation110_spill] sm:$0xff] }
 0x6d2   : > { %v12065_v41 = vpop.f32.mrb[24].mxu1 }
 0x6d3   : > { %v6441_v16 = vpop.f32.mrb[25].mxu1  ;;  %v18945_v41 = vld [vmem:[#allocation99_spill] sm:$0xff] }
 0x6d4   : > { %v6544_v62 = vadd.f32 %v6441_v16, %v17177_v46  ;;  %v12066_v5 = vpop.f32.mrb[26].mxu1  ;;  %v12385_v26 = vpop.f32.mrb[164].mxu0 }
 0x6d5   : > { %v6546_v29 = vadd.f32 %v12066_v5, %v17180_v4  ;;  %v6444_v14 = vpop.f32.mrb[27].mxu1  ;;  %v17400_v48 = vpop.f32.mrb[165].mxu0  ;;  %v18946_v26 = vld [vmem:[#allocation46_spill] sm:$0xff]  ;;  %v18947_v4 = vld [vmem:[#allocation101_spill] sm:$0xff] }
 0x6d6   : > { %18940 = vst [vmem:[#allocation71_spill] sm:$0xff] %v17400_v48  ;;  %v6545_v25 = vadd.f32 %v6444_v14, %v17185_v55  ;;  %v17403_v30 = vpop.f32.mrb[166].mxu0  ;;  %v17406_v18 = vadd.f32 %v18942_v28, %v6544_v62 }
 0x6d7   : > { %18941 = vst [vmem:[#allocation74_spill] sm:$0xff] %v17403_v30  ;;  %12332 = vmatmul.mubr.bf16.gmra.mrb[132].mxu1 %v18943_v56  ;;  %v17409_v11 = vpop.f32.mrb[167].mxu0  ;;  %v17412_v46 = vadd.f32 %v18945_v41, %v6546_v29  ;;  %v18950_v29 = vld [vmem:[#allocation119_spill] sm:$0xff] }
 0x6d8   : > { %18944 = vst [vmem:[#allocation56_spill] sm:$0xff] %v17409_v11  ;;  %12335 = vmatprep.mubr.bf16.mxu1 %v18946_v26  ;;  %v17416_v16 = vadd.f32 %v18947_v4, %v6545_v25  ;;  %v18952_v25 = vld [vmem:[#allocation104_spill] sm:$0xff] }
 0x6da   : > { %v12069_v5 = vpop.f32.mrb[28].mxu1 }
 0x6db   : > { %v6548_v55 = vadd.f32 %v12069_v5, %v17194_v36  ;;  %v6456_v14 = vpop.f32.mrb[29].mxu1  ;;  %v18953_v36 = vld [vmem:[#allocation85_spill] sm:$0xff] }
 0x6dc   : > { %v6547_v30 = vadd.f32 %v6456_v14, %v17197_v57  ;;  %v12070_v62 = vpop.f32.mrb[30].mxu1  ;;  %v17420_v28 = vpop.f32.mrb[168].mxu0  ;;  %v18954_v57 = vld [vmem:[#allocation122_spill] sm:$0xff] }
 0x6dd   : > { %18948 = vst [vmem:[#allocation75_spill] sm:$0xff] %v17420_v28  ;;  %v6549_v56 = vadd.f32 %v12070_v62, %v17202_v33  ;;  %v6459_v11 = vpop.f32.mrb[31].mxu1  ;;  %v17423_v48 = vpop.f32.mrb[169].mxu0  ;;  %v17426_v41 = vadd.f32 %v18950_v29, %v6548_v55  ;;  %v18955_v28 = vld [vmem:[#allocation49_spill] sm:$0xff] }
 0x6de   : > { %18949 = vst [vmem:[#allocation79_spill] sm:$0xff] %v17423_v48  ;;  %v17428_v26 = vpop.f32.mrb[170].mxu0  ;;  %v17431_v4 = vadd.f32 %v18952_v25, %v6547_v30 }
 0x6df   : > { %18951 = vst [vmem:[#allocation81_spill] sm:$0xff] %v17428_v26  ;;  %12336 = vmatmul.mubr.bf16.gmra.mrb[136].mxu1 %v18953_v36  ;;  %v8383_v5 = vpop.f32.mrb[171].mxu0  ;;  %v17435_v14 = vadd.f32 %v18954_v57, %v6549_v56  ;;  %v18959_v57 = vld [vmem:[#allocation113_spill] sm:$0xff] }
 0x6e0   : > { %12339 = vmatprep.mubr.bf16.mxu1 %v18955_v28 }
 0x6e2   : > { %v12073_v33 = vpop.f32.mrb[32].mxu1 }
 0x6e3   : > { %v6551_v11 = vadd.f32 %v12073_v33, %v17211_v63  ;;  %v6471_v62 = vpop.f32.mrb[33].mxu1 }
 0x6e4   : > { %v12074_v48 = vpop.f32.mrb[34].mxu1  ;;  %v17439_v55 = vpop.f32.mrb[172].mxu0 }
 0x6e5   : > { %18956 = vst [vmem:[#allocation131_spill] sm:$0xff] %v17439_v55  ;;  %v6473_v29 = vpop.f32.mrb[35].mxu1  ;;  %v8395_v26 = vpop.f32.mrb[173].mxu0  ;;  %v17442_v30 = vadd.f32 %v18957_v43, %v6551_v11 }
 0x6e6   : > { %v6550_v25 = vadd.f32 %v6473_v29, %v17216_v0  ;;  %v12394_v5 = vpop.f32.mrb[174].mxu0 }
 0x6e7   : > { %12340 = vmatmul.mubr.bf16.gmra.mrb[140].mxu1 %v16967_v34  ;;  %v17446_v56 = vpop.f32.mrb[175].mxu0  ;;  %v18963_v5 = vld [vmem:[#allocation59_spill] sm:$0xff] }
 0x6e8   : > { %18958 = vst [vmem:[#allocation3_spill] sm:$0xff] %v17446_v56  ;;  %12423 = vmatprep.mubr.bf16.mxu1 %v18959_v57  ;;  %v17450_v63 = vadd.f32 %v18960_v44, %v6550_v25  ;;  %v18964_v44 = vld [vmem:[#allocation92_spill] sm:$0xff] }
 0x6ea   : > { %v12077_v48 = vpop.f32.mrb[36].mxu1 }
 0x6eb   : > { %v6485_v33 = vpop.f32.mrb[37].mxu1  ;;  %v18966_v48 = vld [vmem:[#allocation114_spill] sm:$0xff] }
 0x6ec   : > { %v6552_v62 = vadd.f32 %v6485_v33, %v17223_v61  ;;  %v12078_v26 = vpop.f32.mrb[38].mxu1  ;;  %v12397_v55 = vpop.f32.mrb[176].mxu0 }
 0x6ed   : > { %v6554_v43 = vadd.f32 %v12078_v26, %v17226_v3  ;;  %v6488_v11 = vpop.f32.mrb[39].mxu1  ;;  %v17454_v0 = vpop.f32.mrb[177].mxu0  ;;  %v18967_v55 = vld [vmem:[#allocation94_spill] sm:$0xff] }
 0x6ee   : > { %18961 = vst [vmem:[#allocation4_spill] sm:$0xff] %v17454_v0  ;;  %v6553_v34 = vadd.f32 %v6488_v11, %v17234_v51  ;;  %v17457_v29 = vpop.f32.mrb[178].mxu0  ;;  %v17460_v57 = vadd.f32 %v18963_v5, %v6552_v62  ;;  %v18968_v3 = vld [vmem:[#allocation6_spill] sm:$0xff] }
 0x6ef   : > { %18962 = vst [vmem:[#allocation26_spill] sm:$0xff] %v17457_v29  ;;  %12424 = vmatmul.mubr.bf16.vlgmr.msra.gmra.mrb[144].mxu1 %v18964_v44  ;;  %v17463_v25 = vpop.f32.mrb[179].mxu0  ;;  %v17466_v61 = vadd.f32 %v18966_v48, %v6554_v43  ;;  %v18971_v43 = vld [vmem:[#allocation118_spill] sm:$0xff] }
 0x6f0   : > { %18965 = vst [vmem:[#allocation32_spill] sm:$0xff] %v17463_v25  ;;  %12427 = vmatprep.mubr.bf16.mxu1 %v18967_v55  ;;  %v17470_v33 = vadd.f32 %v18968_v3, %v6553_v34  ;;  %v18973_v34 = vld [vmem:[#allocation120_spill] sm:$0xff] }
 0x6f2   : > { %v12081_v26 = vpop.f32.mrb[40].mxu1 }
 0x6f3   : > { %v6556_v51 = vadd.f32 %v12081_v26, %v17247_v15  ;;  %v6500_v11 = vpop.f32.mrb[41].mxu1  ;;  %v18974_v15 = vld [vmem:[#allocation117_spill] sm:$0xff] }
 0x6f4   : > { %v6555_v29 = vadd.f32 %v6500_v11, %v17250_v52  ;;  %v12082_v62 = vpop.f32.mrb[42].mxu1  ;;  %v17474_v5 = vpop.f32.mrb[180].mxu0  ;;  %v18975_v52 = vld [vmem:[#allocation8_spill] sm:$0xff] }
 0x6f5   : > { %18969 = vst [vmem:[#allocation15_spill] sm:$0xff] %v17474_v5  ;;  %v6557_v44 = vadd.f32 %v12082_v62, %v17255_v8  ;;  %v6503_v25 = vpop.f32.mrb[43].mxu1  ;;  %v17477_v0 = vpop.f32.mrb[181].mxu0  ;;  %v17480_v48 = vadd.f32 %v18971_v43, %v6556_v51  ;;  %v18976_v5 = vld [vmem:[#allocation96_spill] sm:$0xff]  ;;  %v18977_v43 = vld [vmem:[#allocation121_spill] sm:$0xff] }
 0x6f6   : > { %18970 = vst [vmem:[#allocation38_spill] sm:$0xff] %v17477_v0  ;;  %v17482_v55 = vpop.f32.mrb[182].mxu0  ;;  %v17485_v3 = vadd.f32 %v18973_v34, %v6555_v29  ;;  %v18978_v34 = vld [vmem:[#allocation98_spill] sm:$0xff] }
 0x6f7   : > { %18972 = vst [vmem:[#allocation62_spill] sm:$0xff] %v17482_v55  ;;  %12428 = vmatmul.mubr.bf16.gmra.mrb[148].mxu1 %v18974_v15  ;;  %v8427_v26 = vpop.f32.mrb[183].mxu0  ;;  %v17489_v11 = vadd.f32 %v18975_v52, %v6557_v44  ;;  %v18979_v15 = vld [vmem:[#allocation45_spill] sm:$0xff] }
 0x6f8   : > { %12431 = vmatprep.mubr.bf16.mxu1 %v18976_v5  ;;  %v18980_v26 = vld [vmem:[#allocation123_spill] sm:$0xff] }
 0x6fa   : > { %v12085_v8 = vpop.f32.mrb[44].mxu1 }
 0x6fb   : > { %v6559_v25 = vadd.f32 %v12085_v8, %v17270_v58  ;;  %v6515_v62 = vpop.f32.mrb[45].mxu1 }
 0x6fc   : > { %v12086_v0 = vpop.f32.mrb[46].mxu1  ;;  %v18981_v62 = vld [vmem:[#allocation10_spill] sm:$0xff] }
 0x6fd   : > { %v6517_v51 = vpop.f32.mrb[47].mxu1  ;;  %v17494_v56 = vadd.f32 %v18977_v43, %v6559_v25 }
 0x6fe   : > { %v6558_v29 = vadd.f32 %v6517_v51, %v17278_v35  ;;  %v18982_v35 = vld [vmem:[#allocation115_spill] sm:$0xff]  ;;  %v18983_v51 = vld [vmem:[#allocation48_spill] sm:$0xff] }
 0x6ff   : > { %12432 = vmatmul.mubr.bf16.gmra.mrb[152].mxu1 %v18978_v34 }
 0x700   : > { %12435 = vmatprep.mubr.bf16.mxu1 %v18979_v15  ;;  %v17500_v44 = vadd.f32 %v18980_v26, %v6558_v29  ;;  %v18984_v29 = vld [vmem:[#allocation51_spill] sm:$0xff]  ;;  %v18985_v15 = vld [vmem:[#allocation125_spill] sm:$0xff] }
 0x702   : > { %v12169_v52 = vpop.f32.mrb[48].mxu1 }
 0x703   : > { %v7240_v5 = vpop.f32.mrb[49].mxu1 }
 0x704   : > { %v7415_v55 = vadd.f32 %v7240_v5, %v17298_v50  ;;  %v12170_v58 = vpop.f32.mrb[50].mxu1 }
 0x705   : > { %v7417_v0 = vadd.f32 %v12170_v58, %v17304_v21  ;;  %v7243_v8 = vpop.f32.mrb[51].mxu1 }
 0x706   : > { %v7416_v25 = vadd.f32 %v7243_v8, %v17308_v53  ;;  %v17506_v43 = vadd.f32 %v18981_v62, %v7415_v55  ;;  %v18986_v8 = vld [vmem:[#allocation12_spill] sm:$0xff] }
 0x707   : > { %12436 = vmatmul.mubr.bf16.gmra.mrb[156].mxu1 %v18982_v35  ;;  %v17510_v34 = vadd.f32 %v18983_v51, %v7417_v0  ;;  %v18987_v0 = vld [vmem:[#allocation52_spill] sm:$0xff]  ;;  %v18988_v51 = vld [vmem:[#allocation102_spill] sm:$0xff] }
 0x708   : > { %12439 = vmatprep.mubr.bf16.mxu1 %v18984_v29  ;;  %v17514_v26 = vadd.f32 %v18985_v15, %v7416_v25  ;;  %v18989_v25 = vld [vmem:[#allocation127_spill] sm:$0xff]  ;;  %v18990_v15 = vld [vmem:[#allocation126_spill] sm:$0xff] }
 0x70a   : > { %v12173_v50 = vpop.f32.mrb[52].mxu1 }
 0x70b   : > { %v7419_v52 = vadd.f32 %v12173_v50, %v17318_v20  ;;  %v7255_v21 = vpop.f32.mrb[53].mxu1 }
 0x70c   : > { %v7418_v5 = vadd.f32 %v7255_v21, %v17323_v9  ;;  %v12174_v53 = vpop.f32.mrb[54].mxu1 }
 0x70d   : > { %v7420_v55 = vadd.f32 %v12174_v53, %v17327_v45  ;;  %v7258_v58 = vpop.f32.mrb[55].mxu1  ;;  %v17520_v62 = vadd.f32 %v18986_v8, %v7419_v52 }
 0x70e   : > { %v17523_v35 = vadd.f32 %v18987_v0, %v7418_v5  ;;  %v18991_v5 = vld [vmem:[#allocation106_spill] sm:$0xff]  ;;  %v18992_v58 = vld [vmem:[#allocation124_spill] sm:$0xff] }
 0x70f   : > { %12440 = vmatmul.mubr.bf16.gmra.mrb[160].mxu1 %v18988_v51  ;;  %v17527_v29 = vadd.f32 %v18989_v25, %v7420_v55 }
 0x710   : > { %12443 = vmatprep.mubr.bf16.mxu1 %v18990_v15 }
 0x712   : > { %v12177_v20 = vpop.f32.mrb[56].mxu1 }
 0x713   : > { %v7422_v9 = vadd.f32 %v12177_v20, %v17334_v10  ;;  %v7270_v50 = vpop.f32.mrb[57].mxu1  ;;  %v18993_v20 = vld [vmem:[#allocation14_spill] sm:$0xff] }
 0x714   : > { %v12178_v21 = vpop.f32.mrb[58].mxu1  ;;  %v18995_v50 = vld [vmem:[#allocation57_spill] sm:$0xff] }
 0x715   : > { %v7272_v45 = vpop.f32.mrb[59].mxu1  ;;  %v17532_v53 = vadd.f32 %v17109_v12, %v7422_v9 }
 0x716   : > { %v7421_v52 = vadd.f32 %v7272_v45, %v17342_v2  ;;  %v18994_v2 = vld [vmem:[#allocation108_spill] sm:$0xff]  ;;  %v18997_v45 = vld [vmem:[#allocation129_spill] sm:$0xff] }
 0x717   : > { %12444 = vmatmul.mubr.bf16.gmra.mrb[164].mxu1 %v18991_v5 }
 0x718   : > { %12447 = vmatprep.mubr.bf16.mxu1 %v18992_v58  ;;  %v17538_v55 = vadd.f32 %v17115_v42, %v7421_v52  ;;  %v18996_v42 = vld [vmem:[#allocation55_spill] sm:$0xff] }
 0x71a   : > { %v12181_v8 = vpop.f32.mrb[60].mxu1 }
 0x71b   : > { %v7284_v0 = vpop.f32.mrb[61].mxu1 }
 0x71c   : > { %v7423_v51 = vadd.f32 %v7284_v0, %v17352_v32  ;;  %v12182_v10 = vpop.f32.mrb[62].mxu1 }
 0x71d   : > { %v7425_v25 = vadd.f32 %v12182_v10, %v17358_v47  ;;  %v7287_v15 = vpop.f32.mrb[63].mxu1  ;;  %v18998_v10 = vld [vmem:[#allocation16_spill] sm:$0xff] }
 0x71e   : > { %v7424_v12 = vadd.f32 %v7287_v15, %v17362_v22  ;;  %v17544_v9 = vadd.f32 %v18993_v20, %v7423_v51  ;;  %v18999_v15 = vld [vmem:[#allocation128_spill] sm:$0xff] }
 0x71f   : > { %12448 = vmatmul.mubr.bf16.gmra.mrb[168].mxu1 %v18994_v2  ;;  %v17548_v21 = vadd.f32 %v18995_v50, %v7425_v25  ;;  %v19001_v2 = vld [vmem:[#allocation63_spill] sm:$0xff] }
 0x720   : > { %12451 = vmatprep.mubr.bf16.mxu1 %v18996_v42  ;;  %v17552_v52 = vadd.f32 %v18997_v45, %v7424_v12  ;;  %v19000_v12 = vld [vmem:[#allocation60_spill] sm:$0xff] }
 0x722   : > { %v12185_v32 = vpop.f32.mrb[64].mxu1 }
 0x723   : > { %v7427_v5 = vadd.f32 %v12185_v32, %v17372_v17  ;;  %v7299_v47 = vpop.f32.mrb[65].mxu1  ;;  %v19002_v32 = vld [vmem:[#allocation58_spill] sm:$0xff] }
 0x724   : > { %v7426_v58 = vadd.f32 %v7299_v47, %v17377_v19  ;;  %v12186_v22 = vpop.f32.mrb[66].mxu1 }
 0x725   : > { %v7428_v8 = vadd.f32 %v12186_v22, %v17381_v40  ;;  %v7302_v0 = vpop.f32.mrb[67].mxu1  ;;  %v17558_v51 = vadd.f32 %v17144_v38, %v7427_v5  ;;  %v19003_v5 = vld [vmem:[#allocation112_spill] sm:$0xff] }
 0x726   : > { %v17561_v25 = vadd.f32 %v18998_v10, %v7426_v58 }
 0x727   : > { %12452 = vmatmul.mubr.bf16.gmra.mrb[172].mxu1 %v18999_v15  ;;  %v17565_v20 = vadd.f32 %v19000_v12, %v7428_v8  ;;  %v8501_v8 = vrot.slane %v18953_v36, 1  ;;  %v19004_v12 = vld [vmem:[#allocation116_spill] sm:$0xff] }
 0x728   : > { %12455 = vmatprep.mubr.bf16.mxu1 %v19001_v2  ;;  %v19005_v2 = vld [vmem:[#allocation66_spill] sm:$0xff] }
 0x72a   : > { %v12189_v17 = vpop.f32.mrb[68].mxu1 }
 0x72b   : > { %v7430_v19 = vadd.f32 %v12189_v17, %v17388_v59  ;;  %v7314_v50 = vpop.f32.mrb[69].mxu1 }
 0x72c   : > { %v12190_v42 = vpop.f32.mrb[70].mxu1 }
 0x72d   : > { %v7316_v40 = vpop.f32.mrb[71].mxu1  ;;  %v17570_v45 = vadd.f32 %v17164_v60, %v7430_v19 }
 0x72e   : > { %v7429_v38 = vadd.f32 %v7316_v40, %v17396_v37 }
 0x72f   : > { %12456 = vmatmul.mubr.bf16.gmra.mrb[176].mxu1 %v19002_v32 }
 0x730   : > { %12459 = vmatprep.mubr.bf16.mxu1 %v19003_v5  ;;  %v17576_v47 = vadd.f32 %v17172_v54, %v7429_v38  ;;  %v8502_v54 = vsel %vm1457_vm2, %v19005_v2, %v8501_v8 }
 0x732   : > { %v12193_v58 = vpop.f32.mrb[72].mxu1 }
 0x733   : > { %v7328_v22 = vpop.f32.mrb[73].mxu1 }
 0x734   : > { %v7431_v59 = vadd.f32 %v7328_v22, %v17406_v18  ;;  %v12194_v0 = vpop.f32.mrb[74].mxu1  ;;  %v19007_v22 = vld [vmem:[#allocation24_spill] sm:$0xff] }
 0x735   : > { %v7433_v10 = vadd.f32 %v12194_v0, %v17412_v46  ;;  %v7331_v60 = vpop.f32.mrb[75].mxu1  ;;  %v8503_v46 = vrot.slane %v18955_v28, 1 }
 0x736   : > { %v7432_v15 = vadd.f32 %v7331_v60, %v17416_v16  ;;  %v17583_v37 = vadd.f32 %v17182_v7, %v7431_v59  ;;  %v12805_v7 = vld [vmem:[#allocation2 + $0xd0] sm:$0xff]  }
 0x737   : > { %12460 = vmatmul.mubr.bf16.gmra.mrb[180].mxu1 %v19004_v12  ;;  %v17589_v17 = vadd.f32 %v17187_v24, %v7433_v10  ;;  %v8505_v50 = vrot.slane %v12805_v7, 1 }
 0x738   : > { %12463 = vmatprep.mubr.bf16.mxu1 %v8502_v54  ;;  %v17592_v18 = vadd.f32 %v17190_v23, %v7432_v15  ;;  %v8504_v23 = vsel %vm1457_vm2, %v8501_v8, %v8503_v46 }
 0x739   : > { %v8506_v28 = vsel %vm1457_vm2, %v8503_v46, %v8505_v50 }
 0x73a   : > { %v12197_v36 = vpop.f32.mrb[76].mxu1 }
 0x73b   : > { %v7435_v16 = vadd.f32 %v12197_v36, %v17426_v41  ;;  %v7343_v19 = vpop.f32.mrb[77].mxu1  ;;  %v19006_v41 = vld [vmem:[#allocation28_spill] sm:$0xff] }
 0x73c   : > { %v7434_v42 = vadd.f32 %v7343_v19, %v17431_v4  ;;  %v12198_v40 = vpop.f32.mrb[78].mxu1  ;;  %v8507_v4 = vrot.slane %v19007_v22, 1 }
 0x73d   : > { %v7436_v38 = vadd.f32 %v12198_v40, %v17435_v14  ;;  %v7346_v32 = vpop.f32.mrb[79].mxu1  ;;  %v17599_v24 = vadd.f32 %v17199_v6, %v7435_v16 }
 0x73e   : > { %v17603_v5 = vadd.f32 %v17204_v31, %v7434_v42  ;;  %v8508_v6 = vsel %vm1457_vm2, %v8505_v50, %v8507_v4 }
 0x73f   : > { %12464 = vmatmul.mubr.bf16.gmra.mrb[184].mxu1 %v8504_v23  ;;  %v17607_v58 = vadd.f32 %v19006_v41, %v7436_v38  ;;  %v17615_v60 = vpop.f32.mrb[184].mxu0 }
 0x740   : > { %12467 = vmatprep.mubr.bf16.mxu1 %v8506_v28  ;;  %v8439_v12 = vpop.f32.mrb[185].mxu0 }
 0x741   : > { %v12406_v2 = vpop.f32.mrb[186].mxu0 }
 0x742   : > { %v12201_v59 = vpop.f32.mrb[80].mxu1  ;;  %v17621_v46 = vpop.f32.mrb[187].mxu0 }
 0x743   : > { %v7438_v14 = vadd.f32 %v12201_v59, %v17442_v30  ;;  %v7358_v0 = vpop.f32.mrb[81].mxu1 }
 0x744   : > { %v12202_v10 = vpop.f32.mrb[82].mxu1 }
 0x745   : > { %v7360_v8 = vpop.f32.mrb[83].mxu1  ;;  %v17613_v31 = vadd.f32 %v17213_v39, %v7438_v14  ;;  %v19012_v10 = vld [vmem:[#allocation13_spill] sm:$0xff] }
 0x746   : > { %v7437_v15 = vadd.f32 %v7360_v8, %v17450_v63 }
 0x747   : > { %12468 = vmatmul.mubr.bf16.gmra.mrb[188].mxu1 %v8508_v6 }
 0x748   : > { %v17619_v54 = vadd.f32 %v17219_v49, %v7437_v15 }
 0x74a   : > { %v12205_v30 = vpop.f32.mrb[84].mxu1 }
 0x74b   : > { %v7372_v36 = vpop.f32.mrb[85].mxu1 }
 0x74c   : > { %v7439_v16 = vadd.f32 %v7372_v36, %v17460_v57  ;;  %v12206_v19 = vpop.f32.mrb[86].mxu1 }
 0x74d   : > { %v7441_v39 = vadd.f32 %v12206_v19, %v17466_v61  ;;  %v7375_v7 = vpop.f32.mrb[87].mxu1  ;;  %v19013_v19 = vld [vmem:[#allocation20_spill] sm:$0xff] }
 0x74e   : > { %v7440_v50 = vadd.f32 %v7375_v7, %v17470_v33  ;;  %v17627_v63 = vadd.f32 %v17228_v1, %v7439_v16  ;;  %v19008_v33 = vld [vmem:[#allocation21_spill] sm:$0xff]  ;;  %v19009_v1 = vld [vmem:[#allocation11_spill] sm:$0xff]  ;;  %v19014_v7 = vld [vmem:[#allocation40_spill] sm:$0xff] }
 0x74f   : > { %v17630_v42 = vadd.f32 %v17236_v13, %v7441_v39  ;;  %v19010_v13 = vld [vmem:[#allocation36_spill] sm:$0xff] }
 0x750   : > { %v17633_v49 = vadd.f32 %v17239_v27, %v7440_v50 }
 0x752   : > { %v12209_v40 = vpop.f32.mrb[88].mxu1 }
 0x753   : > { %v7443_v38 = vadd.f32 %v12209_v40, %v17480_v48  ;;  %v7387_v32 = vpop.f32.mrb[89].mxu1 }
 0x754   : > { %v7442_v57 = vadd.f32 %v7387_v32, %v17485_v3  ;;  %v12210_v23 = vpop.f32.mrb[90].mxu1  ;;  %v19011_v3 = vld [vmem:[#allocation9_spill] sm:$0xff] }
 0x755   : > { %v7444_v61 = vadd.f32 %v12210_v23, %v17489_v11  ;;  %v7390_v28 = vpop.f32.mrb[91].mxu1  ;;  %v17639_v41 = vadd.f32 %v19008_v33, %v7443_v38  ;;  %v19017_v33 = vld [vmem:[#allocation65_spill] sm:$0xff] }
 0x756   : > { %v17642_v22 = vadd.f32 %v19009_v1, %v7442_v57 }
 0x757   : > { %v17645_v4 = vadd.f32 %v19010_v13, %v7444_v61  ;;  %v19018_v13 = vld [vmem:[#allocation18_spill] sm:$0xff] }
 0x75a   : > { %v12213_v27 = vpop.f32.mrb[92].mxu1 }
 0x75b   : > { %v7446_v59 = vadd.f32 %v12213_v27, %v17494_v56  ;;  %v7402_v48 = vpop.f32.mrb[93].mxu1 }
 0x75c   : > { %v12214_v14 = vpop.f32.mrb[94].mxu1 }
 0x75d   : > { %v7404_v0 = vpop.f32.mrb[95].mxu1  ;;  %v17649_v6 = vadd.f32 %v19011_v3, %v7446_v59 }
 0x75e   : > { %v7445_v11 = vadd.f32 %v7404_v0, %v17500_v44  ;;  %v19015_v44 = vld [vmem:[#allocation17_spill] sm:$0xff] }
 0x760   : > { %v17653_v8 = vadd.f32 %v19012_v10, %v7445_v11  ;;  %v19020_v11 = vld [vmem:[#allocation7_spill] sm:$0xff] }
 0x762   : > { %v12297_v15 = vpop.f32.mrb[96].mxu1 }
 0x763   : > { %v7935_v12 = vpop.f32.mrb[97].mxu1 }
 0x764   : > { %v8110_v2 = vadd.f32 %v7935_v12, %v17506_v43  ;;  %v12298_v30 = vpop.f32.mrb[98].mxu1 }
 0x765   : > { %v8112_v36 = vadd.f32 %v12298_v30, %v17510_v34  ;;  %v7938_v16 = vpop.f32.mrb[99].mxu1 }
 0x766   : > { %v8111_v56 = vadd.f32 %v7938_v16, %v17514_v26  ;;  %v17659_v39 = vadd.f32 %v19013_v19, %v8110_v2  ;;  %v19016_v26 = vld [vmem:[#allocation25_spill] sm:$0xff] }
 0x767   : > { %v17662_v50 = vadd.f32 %v19014_v7, %v8112_v36  ;;  %v19022_v7 = vld [vmem:[#allocation34_spill] sm:$0xff] }
 0x768   : > { %v17665_v40 = vadd.f32 %v19015_v44, %v8111_v56  ;;  %v19021_v56 = vld [vmem:[#allocation30_spill] sm:$0xff] }
 0x76a   : > { %v12301_v38 = vpop.f32.mrb[100].mxu1 }
 0x76b   : > { %v8114_v32 = vadd.f32 %v12301_v38, %v17520_v62  ;;  %v7950_v57 = vpop.f32.mrb[101].mxu1 }
 0x76c   : > { %v8113_v43 = vadd.f32 %v7950_v57, %v17523_v35  ;;  %v12302_v23 = vpop.f32.mrb[102].mxu1  ;;  %v19019_v35 = vld [vmem:[#allocation22_spill] sm:$0xff] }
 0x76d   : > { %v8115_v34 = vadd.f32 %v12302_v23, %v17527_v29  ;;  %v7953_v61 = vpop.f32.mrb[103].mxu1  ;;  %v17671_v28 = vadd.f32 %v19016_v26, %v8114_v32  ;;  %v19025_v26 = vld [vmem:[#allocation42_spill] sm:$0xff] }
 0x76e   : > { %v17674_v1 = vadd.f32 %v19017_v33, %v8113_v43 }
 0x76f   : > { %v17677_v27 = vadd.f32 %v19018_v13, %v8115_v34  ;;  %v19026_v13 = vld [vmem:[#allocation44_spill] sm:$0xff] }
 0x772   : > { %v12305_v59 = vpop.f32.mrb[104].mxu1 }
 0x773   : > { %v8117_v48 = vadd.f32 %v12305_v59, %v17532_v53  ;;  %v7965_v62 = vpop.f32.mrb[105].mxu1 }
 0x774   : > { %v12306_v14 = vpop.f32.mrb[106].mxu1 }
 0x775   : > { %v7967_v0 = vpop.f32.mrb[107].mxu1  ;;  %v17681_v3 = vadd.f32 %v19019_v35, %v8117_v48 }
 0x776   : > { %v8116_v29 = vadd.f32 %v7967_v0, %v17538_v55  ;;  %v19023_v55 = vld [vmem:[#allocation19_spill] sm:$0xff] }
 0x778   : > { %v17685_v10 = vadd.f32 %v19020_v11, %v8116_v29  ;;  %v19028_v29 = vld [vmem:[#allocation29_spill] sm:$0xff] }
 0x77a   : > { %v12309_v15 = vpop.f32.mrb[108].mxu1 }
 0x77b   : > { %v7979_v12 = vpop.f32.mrb[109].mxu1 }
 0x77c   : > { %v8118_v2 = vadd.f32 %v7979_v12, %v17544_v9  ;;  %v12310_v30 = vpop.f32.mrb[110].mxu1 }
 0x77d   : > { %v8120_v36 = vadd.f32 %v12310_v30, %v17548_v21  ;;  %v7982_v16 = vpop.f32.mrb[111].mxu1 }
 0x77e   : > { %v8119_v53 = vadd.f32 %v7982_v16, %v17552_v52  ;;  %v17691_v19 = vadd.f32 %v19021_v56, %v8118_v2  ;;  %v19024_v52 = vld [vmem:[#allocation23_spill] sm:$0xff] }
 0x77f   : > { %v17694_v44 = vadd.f32 %v19022_v7, %v8120_v36  ;;  %v19030_v7 = vld [vmem:[#allocation74_spill] sm:$0xff] }
 0x780   : > { %v17697_v38 = vadd.f32 %v19023_v55, %v8119_v53  ;;  %v19029_v53 = vld [vmem:[#allocation71_spill] sm:$0xff] }
 0x782   : > { %v12313_v32 = vpop.f32.mrb[112].mxu1 }
 0x783   : > { %v8122_v57 = vadd.f32 %v12313_v32, %v17558_v51  ;;  %v7994_v43 = vpop.f32.mrb[113].mxu1 }
 0x784   : > { %v8121_v9 = vadd.f32 %v7994_v43, %v17561_v25  ;;  %v12314_v23 = vpop.f32.mrb[114].mxu1  ;;  %v19027_v25 = vld [vmem:[#allocation27_spill] sm:$0xff] }
 0x785   : > { %v8123_v21 = vadd.f32 %v12314_v23, %v17565_v20  ;;  %v7997_v34 = vpop.f32.mrb[115].mxu1  ;;  %v17703_v61 = vadd.f32 %v19024_v52, %v8122_v57  ;;  %v19033_v52 = vld [vmem:[#allocation79_spill] sm:$0xff] }
 0x786   : > { %v17706_v33 = vadd.f32 %v19025_v26, %v8121_v9 }
 0x787   : > { %v17709_v59 = vadd.f32 %v19026_v13, %v8123_v21  ;;  %v19034_v13 = vld [vmem:[#allocation81_spill] sm:$0xff] }
 0x78a   : > { %v12317_v48 = vpop.f32.mrb[116].mxu1 }
 0x78b   : > { %v8125_v62 = vadd.f32 %v12317_v48, %v17570_v45  ;;  %v8009_v51 = vpop.f32.mrb[117].mxu1 }
 0x78c   : > { %v12318_v14 = vpop.f32.mrb[118].mxu1 }
 0x78d   : > { %v8011_v0 = vpop.f32.mrb[119].mxu1  ;;  %v17713_v35 = vadd.f32 %v19027_v25, %v8125_v62 }
 0x78e   : > { %v8124_v20 = vadd.f32 %v8011_v0, %v17576_v47  ;;  %v19031_v47 = vld [vmem:[#allocation56_spill] sm:$0xff] }
 0x790   : > { %v17717_v11 = vadd.f32 %v19028_v29, %v8124_v20  ;;  %v19036_v20 = vld [vmem:[#allocation3_spill] sm:$0xff] }
 0x792   : > { %v12321_v15 = vpop.f32.mrb[120].mxu1 }
 0x793   : > { %v8023_v12 = vpop.f32.mrb[121].mxu1 }
 0x794   : > { %v8126_v2 = vadd.f32 %v8023_v12, %v17583_v37  ;;  %v12322_v30 = vpop.f32.mrb[122].mxu1 }
 0x795   : > { %v8128_v36 = vadd.f32 %v12322_v30, %v17589_v17  ;;  %v8026_v16 = vpop.f32.mrb[123].mxu1 }
 0x796   : > { %v8127_v45 = vadd.f32 %v8026_v16, %v17592_v18  ;;  %v17723_v56 = vadd.f32 %v19029_v53, %v8126_v2  ;;  %v19032_v18 = vld [vmem:[#allocation75_spill] sm:$0xff] }
 0x797   : > { %v17726_v55 = vadd.f32 %v19030_v7, %v8128_v36  ;;  %v19038_v7 = vld [vmem:[#allocation26_spill] sm:$0xff] }
 0x798   : > { %v17729_v32 = vadd.f32 %v19031_v47, %v8127_v45  ;;  %v19037_v45 = vld [vmem:[#allocation4_spill] sm:$0xff] }
 0x79a   : > { %v12325_v57 = vpop.f32.mrb[124].mxu1 }
 0x79b   : > { %v8130_v43 = vadd.f32 %v12325_v57, %v17599_v24  ;;  %v8038_v9 = vpop.f32.mrb[125].mxu1 }
 0x79c   : > { %v8129_v37 = vadd.f32 %v8038_v9, %v17603_v5  ;;  %v12326_v23 = vpop.f32.mrb[126].mxu1  ;;  %v19035_v5 = vld [vmem:[#allocation131_spill] sm:$0xff] }
 0x79d   : > { %v8131_v17 = vadd.f32 %v12326_v23, %v17607_v58  ;;  %v8041_v21 = vpop.f32.mrb[127].mxu1  ;;  %v17735_v34 = vadd.f32 %v19032_v18, %v8130_v43  ;;  %v19041_v18 = vld [vmem:[#allocation38_spill] sm:$0xff] }
 0x79e   : > { %v17738_v26 = vadd.f32 %v19033_v52, %v8129_v37 }
 0x79f   : > { %v17741_v48 = vadd.f32 %v19034_v13, %v8131_v17  ;;  %v19040_v17 = vld [vmem:[#allocation15_spill] sm:$0xff]  ;;  %v19042_v13 = vld [vmem:[#allocation62_spill] sm:$0xff] }
 0x7a2   : > { %v12329_v62 = vpop.f32.mrb[128].mxu1 }
 0x7a3   : > { %v8133_v51 = vadd.f32 %v12329_v62, %v17613_v31  ;;  %v8053_v24 = vpop.f32.mrb[129].mxu1 }
 0x7a4   : > { %v12330_v14 = vpop.f32.mrb[130].mxu1 }
 0x7a5   : > { %v8055_v0 = vpop.f32.mrb[131].mxu1  ;;  %v17745_v25 = vadd.f32 %v19035_v5, %v8133_v51 }
 0x7a6   : > { %v8132_v58 = vadd.f32 %v8055_v0, %v17619_v54  ;;  %v19039_v54 = vld [vmem:[#allocation32_spill] sm:$0xff] }
 0x7a8   : > { %v17749_v29 = vadd.f32 %v19036_v20, %v8132_v58 }
 0x7aa   : > { %v12333_v15 = vpop.f32.mrb[132].mxu1 }
 0x7ab   : > { %v8067_v12 = vpop.f32.mrb[133].mxu1 }
 0x7ac   : > { %v8134_v2 = vadd.f32 %v8067_v12, %v17627_v63  ;;  %v12334_v30 = vpop.f32.mrb[134].mxu1  ;;  %v12808_v12 = vld [vmem:[%s12967_s18 + $0x24] sm:$0xf] }
 0x7ad   : > { %v8136_v36 = vadd.f32 %v12334_v30, %v17630_v42  ;;  %v8070_v16 = vpop.f32.mrb[135].mxu1 }
 0x7ae   : > { %v8135_v31 = vadd.f32 %v8070_v16, %v17633_v49  ;;  %v17755_v53 = vadd.f32 %v19037_v45, %v8134_v2  ;;  %v12809_v2 = vld [vmem:[%s12967_s18 + $0x28] sm:$0xf] }
 0x7af   : > { %v17758_v47 = vadd.f32 %v19038_v7, %v8136_v36  ;;  %v8845_v30 = vunpack.c.l.bf16 %v12809_v2  ;;  %v12811_v7 = vld [vmem:[%s12967_s18 + $0x30] sm:$0xf] }
 0x7b0   : > { %v17761_v57 = vadd.f32 %v19039_v54, %v8135_v31  ;;  %v12810_v31 = vld [vmem:[%s12967_s18 + $0x20] sm:$0xf] }
 0x7b1   : > { %v8843_v45 = vunpack.c.l.bf16 %v12810_v31 }
 0x7b2   : > { %v12337_v43 = vpop.f32.mrb[136].mxu1 }
 0x7b3   : > { %v8138_v63 = vadd.f32 %v12337_v43, %v17639_v41  ;;  %v8082_v9 = vpop.f32.mrb[137].mxu1  ;;  %v12812_v43 = vld [vmem:[%s12967_s18 + $0x34] sm:$0xf] }
 0x7b4   : > { %v8137_v42 = vadd.f32 %v8082_v9, %v17642_v22  ;;  %v12338_v37 = vpop.f32.mrb[138].mxu1  ;;  %v12806_v22 = vld [vmem:[%s12967_s18 + $0x18] sm:$0xf] }
 0x7b5   : > { %v8139_v49 = vadd.f32 %v12338_v37, %v17645_v4  ;;  %v8085_v23 = vpop.f32.mrb[139].mxu1  ;;  %v17767_v21 = vadd.f32 %v19040_v17, %v8138_v63  ;;  %v8841_v14 = vunpack.c.l.bf16 %v12806_v22  ;;  %v12807_v4 = vld [vmem:[%s12967_s18 + $0x1c] sm:$0xf]  ;;  %v12813_v63 = vld [vmem:[%s12967_s18 + $0x2c] sm:$0xf]  ;;  %v8944_v22 = vrot.slane %v8845_v30, 2 }
 0x7b6   : > { %v17770_v52 = vadd.f32 %v19041_v18, %v8137_v42  ;;  %v8842_v0 = vunpack.c.l.bf16 %v12807_v4  ;;  %v8846_v9 = vunpack.c.l.bf16 %v12813_v63  ;;  %v12814_v42 = vld [vmem:[%s12967_s18 + $0x38] sm:$0xf]  ;;  %v12816_v17 = vld [vmem:[%s12967_s18 + $0x44] sm:$0xf] }
 0x7b7   : > { %v17773_v62 = vadd.f32 %v19042_v13, %v8139_v49  ;;  %v8938_v36 = vrot.slane %v8841_v14, 2  ;;  %v8849_v37 = vunpack.c.l.bf16 %v12814_v42  ;;  %v12815_v49 = vld [vmem:[%s12967_s18 + $0x40] sm:$0xf]  ;;  %v8852_v18 = vunpack.c.l.bf16 %v12816_v17  ;;  %v12817_v13 = vld [vmem:[%s12967_s18 + $0x3c] sm:$0xf] }
 0x7b8   : > { %v8939_v16 = vrot.slane %v8842_v0, 2  ;;  %v8851_v23 = vunpack.c.l.bf16 %v12815_v49  ;;  %v8941_v0 = vrot.slane %v8843_v45, 2  ;;  %v8946_v2 = vrot.slane %v8846_v9, 2 }
 0x7b9   : > { %v8951_v31 = vrot.slane %v8849_v37, 2 }
 0x7ba   : > { %v12341_v51 = vpop.f32.mrb[140].mxu1  ;;  %v8940_v4 = vsel %vm8937_vm1, %v8938_v36, %v8939_v16  ;;  %v8954_v30 = vrot.slane %v8851_v23, 2  ;;  %v8947_v9 = vsel %vm8937_vm1, %v8944_v22, %v8946_v2 }
 0x7bb   : > { %v8141_v41 = vadd.f32 %v12341_v51, %v17649_v6  ;;  %v8097_v24 = vpop.f32.mrb[141].mxu1  ;;  %v8844_v6 = vunpack.c.l.bf16 %v12808_v12  ;;  %v8850_v51 = vunpack.c.l.bf16 %v12817_v13 }
 0x7bc   : > { %v12342_v5 = vpop.f32.mrb[142].mxu1 }
 0x7bd   : > { %v17779_v58 = vadd.f32 %v17615_v60, %v8141_v41  ;;  %v8099_v20 = vpop.f32.mrb[143].mxu1  ;;  %v8847_v60 = vunpack.c.l.bf16 %v12811_v7  ;;  %v8943_v24 = vrot.slane %v8844_v6, 2  ;;  %v8953_v63 = vrot.slane %v8850_v51, 2 }
 0x7be   : > { %v8140_v15 = vadd.f32 %v8099_v20, %v17653_v8  ;;  %v8848_v8 = vunpack.c.l.bf16 %v12812_v43  ;;  %v8956_v43 = vrot.slane %v8852_v18, 2  ;;  %v17821_v18 = vld [vmem:[%s18083_s6] ss:$0 sm:$0xff] }
 0x7bf   : > { %v8948_v5 = vrot.slane %v8847_v60, 2  ;;  %v8945_v49 = vsel %vm8937_vm1, %v8943_v24, %v8944_v22 }
 0x7c0   : > { %v17787_v54 = vadd.f32 %v17621_v46, %v8140_v15  ;;  %v17798_v46 = vld [vmem:[%s18082_s5] ss:$0 sm:$0xff]  ;;  %v8949_v12 = vrot.slane %v8848_v8, 2  ;;  %v17813_v17 = vsel %vm8937_vm1, %v8954_v30, %v8956_v43 }
 0x7c2   : > { %v12425_v41 = vpop.f32.mrb[144].mxu1  ;;  %v8952_v23 = vsel %vm8937_vm1, %v8949_v12, %v8951_v31 }
 0x7c3   : > { %v8595_v14 = vpop.f32.mrb[145].mxu1  ;;  %v12818_v41 = vld [vmem:[%s12967_s18 + $0x48] sm:$0xf] }
 0x7c4   : > { %v8770_v20 = vadd.f32 %v8595_v14, %v17659_v39  ;;  %v12426_v15 = vpop.f32.mrb[146].mxu1  ;;  %v8942_v39 = vsel %vm8937_vm1, %v8939_v16, %v8941_v0  ;;  %v8853_v24 = vunpack.c.l.bf16 %v12818_v41  ;;  %v12819_v0 = vld [vmem:[%s12967_s18 + $0x4c] sm:$0xf] }
 0x7c5   : > { %v8772_v7 = vadd.f32 %v12426_v15, %v17662_v50  ;;  %v8598_v6 = vpop.f32.mrb[147].mxu1  ;;  %v8950_v50 = vsel %vm8937_vm1, %v8948_v5, %v8949_v12  ;;  %v8854_v5 = vunpack.c.l.bf16 %v12819_v0  ;;  %v17830_v15 = vld [vmem:[%s18084_s7] ss:$0 sm:$0xff]  ;;  %v12822_v0 = vld [vmem:[%s12967_s18 + $0x50] sm:$0xf] }
 0x7c6   : > { %v8809_v42 = vadd.f32 %v17798_v46, %v8770_v20  ;;  %v8771_v36 = vadd.f32 %v8598_v6, %v17665_v40  ;;  %v17816_v40 = vsel %vm8937_vm1, %v8953_v63, %v8954_v30 }
 0x7c7   : > { %v8811_v45 = vadd.f32 %v17798_v46, %v8772_v7 }
 0x7c8   : > { %v9050_v60 = vadd.f32 %v8940_v4, %v8809_v42  ;;  %v8810_v8 = vadd.f32 %v17798_v46, %v8771_v36 }
 0x7c9   : > { %v9052_v37 = vadd.f32 %v8945_v49, %v8811_v45  ;;  %v8958_v49 = vrot.slane %v8853_v24, 2 }
 0x7ca   : > { %vm9082_vm2 = vcmp.ge.f32.partialorder %v9050_v60, 0.0  ;;  %v9114_v16 = vmul.f32 0.3, %v9050_v60  ;;  %v9051_v13 = vadd.f32 %v8942_v39, %v8810_v8  ;;  %v12429_v51 = vpop.f32.mrb[148].mxu1 }
 0x7cb   : > { %vm9084_vm9 = vcmp.ge.f32.partialorder %v9052_v37, 0.0  ;;  %v9116_v22 = vmul.f32 0.3, %v9052_v37  ;;  %v8774_v14 = vadd.f32 %v12429_v51, %v17671_v28  ;;  %v8610_v4 = vpop.f32.mrb[149].mxu1  ;;  %v12821_v51 = vld [vmem:[%s12967_s18 + $0x58] sm:$0xf] }
 0x7cc   : > { %v9146_v20 = vsel %vm9082_vm2, %v9050_v60, %v9114_v16  ;;  %vm9083_vm13 = vcmp.ge.f32.partialorder %v9051_v13, 0.0  ;;  %v9115_v12 = vmul.f32 0.3, %v9051_v13  ;;  %v8773_v2 = vadd.f32 %v8610_v4, %v17674_v1  ;;  %v12430_v31 = vpop.f32.mrb[150].mxu1 }
 0x7cd   : > { %v9185_v7 = vmul.f32 %v17821_v18, %v9146_v20  ;;  %v9148_v6 = vsel %vm9084_vm9, %v9052_v37, %v9116_v22  ;;  %v8813_v28 = vadd.f32 %v17798_v46, %v8774_v14  ;;  %v8775_v30 = vadd.f32 %v12430_v31, %v17677_v27  ;;  %v8613_v43 = vpop.f32.mrb[151].mxu1  ;;  %v12820_v37 = vld [vmem:[%s12967_s18 + $0x54] sm:$0xf] }
 0x7ce   : > { %v9187_v63 = vmul.f32 %v17821_v18, %v9148_v6  ;;  %v9147_v1 = vsel %vm9083_vm13, %v9051_v13, %v9115_v12  ;;  %v8812_v42 = vadd.f32 %v17798_v46, %v8773_v2  ;;  %v8856_v16 = vunpack.c.l.bf16 %v12820_v37 }
 0x7cf   : > { %v9224_v36 = vadd.f32 %v17830_v15, %v9185_v7  ;;  %v9186_v45 = vmul.f32 %v17821_v18, %v9147_v1  ;;  %v9054_v39 = vadd.f32 %v8950_v50, %v8813_v28  ;;  %v8814_v27 = vadd.f32 %v17798_v46, %v8775_v30 }
 0x7d0   : > { %v9226_v60 = vadd.f32 %v17830_v15, %v9187_v63  ;;  %v9053_v8 = vadd.f32 %v8947_v9, %v8812_v42  ;;  %v8857_v13 = vunpack.c.l.bf16 %v12821_v51  ;;  %v17852_v4 = vrot.slane %v8854_v5, 2  ;;  %v12823_v42 = vld [vmem:[%s12967_s18 + $0x60] sm:$0xf] }
 0x7d1   : > { %9256 = vst [vmem:[%s17839_s10] sm:$0xff] %v9224_v36  ;;  %v9225_v41 = vadd.f32 %v17830_v15, %v9186_v45  ;;  %vm9086_vm14 = vcmp.ge.f32.partialorder %v9054_v39, 0.0  ;;  %v9118_v24 = vmul.f32 0.3, %v9054_v39  ;;  %v9055_v22 = vadd.f32 %v8952_v23, %v8814_v27  ;;  %v12824_v27 = vld [vmem:[%s12967_s18 + $0x64] sm:$0xf] }
 0x7d2   : > { %9258 = vst [vmem:[%s17839_s10 + $0x10] sm:$0xff] %v9226_v60  ;;  %vm9085_vm15 = vcmp.ge.f32.partialorder %v9053_v8, 0.0  ;;  %v9117_v50 = vmul.f32 0.3, %v9053_v8  ;;  %v12433_v14 = vpop.f32.mrb[152].mxu1  ;;  %v8855_v20 = vunpack.c.l.bf16 %v12822_v0  ;;  %v8963_v28 = vrot.slane %v8856_v16, 2 }
 0x7d3   : > { %9257 = vst [vmem:[%s17839_s10 + $0x8] sm:$0xff] %v9225_v41  ;;  %v9150_v9 = vsel %vm9086_vm14, %v9054_v39, %v9118_v24  ;;  %vm9087_vm0 = vcmp.ge.f32.partialorder %v9055_v22, 0.0  ;;  %v9119_v12 = vmul.f32 0.3, %v9055_v22  ;;  %v8777_v2 = vadd.f32 %v12433_v14, %v17681_v3  ;;  %v8625_v31 = vpop.f32.mrb[153].mxu1 }
 0x7d4   : > { %v9189_v7 = vmul.f32 %v17821_v18, %v9150_v9  ;;  %v9149_v23 = vsel %vm9085_vm15, %v9053_v8, %v9117_v50  ;;  %v12434_v6 = vpop.f32.mrb[154].mxu1  ;;  %v17858_v30 = vrot.slane %v8857_v13, 2  ;;  %v8859_v3 = vunpack.c.l.bf16 %v12823_v42  ;;  %v12825_v16 = vld [vmem:[%s12967_s18 + $0x5c] sm:$0xf]  ;;  %v12826_v13 = vld [vmem:[%s12967_s18 + $0x68] sm:$0xf] }
 0x7d5   : > { %v9188_v5 = vmul.f32 %v17821_v18, %v9149_v23  ;;  %v9151_v43 = vsel %vm9087_vm0, %v9055_v22, %v9119_v12  ;;  %v8816_v63 = vadd.f32 %v17798_v46, %v8777_v2  ;;  %v8627_v1 = vpop.f32.mrb[155].mxu1  ;;  %v8860_v60 = vunpack.c.l.bf16 %v12824_v27  ;;  %v12827_v50 = vld [vmem:[%s12967_s18 + $0x70] sm:$0xf]  ;;  %v12829_v12 = vld [vmem:[%s12967_s18 + $0x6c] sm:$0xf] }
 0x7d6   : > { %v9228_v36 = vadd.f32 %v17830_v15, %v9189_v7  ;;  %v9190_v45 = vmul.f32 %v17821_v18, %v9151_v43  ;;  %v8776_v39 = vadd.f32 %v8627_v1, %v17685_v10  ;;  %v8858_v51 = vunpack.c.l.bf16 %v12825_v16 }
 0x7d7   : > { %v9227_v8 = vadd.f32 %v17830_v15, %v9188_v5  ;;  %v9057_v37 = vadd.f32 %v17813_v17, %v8816_v63  ;;  %v8861_v41 = vunpack.c.l.bf16 %v12826_v13  ;;  %v8960_v10 = vsel %vm8937_vm1, %v8958_v49, %v17852_v4  ;;  %v12828_v17 = vld [vmem:[%s12967_s18 + $0x74] sm:$0xf] }
 0x7d8   : > { %9260 = vst [vmem:[%s17839_s10 + $0x20] sm:$0xff] %v9228_v36  ;;  %v9229_v24 = vadd.f32 %v17830_v15, %v9190_v45  ;;  %v8815_v22 = vadd.f32 %v17798_v46, %v8776_v39  ;;  %v8863_v14 = vunpack.c.l.bf16 %v12827_v50  ;;  %v8864_v9 = vunpack.c.l.bf16 %v12828_v17 }
 0x7d9   : > { %9259 = vst [vmem:[%s17839_s10 + $0x18] sm:$0xff] %v9227_v8  ;;  %vm9089_vm3 = vcmp.ge.f32.partialorder %v9057_v37, 0.0  ;;  %v9121_v0 = vmul.f32 0.3, %v9057_v37  ;;  %v8862_v2 = vunpack.c.l.bf16 %v12829_v12  ;;  %v8965_v23 = vsel %vm8937_vm1, %v8963_v28, %v17858_v30 }
 0x7da   : > { %9261 = vst [vmem:[%s17839_s10 + $0x28] sm:$0xff] %v9229_v24  ;;  %v9056_v31 = vadd.f32 %v17816_v40, %v8815_v22  ;;  %v12437_v7 = vpop.f32.mrb[156].mxu1  ;;  %v8961_v6 = vrot.slane %v8855_v20, 2  ;;  %v8968_v5 = vrot.slane %v8859_v3, 2  ;;  %v8969_v63 = vrot.slane %v8860_v60, 2 }
 0x7db   : > { %v9153_v43 = vsel %vm9089_vm3, %v9057_v37, %v9121_v0  ;;  %v8639_v49 = vpop.f32.mrb[157].mxu1  ;;  %v8966_v1 = vrot.slane %v8858_v51, 2  ;;  %v8971_v42 = vrot.slane %v8861_v41, 2  ;;  %v8974_v16 = vrot.slane %v8863_v14, 2  ;;  %v12830_v7 = vld [vmem:[%s12967_s18 + $0x78] sm:$0xf] }
 0x7dc   : > { %v9192_v36 = vmul.f32 %v17821_v18, %v9153_v43  ;;  %vm9088_vm4 = vcmp.ge.f32.partialorder %v9056_v31, 0.0  ;;  %v9120_v45 = vmul.f32 0.3, %v9056_v31  ;;  %v8778_v39 = vadd.f32 %v8639_v49, %v17691_v19  ;;  %v12438_v27 = vpop.f32.mrb[158].mxu1 }
 0x7dd   : > { %v8780_v40 = vadd.f32 %v12438_v27, %v17694_v44  ;;  %v8642_v8 = vpop.f32.mrb[159].mxu1  ;;  %v8976_v28 = vrot.slane %v8864_v9, 2  ;;  %v8973_v20 = vrot.slane %v8862_v2, 2  ;;  %v8962_v19 = vsel %vm8937_vm1, %v17852_v4, %v8961_v6 }
 0x7de   : > { %v9231_v3 = vadd.f32 %v17830_v15, %v9192_v36  ;;  %v9152_v37 = vsel %vm9088_vm4, %v9056_v31, %v9120_v45  ;;  %v8817_v60 = vadd.f32 %v17798_v46, %v8778_v39  ;;  %v8779_v51 = vadd.f32 %v8642_v8, %v17697_v38 }
 0x7df   : > { %v9191_v13 = vmul.f32 %v17821_v18, %v9152_v37  ;;  %v8819_v41 = vadd.f32 %v17798_v46, %v8780_v40  ;;  %v8970_v22 = vsel %vm8937_vm1, %v8968_v5, %v8969_v63  ;;  %v8967_v50 = vsel %vm8937_vm1, %v17858_v30, %v8966_v1  ;;  %v12831_v40 = vld [vmem:[%s12967_s18 + $0x7c] sm:$0xf]  ;;  %v12832_v37 = vld [vmem:[%s12967_s18 + $0x84] sm:$0xf] }
 0x7e0   : > { %9263 = vst [vmem:[%s17839_s10 + $0x38] sm:$0xff] %v9231_v3  ;;  %v9058_v44 = vadd.f32 %v8960_v10, %v8817_v60  ;;  %v8818_v24 = vadd.f32 %v17798_v46, %v8779_v51  ;;  %v8972_v0 = vsel %vm8937_vm1, %v8969_v63, %v8971_v42  ;;  %v17902_v17 = vsel %vm8937_vm1, %v8974_v16, %v8976_v28  ;;  %v12833_v51 = vld [vmem:[%s12967_s18 + $0x88] sm:$0xf] }
 0x7e1   : > { %v9230_v38 = vadd.f32 %v17830_v15, %v9191_v13  ;;  %v9060_v14 = vadd.f32 %v8965_v23, %v8819_v41  ;;  %v17905_v12 = vsel %vm8937_vm1, %v8973_v20, %v8974_v16  ;;  %v8865_v23 = vunpack.c.l.bf16 %v12830_v7  ;;  %v12834_v7 = vld [vmem:[%s12967_s18 + $0x80] sm:$0xf] }
 0x7e2   : > { %vm9090_vm5 = vcmp.ge.f32.partialorder %v9058_v44, 0.0  ;;  %v9122_v4 = vmul.f32 0.3, %v9058_v44  ;;  %v9059_v9 = vadd.f32 %v8962_v19, %v8818_v24  ;;  %v12441_v10 = vpop.f32.mrb[160].mxu1  ;;  %v8866_v8 = vunpack.c.l.bf16 %v12831_v40 }
 0x7e3   : > { %9262 = vst [vmem:[%s17839_s10 + $0x30] sm:$0xff] %v9230_v38  ;;  %vm9092_vm6 = vcmp.ge.f32.partialorder %v9060_v14, 0.0  ;;  %v9124_v2 = vmul.f32 0.3, %v9060_v14  ;;  %v8782_v30 = vadd.f32 %v12441_v10, %v17703_v61  ;;  %v8654_v31 = vpop.f32.mrb[161].mxu1  ;;  %v8868_v60 = vunpack.c.l.bf16 %v12832_v37 }
 0x7e4   : > { %v9154_v6 = vsel %vm9090_vm5, %v9058_v44, %v9122_v4  ;;  %vm9091_vm7 = vcmp.ge.f32.partialorder %v9059_v9, 0.0  ;;  %v9123_v5 = vmul.f32 0.3, %v9059_v9  ;;  %v8781_v43 = vadd.f32 %v8654_v31, %v17706_v33  ;;  %v12442_v49 = vpop.f32.mrb[162].mxu1 }
 0x7e5   : > { %v9193_v63 = vmul.f32 %v17821_v18, %v9154_v6  ;;  %v9156_v1 = vsel %vm9092_vm6, %v9060_v14, %v9124_v2  ;;  %v8821_v42 = vadd.f32 %v17798_v46, %v8782_v30  ;;  %v8783_v36 = vadd.f32 %v12442_v49, %v17709_v59  ;;  %v8657_v61 = vpop.f32.mrb[163].mxu1 }
 0x7e6   : > { %v9195_v45 = vmul.f32 %v17821_v18, %v9156_v1  ;;  %v9155_v39 = vsel %vm9091_vm7, %v9059_v9, %v9123_v5  ;;  %v8820_v27 = vadd.f32 %v17798_v46, %v8781_v43  ;;  %v8869_v13 = vunpack.c.l.bf16 %v12833_v51 }
 0x7e7   : > { %v9232_v33 = vadd.f32 %v17830_v15, %v9193_v63  ;;  %v9194_v16 = vmul.f32 %v17821_v18, %v9155_v39  ;;  %v9062_v28 = vadd.f32 %v8970_v22, %v8821_v42  ;;  %v8822_v20 = vadd.f32 %v17798_v46, %v8783_v36  ;;  %v12835_v36 = vld [vmem:[%s12967_s18 + $0x90] sm:$0xf] }
 0x7e8   : > { %v9234_v3 = vadd.f32 %v17830_v15, %v9195_v45  ;;  %v9061_v59 = vadd.f32 %v8967_v50, %v8820_v27  ;;  %v8978_v38 = vrot.slane %v8865_v23, 2  ;;  %v17926_v14 = vrot.slane %v8866_v8, 2  ;;  %v12836_v27 = vld [vmem:[%s12967_s18 + $0x94] sm:$0xf]  ;;  %v12837_v8 = vld [vmem:[%s12967_s18 + $0x8c] sm:$0xf] }
 0x7e9   : > { %9264 = vst [vmem:[%s17839_s10 + $0x40] sm:$0xff] %v9232_v33  ;;  %v9233_v41 = vadd.f32 %v17830_v15, %v9194_v16  ;;  %vm9094_vm8 = vcmp.ge.f32.partialorder %v9062_v28, 0.0  ;;  %v9126_v19 = vmul.f32 0.3, %v9062_v28  ;;  %v9063_v44 = vadd.f32 %v8972_v0, %v8822_v20 }
 0x7ea   : > { %9266 = vst [vmem:[%s17839_s10 + $0x50] sm:$0xff] %v9234_v3  ;;  %vm9093_vm10 = vcmp.ge.f32.partialorder %v9061_v59, 0.0  ;;  %v9125_v24 = vmul.f32 0.3, %v9061_v59  ;;  %v12445_v22 = vpop.f32.mrb[164].mxu1  ;;  %v8983_v31 = vrot.slane %v8868_v60, 2  ;;  %v8867_v6 = vunpack.c.l.bf16 %v12834_v7 }
 0x7eb   : > { %9265 = vst [vmem:[%s17839_s10 + $0x48] sm:$0xff] %v9233_v41  ;;  %v9158_v50 = vsel %vm9094_vm8, %v9062_v28, %v9126_v19  ;;  %vm9095_vm11 = vcmp.ge.f32.partialorder %v9063_v44, 0.0  ;;  %v9127_v4 = vmul.f32 0.3, %v9063_v44  ;;  %v8785_v9 = vadd.f32 %v12445_v22, %v17713_v35  ;;  %v8669_v10 = vpop.f32.mrb[165].mxu1 }
 0x7ec   : > { %v9197_v2 = vmul.f32 %v17821_v18, %v9158_v50  ;;  %v9157_v30 = vsel %vm9093_vm10, %v9061_v59, %v9125_v24  ;;  %v12446_v0 = vpop.f32.mrb[166].mxu1  ;;  %v8984_v35 = vrot.slane %v8869_v13, 2  ;;  %v8871_v61 = vunpack.c.l.bf16 %v12835_v36 }
 0x7ed   : > { %v9196_v23 = vmul.f32 %v17821_v18, %v9157_v30  ;;  %v9159_v5 = vsel %vm9095_vm11, %v9063_v44, %v9127_v4  ;;  %v8824_v43 = vadd.f32 %v17798_v46, %v8785_v9  ;;  %v8671_v49 = vpop.f32.mrb[167].mxu1  ;;  %v8872_v40 = vunpack.c.l.bf16 %v12836_v27  ;;  %v12840_v0 = vld [vmem:[%s12967_s18 + $0xa4] sm:$0xf] }
 0x7ee   : > { %v9236_v63 = vadd.f32 %v17830_v15, %v9197_v2  ;;  %v9198_v1 = vmul.f32 %v17821_v18, %v9159_v5  ;;  %v8784_v42 = vadd.f32 %v8671_v49, %v17717_v11  ;;  %v8870_v33 = vunpack.c.l.bf16 %v12837_v8  ;;  %v12838_v11 = vld [vmem:[%s12967_s18 + $0x98] sm:$0xf]  ;;  %v12839_v2 = vld [vmem:[%s12967_s18 + $0xa0] sm:$0xf]  ;;  %v12841_v49 = vld [vmem:[%s12967_s18 + $0x9c] sm:$0xf] }
 0x7ef   : > { %v9235_v45 = vadd.f32 %v17830_v15, %v9196_v23  ;;  %v9065_v39 = vadd.f32 %v17902_v17, %v8824_v43  ;;  %v8873_v3 = vunpack.c.l.bf16 %v12838_v11  ;;  %v8980_v17 = vsel %vm8937_vm1, %v8978_v38, %v17926_v14 }
 0x7f0   : > { %9268 = vst [vmem:[%s17839_s10 + $0x60] sm:$0xff] %v9236_v63  ;;  %v9237_v16 = vadd.f32 %v17830_v15, %v9198_v1  ;;  %v8823_v28 = vadd.f32 %v17798_v46, %v8784_v42  ;;  %v8985_v60 = vsel %vm8937_vm1, %v8983_v31, %v8984_v35  ;;  %v8981_v51 = vrot.slane %v8867_v6, 2 }
 0x7f1   : > { %9267 = vst [vmem:[%s17839_s10 + $0x58] sm:$0xff] %v9235_v45  ;;  %vm9097_vm12 = vcmp.ge.f32.partialorder %v9065_v39, 0.0  ;;  %v9129_v20 = vmul.f32 0.3, %v9065_v39  ;;  %v8988_v19 = vrot.slane %v8871_v61, 2  ;;  %v8989_v44 = vrot.slane %v8872_v40, 2 }
 0x7f2   : > { %9269 = vst [vmem:[%s17839_s10 + $0x68] sm:$0xff] %v9237_v16  ;;  %v9064_v59 = vadd.f32 %v17905_v12, %v8823_v28  ;;  %v12449_v37 = vpop.f32.mrb[168].mxu1  ;;  %v8986_v24 = vrot.slane %v8870_v33, 2  ;;  %v8991_v10 = vrot.slane %v8873_v3, 2  ;;  %v8875_v30 = vunpack.c.l.bf16 %v12839_v2 }
 0x7f3   : > { %v9161_v13 = vsel %vm9097_vm12, %v9065_v39, %v9129_v20  ;;  %v8683_v41 = vpop.f32.mrb[169].mxu1  ;;  %v8876_v31 = vunpack.c.l.bf16 %v12840_v0  ;;  %v8874_v63 = vunpack.c.l.bf16 %v12841_v49  ;;  %v8990_v36 = vsel %vm8937_vm1, %v8988_v19, %v8989_v44 }
 0x7f4   : > { %v9200_v22 = vmul.f32 %v17821_v18, %v9161_v13  ;;  %vm9096_vm2 = vcmp.ge.f32.partialorder %v9064_v59, 0.0  ;;  %v9128_v50 = vmul.f32 0.3, %v9064_v59  ;;  %v8786_v12 = vadd.f32 %v8683_v41, %v17723_v56  ;;  %v12450_v4 = vpop.f32.mrb[170].mxu1 }
 0x7f5   : > { %v8788_v38 = vadd.f32 %v12450_v4, %v17726_v55  ;;  %v8686_v9 = vpop.f32.mrb[171].mxu1  ;;  %v8982_v55 = vsel %vm8937_vm1, %v17926_v14, %v8981_v51  ;;  %v8987_v61 = vsel %vm8937_vm1, %v8984_v35, %v8986_v24  ;;  %v8992_v39 = vsel %vm8937_vm1, %v8989_v44, %v8991_v10  ;;  %v12842_v24 = vld [vmem:[%s12967_s18 + $0xa8] sm:$0xf]  ;;  %v12843_v10 = vld [vmem:[%s12967_s18 + $0xac] sm:$0xf] }
 0x7f6   : > { %v9239_v7 = vadd.f32 %v17830_v15, %v9200_v22  ;;  %v9160_v6 = vsel %vm9096_vm2, %v9064_v59, %v9128_v50  ;;  %v8825_v23 = vadd.f32 %v17798_v46, %v8786_v12  ;;  %v8787_v5 = vadd.f32 %v8686_v9, %v17729_v32 }
 0x7f7   : > { %v9199_v56 = vmul.f32 %v17821_v18, %v9160_v6  ;;  %v8827_v43 = vadd.f32 %v17798_v46, %v8788_v38  ;;  %v8994_v27 = vrot.slane %v8875_v30, 2  ;;  %v8996_v33 = vrot.slane %v8876_v31, 2 }
 0x7f8   : > { %9271 = vst [vmem:[%s17839_s10 + $0x78] sm:$0xff] %v9239_v7  ;;  %v9066_v1 = vadd.f32 %v8980_v17, %v8825_v23  ;;  %v8826_v42 = vadd.f32 %v17798_v46, %v8787_v5  ;;  %v8993_v11 = vrot.slane %v8874_v63, 2  ;;  %v8877_v22 = vunpack.c.l.bf16 %v12842_v24 }
 0x7f9   : > { %v9238_v32 = vadd.f32 %v17830_v15, %v9199_v56  ;;  %v9068_v45 = vadd.f32 %v8985_v60, %v8827_v43  ;;  %v8997_v9 = vsel %vm8937_vm1, %v8994_v27, %v8996_v33  ;;  %v8878_v2 = vunpack.c.l.bf16 %v12843_v10 }
 0x7fa   : > { %vm9098_vm9 = vcmp.ge.f32.partialorder %v9066_v1, 0.0  ;;  %v9130_v40 = vmul.f32 0.3, %v9066_v1  ;;  %v9067_v14 = vadd.f32 %v8982_v55, %v8826_v42  ;;  %v12453_v8 = vpop.f32.mrb[172].mxu1  ;;  %v8995_v23 = vsel %vm8937_vm1, %v8993_v11, %v8994_v27 }
 0x7fb   : > { %9270 = vst [vmem:[%s17839_s10 + $0x70] sm:$0xff] %v9238_v32  ;;  %vm9100_vm13 = vcmp.ge.f32.partialorder %v9068_v45, 0.0  ;;  %v9132_v16 = vmul.f32 0.3, %v9068_v45  ;;  %v8790_v28 = vadd.f32 %v12453_v8, %v17735_v34  ;;  %v8698_v20 = vpop.f32.mrb[173].mxu1  ;;  %v8998_v5 = vrot.slane %v8877_v22, 2 }
 0x7fc   : > { %v9162_v35 = vsel %vm9098_vm9, %v9066_v1, %v9130_v40  ;;  %vm9099_vm14 = vcmp.ge.f32.partialorder %v9067_v14, 0.0  ;;  %v9131_v3 = vmul.f32 0.3, %v9067_v14  ;;  %v8789_v59 = vadd.f32 %v8698_v20, %v17738_v26  ;;  %v12454_v37 = vpop.f32.mrb[174].mxu1  ;;  %v12845_v32 = vld [vmem:[%s12967_s18 + $0xb8] sm:$0xf] }
 0x7fd   : > { %v9201_v17 = vmul.f32 %v17821_v18, %v9162_v35  ;;  %v9164_v60 = vsel %vm9100_vm13, %v9068_v45, %v9132_v16  ;;  %v8829_v51 = vadd.f32 %v17798_v46, %v8790_v28  ;;  %v8791_v13 = vadd.f32 %v12454_v37, %v17741_v48  ;;  %v8701_v41 = vpop.f32.mrb[175].mxu1  ;;  %v12846_v28 = vld [vmem:[%s12967_s18 + $0xb0] sm:$0xf]  ;;  %v12848_v37 = vld [vmem:[%s12967_s18 + $0xc4] sm:$0xf] }
 0x7fe   : > { %v9203_v34 = vmul.f32 %v17821_v18, %v9164_v60  ;;  %v9163_v19 = vsel %vm9099_vm14, %v9067_v14, %v9131_v3  ;;  %v8828_v44 = vadd.f32 %v17798_v46, %v8789_v59  ;;  %v8881_v45 = vunpack.c.l.bf16 %v12845_v32  ;;  %v12847_v3 = vld [vmem:[%s12967_s18 + $0xc0] sm:$0xf] }
 0x7ff   : > { %v9240_v26 = vadd.f32 %v17830_v15, %v9201_v17  ;;  %v9202_v50 = vmul.f32 %v17821_v18, %v9163_v19  ;;  %v9070_v12 = vadd.f32 %v8990_v36, %v8829_v51  ;;  %v8830_v4 = vadd.f32 %v17798_v46, %v8791_v13  ;;  %v12844_v36 = vld [vmem:[%s12967_s18 + $0xb4] sm:$0xf] }
 0x800   : > { %v9242_v38 = vadd.f32 %v17830_v15, %v9203_v34  ;;  %v9069_v48 = vadd.f32 %v8987_v61, %v8828_v44  ;;  %v8880_v61 = vunpack.c.l.bf16 %v12844_v36  ;;  %v8879_v20 = vunpack.c.l.bf16 %v12846_v28  ;;  %v12849_v34 = vld [vmem:[%s12967_s18 + $0xbc] sm:$0xf]  ;;  %v12850_v44 = vld [vmem:[%s12967_s18 + $0xc8] sm:$0xf]  ;;  %v12852_v28 = vld [vmem:[%s12967_s18 + $0xd4] sm:$0xf] }
 0x801   : > { %9272 = vst [vmem:[%s17839_s10 + $0x80] sm:$0xff] %v9240_v26  ;;  %v9241_v30 = vadd.f32 %v17830_v15, %v9202_v50  ;;  %vm9102_vm15 = vcmp.ge.f32.partialorder %v9070_v12, 0.0  ;;  %v9134_v0 = vmul.f32 0.3, %v9070_v12  ;;  %v9071_v31 = vadd.f32 %v8992_v39, %v8830_v4 }
 0x802   : > { %9274 = vst [vmem:[%s17839_s10 + $0x90] sm:$0xff] %v9242_v38  ;;  %vm9101_vm0 = vcmp.ge.f32.partialorder %v9069_v48, 0.0  ;;  %v9133_v7 = vmul.f32 0.3, %v9069_v48  ;;  %v12457_v6 = vpop.f32.mrb[176].mxu1  ;;  %v8883_v59 = vunpack.c.l.bf16 %v12847_v3  ;;  %v8884_v17 = vunpack.c.l.bf16 %v12848_v37 }
 0x803   : > { %9273 = vst [vmem:[%s17839_s10 + $0x88] sm:$0xff] %v9241_v30  ;;  %v9166_v56 = vsel %vm9102_vm15, %v9070_v12, %v9134_v0  ;;  %vm9103_vm3 = vcmp.ge.f32.partialorder %v9071_v31, 0.0  ;;  %v9135_v43 = vmul.f32 0.3, %v9071_v31  ;;  %v8793_v55 = vadd.f32 %v12457_v6, %v17745_v25  ;;  %v8713_v49 = vpop.f32.mrb[177].mxu1 }
 0x804   : > { %v9205_v63 = vmul.f32 %v17821_v18, %v9166_v56  ;;  %v9165_v1 = vsel %vm9101_vm0, %v9069_v48, %v9133_v7  ;;  %v12458_v42 = vpop.f32.mrb[178].mxu1  ;;  %v8999_v25 = vrot.slane %v8878_v2, 2  ;;  %v9003_v13 = vrot.slane %v8880_v61, 2 }
 0x805   : > { %v9204_v39 = vmul.f32 %v17821_v18, %v9165_v1  ;;  %v9167_v27 = vsel %vm9103_vm3, %v9071_v31, %v9135_v43  ;;  %v8832_v40 = vadd.f32 %v17798_v46, %v8793_v55  ;;  %v8715_v14 = vpop.f32.mrb[179].mxu1  ;;  %v9004_v41 = vrot.slane %v8881_v45, 2 }
 0x806   : > { %v9244_v8 = vadd.f32 %v17830_v15, %v9205_v63  ;;  %v9206_v33 = vmul.f32 %v17821_v18, %v9167_v27  ;;  %v8792_v16 = vadd.f32 %v8715_v14, %v17749_v29  ;;  %v8882_v19 = vunpack.c.l.bf16 %v12849_v34  ;;  %v12851_v14 = vld [vmem:[%s12967_s18 + $0xd0] sm:$0xf]  ;;  %v12853_v34 = vld [vmem:[%s12967_s18 + $0xcc] sm:$0xf] }
 0x807   : > { %v9243_v11 = vadd.f32 %v17830_v15, %v9204_v39  ;;  %v9073_v35 = vadd.f32 %v8997_v9, %v8832_v40  ;;  %v8885_v24 = vunpack.c.l.bf16 %v12850_v44  ;;  %v9000_v50 = vsel %vm8937_vm1, %v8998_v5, %v8999_v25 }
 0x808   : > { %9276 = vst [vmem:[%s17839_s10 + $0xa0] sm:$0xff] %v9244_v8  ;;  %v9245_v60 = vadd.f32 %v17830_v15, %v9206_v33  ;;  %v8831_v51 = vadd.f32 %v17798_v46, %v8792_v16  ;;  %v9001_v38 = vrot.slane %v8879_v20, 2  ;;  %v9008_v48 = vrot.slane %v8883_v59, 2 }
 0x809   : > { %9275 = vst [vmem:[%s17839_s10 + $0x98] sm:$0xff] %v9243_v11  ;;  %vm9105_vm4 = vcmp.ge.f32.partialorder %v9073_v35, 0.0  ;;  %v9137_v29 = vmul.f32 0.3, %v9073_v35  ;;  %v9009_v9 = vrot.slane %v8884_v17, 2  ;;  %v9005_v7 = vsel %vm8937_vm1, %v9003_v13, %v9004_v41 }
 0x80a   : > { %9277 = vst [vmem:[%s17839_s10 + $0xa8] sm:$0xff] %v9245_v60  ;;  %v9072_v22 = vadd.f32 %v8995_v23, %v8831_v51  ;;  %v12461_v26 = vpop.f32.mrb[180].mxu1  ;;  %v9006_v23 = vrot.slane %v8882_v19, 2  ;;  %v9011_v5 = vrot.slane %v8885_v24, 2  ;;  %v8888_v20 = vunpack.c.l.bf16 %v12852_v28 }
 0x80b   : > { %v9169_v12 = vsel %vm9105_vm4, %v9073_v35, %v9137_v29  ;;  %v8727_v4 = vpop.f32.mrb[181].mxu1  ;;  %v9010_v36 = vsel %vm8937_vm1, %v9008_v48, %v9009_v9  ;;  %v8886_v19 = vunpack.c.l.bf16 %v12853_v34 }
 0x80c   : > { %v9208_v10 = vmul.f32 %v17821_v18, %v9169_v12  ;;  %vm9104_vm5 = vcmp.ge.f32.partialorder %v9072_v22, 0.0  ;;  %v9136_v2 = vmul.f32 0.3, %v9072_v22  ;;  %v8794_v30 = vadd.f32 %v8727_v4, %v17755_v53  ;;  %v12462_v0 = vpop.f32.mrb[182].mxu1 }
 0x80d   : > { %v8796_v31 = vadd.f32 %v12462_v0, %v17758_v47  ;;  %v8730_v6 = vpop.f32.mrb[183].mxu1  ;;  %v9002_v47 = vsel %vm8937_vm1, %v8999_v25, %v9001_v38  ;;  %v9012_v45 = vsel %vm8937_vm1, %v9009_v9, %v9011_v5  ;;  %v8887_v25 = vunpack.c.l.bf16 %v12851_v14 }
 0x80e   : > { %v9247_v56 = vadd.f32 %v17830_v15, %v9208_v10  ;;  %v9168_v43 = vsel %vm9104_vm5, %v9072_v22, %v9136_v2  ;;  %v8833_v55 = vadd.f32 %v17798_v46, %v8794_v30  ;;  %v8795_v49 = vadd.f32 %v8730_v6, %v17761_v57 }
 0x80f   : > { %v9207_v63 = vmul.f32 %v17821_v18, %v9168_v43  ;;  %v8835_v53 = vadd.f32 %v17798_v46, %v8796_v31  ;;  %v9007_v57 = vsel %vm8937_vm1, %v9004_v41, %v9006_v23  ;;  %v9016_v12 = vrot.slane %v8888_v20, 2 }
 0x810   : > { %9279 = vst [vmem:[%s17839_s10 + $0xb8] sm:$0xff] %v9247_v56  ;;  %v9074_v1 = vadd.f32 %v9000_v50, %v8833_v55  ;;  %v8834_v42 = vadd.f32 %v17798_v46, %v8795_v49  ;;  %v9014_v50 = vrot.slane %v8887_v25, 2  ;;  %v9013_v2 = vrot.slane %v8886_v19, 2 }
 0x811   : > { %v9246_v61 = vadd.f32 %v17830_v15, %v9207_v63  ;;  %v9076_v32 = vadd.f32 %v9005_v7, %v8835_v53 }
 0x812   : > { %vm9106_vm6 = vcmp.ge.f32.partialorder %v9074_v1, 0.0  ;;  %v9138_v39 = vmul.f32 0.3, %v9074_v1  ;;  %v9075_v27 = vadd.f32 %v9002_v47, %v8834_v42  ;;  %v12465_v40 = vpop.f32.mrb[184].mxu1  ;;  %v9017_v5 = vsel %vm8937_vm1, %v9014_v50, %v9016_v12 }
 0x813   : > { %9278 = vst [vmem:[%s17839_s10 + $0xb0] sm:$0xff] %v9246_v61  ;;  %vm9108_vm7 = vcmp.ge.f32.partialorder %v9076_v32, 0.0  ;;  %v9140_v8 = vmul.f32 0.3, %v9076_v32  ;;  %v8798_v33 = vadd.f32 %v12465_v40, %v17767_v21  ;;  %v8742_v16 = vpop.f32.mrb[185].mxu1 }
 0x814   : > { %v9170_v11 = vsel %vm9106_vm6, %v9074_v1, %v9138_v39  ;;  %vm9107_vm8 = vcmp.ge.f32.partialorder %v9075_v27, 0.0  ;;  %v9139_v35 = vmul.f32 0.3, %v9075_v27  ;;  %v8797_v3 = vadd.f32 %v8742_v16, %v17770_v52  ;;  %v12466_v59 = vpop.f32.mrb[186].mxu1 }
 0x815   : > { %v9209_v37 = vmul.f32 %v17821_v18, %v9170_v11  ;;  %v9172_v17 = vsel %vm9108_vm7, %v9076_v32, %v9140_v8  ;;  %v8837_v60 = vadd.f32 %v17798_v46, %v8798_v33  ;;  %v8799_v51 = vadd.f32 %v12466_v59, %v17773_v62  ;;  %v8745_v13 = vpop.f32.mrb[187].mxu1 }
 0x816   : > { %v9211_v21 = vmul.f32 %v17821_v18, %v9172_v17  ;;  %v9171_v41 = vsel %vm9107_vm8, %v9075_v27, %v9139_v35  ;;  %v8836_v29 = vadd.f32 %v17798_v46, %v8797_v3 }
 0x817   : > { %v9248_v52 = vadd.f32 %v17830_v15, %v9209_v37  ;;  %v9210_v44 = vmul.f32 %v17821_v18, %v9171_v41  ;;  %v9078_v24 = vadd.f32 %v9010_v36, %v8837_v60  ;;  %v8838_v22 = vadd.f32 %v17798_v46, %v8799_v51 }
 0x818   : > { %v9250_v26 = vadd.f32 %v17830_v15, %v9211_v21  ;;  %v9077_v62 = vadd.f32 %v9007_v57, %v8836_v29  ;;  %v9015_v36 = vsel %vm8937_vm1, %v9013_v2, %v9014_v50 }
 0x819   : > { %9280 = vst [vmem:[%s17839_s10 + $0xc0] sm:$0xff] %v9248_v52  ;;  %v9249_v4 = vadd.f32 %v17830_v15, %v9210_v44  ;;  %vm9110_vm10 = vcmp.ge.f32.partialorder %v9078_v24, 0.0  ;;  %v9142_v38 = vmul.f32 0.3, %v9078_v24  ;;  %v9079_v48 = vadd.f32 %v9012_v45, %v8838_v22 }
 0x81a   : > { %9282 = vst [vmem:[%s17839_s10 + $0xd0] sm:$0xff] %v9250_v26  ;;  %vm9109_vm11 = vcmp.ge.f32.partialorder %v9077_v62, 0.0  ;;  %v9141_v9 = vmul.f32 0.3, %v9077_v62  ;;  %v12469_v10 = vpop.f32.mrb[188].mxu1 }
 0x81b   : > { %9281 = vst [vmem:[%s17839_s10 + $0xc8] sm:$0xff] %v9249_v4  ;;  %v9174_v30 = vsel %vm9110_vm10, %v9078_v24, %v9142_v38  ;;  %vm9111_vm12 = vcmp.ge.f32.partialorder %v9079_v48, 0.0  ;;  %v9143_v0 = vmul.f32 0.3, %v9079_v48  ;;  %v8801_v31 = vadd.f32 %v12469_v10, %v17779_v58  ;;  %v8757_v7 = vpop.f32.mrb[189].mxu1 }
 0x81c   : > { %v9213_v6 = vmul.f32 %v17821_v18, %v9174_v30  ;;  %v9173_v23 = vsel %vm9109_vm11, %v9077_v62, %v9141_v9  ;;  %v12470_v56 = vpop.f32.mrb[190].mxu1 }
 0x81d   : > { %v9212_v43 = vmul.f32 %v17821_v18, %v9173_v23  ;;  %v9175_v55 = vsel %vm9111_vm12, %v9079_v48, %v9143_v0  ;;  %v8840_v49 = vadd.f32 %v17798_v46, %v8801_v31  ;;  %v8759_v63 = vpop.f32.mrb[191].mxu1 }
 0x81e   : > { %v9252_v53 = vadd.f32 %v17830_v15, %v9213_v6  ;;  %v9214_v58 = vmul.f32 %v17821_v18, %v9175_v55  ;;  %v8800_v47 = vadd.f32 %v8759_v63, %v17787_v54 }
 0x81f   : > { %v9251_v1 = vadd.f32 %v17830_v15, %v9212_v43  ;;  %v9081_v42 = vadd.f32 %v9017_v5, %v8840_v49 }
 0x820   : > { %9284 = vst [vmem:[%s17839_s10 + $0xe0] sm:$0xff] %v9252_v53  ;;  %v9253_v61 = vadd.f32 %v17830_v15, %v9214_v58  ;;  %v8839_v32 = vadd.f32 %v17798_v46, %v8800_v47 }
 0x821   : > { %9283 = vst [vmem:[%s17839_s10 + $0xd8] sm:$0xff] %v9251_v1  ;;  %vm9113_vm2 = vcmp.ge.f32.partialorder %v9081_v42, 0.0  ;;  %v9145_v57 = vmul.f32 0.3, %v9081_v42 }
 0x822   : > { %9285 = vst [vmem:[%s17839_s10 + $0xe8] sm:$0xff] %v9253_v61  ;;  %v9080_v45 = vadd.f32 %v9015_v36, %v8839_v32 }
 0x823   : > { %v9177_v39 = vsel %vm9113_vm2, %v9081_v42, %v9145_v57 }
 0x824   : > { %v9216_v54 = vmul.f32 %v17821_v18, %v9177_v39  ;;  %vm9112_vm9 = vcmp.ge.f32.partialorder %v9080_v45, 0.0  ;;  %v9144_v27 = vmul.f32 0.3, %v9080_v45 }
 0x826   : > { %v9255_v40 = vadd.f32 %v17830_v15, %v9216_v54  ;;  %v9176_v14 = vsel %vm9112_vm9, %v9080_v45, %v9144_v27 }
 0x827   : > { %v9215_v25 = vmul.f32 %v17821_v18, %v9176_v14 }
 0x828   : > { %9287 = vst [vmem:[%s17839_s10 + $0xf8] sm:$0xff] %v9255_v40 }
 0x829   : > { %v9254_v8 = vadd.f32 %v17830_v15, %v9215_v25 }
 0x82b   : > { %9286 = vst [vmem:[%s17839_s10 + $0xf0] sm:$0xff] %v9254_v8 }
 0x82c PF: > { %s18_s29 = sadd.s32 1, %s12876_s29   ;;  %s19043_s27 = smov %s12872_s28 }
 0x82d   : > { %p15_p5 = scmp.ge.s32.totalorder %s18_s29, 4   ;;  %s19044_s28 = smov %s19046_s30 }
 0x82f   :  { %17 = sbr.rel (!%p15_p5) target bundleno = 2 (0x2), region = 104 }

</bundles_post_ra>
